<compile_context>
chip_gen: v6e
topology: v6e:2x2x1
jax: 0.10.0
libtpu: 0.0.40
codegen_flags: <defaults>
</compile_context>

<pallas_src>
import functools
import math

import jax
import jax.numpy as jnp
from jax.experimental import pallas as pl
from jax.experimental.pallas import tpu as pltpu

_LN_EPS = 1e-5
_VMEM_LIMIT = 32 * 1024 * 1024


# ----------------------------------------------------------------------------
# In-kernel helpers (operate on values already resident in vregs)
# ----------------------------------------------------------------------------
def _mm(a, b):
    """MXU matmul: bf16 operands, f32 accumulation."""
    return jnp.dot(a.astype(jnp.bfloat16), b.astype(jnp.bfloat16),
                   preferred_element_type=jnp.float32)


def _layernorm(x, g, b):
    mu = jnp.mean(x, axis=-1, keepdims=True)
    xc = x - mu
    var = jnp.mean(xc * xc, axis=-1, keepdims=True)
    return xc * jax.lax.rsqrt(var + _LN_EPS) * g + b


def _mha(q, k, v, nheads):
    """softmax(q k^T / sqrt(dh)) v; head split via static lane slices, f32 softmax."""
    d = q.shape[-1]
    dh = d // nheads
    scale = 1.0 / math.sqrt(dh)
    outs = []
    for h in range(nheads):
        sl = slice(h * dh, (h + 1) * dh)
        qh = q[:, sl].astype(jnp.bfloat16)
        kh = k[:, sl].astype(jnp.bfloat16)
        s = jax.lax.dot_general(qh, kh, (((1,), (1,)), ((), ())),
                                preferred_element_type=jnp.float32) * scale
        s = s - jnp.max(s, axis=-1, keepdims=True)
        p = jnp.exp(s)
        p = p * pl.reciprocal(jnp.sum(p, axis=-1, keepdims=True), approx=True)
        outs.append(_mm(p, v[:, sl]))
    return jnp.concatenate(outs, axis=-1)


def _full_spec(a):
    """BlockSpec covering the whole array, same block at every grid step (kept resident)."""
    nd = a.ndim
    return pl.BlockSpec(a.shape, lambda b, _nd=nd: (0,) * _nd)


# ----------------------------------------------------------------------------
# Pallas kernels
# ----------------------------------------------------------------------------
def _stem_proj_kernel(patch_ref, sw_ref, sb_ref, ipw_ref, ipb_ref, tok_ref, src_ref):
    """Patchify conv stem (linear + ReLU) fused with the 1x1 input_proj."""
    t = jnp.maximum(_mm(patch_ref[...], sw_ref[...]) + sb_ref[...], 0.0)
    tok_ref[...] = t.astype(tok_ref.dtype)
    src_ref[...] = (_mm(t, ipw_ref[...]) + ipb_ref[...]).astype(src_ref.dtype)


def _codes_kernel(tok_ref, cw_ref, cb_ref, o_ref):
    """Global-code head of the backbone (unused downstream -> DCE'd under jit)."""
    o_ref[...] = (_mm(tok_ref[...], cw_ref[...]) + cb_ref[...]).astype(o_ref.dtype)


def _encoder_layer_kernel(src_ref, pos_ref,
                          wqk_ref, bqk_ref, wv_ref, bv_ref, wo_ref, bo_ref,
                          n1g_ref, n1b_ref,
                          w1_ref, b1_ref, w2_ref, b2_ref,
                          n2g_ref, n2b_ref,
                          o_ref, *, nheads):
    x = src_ref[0]
    pos = pos_ref[0]
    d = x.shape[-1]
    # self-attention (post-norm DETR): q = k = src + pos, v = src
    qk = _mm(x + pos, wqk_ref[...]) + bqk_ref[...]
    q, k = qk[:, :d], qk[:, d:]
    v = _mm(x, wv_ref[...]) + bv_ref[...]
    a = _mha(q, k, v, nheads)
    a = _mm(a, wo_ref[...]) + bo_ref[...]
    x = _layernorm(x + a, n1g_ref[...], n1b_ref[...])
    # FFN
    h = jnp.maximum(_mm(x, w1_ref[...]) + b1_ref[...], 0.0)
    y = _mm(h, w2_ref[...]) + b2_ref[...]
    x = _layernorm(x + y, n2g_ref[...], n2b_ref[...])
    o_ref[0] = x.astype(o_ref.dtype)


def _decoder_layer_kernel(tgt_ref, mem_ref, pos_ref, qpos_ref,
                          s_wqk_ref, s_bqk_ref, s_wv_ref, s_bv_ref, s_wo_ref, s_bo_ref,
                          n1g_ref, n1b_ref,
                          c_wq_ref, c_bq_ref, c_wk_ref, c_bk_ref, c_wv_ref, c_bv_ref,
                          c_wo_ref, c_bo_ref,
                          n2g_ref, n2b_ref,
                          w1_ref, b1_ref, w2_ref, b2_ref,
                          n3g_ref, n3b_ref,
                          o_ref, *, nheads):
    x = tgt_ref[0]
    mem = mem_ref[0]
    pos = pos_ref[0]
    qpos = qpos_ref[...]
    d = x.shape[-1]
    # self-attention: q = k = tgt + query_pos, v = tgt
    qk = _mm(x + qpos, s_wqk_ref[...]) + s_bqk_ref[...]
    q, k = qk[:, :d], qk[:, d:]
    v = _mm(x, s_wv_ref[...]) + s_bv_ref[...]
    a = _mha(q, k, v, nheads)
    a = _mm(a, s_wo_ref[...]) + s_bo_ref[...]
    x = _layernorm(x + a, n1g_ref[...], n1b_ref[...])
    # cross-attention: q = tgt + query_pos, k = memory + pos, v = memory
    q = _mm(x + qpos, c_wq_ref[...]) + c_bq_ref[...]
    k = _mm(mem + pos, c_wk_ref[...]) + c_bk_ref[...]
    v = _mm(mem, c_wv_ref[...]) + c_bv_ref[...]
    a = _mha(q, k, v, nheads)
    a = _mm(a, c_wo_ref[...]) + c_bo_ref[...]
    x = _layernorm(x + a, n2g_ref[...], n2b_ref[...])
    # FFN
    h = jnp.maximum(_mm(x, w1_ref[...]) + b1_ref[...], 0.0)
    y = _mm(h, w2_ref[...]) + b2_ref[...]
    x = _layernorm(x + y, n3g_ref[...], n3b_ref[...])
    o_ref[0] = x.astype(o_ref.dtype)


def _head_kernel(tgt_ref, ng_ref, nb_ref, hw_ref, hb_ref, o_ref):
    """Decoder LayerNorm fused with the SMPL head (pose|shape|cam packed, 128-wide slab)."""
    x = _layernorm(tgt_ref[...], ng_ref[...], nb_ref[...])
    o_ref[...] = (_mm(x, hw_ref[...]) + hb_ref[...]).astype(o_ref.dtype)


# ----------------------------------------------------------------------------
# Wrappers (one pallas_call per fused block)
# ----------------------------------------------------------------------------
_ENC_KEYS = ("wqk", "bqk", "wv", "bv", "wo", "bo", "n1g", "n1b",
             "w1", "b1", "w2", "b2", "n2g", "n2b")

_DEC_KEYS = ("s_wqk", "s_bqk", "s_wv", "s_bv", "s_wo", "s_bo", "n1g", "n1b",
             "c_wq", "c_bq", "c_wk", "c_bk", "c_wv", "c_bv", "c_wo", "c_bo",
             "n2g", "n2b", "w1", "b1", "w2", "b2", "n3g", "n3b")


def encoder_layer(src, pos, lp, nheads):
    B, L, d = src.shape
    weights = [lp[k] for k in _ENC_KEYS]
    in_specs = ([pl.BlockSpec((1, L, d), lambda b: (b, 0, 0)),
                 pl.BlockSpec((1, L, d), lambda b: (b, 0, 0))]
                + [_full_spec(w) for w in weights])
    return pl.pallas_call(
        functools.partial(_encoder_layer_kernel, nheads=nheads),
        out_shape=jax.ShapeDtypeStruct((B, L, d), jnp.float32),
        grid_spec=pltpu.PrefetchScalarGridSpec(
            num_scalar_prefetch=0,
            grid=(B,),
            in_specs=in_specs,
            out_specs=pl.BlockSpec((1, L, d), lambda b: (b, 0, 0)),
        ),
        compiler_params=pltpu.CompilerParams(
            dimension_semantics=("parallel",),
            vmem_limit_bytes=_VMEM_LIMIT,
        ),
    )(src, pos, *weights)


def decoder_layer(tgt, memory, pos, qpos, lp, nheads):
    B, Q, d = tgt.shape
    L = memory.shape[1]
    weights = [lp[k] for k in _DEC_KEYS]
    in_specs = ([pl.BlockSpec((1, Q, d), lambda b: (b, 0, 0)),
                 pl.BlockSpec((1, L, d), lambda b: (b, 0, 0)),
                 pl.BlockSpec((1, L, d), lambda b: (b, 0, 0)),
                 _full_spec(qpos)]
                + [_full_spec(w) for w in weights])
    return pl.pallas_call(
        functools.partial(_decoder_layer_kernel, nheads=nheads),
        out_shape=jax.ShapeDtypeStruct((B, Q, d), jnp.float32),
        grid_spec=pltpu.PrefetchScalarGridSpec(
            num_scalar_prefetch=0,
            grid=(B,),
            in_specs=in_specs,
            out_specs=pl.BlockSpec((1, Q, d), lambda b: (b, 0, 0)),
        ),
        compiler_params=pltpu.CompilerParams(
            dimension_semantics=("parallel",),
            vmem_limit_bytes=_VMEM_LIMIT,
        ),
    )(tgt, memory, pos, qpos, *weights)


# ----------------------------------------------------------------------------
# Model forward (plain-JAX glue around the fused kernels)
# ----------------------------------------------------------------------------
def sine_position_embedding(B, H, W, num_pos_feats, temperature=10000.0):
    scale = 2.0 * math.pi
    not_mask = jnp.ones((B, H, W), jnp.float32)
    y_embed = jnp.cumsum(not_mask, axis=1)
    x_embed = jnp.cumsum(not_mask, axis=2)
    eps = 1e-6
    y_embed = y_embed / (y_embed[:, -1:, :] + eps) * scale
    x_embed = x_embed / (x_embed[:, :, -1:] + eps) * scale
    dim_t = jnp.arange(num_pos_feats, dtype=jnp.float32)
    dim_t = temperature ** (2.0 * jnp.floor(dim_t / 2.0) / num_pos_feats)
    pos_x = x_embed[:, :, :, None] / dim_t
    pos_y = y_embed[:, :, :, None] / dim_t
    pos_x = jnp.stack(
        [jnp.sin(pos_x[:, :, :, 0::2]), jnp.cos(pos_x[:, :, :, 1::2])], axis=4
    ).reshape(B, H, W, -1)
    pos_y = jnp.stack(
        [jnp.sin(pos_y[:, :, :, 0::2]), jnp.cos(pos_y[:, :, :, 1::2])], axis=4
    ).reshape(B, H, W, -1)
    pos = jnp.concatenate([pos_y, pos_x], axis=3)  # (B, H, W, 2*num_pos_feats)
    return pos.transpose(0, 3, 1, 2)  # NCHW


def backbone_forward(images, params, cfg):
    # TODO(synk): pretrained ResNet-50 + ConvBottleNeck decoder not available in-script;
    # a deterministic patchify conv-stem with identical output shapes is used instead.
    bp = params["backbone"]
    B, C, H, W = images.shape
    s = 4
    Hf, Wf = H // s, W // s
    patches = (images.reshape(B, C, Hf, s, Wf, s)
               .transpose(0, 2, 4, 1, 3, 5)
               .reshape(B * Hf * Wf, C * s * s))
    cin = bp["stem_w"].shape[1]
    d = cfg["hidden_dim"]
    tokens, src = pl.pallas_call(
        _stem_proj_kernel,
        out_shape=(jax.ShapeDtypeStruct((B * Hf * Wf, cin), jnp.float32),
                   jax.ShapeDtypeStruct((B * Hf * Wf, d), jnp.float32)),
        compiler_params=pltpu.CompilerParams(vmem_limit_bytes=_VMEM_LIMIT),
    )(patches, bp["stem_w"], bp["stem_b"], params["input_proj_w"], params["input_proj_b"])
    # Global code vector (ResNet "codes"); unused by TNet.forward output -> DCE'd.
    code_tokens = pl.pallas_call(
        _codes_kernel,
        out_shape=jax.ShapeDtypeStruct((B * Hf * Wf, bp["code_w"].shape[1]), jnp.float32),
        compiler_params=pltpu.CompilerParams(vmem_limit_bytes=_VMEM_LIMIT),
    )(tokens, bp["code_w"], bp["code_b"])
    codes = code_tokens.reshape(B, Hf * Wf, -1).mean(axis=1)  # (B, 2048)
    return src.reshape(B, Hf * Wf, d), codes, (Hf, Wf)


def transformer_forward(src, pos, query_embed, p, cfg):
    """src/pos: (B, HW, d); query_embed: (Q, d). Returns decoder output (B, Q, d)."""
    B, L, d = src.shape
    nheads = cfg["nheads"]
    memory = src
    for lp in p["encoder_layers"]:
        memory = encoder_layer(memory, pos, lp, nheads)
    Q = query_embed.shape[0]
    tgt = jnp.zeros((B, Q, d), jnp.float32)
    for lp in p["decoder_layers"]:
        tgt = decoder_layer(tgt, memory, pos, query_embed, lp, nheads)
    return tgt  # final decoder LayerNorm is fused into the SMPL head kernel


def smpl_head_forward(tgt, p):
    # TODO(synk): SimpleSMPLHead source not provided — per-query linear head used.
    B, Q, d = tgt.shape
    out = pl.pallas_call(
        _head_kernel,
        out_shape=jax.ShapeDtypeStruct((B * Q, p["head_w"].shape[1]), jnp.float32),
        compiler_params=pltpu.CompilerParams(vmem_limit_bytes=_VMEM_LIMIT),
    )(tgt.reshape(B * Q, d), p["dn_g"], p["dn_b"], p["head_w"], p["head_b"])
    out = out.reshape(B, 1, Q, -1)  # (B, L=1, Q, 128): return_intermediate_dec=False
    pred_pose = out[:, :, :24, 0:6]      # (B, 1, 24, 6)
    pred_shape = out[:, :, 24, 6:16]     # (B, 1, 10)
    pred_cam = out[:, :, 25, 16:19]      # (B, 1, 3)
    return {"pred_pose6d": pred_pose, "pred_shape": pred_shape, "pred_cam": pred_cam}


def tnet_forward(images, params, cfg):
    src, _codes, (Hf, Wf) = backbone_forward(images, params, cfg)
    B = src.shape[0]
    d = cfg["hidden_dim"]
    pos = sine_position_embedding(B, Hf, Wf, d // 2)            # (B, d, Hf, Wf)
    pos_tokens = pos.transpose(0, 2, 3, 1).reshape(B, Hf * Wf, d)
    tgt = transformer_forward(src, pos_tokens, params["query_embed"],
                              params["transformer"], cfg)
    return smpl_head_forward(tgt, params["head"])


# ----------------------------------------------------------------------------
# Deterministic parameter init (weights stored bf16 for MXU, LN/bias params f32)
# ----------------------------------------------------------------------------
def init_params(key, cfg):
    d = cfg["hidden_dim"]
    dff = cfg["dim_feedforward"]
    cin = cfg["in_channels"]
    Q = cfg["num_queries"]
    keys = iter(jax.random.split(key, 64))

    def w(din, dout, scale=0.02):
        return (scale * jax.random.normal(next(keys), (din, dout), jnp.float32)
                ).astype(jnp.bfloat16)

    def b(dout):
        return jnp.zeros((1, dout), jnp.float32)

    def ln():
        return jnp.ones((1, d), jnp.float32), jnp.zeros((1, d), jnp.float32)

    def enc_layer():
        n1g, n1b = ln()
        n2g, n2b = ln()
        return {"wqk": w(d, 2 * d), "bqk": b(2 * d),
                "wv": w(d, d), "bv": b(d),
                "wo": w(d, d), "bo": b(d),
                "n1g": n1g, "n1b": n1b,
                "w1": w(d, dff), "b1": b(dff),
                "w2": w(dff, d), "b2": b(d),
                "n2g": n2g, "n2b": n2b}

    def dec_layer():
        n1g, n1b = ln()
        n2g, n2b = ln()
        n3g, n3b = ln()
        return {"s_wqk": w(d, 2 * d), "s_bqk": b(2 * d),
                "s_wv": w(d, d), "s_bv": b(d),
                "s_wo": w(d, d), "s_bo": b(d),
                "n1g": n1g, "n1b": n1b,
                "c_wq": w(d, d), "c_bq": b(d),
                "c_wk": w(d, d), "c_bk": b(d),
                "c_wv": w(d, d), "c_bv": b(d),
                "c_wo": w(d, d), "c_bo": b(d),
                "n2g": n2g, "n2b": n2b,
                "w1": w(d, dff), "b1": b(dff),
                "w2": w(dff, d), "b2": b(d),
                "n3g": n3g, "n3b": n3b}

    # SMPL head: pose(6) | shape(10) | cam(3) packed and zero-padded to 128 lanes.
    pose_w = 0.02 * jax.random.normal(next(keys), (d, 6), jnp.float32)
    shape_w = 0.02 * jax.random.normal(next(keys), (d, 10), jnp.float32)
    cam_w = 0.02 * jax.random.normal(next(keys), (d, 3), jnp.float32)
    head_w = (jnp.zeros((d, 128), jnp.float32)
              .at[:, 0:6].set(pose_w)
              .at[:, 6:16].set(shape_w)
              .at[:, 16:19].set(cam_w)).astype(jnp.bfloat16)
    dn_g, dn_b = ln()

    return {
        "backbone": {"stem_w": w(3 * 4 * 4, cin), "stem_b": b(cin),
                     "code_w": w(cin, 2048), "code_b": b(2048)},
        "input_proj_w": w(cin, d), "input_proj_b": b(d),
        "query_embed": 0.02 * jax.random.normal(next(keys), (Q, d), jnp.float32),
        "transformer": {
            "encoder_layers": [enc_layer() for _ in range(cfg["enc_layers"])],
            "decoder_layers": [dec_layer() for _ in range(cfg["dec_layers"])],
        },
        "head": {"dn_g": dn_g, "dn_b": dn_b,
                 "head_w": head_w, "head_b": jnp.zeros((1, 128), jnp.float32)},
    }


if __name__ == "__main__":
    cfg = {
        "hidden_dim": 32,        # args.hidden_dim
        "nheads": 4,             # args.nheads
        "dim_feedforward": 64,   # args.dim_feedforward
        "enc_layers": 1,         # args.enc_layers
        "dec_layers": 1,         # args.dec_layers
        "out_lv": 2,             # -> in_channels = channel_list[2] = 256
        "in_channels": 256,
        "num_queries": 24 + 1 + 1,
    }
    key = jax.random.PRNGKey(0)
    k_params, k_img = jax.random.split(key)
    params = init_params(k_params, cfg)
    images = jax.random.normal(k_img, (2, 3, 32, 32), jnp.float32)  # NCHW

    fwd = jax.jit(lambda imgs: tnet_forward(imgs, params, cfg))
    pred = fwd(images)
    jax.block_until_ready(pred)

    assert pred["pred_pose6d"].shape == (2, 1, 24, 6)
    assert pred["pred_shape"].shape == (2, 1, 10)
    assert pred["pred_cam"].shape == (2, 1, 3)
    print("KERNEL_OK")
</pallas_src>

<mosaic_0001>
module attributes {stable_mosaic.version = 11 : i64} {
  func.func @_stem_proj_kernel(%arg0: memref<128x48xf32, #tpu.memory_space<vmem>>, %arg1: memref<48x256xbf16, #tpu.memory_space<vmem>>, %arg2: memref<1x256xf32, #tpu.memory_space<vmem>>, %arg3: memref<256x32xbf16, #tpu.memory_space<vmem>>, %arg4: memref<1x32xf32, #tpu.memory_space<vmem>>, %arg5: memref<128x256xf32, #tpu.memory_space<vmem>>, %arg6: memref<128x32xf32, #tpu.memory_space<vmem>>) attributes {dimension_semantics = [], scalar_prefetch = 0 : i64, scratch_operands = 0 : i64, tpu.core_type = #tpu.core_type<tc>} {
    %c0 = arith.constant 0 : index
    %c0_0 = arith.constant 0 : index
    %0 = vector.load %arg0[%c0, %c0_0] : memref<128x48xf32, #tpu.memory_space<vmem>>, vector<128x48xf32>
    %c0_1 = arith.constant 0 : index
    %c0_2 = arith.constant 0 : index
    %1 = vector.load %arg1[%c0_1, %c0_2] : memref<48x256xbf16, #tpu.memory_space<vmem>>, vector<48x256xbf16>
    %2 = arith.truncf %0 : vector<128x48xf32> to vector<128x48xbf16>
    %cst = arith.constant dense<0.000000e+00> : vector<128x256xf32>
    %3 = tpu.matmul %2, %1, %cst {dimension_numbers = #tpu.dot_dimension_numbers<[1], [0], [0], [1], [0, 0, 1, 1], [], []>} : vector<128x48xbf16>, vector<48x256xbf16>, vector<128x256xf32> -> vector<128x256xf32>
    %c0_3 = arith.constant 0 : index
    %c0_4 = arith.constant 0 : index
    %4 = vector.load %arg2[%c0_3, %c0_4] : memref<1x256xf32, #tpu.memory_space<vmem>>, vector<1x256xf32>
    %5 = vector.broadcast %4 : vector<1x256xf32> to vector<128x256xf32>
    %6 = arith.addf %3, %5 : vector<128x256xf32>
    %cst_5 = arith.constant 0.000000e+00 : f32
    %7 = vector.broadcast %cst_5 : f32 to vector<128x256xf32>
    %8 = arith.maximumf %6, %7 : vector<128x256xf32>
    %c0_6 = arith.constant 0 : index
    %c0_7 = arith.constant 0 : index
    %9 = vector.load %arg5[%c0_6, %c0_7] : memref<128x256xf32, #tpu.memory_space<vmem>>, vector<128x256xf32>
    tpu.vector_store %arg5[%c0_6, %c0_7], %8 {strides = array<i32>} : memref<128x256xf32, #tpu.memory_space<vmem>>, vector<128x256xf32>,
    %c0_8 = arith.constant 0 : index
    %c0_9 = arith.constant 0 : index
    %10 = vector.load %arg3[%c0_8, %c0_9] : memref<256x32xbf16, #tpu.memory_space<vmem>>, vector<256x32xbf16>
    %11 = arith.truncf %8 : vector<128x256xf32> to vector<128x256xbf16>
    %cst_10 = arith.constant dense<0.000000e+00> : vector<128x32xf32>
    %12 = tpu.matmul %11, %10, %cst_10 {dimension_numbers = #tpu.dot_dimension_numbers<[1], [0], [0], [1], [0, 0, 1, 1], [], []>} : vector<128x256xbf16>, vector<256x32xbf16>, vector<128x32xf32> -> vector<128x32xf32>
    %c0_11 = arith.constant 0 : index
    %c0_12 = arith.constant 0 : index
    %13 = vector.load %arg4[%c0_11, %c0_12] : memref<1x32xf32, #tpu.memory_space<vmem>>, vector<1x32xf32>
    %14 = vector.broadcast %13 : vector<1x32xf32> to vector<128x32xf32>
    %15 = arith.addf %12, %14 : vector<128x32xf32>
    %c0_13 = arith.constant 0 : index
    %c0_14 = arith.constant 0 : index
    %16 = vector.load %arg6[%c0_13, %c0_14] : memref<128x32xf32, #tpu.memory_space<vmem>>, vector<128x32xf32>
    tpu.vector_store %arg6[%c0_13, %c0_14], %15 {strides = array<i32>} : memref<128x32xf32, #tpu.memory_space<vmem>>, vector<128x32xf32>,
    return
  }
}

module attributes {stable_mosaic.version = 11 : i64} {
  func.func @_encoder_layer_kernel(%arg0: i32, %arg1: memref<1x64x32xf32, #tpu.memory_space<vmem>>, %arg2: memref<1x64x32xf32, #tpu.memory_space<vmem>>, %arg3: memref<32x64xbf16, #tpu.memory_space<vmem>>, %arg4: memref<1x64xf32, #tpu.memory_space<vmem>>, %arg5: memref<32x32xbf16, #tpu.memory_space<vmem>>, %arg6: memref<1x32xf32, #tpu.memory_space<vmem>>, %arg7: memref<32x32xbf16, #tpu.memory_space<vmem>>, %arg8: memref<1x32xf32, #tpu.memory_space<vmem>>, %arg9: memref<1x32xf32, #tpu.memory_space<vmem>>, %arg10: memref<1x32xf32, #tpu.memory_space<vmem>>, %arg11: memref<32x64xbf16, #tpu.memory_space<vmem>>, %arg12: memref<1x64xf32, #tpu.memory_space<vmem>>, %arg13: memref<64x32xbf16, #tpu.memory_space<vmem>>, %arg14: memref<1x32xf32, #tpu.memory_space<vmem>>, %arg15: memref<1x32xf32, #tpu.memory_space<vmem>>, %arg16: memref<1x32xf32, #tpu.memory_space<vmem>>, %arg17: memref<1x64x32xf32, #tpu.memory_space<vmem>>) attributes {dimension_semantics = [#tpu.dimension_semantics<parallel>], iteration_bounds = array<i64: 2>, scalar_prefetch = 0 : i64, scratch_operands = 0 : i64, tpu.core_type = #tpu.core_type<tc>, window_params = [{transform_indices = @transform_0, window_bounds = array<i64: 1, 64, 32>}, {transform_indices = @transform_1, window_bounds = array<i64: 1, 64, 32>}, {pipeline_mode = #tpu.pipeline_mode<synchronous>, transform_indices = @transform_2, window_bounds = array<i64: 32, 64>}, {pipeline_mode = #tpu.pipeline_mode<synchronous>, transform_indices = @transform_3, window_bounds = array<i64: 1, 64>}, {pipeline_mode = #tpu.pipeline_mode<synchronous>, transform_indices = @transform_4, window_bounds = array<i64: 32, 32>}, {pipeline_mode = #tpu.pipeline_mode<synchronous>, transform_indices = @transform_5, window_bounds = array<i64: 1, 32>}, {pipeline_mode = #tpu.pipeline_mode<synchronous>, transform_indices = @transform_6, window_bounds = array<i64: 32, 32>}, {pipeline_mode = #tpu.pipeline_mode<synchronous>, transform_indices = @transform_7, window_bounds = array<i64: 1, 32>}, {pipeline_mode = #tpu.pipeline_mode<synchronous>, transform_indices = @transform_8, window_bounds = array<i64: 1, 32>}, {pipeline_mode = #tpu.pipeline_mode<synchronous>, transform_indices = @transform_9, window_bounds = array<i64: 1, 32>}, {pipeline_mode = #tpu.pipeline_mode<synchronous>, transform_indices = @transform_10, window_bounds = array<i64: 32, 64>}, {pipeline_mode = #tpu.pipeline_mode<synchronous>, transform_indices = @transform_11, window_bounds = array<i64: 1, 64>}, {pipeline_mode = #tpu.pipeline_mode<synchronous>, transform_indices = @transform_12, window_bounds = array<i64: 64, 32>}, {pipeline_mode = #tpu.pipeline_mode<synchronous>, transform_indices = @transform_13, window_bounds = array<i64: 1, 32>}, {pipeline_mode = #tpu.pipeline_mode<synchronous>, transform_indices = @transform_14, window_bounds = array<i64: 1, 32>}, {pipeline_mode = #tpu.pipeline_mode<synchronous>, transform_indices = @transform_15, window_bounds = array<i64: 1, 32>}, {transform_indices = @transform_16, window_bounds = array<i64: 1, 64, 32>}]} {
    %c0 = arith.constant 0 : index
    %c0_0 = arith.constant 0 : index
    %c0_1 = arith.constant 0 : index
    %0 = vector.load %arg1[%c0, %c0_0, %c0_1] : memref<1x64x32xf32, #tpu.memory_space<vmem>>, vector<1x64x32xf32>
    %1 = vector.shape_cast %0 : vector<1x64x32xf32> to vector<64x32xf32>
    %c0_2 = arith.constant 0 : index
    %c0_3 = arith.constant 0 : index
    %c0_4 = arith.constant 0 : index
    %2 = vector.load %arg2[%c0_2, %c0_3, %c0_4] : memref<1x64x32xf32, #tpu.memory_space<vmem>>, vector<1x64x32xf32>
    %3 = vector.shape_cast %2 : vector<1x64x32xf32> to vector<64x32xf32>
    %4 = arith.addf %1, %3 : vector<64x32xf32>
    %c0_5 = arith.constant 0 : index
    %c0_6 = arith.constant 0 : index
    %5 = vector.load %arg3[%c0_5, %c0_6] : memref<32x64xbf16, #tpu.memory_space<vmem>>, vector<32x64xbf16>
    %6 = arith.truncf %4 : vector<64x32xf32> to vector<64x32xbf16>
    %cst = arith.constant dense<0.000000e+00> : vector<64x64xf32>
    %7 = tpu.matmul %6, %5, %cst {dimension_numbers = #tpu.dot_dimension_numbers<[1], [0], [0], [1], [0, 0, 1, 1], [], []>} : vector<64x32xbf16>, vector<32x64xbf16>, vector<64x64xf32> -> vector<64x64xf32>
    %c0_7 = arith.constant 0 : index
    %c0_8 = arith.constant 0 : index
    %8 = vector.load %arg4[%c0_7, %c0_8] : memref<1x64xf32, #tpu.memory_space<vmem>>, vector<1x64xf32>
    %9 = vector.broadcast %8 : vector<1x64xf32> to vector<64x64xf32>
    %10 = arith.addf %7, %9 : vector<64x64xf32>
    %11 = vector.extract_strided_slice %10 {offsets = [0, 0], sizes = [64, 32], strides = [1, 1]} : vector<64x64xf32> to vector<64x32xf32>
    %12 = vector.extract_strided_slice %10 {offsets = [0, 32], sizes = [64, 32], strides = [1, 1]} : vector<64x64xf32> to vector<64x32xf32>
    %c0_9 = arith.constant 0 : index
    %c0_10 = arith.constant 0 : index
    %13 = vector.load %arg5[%c0_9, %c0_10] : memref<32x32xbf16, #tpu.memory_space<vmem>>, vector<32x32xbf16>
    %14 = arith.truncf %1 : vector<64x32xf32> to vector<64x32xbf16>
    %cst_11 = arith.constant dense<0.000000e+00> : vector<64x32xf32>
    %15 = tpu.matmul %14, %13, %cst_11 {dimension_numbers = #tpu.dot_dimension_numbers<[1], [0], [0], [1], [0, 0, 1, 1], [], []>} : vector<64x32xbf16>, vector<32x32xbf16>, vector<64x32xf32> -> vector<64x32xf32>
    %c0_12 = arith.constant 0 : index
    %c0_13 = arith.constant 0 : index
    %16 = vector.load %arg6[%c0_12, %c0_13] : memref<1x32xf32, #tpu.memory_space<vmem>>, vector<1x32xf32>
    %17 = vector.broadcast %16 : vector<1x32xf32> to vector<64x32xf32>
    %18 = arith.addf %15, %17 : vector<64x32xf32>
    %19 = vector.extract_strided_slice %11 {offsets = [0, 0], sizes = [64, 8], strides = [1, 1]} : vector<64x32xf32> to vector<64x8xf32>
    %20 = arith.truncf %19 : vector<64x8xf32> to vector<64x8xbf16>
    %21 = vector.extract_strided_slice %12 {offsets = [0, 0], sizes = [64, 8], strides = [1, 1]} : vector<64x32xf32> to vector<64x8xf32>
    %22 = arith.truncf %21 : vector<64x8xf32> to vector<64x8xbf16>
    %cst_14 = arith.constant dense<0.000000e+00> : vector<64x64xf32>
    %23 = tpu.matmul %20, %22, %cst_14 {dimension_numbers = #tpu.dot_dimension_numbers<[1], [1], [0], [0], [0, 0, 1, 0], [], []>} : vector<64x8xbf16>, vector<64x8xbf16>, vector<64x64xf32> -> vector<64x64xf32>
    %cst_15 = arith.constant 0.353553385 : f32
    %24 = vector.broadcast %cst_15 : f32 to vector<64x64xf32>
    %25 = arith.mulf %23, %24 : vector<64x64xf32>
    %cst_16 = arith.constant dense<0xFF800000> : vector<64xf32>
    %26 = vector.multi_reduction <maximumf>, %25, %cst_16 [1] : vector<64x64xf32> to vector<64xf32>
    %27 = vector.shape_cast %26 : vector<64xf32> to vector<64x1xf32>
    %28 = vector.broadcast %27 : vector<64x1xf32> to vector<64x64xf32>
    %29 = arith.subf %25, %28 : vector<64x64xf32>
    %30 = math.exp %29 : vector<64x64xf32>
    %cst_17 = arith.constant dense<0.000000e+00> : vector<64xf32>
    %31 = vector.multi_reduction <add>, %30, %cst_17 [1] : vector<64x64xf32> to vector<64xf32>
    %32 = vector.shape_cast %31 : vector<64xf32> to vector<64x1xf32>
    %33 = tpu.reciprocal %32 {approx = true} : vector<64x1xf32> -> vector<64x1xf32>
    %34 = vector.broadcast %33 : vector<64x1xf32> to vector<64x64xf32>
    %35 = arith.mulf %30, %34 : vector<64x64xf32>
    %36 = vector.extract_strided_slice %18 {offsets = [0, 0], sizes = [64, 8], strides = [1, 1]} : vector<64x32xf32> to vector<64x8xf32>
    %37 = arith.truncf %35 : vector<64x64xf32> to vector<64x64xbf16>
    %38 = arith.truncf %36 : vector<64x8xf32> to vector<64x8xbf16>
    %cst_18 = arith.constant dense<0.000000e+00> : vector<64x8xf32>
    %39 = tpu.matmul %37, %38, %cst_18 {dimension_numbers = #tpu.dot_dimension_numbers<[1], [0], [0], [1], [0, 0, 1, 1], [], []>} : vector<64x64xbf16>, vector<64x8xbf16>, vector<64x8xf32> -> vector<64x8xf32>
    %40 = vector.extract_strided_slice %11 {offsets = [0, 8], sizes = [64, 8], strides = [1, 1]} : vector<64x32xf32> to vector<64x8xf32>
    %41 = arith.truncf %40 : vector<64x8xf32> to vector<64x8xbf16>
    %42 = vector.extract_strided_slice %12 {offsets = [0, 8], sizes = [64, 8], strides = [1, 1]} : vector<64x32xf32> to vector<64x8xf32>
    %43 = arith.truncf %42 : vector<64x8xf32> to vector<64x8xbf16>
    %cst_19 = arith.constant dense<0.000000e+00> : vector<64x64xf32>
    %44 = tpu.matmul %41, %43, %cst_19 {dimension_numbers = #tpu.dot_dimension_numbers<[1], [1], [0], [0], [0, 0, 1, 0], [], []>} : vector<64x8xbf16>, vector<64x8xbf16>, vector<64x64xf32> -> vector<64x64xf32>
    %cst_20 = arith.constant 0.353553385 : f32
    %45 = vector.broadcast %cst_20 : f32 to vector<64x64xf32>
    %46 = arith.mulf %44, %45 : vector<64x64xf32>
    %cst_21 = arith.constant dense<0xFF800000> : vector<64xf32>
    %47 = vector.multi_reduction <maximumf>, %46, %cst_21 [1] : vector<64x64xf32> to vector<64xf32>
    %48 = vector.shape_cast %47 : vector<64xf32> to vector<64x1xf32>
    %49 = vector.broadcast %48 : vector<64x1xf32> to vector<64x64xf32>
    %50 = arith.subf %46, %49 : vector<64x64xf32>
    %51 = math.exp %50 : vector<64x64xf32>
    %cst_22 = arith.constant dense<0.000000e+00> : vector<64xf32>
    %52 = vector.multi_reduction <add>, %51, %cst_22 [1] : vector<64x64xf32> to vector<64xf32>
    %53 = vector.shape_cast %52 : vector<64xf32> to vector<64x1xf32>
    %54 = tpu.reciprocal %53 {approx = true} : vector<64x1xf32> -> vector<64x1xf32>
    %55 = vector.broadcast %54 : vector<64x1xf32> to vector<64x64xf32>
    %56 = arith.mulf %51, %55 : vector<64x64xf32>
    %57 = vector.extract_strided_slice %18 {offsets = [0, 8], sizes = [64, 8], strides = [1, 1]} : vector<64x32xf32> to vector<64x8xf32>
    %58 = arith.truncf %56 : vector<64x64xf32> to vector<64x64xbf16>
    %59 = arith.truncf %57 : vector<64x8xf32> to vector<64x8xbf16>
    %cst_23 = arith.constant dense<0.000000e+00> : vector<64x8xf32>
    %60 = tpu.matmul %58, %59, %cst_23 {dimension_numbers = #tpu.dot_dimension_numbers<[1], [0], [0], [1], [0, 0, 1, 1], [], []>} : vector<64x64xbf16>, vector<64x8xbf16>, vector<64x8xf32> -> vector<64x8xf32>
    %61 = vector.extract_strided_slice %11 {offsets = [0, 16], sizes = [64, 8], strides = [1, 1]} : vector<64x32xf32> to vector<64x8xf32>
    %62 = arith.truncf %61 : vector<64x8xf32> to vector<64x8xbf16>
    %63 = vector.extract_strided_slice %12 {offsets = [0, 16], sizes = [64, 8], strides = [1, 1]} : vector<64x32xf32> to vector<64x8xf32>
    %64 = arith.truncf %63 : vector<64x8xf32> to vector<64x8xbf16>
    %cst_24 = arith.constant dense<0.000000e+00> : vector<64x64xf32>
    %65 = tpu.matmul %62, %64, %cst_24 {dimension_numbers = #tpu.dot_dimension_numbers<[1], [1], [0], [0], [0, 0, 1, 0], [], []>} : vector<64x8xbf16>, vector<64x8xbf16>, vector<64x64xf32> -> vector<64x64xf32>
    %cst_25 = arith.constant 0.353553385 : f32
    %66 = vector.broadcast %cst_25 : f32 to vector<64x64xf32>
    %67 = arith.mulf %65, %66 : vector<64x64xf32>
    %cst_26 = arith.constant dense<0xFF800000> : vector<64xf32>
    %68 = vector.multi_reduction <maximumf>, %67, %cst_26 [1] : vector<64x64xf32> to vector<64xf32>
    %69 = vector.shape_cast %68 : vector<64xf32> to vector<64x1xf32>
    %70 = vector.broadcast %69 : vector<64x1xf32> to vector<64x64xf32>
    %71 = arith.subf %67, %70 : vector<64x64xf32>
    %72 = math.exp %71 : vector<64x64xf32>
    %cst_27 = arith.constant dense<0.000000e+00> : vector<64xf32>
    %73 = vector.multi_reduction <add>, %72, %cst_27 [1] : vector<64x64xf32> to vector<64xf32>
    %74 = vector.shape_cast %73 : vector<64xf32> to vector<64x1xf32>
    %75 = tpu.reciprocal %74 {approx = true} : vector<64x1xf32> -> vector<64x1xf32>
    %76 = vector.broadcast %75 : vector<64x1xf32> to vector<64x64xf32>
    %77 = arith.mulf %72, %76 : vector<64x64xf32>
    %78 = vector.extract_strided_slice %18 {offsets = [0, 16], sizes = [64, 8], strides = [1, 1]} : vector<64x32xf32> to vector<64x8xf32>
    %79 = arith.truncf %77 : vector<64x64xf32> to vector<64x64xbf16>
    %80 = arith.truncf %78 : vector<64x8xf32> to vector<64x8xbf16>
    %cst_28 = arith.constant dense<0.000000e+00> : vector<64x8xf32>
    %81 = tpu.matmul %79, %80, %cst_28 {dimension_numbers = #tpu.dot_dimension_numbers<[1], [0], [0], [1], [0, 0, 1, 1], [], []>} : vector<64x64xbf16>, vector<64x8xbf16>, vector<64x8xf32> -> vector<64x8xf32>
    %82 = vector.extract_strided_slice %11 {offsets = [0, 24], sizes = [64, 8], strides = [1, 1]} : vector<64x32xf32> to vector<64x8xf32>
    %83 = arith.truncf %82 : vector<64x8xf32> to vector<64x8xbf16>
    %84 = vector.extract_strided_slice %12 {offsets = [0, 24], sizes = [64, 8], strides = [1, 1]} : vector<64x32xf32> to vector<64x8xf32>
    %85 = arith.truncf %84 : vector<64x8xf32> to vector<64x8xbf16>
    %cst_29 = arith.constant dense<0.000000e+00> : vector<64x64xf32>
    %86 = tpu.matmul %83, %85, %cst_29 {dimension_numbers = #tpu.dot_dimension_numbers<[1], [1], [0], [0], [0, 0, 1, 0], [], []>} : vector<64x8xbf16>, vector<64x8xbf16>, vector<64x64xf32> -> vector<64x64xf32>
    %cst_30 = arith.constant 0.353553385 : f32
    %87 = vector.broadcast %cst_30 : f32 to vector<64x64xf32>
    %88 = arith.mulf %86, %87 : vector<64x64xf32>
    %cst_31 = arith.constant dense<0xFF800000> : vector<64xf32>
    %89 = vector.multi_reduction <maximumf>, %88, %cst_31 [1] : vector<64x64xf32> to vector<64xf32>
    %90 = vector.shape_cast %89 : vector<64xf32> to vector<64x1xf32>
    %91 = vector.broadcast %90 : vector<64x1xf32> to vector<64x64xf32>
    %92 = arith.subf %88, %91 : vector<64x64xf32>
    %93 = math.exp %92 : vector<64x64xf32>
    %cst_32 = arith.constant dense<0.000000e+00> : vector<64xf32>
    %94 = vector.multi_reduction <add>, %93, %cst_32 [1] : vector<64x64xf32> to vector<64xf32>
    %95 = vector.shape_cast %94 : vector<64xf32> to vector<64x1xf32>
    %96 = tpu.reciprocal %95 {approx = true} : vector<64x1xf32> -> vector<64x1xf32>
    %97 = vector.broadcast %96 : vector<64x1xf32> to vector<64x64xf32>
    %98 = arith.mulf %93, %97 : vector<64x64xf32>
    %99 = vector.extract_strided_slice %18 {offsets = [0, 24], sizes = [64, 8], strides = [1, 1]} : vector<64x32xf32> to vector<64x8xf32>
    %100 = arith.truncf %98 : vector<64x64xf32> to vector<64x64xbf16>
    %101 = arith.truncf %99 : vector<64x8xf32> to vector<64x8xbf16>
    %cst_33 = arith.constant dense<0.000000e+00> : vector<64x8xf32>
    %102 = tpu.matmul %100, %101, %cst_33 {dimension_numbers = #tpu.dot_dimension_numbers<[1], [0], [0], [1], [0, 0, 1, 1], [], []>} : vector<64x64xbf16>, vector<64x8xbf16>, vector<64x8xf32> -> vector<64x8xf32>
    %103 = tpu.concatenate %39, %60, %81, %102 in 1 : vector<64x8xf32>, vector<64x8xf32>, vector<64x8xf32>, vector<64x8xf32> -> vector<64x32xf32>
    %c0_34 = arith.constant 0 : index
    %c0_35 = arith.constant 0 : index
    %104 = vector.load %arg7[%c0_34, %c0_35] : memref<32x32xbf16, #tpu.memory_space<vmem>>, vector<32x32xbf16>
    %105 = arith.truncf %103 : vector<64x32xf32> to vector<64x32xbf16>
    %cst_36 = arith.constant dense<0.000000e+00> : vector<64x32xf32>
    %106 = tpu.matmul %105, %104, %cst_36 {dimension_numbers = #tpu.dot_dimension_numbers<[1], [0], [0], [1], [0, 0, 1, 1], [], []>} : vector<64x32xbf16>, vector<32x32xbf16>, vector<64x32xf32> -> vector<64x32xf32>
    %c0_37 = arith.constant 0 : index
    %c0_38 = arith.constant 0 : index
    %107 = vector.load %arg8[%c0_37, %c0_38] : memref<1x32xf32, #tpu.memory_space<vmem>>, vector<1x32xf32>
    %108 = vector.broadcast %107 : vector<1x32xf32> to vector<64x32xf32>
    %109 = arith.addf %106, %108 : vector<64x32xf32>
    %110 = arith.addf %1, %109 : vector<64x32xf32>
    %c0_39 = arith.constant 0 : index
    %c0_40 = arith.constant 0 : index
    %111 = vector.load %arg9[%c0_39, %c0_40] : memref<1x32xf32, #tpu.memory_space<vmem>>, vector<1x32xf32>
    %c0_41 = arith.constant 0 : index
    %c0_42 = arith.constant 0 : index
    %112 = vector.load %arg10[%c0_41, %c0_42] : memref<1x32xf32, #tpu.memory_space<vmem>>, vector<1x32xf32>
    %cst_43 = arith.constant dense<0.000000e+00> : vector<64xf32>
    %113 = vector.multi_reduction <add>, %110, %cst_43 [1] : vector<64x32xf32> to vector<64xf32>
    %114 = vector.shape_cast %113 : vector<64xf32> to vector<64x1xf32>
    %cst_44 = arith.constant 3.200000e+01 : f32
    %115 = vector.broadcast %cst_44 : f32 to vector<64x1xf32>
    %116 = arith.divf %114, %115 : vector<64x1xf32>
    %117 = vector.broadcast %116 : vector<64x1xf32> to vector<64x32xf32>
    %118 = arith.subf %110, %117 : vector<64x32xf32>
    %119 = arith.mulf %118, %118 : vector<64x32xf32>
    %cst_45 = arith.constant dense<0.000000e+00> : vector<64xf32>
    %120 = vector.multi_reduction <add>, %119, %cst_45 [1] : vector<64x32xf32> to vector<64xf32>
    %121 = vector.shape_cast %120 : vector<64xf32> to vector<64x1xf32>
    %cst_46 = arith.constant 3.200000e+01 : f32
    %122 = vector.broadcast %cst_46 : f32 to vector<64x1xf32>
    %123 = arith.divf %121, %122 : vector<64x1xf32>
    %cst_47 = arith.constant 9.99999974E-6 : f32
    %124 = vector.broadcast %cst_47 : f32 to vector<64x1xf32>
    %125 = arith.addf %123, %124 : vector<64x1xf32>
    %126 = math.rsqrt %125 : vector<64x1xf32>
    %127 = vector.broadcast %126 : vector<64x1xf32> to vector<64x32xf32>
    %128 = arith.mulf %118, %127 : vector<64x32xf32>
    %129 = vector.broadcast %111 : vector<1x32xf32> to vector<64x32xf32>
    %130 = arith.mulf %128, %129 : vector<64x32xf32>
    %131 = vector.broadcast %112 : vector<1x32xf32> to vector<64x32xf32>
    %132 = arith.addf %130, %131 : vector<64x32xf32>
    %c0_48 = arith.constant 0 : index
    %c0_49 = arith.constant 0 : index
    %133 = vector.load %arg11[%c0_48, %c0_49] : memref<32x64xbf16, #tpu.memory_space<vmem>>, vector<32x64xbf16>
    %134 = arith.truncf %132 : vector<64x32xf32> to vector<64x32xbf16>
    %cst_50 = arith.constant dense<0.000000e+00> : vector<64x64xf32>
    %135 = tpu.matmul %134, %133, %cst_50 {dimension_numbers = #tpu.dot_dimension_numbers<[1], [0], [0], [1], [0, 0, 1, 1], [], []>} : vector<64x32xbf16>, vector<32x64xbf16>, vector<64x64xf32> -> vector<64x64xf32>
    %c0_51 = arith.constant 0 : index
    %c0_52 = arith.constant 0 : index
    %136 = vector.load %arg12[%c0_51, %c0_52] : memref<1x64xf32, #tpu.memory_space<vmem>>, vector<1x64xf32>
    %137 = vector.broadcast %136 : vector<1x64xf32> to vector<64x64xf32>
    %138 = arith.addf %135, %137 : vector<64x64xf32>
    %cst_53 = arith.constant 0.000000e+00 : f32
    %139 = vector.broadcast %cst_53 : f32 to vector<64x64xf32>
    %140 = arith.maximumf %138, %139 : vector<64x64xf32>
    %c0_54 = arith.constant 0 : index
    %c0_55 = arith.constant 0 : index
    %141 = vector.load %arg13[%c0_54, %c0_55] : memref<64x32xbf16, #tpu.memory_space<vmem>>, vector<64x32xbf16>
    %142 = arith.truncf %140 : vector<64x64xf32> to vector<64x64xbf16>
    %cst_56 = arith.constant dense<0.000000e+00> : vector<64x32xf32>
    %143 = tpu.matmul %142, %141, %cst_56 {dimension_numbers = #tpu.dot_dimension_numbers<[1], [0], [0], [1], [0, 0, 1, 1], [], []>} : vector<64x64xbf16>, vector<64x32xbf16>, vector<64x32xf32> -> vector<64x32xf32>
    %c0_57 = arith.constant 0 : index
    %c0_58 = arith.constant 0 : index
    %144 = vector.load %arg14[%c0_57, %c0_58] : memref<1x32xf32, #tpu.memory_space<vmem>>, vector<1x32xf32>
    %145 = vector.broadcast %144 : vector<1x32xf32> to vector<64x32xf32>
    %146 = arith.addf %143, %145 : vector<64x32xf32>
    %147 = arith.addf %132, %146 : vector<64x32xf32>
    %c0_59 = arith.constant 0 : index
    %c0_60 = arith.constant 0 : index
    %148 = vector.load %arg15[%c0_59, %c0_60] : memref<1x32xf32, #tpu.memory_space<vmem>>, vector<1x32xf32>
    %c0_61 = arith.constant 0 : index
    %c0_62 = arith.constant 0 : index
    %149 = vector.load %arg16[%c0_61, %c0_62] : memref<1x32xf32, #tpu.memory_space<vmem>>, vector<1x32xf32>
    %cst_63 = arith.constant dense<0.000000e+00> : vector<64xf32>
    %150 = vector.multi_reduction <add>, %147, %cst_63 [1] : vector<64x32xf32> to vector<64xf32>
    %151 = vector.shape_cast %150 : vector<64xf32> to vector<64x1xf32>
    %cst_64 = arith.constant 3.200000e+01 : f32
    %152 = vector.broadcast %cst_64 : f32 to vector<64x1xf32>
    %153 = arith.divf %151, %152 : vector<64x1xf32>
    %154 = vector.broadcast %153 : vector<64x1xf32> to vector<64x32xf32>
    %155 = arith.subf %147, %154 : vector<64x32xf32>
    %156 = arith.mulf %155, %155 : vector<64x32xf32>
    %cst_65 = arith.constant dense<0.000000e+00> : vector<64xf32>
    %157 = vector.multi_reduction <add>, %156, %cst_65 [1] : vector<64x32xf32> to vector<64xf32>
    %158 = vector.shape_cast %157 : vector<64xf32> to vector<64x1xf32>
    %cst_66 = arith.constant 3.200000e+01 : f32
    %159 = vector.broadcast %cst_66 : f32 to vector<64x1xf32>
    %160 = arith.divf %158, %159 : vector<64x1xf32>
    %cst_67 = arith.constant 9.99999974E-6 : f32
    %161 = vector.broadcast %cst_67 : f32 to vector<64x1xf32>
    %162 = arith.addf %160, %161 : vector<64x1xf32>
    %163 = math.rsqrt %162 : vector<64x1xf32>
    %164 = vector.broadcast %163 : vector<64x1xf32> to vector<64x32xf32>
    %165 = arith.mulf %155, %164 : vector<64x32xf32>
    %166 = vector.broadcast %148 : vector<1x32xf32> to vector<64x32xf32>
    %167 = arith.mulf %165, %166 : vector<64x32xf32>
    %168 = vector.broadcast %149 : vector<1x32xf32> to vector<64x32xf32>
    %169 = arith.addf %167, %168 : vector<64x32xf32>
    %c0_68 = arith.constant 0 : index
    %c0_69 = arith.constant 0 : index
    %c0_70 = arith.constant 0 : index
    %170 = vector.load %arg17[%c0_68, %c0_69, %c0_70] : memref<1x64x32xf32, #tpu.memory_space<vmem>>, vector<1x64x32xf32>
    %171 = vector.shape_cast %170 : vector<1x64x32xf32> to vector<64x32xf32>
    %172 = vector.shape_cast %169 : vector<64x32xf32> to vector<1x64x32xf32>
    tpu.vector_store %arg17[%c0_68, %c0_69, %c0_70], %172 {strides = array<i32>} : memref<1x64x32xf32, #tpu.memory_space<vmem>>, vector<1x64x32xf32>,
    return
  }
  func.func @transform_0(%arg0: i32) -> (i32, i32, i32) {
    %c0_i32 = arith.constant 0 : i32
    %c0_i32_0 = arith.constant 0 : i32
    %c0_i32_1 = arith.constant 0 : i32
    return %arg0, %c0_i32, %c0_i32_0 : i32, i32, i32
  }
  func.func @transform_1(%arg0: i32) -> (i32, i32, i32) {
    %c0_i32 = arith.constant 0 : i32
    %c0_i32_0 = arith.constant 0 : i32
    %c0_i32_1 = arith.constant 0 : i32
    return %arg0, %c0_i32, %c0_i32_0 : i32, i32, i32
  }
  func.func @transform_2(%arg0: i32) -> (i32, i32) {
    %c0_i32 = arith.constant 0 : i32
    %c0_i32_0 = arith.constant 0 : i32
    %c0_i32_1 = arith.constant 0 : i32
    return %c0_i32, %c0_i32_0 : i32, i32
  }
  func.func @transform_3(%arg0: i32) -> (i32, i32) {
    %c0_i32 = arith.constant 0 : i32
    %c0_i32_0 = arith.constant 0 : i32
    %c0_i32_1 = arith.constant 0 : i32
    return %c0_i32, %c0_i32_0 : i32, i32
  }
  func.func @transform_4(%arg0: i32) -> (i32, i32) {
    %c0_i32 = arith.constant 0 : i32
    %c0_i32_0 = arith.constant 0 : i32
    %c0_i32_1 = arith.constant 0 : i32
    return %c0_i32, %c0_i32_0 : i32, i32
  }
  func.func @transform_5(%arg0: i32) -> (i32, i32) {
    %c0_i32 = arith.constant 0 : i32
    %c0_i32_0 = arith.constant 0 : i32
    %c0_i32_1 = arith.constant 0 : i32
    return %c0_i32, %c0_i32_0 : i32, i32
  }
  func.func @transform_6(%arg0: i32) -> (i32, i32) {
    %c0_i32 = arith.constant 0 : i32
    %c0_i32_0 = arith.constant 0 : i32
    %c0_i32_1 = arith.constant 0 : i32
    return %c0_i32, %c0_i32_0 : i32, i32
  }
  func.func @transform_7(%arg0: i32) -> (i32, i32) {
    %c0_i32 = arith.constant 0 : i32
    %c0_i32_0 = arith.constant 0 : i32
    %c0_i32_1 = arith.constant 0 : i32
    return %c0_i32, %c0_i32_0 : i32, i32
  }
  func.func @transform_8(%arg0: i32) -> (i32, i32) {
    %c0_i32 = arith.constant 0 : i32
    %c0_i32_0 = arith.constant 0 : i32
    %c0_i32_1 = arith.constant 0 : i32
    return %c0_i32, %c0_i32_0 : i32, i32
  }
  func.func @transform_9(%arg0: i32) -> (i32, i32) {
    %c0_i32 = arith.constant 0 : i32
    %c0_i32_0 = arith.constant 0 : i32
    %c0_i32_1 = arith.constant 0 : i32
    return %c0_i32, %c0_i32_0 : i32, i32
  }
  func.func @transform_10(%arg0: i32) -> (i32, i32) {
    %c0_i32 = arith.constant 0 : i32
    %c0_i32_0 = arith.constant 0 : i32
    %c0_i32_1 = arith.constant 0 : i32
    return %c0_i32, %c0_i32_0 : i32, i32
  }
  func.func @transform_11(%arg0: i32) -> (i32, i32) {
    %c0_i32 = arith.constant 0 : i32
    %c0_i32_0 = arith.constant 0 : i32
    %c0_i32_1 = arith.constant 0 : i32
    return %c0_i32, %c0_i32_0 : i32, i32
  }
  func.func @transform_12(%arg0: i32) -> (i32, i32) {
    %c0_i32 = arith.constant 0 : i32
    %c0_i32_0 = arith.constant 0 : i32
    %c0_i32_1 = arith.constant 0 : i32
    return %c0_i32, %c0_i32_0 : i32, i32
  }
  func.func @transform_13(%arg0: i32) -> (i32, i32) {
    %c0_i32 = arith.constant 0 : i32
    %c0_i32_0 = arith.constant 0 : i32
    %c0_i32_1 = arith.constant 0 : i32
    return %c0_i32, %c0_i32_0 : i32, i32
  }
  func.func @transform_14(%arg0: i32) -> (i32, i32) {
    %c0_i32 = arith.constant 0 : i32
    %c0_i32_0 = arith.constant 0 : i32
    %c0_i32_1 = arith.constant 0 : i32
    return %c0_i32, %c0_i32_0 : i32, i32
  }
  func.func @transform_15(%arg0: i32) -> (i32, i32) {
    %c0_i32 = arith.constant 0 : i32
    %c0_i32_0 = arith.constant 0 : i32
    %c0_i32_1 = arith.constant 0 : i32
    return %c0_i32, %c0_i32_0 : i32, i32
  }
  func.func @transform_16(%arg0: i32) -> (i32, i32, i32) {
    %c0_i32 = arith.constant 0 : i32
    %c0_i32_0 = arith.constant 0 : i32
    %c0_i32_1 = arith.constant 0 : i32
    return %arg0, %c0_i32, %c0_i32_0 : i32, i32, i32
  }
}

module attributes {stable_mosaic.version = 11 : i64} {
  func.func @_decoder_layer_kernel(%arg0: i32, %arg1: memref<1x26x32xf32, #tpu.memory_space<vmem>>, %arg2: memref<1x64x32xf32, #tpu.memory_space<vmem>>, %arg3: memref<1x64x32xf32, #tpu.memory_space<vmem>>, %arg4: memref<26x32xf32, #tpu.memory_space<vmem>>, %arg5: memref<32x64xbf16, #tpu.memory_space<vmem>>, %arg6: memref<1x64xf32, #tpu.memory_space<vmem>>, %arg7: memref<32x32xbf16, #tpu.memory_space<vmem>>, %arg8: memref<1x32xf32, #tpu.memory_space<vmem>>, %arg9: memref<32x32xbf16, #tpu.memory_space<vmem>>, %arg10: memref<1x32xf32, #tpu.memory_space<vmem>>, %arg11: memref<1x32xf32, #tpu.memory_space<vmem>>, %arg12: memref<1x32xf32, #tpu.memory_space<vmem>>, %arg13: memref<32x32xbf16, #tpu.memory_space<vmem>>, %arg14: memref<1x32xf32, #tpu.memory_space<vmem>>, %arg15: memref<32x32xbf16, #tpu.memory_space<vmem>>, %arg16: memref<1x32xf32, #tpu.memory_space<vmem>>, %arg17: memref<32x32xbf16, #tpu.memory_space<vmem>>, %arg18: memref<1x32xf32, #tpu.memory_space<vmem>>, %arg19: memref<32x32xbf16, #tpu.memory_space<vmem>>, %arg20: memref<1x32xf32, #tpu.memory_space<vmem>>, %arg21: memref<1x32xf32, #tpu.memory_space<vmem>>, %arg22: memref<1x32xf32, #tpu.memory_space<vmem>>, %arg23: memref<32x64xbf16, #tpu.memory_space<vmem>>, %arg24: memref<1x64xf32, #tpu.memory_space<vmem>>, %arg25: memref<64x32xbf16, #tpu.memory_space<vmem>>, %arg26: memref<1x32xf32, #tpu.memory_space<vmem>>, %arg27: memref<1x32xf32, #tpu.memory_space<vmem>>, %arg28: memref<1x32xf32, #tpu.memory_space<vmem>>, %arg29: memref<1x26x32xf32, #tpu.memory_space<vmem>>) attributes {dimension_semantics = [#tpu.dimension_semantics<parallel>], iteration_bounds = array<i64: 2>, scalar_prefetch = 0 : i64, scratch_operands = 0 : i64, tpu.core_type = #tpu.core_type<tc>, window_params = [{transform_indices = @transform_0, window_bounds = array<i64: 1, 26, 32>}, {transform_indices = @transform_1, window_bounds = array<i64: 1, 64, 32>}, {transform_indices = @transform_2, window_bounds = array<i64: 1, 64, 32>}, {pipeline_mode = #tpu.pipeline_mode<synchronous>, transform_indices = @transform_3, window_bounds = array<i64: 26, 32>}, {pipeline_mode = #tpu.pipeline_mode<synchronous>, transform_indices = @transform_4, window_bounds = array<i64: 32, 64>}, {pipeline_mode = #tpu.pipeline_mode<synchronous>, transform_indices = @transform_5, window_bounds = array<i64: 1, 64>}, {pipeline_mode = #tpu.pipeline_mode<synchronous>, transform_indices = @transform_6, window_bounds = array<i64: 32, 32>}, {pipeline_mode = #tpu.pipeline_mode<synchronous>, transform_indices = @transform_7, window_bounds = array<i64: 1, 32>}, {pipeline_mode = #tpu.pipeline_mode<synchronous>, transform_indices = @transform_8, window_bounds = array<i64: 32, 32>}, {pipeline_mode = #tpu.pipeline_mode<synchronous>, transform_indices = @transform_9, window_bounds = array<i64: 1, 32>}, {pipeline_mode = #tpu.pipeline_mode<synchronous>, transform_indices = @transform_10, window_bounds = array<i64: 1, 32>}, {pipeline_mode = #tpu.pipeline_mode<synchronous>, transform_indices = @transform_11, window_bounds = array<i64: 1, 32>}, {pipeline_mode = #tpu.pipeline_mode<synchronous>, transform_indices = @transform_12, window_bounds = array<i64: 32, 32>}, {pipeline_mode = #tpu.pipeline_mode<synchronous>, transform_indices = @transform_13, window_bounds = array<i64: 1, 32>}, {pipeline_mode = #tpu.pipeline_mode<synchronous>, transform_indices = @transform_14, window_bounds = array<i64: 32, 32>}, {pipeline_mode = #tpu.pipeline_mode<synchronous>, transform_indices = @transform_15, window_bounds = array<i64: 1, 32>}, {pipeline_mode = #tpu.pipeline_mode<synchronous>, transform_indices = @transform_16, window_bounds = array<i64: 32, 32>}, {pipeline_mode = #tpu.pipeline_mode<synchronous>, transform_indices = @transform_17, window_bounds = array<i64: 1, 32>}, {pipeline_mode = #tpu.pipeline_mode<synchronous>, transform_indices = @transform_18, window_bounds = array<i64: 32, 32>}, {pipeline_mode = #tpu.pipeline_mode<synchronous>, transform_indices = @transform_19, window_bounds = array<i64: 1, 32>}, {pipeline_mode = #tpu.pipeline_mode<synchronous>, transform_indices = @transform_20, window_bounds = array<i64: 1, 32>}, {pipeline_mode = #tpu.pipeline_mode<synchronous>, transform_indices = @transform_21, window_bounds = array<i64: 1, 32>}, {pipeline_mode = #tpu.pipeline_mode<synchronous>, transform_indices = @transform_22, window_bounds = array<i64: 32, 64>}, {pipeline_mode = #tpu.pipeline_mode<synchronous>, transform_indices = @transform_23, window_bounds = array<i64: 1, 64>}, {pipeline_mode = #tpu.pipeline_mode<synchronous>, transform_indices = @transform_24, window_bounds = array<i64: 64, 32>}, {pipeline_mode = #tpu.pipeline_mode<synchronous>, transform_indices = @transform_25, window_bounds = array<i64: 1, 32>}, {pipeline_mode = #tpu.pipeline_mode<synchronous>, transform_indices = @transform_26, window_bounds = array<i64: 1, 32>}, {pipeline_mode = #tpu.pipeline_mode<synchronous>, transform_indices = @transform_27, window_bounds = array<i64: 1, 32>}, {transform_indices = @transform_28, window_bounds = array<i64: 1, 26, 32>}]} {
    %c0 = arith.constant 0 : index
    %c0_0 = arith.constant 0 : index
    %c0_1 = arith.constant 0 : index
    %0 = vector.load %arg1[%c0, %c0_0, %c0_1] : memref<1x26x32xf32, #tpu.memory_space<vmem>>, vector<1x26x32xf32>
    %1 = vector.shape_cast %0 : vector<1x26x32xf32> to vector<26x32xf32>
    %c0_2 = arith.constant 0 : index
    %c0_3 = arith.constant 0 : index
    %c0_4 = arith.constant 0 : index
    %2 = vector.load %arg2[%c0_2, %c0_3, %c0_4] : memref<1x64x32xf32, #tpu.memory_space<vmem>>, vector<1x64x32xf32>
    %3 = vector.shape_cast %2 : vector<1x64x32xf32> to vector<64x32xf32>
    %c0_5 = arith.constant 0 : index
    %c0_6 = arith.constant 0 : index
    %c0_7 = arith.constant 0 : index
    %4 = vector.load %arg3[%c0_5, %c0_6, %c0_7] : memref<1x64x32xf32, #tpu.memory_space<vmem>>, vector<1x64x32xf32>
    %5 = vector.shape_cast %4 : vector<1x64x32xf32> to vector<64x32xf32>
    %c0_8 = arith.constant 0 : index
    %c0_9 = arith.constant 0 : index
    %6 = vector.load %arg4[%c0_8, %c0_9] : memref<26x32xf32, #tpu.memory_space<vmem>>, vector<26x32xf32>
    %7 = arith.addf %1, %6 : vector<26x32xf32>
    %c0_10 = arith.constant 0 : index
    %c0_11 = arith.constant 0 : index
    %8 = vector.load %arg5[%c0_10, %c0_11] : memref<32x64xbf16, #tpu.memory_space<vmem>>, vector<32x64xbf16>
    %9 = arith.truncf %7 : vector<26x32xf32> to vector<26x32xbf16>
    %cst = arith.constant dense<0.000000e+00> : vector<26x64xf32>
    %10 = tpu.matmul %9, %8, %cst {dimension_numbers = #tpu.dot_dimension_numbers<[1], [0], [0], [1], [0, 0, 1, 1], [], []>} : vector<26x32xbf16>, vector<32x64xbf16>, vector<26x64xf32> -> vector<26x64xf32>
    %c0_12 = arith.constant 0 : index
    %c0_13 = arith.constant 0 : index
    %11 = vector.load %arg6[%c0_12, %c0_13] : memref<1x64xf32, #tpu.memory_space<vmem>>, vector<1x64xf32>
    %12 = vector.broadcast %11 : vector<1x64xf32> to vector<26x64xf32>
    %13 = arith.addf %10, %12 : vector<26x64xf32>
    %14 = vector.extract_strided_slice %13 {offsets = [0, 0], sizes = [26, 32], strides = [1, 1]} : vector<26x64xf32> to vector<26x32xf32>
    %15 = vector.extract_strided_slice %13 {offsets = [0, 32], sizes = [26, 32], strides = [1, 1]} : vector<26x64xf32> to vector<26x32xf32>
    %c0_14 = arith.constant 0 : index
    %c0_15 = arith.constant 0 : index
    %16 = vector.load %arg7[%c0_14, %c0_15] : memref<32x32xbf16, #tpu.memory_space<vmem>>, vector<32x32xbf16>
    %17 = arith.truncf %1 : vector<26x32xf32> to vector<26x32xbf16>
    %cst_16 = arith.constant dense<0.000000e+00> : vector<26x32xf32>
    %18 = tpu.matmul %17, %16, %cst_16 {dimension_numbers = #tpu.dot_dimension_numbers<[1], [0], [0], [1], [0, 0, 1, 1], [], []>} : vector<26x32xbf16>, vector<32x32xbf16>, vector<26x32xf32> -> vector<26x32xf32>
    %c0_17 = arith.constant 0 : index
    %c0_18 = arith.constant 0 : index
    %19 = vector.load %arg8[%c0_17, %c0_18] : memref<1x32xf32, #tpu.memory_space<vmem>>, vector<1x32xf32>
    %20 = vector.broadcast %19 : vector<1x32xf32> to vector<26x32xf32>
    %21 = arith.addf %18, %20 : vector<26x32xf32>
    %22 = vector.extract_strided_slice %14 {offsets = [0, 0], sizes = [26, 8], strides = [1, 1]} : vector<26x32xf32> to vector<26x8xf32>
    %23 = arith.truncf %22 : vector<26x8xf32> to vector<26x8xbf16>
    %24 = vector.extract_strided_slice %15 {offsets = [0, 0], sizes = [26, 8], strides = [1, 1]} : vector<26x32xf32> to vector<26x8xf32>
    %25 = arith.truncf %24 : vector<26x8xf32> to vector<26x8xbf16>
    %cst_19 = arith.constant dense<0.000000e+00> : vector<26x26xf32>
    %26 = tpu.matmul %23, %25, %cst_19 {dimension_numbers = #tpu.dot_dimension_numbers<[1], [1], [0], [0], [0, 0, 1, 0], [], []>} : vector<26x8xbf16>, vector<26x8xbf16>, vector<26x26xf32> -> vector<26x26xf32>
    %cst_20 = arith.constant 0.353553385 : f32
    %27 = vector.broadcast %cst_20 : f32 to vector<26x26xf32>
    %28 = arith.mulf %26, %27 : vector<26x26xf32>
    %cst_21 = arith.constant dense<0xFF800000> : vector<26xf32>
    %29 = vector.multi_reduction <maximumf>, %28, %cst_21 [1] : vector<26x26xf32> to vector<26xf32>
    %30 = vector.shape_cast %29 : vector<26xf32> to vector<26x1xf32>
    %31 = vector.broadcast %30 : vector<26x1xf32> to vector<26x26xf32>
    %32 = arith.subf %28, %31 : vector<26x26xf32>
    %33 = math.exp %32 : vector<26x26xf32>
    %cst_22 = arith.constant dense<0.000000e+00> : vector<26xf32>
    %34 = vector.multi_reduction <add>, %33, %cst_22 [1] : vector<26x26xf32> to vector<26xf32>
    %35 = vector.shape_cast %34 : vector<26xf32> to vector<26x1xf32>
    %36 = tpu.reciprocal %35 {approx = true} : vector<26x1xf32> -> vector<26x1xf32>
    %37 = vector.broadcast %36 : vector<26x1xf32> to vector<26x26xf32>
    %38 = arith.mulf %33, %37 : vector<26x26xf32>
    %39 = vector.extract_strided_slice %21 {offsets = [0, 0], sizes = [26, 8], strides = [1, 1]} : vector<26x32xf32> to vector<26x8xf32>
    %40 = arith.truncf %38 : vector<26x26xf32> to vector<26x26xbf16>
    %41 = arith.truncf %39 : vector<26x8xf32> to vector<26x8xbf16>
    %cst_23 = arith.constant dense<0.000000e+00> : vector<26x8xf32>
    %42 = tpu.matmul %40, %41, %cst_23 {dimension_numbers = #tpu.dot_dimension_numbers<[1], [0], [0], [1], [0, 0, 1, 1], [], []>} : vector<26x26xbf16>, vector<26x8xbf16>, vector<26x8xf32> -> vector<26x8xf32>
    %43 = vector.extract_strided_slice %14 {offsets = [0, 8], sizes = [26, 8], strides = [1, 1]} : vector<26x32xf32> to vector<26x8xf32>
    %44 = arith.truncf %43 : vector<26x8xf32> to vector<26x8xbf16>
    %45 = vector.extract_strided_slice %15 {offsets = [0, 8], sizes = [26, 8], strides = [1, 1]} : vector<26x32xf32> to vector<26x8xf32>
    %46 = arith.truncf %45 : vector<26x8xf32> to vector<26x8xbf16>
    %cst_24 = arith.constant dense<0.000000e+00> : vector<26x26xf32>
    %47 = tpu.matmul %44, %46, %cst_24 {dimension_numbers = #tpu.dot_dimension_numbers<[1], [1], [0], [0], [0, 0, 1, 0], [], []>} : vector<26x8xbf16>, vector<26x8xbf16>, vector<26x26xf32> -> vector<26x26xf32>
    %cst_25 = arith.constant 0.353553385 : f32
    %48 = vector.broadcast %cst_25 : f32 to vector<26x26xf32>
    %49 = arith.mulf %47, %48 : vector<26x26xf32>
    %cst_26 = arith.constant dense<0xFF800000> : vector<26xf32>
    %50 = vector.multi_reduction <maximumf>, %49, %cst_26 [1] : vector<26x26xf32> to vector<26xf32>
    %51 = vector.shape_cast %50 : vector<26xf32> to vector<26x1xf32>
    %52 = vector.broadcast %51 : vector<26x1xf32> to vector<26x26xf32>
    %53 = arith.subf %49, %52 : vector<26x26xf32>
    %54 = math.exp %53 : vector<26x26xf32>
    %cst_27 = arith.constant dense<0.000000e+00> : vector<26xf32>
    %55 = vector.multi_reduction <add>, %54, %cst_27 [1] : vector<26x26xf32> to vector<26xf32>
    %56 = vector.shape_cast %55 : vector<26xf32> to vector<26x1xf32>
    %57 = tpu.reciprocal %56 {approx = true} : vector<26x1xf32> -> vector<26x1xf32>
    %58 = vector.broadcast %57 : vector<26x1xf32> to vector<26x26xf32>
    %59 = arith.mulf %54, %58 : vector<26x26xf32>
    %60 = vector.extract_strided_slice %21 {offsets = [0, 8], sizes = [26, 8], strides = [1, 1]} : vector<26x32xf32> to vector<26x8xf32>
    %61 = arith.truncf %59 : vector<26x26xf32> to vector<26x26xbf16>
    %62 = arith.truncf %60 : vector<26x8xf32> to vector<26x8xbf16>
    %cst_28 = arith.constant dense<0.000000e+00> : vector<26x8xf32>
    %63 = tpu.matmul %61, %62, %cst_28 {dimension_numbers = #tpu.dot_dimension_numbers<[1], [0], [0], [1], [0, 0, 1, 1], [], []>} : vector<26x26xbf16>, vector<26x8xbf16>, vector<26x8xf32> -> vector<26x8xf32>
    %64 = vector.extract_strided_slice %14 {offsets = [0, 16], sizes = [26, 8], strides = [1, 1]} : vector<26x32xf32> to vector<26x8xf32>
    %65 = arith.truncf %64 : vector<26x8xf32> to vector<26x8xbf16>
    %66 = vector.extract_strided_slice %15 {offsets = [0, 16], sizes = [26, 8], strides = [1, 1]} : vector<26x32xf32> to vector<26x8xf32>
    %67 = arith.truncf %66 : vector<26x8xf32> to vector<26x8xbf16>
    %cst_29 = arith.constant dense<0.000000e+00> : vector<26x26xf32>
    %68 = tpu.matmul %65, %67, %cst_29 {dimension_numbers = #tpu.dot_dimension_numbers<[1], [1], [0], [0], [0, 0, 1, 0], [], []>} : vector<26x8xbf16>, vector<26x8xbf16>, vector<26x26xf32> -> vector<26x26xf32>
    %cst_30 = arith.constant 0.353553385 : f32
    %69 = vector.broadcast %cst_30 : f32 to vector<26x26xf32>
    %70 = arith.mulf %68, %69 : vector<26x26xf32>
    %cst_31 = arith.constant dense<0xFF800000> : vector<26xf32>
    %71 = vector.multi_reduction <maximumf>, %70, %cst_31 [1] : vector<26x26xf32> to vector<26xf32>
    %72 = vector.shape_cast %71 : vector<26xf32> to vector<26x1xf32>
    %73 = vector.broadcast %72 : vector<26x1xf32> to vector<26x26xf32>
    %74 = arith.subf %70, %73 : vector<26x26xf32>
    %75 = math.exp %74 : vector<26x26xf32>
    %cst_32 = arith.constant dense<0.000000e+00> : vector<26xf32>
    %76 = vector.multi_reduction <add>, %75, %cst_32 [1] : vector<26x26xf32> to vector<26xf32>
    %77 = vector.shape_cast %76 : vector<26xf32> to vector<26x1xf32>
    %78 = tpu.reciprocal %77 {approx = true} : vector<26x1xf32> -> vector<26x1xf32>
    %79 = vector.broadcast %78 : vector<26x1xf32> to vector<26x26xf32>
    %80 = arith.mulf %75, %79 : vector<26x26xf32>
    %81 = vector.extract_strided_slice %21 {offsets = [0, 16], sizes = [26, 8], strides = [1, 1]} : vector<26x32xf32> to vector<26x8xf32>
    %82 = arith.truncf %80 : vector<26x26xf32> to vector<26x26xbf16>
    %83 = arith.truncf %81 : vector<26x8xf32> to vector<26x8xbf16>
    %cst_33 = arith.constant dense<0.000000e+00> : vector<26x8xf32>
    %84 = tpu.matmul %82, %83, %cst_33 {dimension_numbers = #tpu.dot_dimension_numbers<[1], [0], [0], [1], [0, 0, 1, 1], [], []>} : vector<26x26xbf16>, vector<26x8xbf16>, vector<26x8xf32> -> vector<26x8xf32>
    %85 = vector.extract_strided_slice %14 {offsets = [0, 24], sizes = [26, 8], strides = [1, 1]} : vector<26x32xf32> to vector<26x8xf32>
    %86 = arith.truncf %85 : vector<26x8xf32> to vector<26x8xbf16>
    %87 = vector.extract_strided_slice %15 {offsets = [0, 24], sizes = [26, 8], strides = [1, 1]} : vector<26x32xf32> to vector<26x8xf32>
    %88 = arith.truncf %87 : vector<26x8xf32> to vector<26x8xbf16>
    %cst_34 = arith.constant dense<0.000000e+00> : vector<26x26xf32>
    %89 = tpu.matmul %86, %88, %cst_34 {dimension_numbers = #tpu.dot_dimension_numbers<[1], [1], [0], [0], [0, 0, 1, 0], [], []>} : vector<26x8xbf16>, vector<26x8xbf16>, vector<26x26xf32> -> vector<26x26xf32>
    %cst_35 = arith.constant 0.353553385 : f32
    %90 = vector.broadcast %cst_35 : f32 to vector<26x26xf32>
    %91 = arith.mulf %89, %90 : vector<26x26xf32>
    %cst_36 = arith.constant dense<0xFF800000> : vector<26xf32>
    %92 = vector.multi_reduction <maximumf>, %91, %cst_36 [1] : vector<26x26xf32> to vector<26xf32>
    %93 = vector.shape_cast %92 : vector<26xf32> to vector<26x1xf32>
    %94 = vector.broadcast %93 : vector<26x1xf32> to vector<26x26xf32>
    %95 = arith.subf %91, %94 : vector<26x26xf32>
    %96 = math.exp %95 : vector<26x26xf32>
    %cst_37 = arith.constant dense<0.000000e+00> : vector<26xf32>
    %97 = vector.multi_reduction <add>, %96, %cst_37 [1] : vector<26x26xf32> to vector<26xf32>
    %98 = vector.shape_cast %97 : vector<26xf32> to vector<26x1xf32>
    %99 = tpu.reciprocal %98 {approx = true} : vector<26x1xf32> -> vector<26x1xf32>
    %100 = vector.broadcast %99 : vector<26x1xf32> to vector<26x26xf32>
    %101 = arith.mulf %96, %100 : vector<26x26xf32>
    %102 = vector.extract_strided_slice %21 {offsets = [0, 24], sizes = [26, 8], strides = [1, 1]} : vector<26x32xf32> to vector<26x8xf32>
    %103 = arith.truncf %101 : vector<26x26xf32> to vector<26x26xbf16>
    %104 = arith.truncf %102 : vector<26x8xf32> to vector<26x8xbf16>
    %cst_38 = arith.constant dense<0.000000e+00> : vector<26x8xf32>
    %105 = tpu.matmul %103, %104, %cst_38 {dimension_numbers = #tpu.dot_dimension_numbers<[1], [0], [0], [1], [0, 0, 1, 1], [], []>} : vector<26x26xbf16>, vector<26x8xbf16>, vector<26x8xf32> -> vector<26x8xf32>
    %106 = tpu.concatenate %42, %63, %84, %105 in 1 : vector<26x8xf32>, vector<26x8xf32>, vector<26x8xf32>, vector<26x8xf32> -> vector<26x32xf32>
    %c0_39 = arith.constant 0 : index
    %c0_40 = arith.constant 0 : index
    %107 = vector.load %arg9[%c0_39, %c0_40] : memref<32x32xbf16, #tpu.memory_space<vmem>>, vector<32x32xbf16>
    %108 = arith.truncf %106 : vector<26x32xf32> to vector<26x32xbf16>
    %cst_41 = arith.constant dense<0.000000e+00> : vector<26x32xf32>
    %109 = tpu.matmul %108, %107, %cst_41 {dimension_numbers = #tpu.dot_dimension_numbers<[1], [0], [0], [1], [0, 0, 1, 1], [], []>} : vector<26x32xbf16>, vector<32x32xbf16>, vector<26x32xf32> -> vector<26x32xf32>
    %c0_42 = arith.constant 0 : index
    %c0_43 = arith.constant 0 : index
    %110 = vector.load %arg10[%c0_42, %c0_43] : memref<1x32xf32, #tpu.memory_space<vmem>>, vector<1x32xf32>
    %111 = vector.broadcast %110 : vector<1x32xf32> to vector<26x32xf32>
    %112 = arith.addf %109, %111 : vector<26x32xf32>
    %113 = arith.addf %1, %112 : vector<26x32xf32>
    %c0_44 = arith.constant 0 : index
    %c0_45 = arith.constant 0 : index
    %114 = vector.load %arg11[%c0_44, %c0_45] : memref<1x32xf32, #tpu.memory_space<vmem>>, vector<1x32xf32>
    %c0_46 = arith.constant 0 : index
    %c0_47 = arith.constant 0 : index
    %115 = vector.load %arg12[%c0_46, %c0_47] : memref<1x32xf32, #tpu.memory_space<vmem>>, vector<1x32xf32>
    %cst_48 = arith.constant dense<0.000000e+00> : vector<26xf32>
    %116 = vector.multi_reduction <add>, %113, %cst_48 [1] : vector<26x32xf32> to vector<26xf32>
    %117 = vector.shape_cast %116 : vector<26xf32> to vector<26x1xf32>
    %cst_49 = arith.constant 3.200000e+01 : f32
    %118 = vector.broadcast %cst_49 : f32 to vector<26x1xf32>
    %119 = arith.divf %117, %118 : vector<26x1xf32>
    %120 = vector.broadcast %119 : vector<26x1xf32> to vector<26x32xf32>
    %121 = arith.subf %113, %120 : vector<26x32xf32>
    %122 = arith.mulf %121, %121 : vector<26x32xf32>
    %cst_50 = arith.constant dense<0.000000e+00> : vector<26xf32>
    %123 = vector.multi_reduction <add>, %122, %cst_50 [1] : vector<26x32xf32> to vector<26xf32>
    %124 = vector.shape_cast %123 : vector<26xf32> to vector<26x1xf32>
    %cst_51 = arith.constant 3.200000e+01 : f32
    %125 = vector.broadcast %cst_51 : f32 to vector<26x1xf32>
    %126 = arith.divf %124, %125 : vector<26x1xf32>
    %cst_52 = arith.constant 9.99999974E-6 : f32
    %127 = vector.broadcast %cst_52 : f32 to vector<26x1xf32>
    %128 = arith.addf %126, %127 : vector<26x1xf32>
    %129 = math.rsqrt %128 : vector<26x1xf32>
    %130 = vector.broadcast %129 : vector<26x1xf32> to vector<26x32xf32>
    %131 = arith.mulf %121, %130 : vector<26x32xf32>
    %132 = vector.broadcast %114 : vector<1x32xf32> to vector<26x32xf32>
    %133 = arith.mulf %131, %132 : vector<26x32xf32>
    %134 = vector.broadcast %115 : vector<1x32xf32> to vector<26x32xf32>
    %135 = arith.addf %133, %134 : vector<26x32xf32>
    %136 = arith.addf %135, %6 : vector<26x32xf32>
    %c0_53 = arith.constant 0 : index
    %c0_54 = arith.constant 0 : index
    %137 = vector.load %arg13[%c0_53, %c0_54] : memref<32x32xbf16, #tpu.memory_space<vmem>>, vector<32x32xbf16>
    %138 = arith.truncf %136 : vector<26x32xf32> to vector<26x32xbf16>
    %cst_55 = arith.constant dense<0.000000e+00> : vector<26x32xf32>
    %139 = tpu.matmul %138, %137, %cst_55 {dimension_numbers = #tpu.dot_dimension_numbers<[1], [0], [0], [1], [0, 0, 1, 1], [], []>} : vector<26x32xbf16>, vector<32x32xbf16>, vector<26x32xf32> -> vector<26x32xf32>
    %c0_56 = arith.constant 0 : index
    %c0_57 = arith.constant 0 : index
    %140 = vector.load %arg14[%c0_56, %c0_57] : memref<1x32xf32, #tpu.memory_space<vmem>>, vector<1x32xf32>
    %141 = vector.broadcast %140 : vector<1x32xf32> to vector<26x32xf32>
    %142 = arith.addf %139, %141 : vector<26x32xf32>
    %143 = arith.addf %3, %5 : vector<64x32xf32>
    %c0_58 = arith.constant 0 : index
    %c0_59 = arith.constant 0 : index
    %144 = vector.load %arg15[%c0_58, %c0_59] : memref<32x32xbf16, #tpu.memory_space<vmem>>, vector<32x32xbf16>
    %145 = arith.truncf %143 : vector<64x32xf32> to vector<64x32xbf16>
    %cst_60 = arith.constant dense<0.000000e+00> : vector<64x32xf32>
    %146 = tpu.matmul %145, %144, %cst_60 {dimension_numbers = #tpu.dot_dimension_numbers<[1], [0], [0], [1], [0, 0, 1, 1], [], []>} : vector<64x32xbf16>, vector<32x32xbf16>, vector<64x32xf32> -> vector<64x32xf32>
    %c0_61 = arith.constant 0 : index
    %c0_62 = arith.constant 0 : index
    %147 = vector.load %arg16[%c0_61, %c0_62] : memref<1x32xf32, #tpu.memory_space<vmem>>, vector<1x32xf32>
    %148 = vector.broadcast %147 : vector<1x32xf32> to vector<64x32xf32>
    %149 = arith.addf %146, %148 : vector<64x32xf32>
    %c0_63 = arith.constant 0 : index
    %c0_64 = arith.constant 0 : index
    %150 = vector.load %arg17[%c0_63, %c0_64] : memref<32x32xbf16, #tpu.memory_space<vmem>>, vector<32x32xbf16>
    %151 = arith.truncf %3 : vector<64x32xf32> to vector<64x32xbf16>
    %cst_65 = arith.constant dense<0.000000e+00> : vector<64x32xf32>
    %152 = tpu.matmul %151, %150, %cst_65 {dimension_numbers = #tpu.dot_dimension_numbers<[1], [0], [0], [1], [0, 0, 1, 1], [], []>} : vector<64x32xbf16>, vector<32x32xbf16>, vector<64x32xf32> -> vector<64x32xf32>
    %c0_66 = arith.constant 0 : index
    %c0_67 = arith.constant 0 : index
    %153 = vector.load %arg18[%c0_66, %c0_67] : memref<1x32xf32, #tpu.memory_space<vmem>>, vector<1x32xf32>
    %154 = vector.broadcast %153 : vector<1x32xf32> to vector<64x32xf32>
    %155 = arith.addf %152, %154 : vector<64x32xf32>
    %156 = vector.extract_strided_slice %142 {offsets = [0, 0], sizes = [26, 8], strides = [1, 1]} : vector<26x32xf32> to vector<26x8xf32>
    %157 = arith.truncf %156 : vector<26x8xf32> to vector<26x8xbf16>
    %158 = vector.extract_strided_slice %149 {offsets = [0, 0], sizes = [64, 8], strides = [1, 1]} : vector<64x32xf32> to vector<64x8xf32>
    %159 = arith.truncf %158 : vector<64x8xf32> to vector<64x8xbf16>
    %cst_68 = arith.constant dense<0.000000e+00> : vector<26x64xf32>
    %160 = tpu.matmul %157, %159, %cst_68 {dimension_numbers = #tpu.dot_dimension_numbers<[1], [1], [0], [0], [0, 0, 1, 0], [], []>} : vector<26x8xbf16>, vector<64x8xbf16>, vector<26x64xf32> -> vector<26x64xf32>
    %cst_69 = arith.constant 0.353553385 : f32
    %161 = vector.broadcast %cst_69 : f32 to vector<26x64xf32>
    %162 = arith.mulf %160, %161 : vector<26x64xf32>
    %cst_70 = arith.constant dense<0xFF800000> : vector<26xf32>
    %163 = vector.multi_reduction <maximumf>, %162, %cst_70 [1] : vector<26x64xf32> to vector<26xf32>
    %164 = vector.shape_cast %163 : vector<26xf32> to vector<26x1xf32>
    %165 = vector.broadcast %164 : vector<26x1xf32> to vector<26x64xf32>
    %166 = arith.subf %162, %165 : vector<26x64xf32>
    %167 = math.exp %166 : vector<26x64xf32>
    %cst_71 = arith.constant dense<0.000000e+00> : vector<26xf32>
    %168 = vector.multi_reduction <add>, %167, %cst_71 [1] : vector<26x64xf32> to vector<26xf32>
    %169 = vector.shape_cast %168 : vector<26xf32> to vector<26x1xf32>
    %170 = tpu.reciprocal %169 {approx = true} : vector<26x1xf32> -> vector<26x1xf32>
    %171 = vector.broadcast %170 : vector<26x1xf32> to vector<26x64xf32>
    %172 = arith.mulf %167, %171 : vector<26x64xf32>
    %173 = vector.extract_strided_slice %155 {offsets = [0, 0], sizes = [64, 8], strides = [1, 1]} : vector<64x32xf32> to vector<64x8xf32>
    %174 = arith.truncf %172 : vector<26x64xf32> to vector<26x64xbf16>
    %175 = arith.truncf %173 : vector<64x8xf32> to vector<64x8xbf16>
    %cst_72 = arith.constant dense<0.000000e+00> : vector<26x8xf32>
    %176 = tpu.matmul %174, %175, %cst_72 {dimension_numbers = #tpu.dot_dimension_numbers<[1], [0], [0], [1], [0, 0, 1, 1], [], []>} : vector<26x64xbf16>, vector<64x8xbf16>, vector<26x8xf32> -> vector<26x8xf32>
    %177 = vector.extract_strided_slice %142 {offsets = [0, 8], sizes = [26, 8], strides = [1, 1]} : vector<26x32xf32> to vector<26x8xf32>
    %178 = arith.truncf %177 : vector<26x8xf32> to vector<26x8xbf16>
    %179 = vector.extract_strided_slice %149 {offsets = [0, 8], sizes = [64, 8], strides = [1, 1]} : vector<64x32xf32> to vector<64x8xf32>
    %180 = arith.truncf %179 : vector<64x8xf32> to vector<64x8xbf16>
    %cst_73 = arith.constant dense<0.000000e+00> : vector<26x64xf32>
    %181 = tpu.matmul %178, %180, %cst_73 {dimension_numbers = #tpu.dot_dimension_numbers<[1], [1], [0], [0], [0, 0, 1, 0], [], []>} : vector<26x8xbf16>, vector<64x8xbf16>, vector<26x64xf32> -> vector<26x64xf32>
    %cst_74 = arith.constant 0.353553385 : f32
    %182 = vector.broadcast %cst_74 : f32 to vector<26x64xf32>
    %183 = arith.mulf %181, %182 : vector<26x64xf32>
    %cst_75 = arith.constant dense<0xFF800000> : vector<26xf32>
    %184 = vector.multi_reduction <maximumf>, %183, %cst_75 [1] : vector<26x64xf32> to vector<26xf32>
    %185 = vector.shape_cast %184 : vector<26xf32> to vector<26x1xf32>
    %186 = vector.broadcast %185 : vector<26x1xf32> to vector<26x64xf32>
    %187 = arith.subf %183, %186 : vector<26x64xf32>
    %188 = math.exp %187 : vector<26x64xf32>
    %cst_76 = arith.constant dense<0.000000e+00> : vector<26xf32>
    %189 = vector.multi_reduction <add>, %188, %cst_76 [1] : vector<26x64xf32> to vector<26xf32>
    %190 = vector.shape_cast %189 : vector<26xf32> to vector<26x1xf32>
    %191 = tpu.reciprocal %190 {approx = true} : vector<26x1xf32> -> vector<26x1xf32>
    %192 = vector.broadcast %191 : vector<26x1xf32> to vector<26x64xf32>
    %193 = arith.mulf %188, %192 : vector<26x64xf32>
    %194 = vector.extract_strided_slice %155 {offsets = [0, 8], sizes = [64, 8], strides = [1, 1]} : vector<64x32xf32> to vector<64x8xf32>
    %195 = arith.truncf %193 : vector<26x64xf32> to vector<26x64xbf16>
    %196 = arith.truncf %194 : vector<64x8xf32> to vector<64x8xbf16>
    %cst_77 = arith.constant dense<0.000000e+00> : vector<26x8xf32>
    %197 = tpu.matmul %195, %196, %cst_77 {dimension_numbers = #tpu.dot_dimension_numbers<[1], [0], [0], [1], [0, 0, 1, 1], [], []>} : vector<26x64xbf16>, vector<64x8xbf16>, vector<26x8xf32> -> vector<26x8xf32>
    %198 = vector.extract_strided_slice %142 {offsets = [0, 16], sizes = [26, 8], strides = [1, 1]} : vector<26x32xf32> to vector<26x8xf32>
    %199 = arith.truncf %198 : vector<26x8xf32> to vector<26x8xbf16>
    %200 = vector.extract_strided_slice %149 {offsets = [0, 16], sizes = [64, 8], strides = [1, 1]} : vector<64x32xf32> to vector<64x8xf32>
    %201 = arith.truncf %200 : vector<64x8xf32> to vector<64x8xbf16>
    %cst_78 = arith.constant dense<0.000000e+00> : vector<26x64xf32>
    %202 = tpu.matmul %199, %201, %cst_78 {dimension_numbers = #tpu.dot_dimension_numbers<[1], [1], [0], [0], [0, 0, 1, 0], [], []>} : vector<26x8xbf16>, vector<64x8xbf16>, vector<26x64xf32> -> vector<26x64xf32>
    %cst_79 = arith.constant 0.353553385 : f32
    %203 = vector.broadcast %cst_79 : f32 to vector<26x64xf32>
    %204 = arith.mulf %202, %203 : vector<26x64xf32>
    %cst_80 = arith.constant dense<0xFF800000> : vector<26xf32>
    %205 = vector.multi_reduction <maximumf>, %204, %cst_80 [1] : vector<26x64xf32> to vector<26xf32>
    %206 = vector.shape_cast %205 : vector<26xf32> to vector<26x1xf32>
    %207 = vector.broadcast %206 : vector<26x1xf32> to vector<26x64xf32>
    %208 = arith.subf %204, %207 : vector<26x64xf32>
    %209 = math.exp %208 : vector<26x64xf32>
    %cst_81 = arith.constant dense<0.000000e+00> : vector<26xf32>
    %210 = vector.multi_reduction <add>, %209, %cst_81 [1] : vector<26x64xf32> to vector<26xf32>
    %211 = vector.shape_cast %210 : vector<26xf32> to vector<26x1xf32>
    %212 = tpu.reciprocal %211 {approx = true} : vector<26x1xf32> -> vector<26x1xf32>
    %213 = vector.broadcast %212 : vector<26x1xf32> to vector<26x64xf32>
    %214 = arith.mulf %209, %213 : vector<26x64xf32>
    %215 = vector.extract_strided_slice %155 {offsets = [0, 16], sizes = [64, 8], strides = [1, 1]} : vector<64x32xf32> to vector<64x8xf32>
    %216 = arith.truncf %214 : vector<26x64xf32> to vector<26x64xbf16>
    %217 = arith.truncf %215 : vector<64x8xf32> to vector<64x8xbf16>
    %cst_82 = arith.constant dense<0.000000e+00> : vector<26x8xf32>
    %218 = tpu.matmul %216, %217, %cst_82 {dimension_numbers = #tpu.dot_dimension_numbers<[1], [0], [0], [1], [0, 0, 1, 1], [], []>} : vector<26x64xbf16>, vector<64x8xbf16>, vector<26x8xf32> -> vector<26x8xf32>
    %219 = vector.extract_strided_slice %142 {offsets = [0, 24], sizes = [26, 8], strides = [1, 1]} : vector<26x32xf32> to vector<26x8xf32>
    %220 = arith.truncf %219 : vector<26x8xf32> to vector<26x8xbf16>
    %221 = vector.extract_strided_slice %149 {offsets = [0, 24], sizes = [64, 8], strides = [1, 1]} : vector<64x32xf32> to vector<64x8xf32>
    %222 = arith.truncf %221 : vector<64x8xf32> to vector<64x8xbf16>
    %cst_83 = arith.constant dense<0.000000e+00> : vector<26x64xf32>
    %223 = tpu.matmul %220, %222, %cst_83 {dimension_numbers = #tpu.dot_dimension_numbers<[1], [1], [0], [0], [0, 0, 1, 0], [], []>} : vector<26x8xbf16>, vector<64x8xbf16>, vector<26x64xf32> -> vector<26x64xf32>
    %cst_84 = arith.constant 0.353553385 : f32
    %224 = vector.broadcast %cst_84 : f32 to vector<26x64xf32>
    %225 = arith.mulf %223, %224 : vector<26x64xf32>
    %cst_85 = arith.constant dense<0xFF800000> : vector<26xf32>
    %226 = vector.multi_reduction <maximumf>, %225, %cst_85 [1] : vector<26x64xf32> to vector<26xf32>
    %227 = vector.shape_cast %226 : vector<26xf32> to vector<26x1xf32>
    %228 = vector.broadcast %227 : vector<26x1xf32> to vector<26x64xf32>
    %229 = arith.subf %225, %228 : vector<26x64xf32>
    %230 = math.exp %229 : vector<26x64xf32>
    %cst_86 = arith.constant dense<0.000000e+00> : vector<26xf32>
    %231 = vector.multi_reduction <add>, %230, %cst_86 [1] : vector<26x64xf32> to vector<26xf32>
    %232 = vector.shape_cast %231 : vector<26xf32> to vector<26x1xf32>
    %233 = tpu.reciprocal %232 {approx = true} : vector<26x1xf32> -> vector<26x1xf32>
    %234 = vector.broadcast %233 : vector<26x1xf32> to vector<26x64xf32>
    %235 = arith.mulf %230, %234 : vector<26x64xf32>
    %236 = vector.extract_strided_slice %155 {offsets = [0, 24], sizes = [64, 8], strides = [1, 1]} : vector<64x32xf32> to vector<64x8xf32>
    %237 = arith.truncf %235 : vector<26x64xf32> to vector<26x64xbf16>
    %238 = arith.truncf %236 : vector<64x8xf32> to vector<64x8xbf16>
    %cst_87 = arith.constant dense<0.000000e+00> : vector<26x8xf32>
    %239 = tpu.matmul %237, %238, %cst_87 {dimension_numbers = #tpu.dot_dimension_numbers<[1], [0], [0], [1], [0, 0, 1, 1], [], []>} : vector<26x64xbf16>, vector<64x8xbf16>, vector<26x8xf32> -> vector<26x8xf32>
    %240 = tpu.concatenate %176, %197, %218, %239 in 1 : vector<26x8xf32>, vector<26x8xf32>, vector<26x8xf32>, vector<26x8xf32> -> vector<26x32xf32>
    %c0_88 = arith.constant 0 : index
    %c0_89 = arith.constant 0 : index
    %241 = vector.load %arg19[%c0_88, %c0_89] : memref<32x32xbf16, #tpu.memory_space<vmem>>, vector<32x32xbf16>
    %242 = arith.truncf %240 : vector<26x32xf32> to vector<26x32xbf16>
    %cst_90 = arith.constant dense<0.000000e+00> : vector<26x32xf32>
    %243 = tpu.matmul %242, %241, %cst_90 {dimension_numbers = #tpu.dot_dimension_numbers<[1], [0], [0], [1], [0, 0, 1, 1], [], []>} : vector<26x32xbf16>, vector<32x32xbf16>, vector<26x32xf32> -> vector<26x32xf32>
    %c0_91 = arith.constant 0 : index
    %c0_92 = arith.constant 0 : index
    %244 = vector.load %arg20[%c0_91, %c0_92] : memref<1x32xf32, #tpu.memory_space<vmem>>, vector<1x32xf32>
    %245 = vector.broadcast %244 : vector<1x32xf32> to vector<26x32xf32>
    %246 = arith.addf %243, %245 : vector<26x32xf32>
    %247 = arith.addf %135, %246 : vector<26x32xf32>
    %c0_93 = arith.constant 0 : index
    %c0_94 = arith.constant 0 : index
    %248 = vector.load %arg21[%c0_93, %c0_94] : memref<1x32xf32, #tpu.memory_space<vmem>>, vector<1x32xf32>
    %c0_95 = arith.constant 0 : index
    %c0_96 = arith.constant 0 : index
    %249 = vector.load %arg22[%c0_95, %c0_96] : memref<1x32xf32, #tpu.memory_space<vmem>>, vector<1x32xf32>
    %cst_97 = arith.constant dense<0.000000e+00> : vector<26xf32>
    %250 = vector.multi_reduction <add>, %247, %cst_97 [1] : vector<26x32xf32> to vector<26xf32>
    %251 = vector.shape_cast %250 : vector<26xf32> to vector<26x1xf32>
    %cst_98 = arith.constant 3.200000e+01 : f32
    %252 = vector.broadcast %cst_98 : f32 to vector<26x1xf32>
    %253 = arith.divf %251, %252 : vector<26x1xf32>
    %254 = vector.broadcast %253 : vector<26x1xf32> to vector<26x32xf32>
    %255 = arith.subf %247, %254 : vector<26x32xf32>
    %256 = arith.mulf %255, %255 : vector<26x32xf32>
    %cst_99 = arith.constant dense<0.000000e+00> : vector<26xf32>
    %257 = vector.multi_reduction <add>, %256, %cst_99 [1] : vector<26x32xf32> to vector<26xf32>
    %258 = vector.shape_cast %257 : vector<26xf32> to vector<26x1xf32>
    %cst_100 = arith.constant 3.200000e+01 : f32
    %259 = vector.broadcast %cst_100 : f32 to vector<26x1xf32>
    %260 = arith.divf %258, %259 : vector<26x1xf32>
    %cst_101 = arith.constant 9.99999974E-6 : f32
    %261 = vector.broadcast %cst_101 : f32 to vector<26x1xf32>
    %262 = arith.addf %260, %261 : vector<26x1xf32>
    %263 = math.rsqrt %262 : vector<26x1xf32>
    %264 = vector.broadcast %263 : vector<26x1xf32> to vector<26x32xf32>
    %265 = arith.mulf %255, %264 : vector<26x32xf32>
    %266 = vector.broadcast %248 : vector<1x32xf32> to vector<26x32xf32>
    %267 = arith.mulf %265, %266 : vector<26x32xf32>
    %268 = vector.broadcast %249 : vector<1x32xf32> to vector<26x32xf32>
    %269 = arith.addf %267, %268 : vector<26x32xf32>
    %c0_102 = arith.constant 0 : index
    %c0_103 = arith.constant 0 : index
    %270 = vector.load %arg23[%c0_102, %c0_103] : memref<32x64xbf16, #tpu.memory_space<vmem>>, vector<32x64xbf16>
    %271 = arith.truncf %269 : vector<26x32xf32> to vector<26x32xbf16>
    %cst_104 = arith.constant dense<0.000000e+00> : vector<26x64xf32>
    %272 = tpu.matmul %271, %270, %cst_104 {dimension_numbers = #tpu.dot_dimension_numbers<[1], [0], [0], [1], [0, 0, 1, 1], [], []>} : vector<26x32xbf16>, vector<32x64xbf16>, vector<26x64xf32> -> vector<26x64xf32>
    %c0_105 = arith.constant 0 : index
    %c0_106 = arith.constant 0 : index
    %273 = vector.load %arg24[%c0_105, %c0_106] : memref<1x64xf32, #tpu.memory_space<vmem>>, vector<1x64xf32>
    %274 = vector.broadcast %273 : vector<1x64xf32> to vector<26x64xf32>
    %275 = arith.addf %272, %274 : vector<26x64xf32>
    %cst_107 = arith.constant 0.000000e+00 : f32
    %276 = vector.broadcast %cst_107 : f32 to vector<26x64xf32>
    %277 = arith.maximumf %275, %276 : vector<26x64xf32>
    %c0_108 = arith.constant 0 : index
    %c0_109 = arith.constant 0 : index
    %278 = vector.load %arg25[%c0_108, %c0_109] : memref<64x32xbf16, #tpu.memory_space<vmem>>, vector<64x32xbf16>
    %279 = arith.truncf %277 : vector<26x64xf32> to vector<26x64xbf16>
    %cst_110 = arith.constant dense<0.000000e+00> : vector<26x32xf32>
    %280 = tpu.matmul %279, %278, %cst_110 {dimension_numbers = #tpu.dot_dimension_numbers<[1], [0], [0], [1], [0, 0, 1, 1], [], []>} : vector<26x64xbf16>, vector<64x32xbf16>, vector<26x32xf32> -> vector<26x32xf32>
    %c0_111 = arith.constant 0 : index
    %c0_112 = arith.constant 0 : index
    %281 = vector.load %arg26[%c0_111, %c0_112] : memref<1x32xf32, #tpu.memory_space<vmem>>, vector<1x32xf32>
    %282 = vector.broadcast %281 : vector<1x32xf32> to vector<26x32xf32>
    %283 = arith.addf %280, %282 : vector<26x32xf32>
    %284 = arith.addf %269, %283 : vector<26x32xf32>
    %c0_113 = arith.constant 0 : index
    %c0_114 = arith.constant 0 : index
    %285 = vector.load %arg27[%c0_113, %c0_114] : memref<1x32xf32, #tpu.memory_space<vmem>>, vector<1x32xf32>
    %c0_115 = arith.constant 0 : index
    %c0_116 = arith.constant 0 : index
    %286 = vector.load %arg28[%c0_115, %c0_116] : memref<1x32xf32, #tpu.memory_space<vmem>>, vector<1x32xf32>
    %cst_117 = arith.constant dense<0.000000e+00> : vector<26xf32>
    %287 = vector.multi_reduction <add>, %284, %cst_117 [1] : vector<26x32xf32> to vector<26xf32>
    %288 = vector.shape_cast %287 : vector<26xf32> to vector<26x1xf32>
    %cst_118 = arith.constant 3.200000e+01 : f32
    %289 = vector.broadcast %cst_118 : f32 to vector<26x1xf32>
    %290 = arith.divf %288, %289 : vector<26x1xf32>
    %291 = vector.broadcast %290 : vector<26x1xf32> to vector<26x32xf32>
    %292 = arith.subf %284, %291 : vector<26x32xf32>
    %293 = arith.mulf %292, %292 : vector<26x32xf32>
    %cst_119 = arith.constant dense<0.000000e+00> : vector<26xf32>
    %294 = vector.multi_reduction <add>, %293, %cst_119 [1] : vector<26x32xf32> to vector<26xf32>
    %295 = vector.shape_cast %294 : vector<26xf32> to vector<26x1xf32>
    %cst_120 = arith.constant 3.200000e+01 : f32
    %296 = vector.broadcast %cst_120 : f32 to vector<26x1xf32>
    %297 = arith.divf %295, %296 : vector<26x1xf32>
    %cst_121 = arith.constant 9.99999974E-6 : f32
    %298 = vector.broadcast %cst_121 : f32 to vector<26x1xf32>
    %299 = arith.addf %297, %298 : vector<26x1xf32>
    %300 = math.rsqrt %299 : vector<26x1xf32>
    %301 = vector.broadcast %300 : vector<26x1xf32> to vector<26x32xf32>
    %302 = arith.mulf %292, %301 : vector<26x32xf32>
    %303 = vector.broadcast %285 : vector<1x32xf32> to vector<26x32xf32>
    %304 = arith.mulf %302, %303 : vector<26x32xf32>
    %305 = vector.broadcast %286 : vector<1x32xf32> to vector<26x32xf32>
    %306 = arith.addf %304, %305 : vector<26x32xf32>
    %c0_122 = arith.constant 0 : index
    %c0_123 = arith.constant 0 : index
    %c0_124 = arith.constant 0 : index
    %307 = vector.load %arg29[%c0_122, %c0_123, %c0_124] : memref<1x26x32xf32, #tpu.memory_space<vmem>>, vector<1x26x32xf32>
    %308 = vector.shape_cast %307 : vector<1x26x32xf32> to vector<26x32xf32>
    %309 = vector.shape_cast %306 : vector<26x32xf32> to vector<1x26x32xf32>
    tpu.vector_store %arg29[%c0_122, %c0_123, %c0_124], %309 {strides = array<i32>} : memref<1x26x32xf32, #tpu.memory_space<vmem>>, vector<1x26x32xf32>,
    return
  }
  func.func @transform_0(%arg0: i32) -> (i32, i32, i32) {
    %c0_i32 = arith.constant 0 : i32
    %c0_i32_0 = arith.constant 0 : i32
    %c0_i32_1 = arith.constant 0 : i32
    return %arg0, %c0_i32, %c0_i32_0 : i32, i32, i32
  }
  func.func @transform_1(%arg0: i32) -> (i32, i32, i32) {
    %c0_i32 = arith.constant 0 : i32
    %c0_i32_0 = arith.constant 0 : i32
    %c0_i32_1 = arith.constant 0 : i32
    return %arg0, %c0_i32, %c0_i32_0 : i32, i32, i32
  }
  func.func @transform_2(%arg0: i32) -> (i32, i32, i32) {
    %c0_i32 = arith.constant 0 : i32
    %c0_i32_0 = arith.constant 0 : i32
    %c0_i32_1 = arith.constant 0 : i32
    return %arg0, %c0_i32, %c0_i32_0 : i32, i32, i32
  }
  func.func @transform_3(%arg0: i32) -> (i32, i32) {
    %c0_i32 = arith.constant 0 : i32
    %c0_i32_0 = arith.constant 0 : i32
    %c0_i32_1 = arith.constant 0 : i32
    return %c0_i32, %c0_i32_0 : i32, i32
  }
  func.func @transform_4(%arg0: i32) -> (i32, i32) {
    %c0_i32 = arith.constant 0 : i32
    %c0_i32_0 = arith.constant 0 : i32
    %c0_i32_1 = arith.constant 0 : i32
    return %c0_i32, %c0_i32_0 : i32, i32
  }
  func.func @transform_5(%arg0: i32) -> (i32, i32) {
    %c0_i32 = arith.constant 0 : i32
    %c0_i32_0 = arith.constant 0 : i32
    %c0_i32_1 = arith.constant 0 : i32
    return %c0_i32, %c0_i32_0 : i32, i32
  }
  func.func @transform_6(%arg0: i32) -> (i32, i32) {
    %c0_i32 = arith.constant 0 : i32
    %c0_i32_0 = arith.constant 0 : i32
    %c0_i32_1 = arith.constant 0 : i32
    return %c0_i32, %c0_i32_0 : i32, i32
  }
  func.func @transform_7(%arg0: i32) -> (i32, i32) {
    %c0_i32 = arith.constant 0 : i32
    %c0_i32_0 = arith.constant 0 : i32
    %c0_i32_1 = arith.constant 0 : i32
    return %c0_i32, %c0_i32_0 : i32, i32
  }
  func.func @transform_8(%arg0: i32) -> (i32, i32) {
    %c0_i32 = arith.constant 0 : i32
    %c0_i32_0 = arith.constant 0 : i32
    %c0_i32_1 = arith.constant 0 : i32
    return %c0_i32, %c0_i32_0 : i32, i32
  }
  func.func @transform_9(%arg0: i32) -> (i32, i32) {
    %c0_i32 = arith.constant 0 : i32
    %c0_i32_0 = arith.constant 0 : i32
    %c0_i32_1 = arith.constant 0 : i32
    return %c0_i32, %c0_i32_0 : i32, i32
  }
  func.func @transform_10(%arg0: i32) -> (i32, i32) {
    %c0_i32 = arith.constant 0 : i32
    %c0_i32_0 = arith.constant 0 : i32
    %c0_i32_1 = arith.constant 0 : i32
    return %c0_i32, %c0_i32_0 : i32, i32
  }
  func.func @transform_11(%arg0: i32) -> (i32, i32) {
    %c0_i32 = arith.constant 0 : i32
    %c0_i32_0 = arith.constant 0 : i32
    %c0_i32_1 = arith.constant 0 : i32
    return %c0_i32, %c0_i32_0 : i32, i32
  }
  func.func @transform_12(%arg0: i32) -> (i32, i32) {
    %c0_i32 = arith.constant 0 : i32
    %c0_i32_0 = arith.constant 0 : i32
    %c0_i32_1 = arith.constant 0 : i32
    return %c0_i32, %c0_i32_0 : i32, i32
  }
  func.func @transform_13(%arg0: i32) -> (i32, i32) {
    %c0_i32 = arith.constant 0 : i32
    %c0_i32_0 = arith.constant 0 : i32
    %c0_i32_1 = arith.constant 0 : i32
    return %c0_i32, %c0_i32_0 : i32, i32
  }
  func.func @transform_14(%arg0: i32) -> (i32, i32) {
    %c0_i32 = arith.constant 0 : i32
    %c0_i32_0 = arith.constant 0 : i32
    %c0_i32_1 = arith.constant 0 : i32
    return %c0_i32, %c0_i32_0 : i32, i32
  }
  func.func @transform_15(%arg0: i32) -> (i32, i32) {
    %c0_i32 = arith.constant 0 : i32
    %c0_i32_0 = arith.constant 0 : i32
    %c0_i32_1 = arith.constant 0 : i32
    return %c0_i32, %c0_i32_0 : i32, i32
  }
  func.func @transform_16(%arg0: i32) -> (i32, i32) {
    %c0_i32 = arith.constant 0 : i32
    %c0_i32_0 = arith.constant 0 : i32
    %c0_i32_1 = arith.constant 0 : i32
    return %c0_i32, %c0_i32_0 : i32, i32
  }
  func.func @transform_17(%arg0: i32) -> (i32, i32) {
    %c0_i32 = arith.constant 0 : i32
    %c0_i32_0 = arith.constant 0 : i32
    %c0_i32_1 = arith.constant 0 : i32
    return %c0_i32, %c0_i32_0 : i32, i32
  }
  func.func @transform_18(%arg0: i32) -> (i32, i32) {
    %c0_i32 = arith.constant 0 : i32
    %c0_i32_0 = arith.constant 0 : i32
    %c0_i32_1 = arith.constant 0 : i32
    return %c0_i32, %c0_i32_0 : i32, i32
  }
  func.func @transform_19(%arg0: i32) -> (i32, i32) {
    %c0_i32 = arith.constant 0 : i32
    %c0_i32_0 = arith.constant 0 : i32
    %c0_i32_1 = arith.constant 0 : i32
    return %c0_i32, %c0_i32_0 : i32, i32
  }
  func.func @transform_20(%arg0: i32) -> (i32, i32) {
    %c0_i32 = arith.constant 0 : i32
    %c0_i32_0 = arith.constant 0 : i32
    %c0_i32_1 = arith.constant 0 : i32
    return %c0_i32, %c0_i32_0 : i32, i32
  }
  func.func @transform_21(%arg0: i32) -> (i32, i32) {
    %c0_i32 = arith.constant 0 : i32
    %c0_i32_0 = arith.constant 0 : i32
    %c0_i32_1 = arith.constant 0 : i32
    return %c0_i32, %c0_i32_0 : i32, i32
  }
  func.func @transform_22(%arg0: i32) -> (i32, i32) {
    %c0_i32 = arith.constant 0 : i32
    %c0_i32_0 = arith.constant 0 : i32
    %c0_i32_1 = arith.constant 0 : i32
    return %c0_i32, %c0_i32_0 : i32, i32
  }
  func.func @transform_23(%arg0: i32) -> (i32, i32) {
    %c0_i32 = arith.constant 0 : i32
    %c0_i32_0 = arith.constant 0 : i32
    %c0_i32_1 = arith.constant 0 : i32
    return %c0_i32, %c0_i32_0 : i32, i32
  }
  func.func @transform_24(%arg0: i32) -> (i32, i32) {
    %c0_i32 = arith.constant 0 : i32
    %c0_i32_0 = arith.constant 0 : i32
    %c0_i32_1 = arith.constant 0 : i32
    return %c0_i32, %c0_i32_0 : i32, i32
  }
  func.func @transform_25(%arg0: i32) -> (i32, i32) {
    %c0_i32 = arith.constant 0 : i32
    %c0_i32_0 = arith.constant 0 : i32
    %c0_i32_1 = arith.constant 0 : i32
    return %c0_i32, %c0_i32_0 : i32, i32
  }
  func.func @transform_26(%arg0: i32) -> (i32, i32) {
    %c0_i32 = arith.constant 0 : i32
    %c0_i32_0 = arith.constant 0 : i32
    %c0_i32_1 = arith.constant 0 : i32
    return %c0_i32, %c0_i32_0 : i32, i32
  }
  func.func @transform_27(%arg0: i32) -> (i32, i32) {
    %c0_i32 = arith.constant 0 : i32
    %c0_i32_0 = arith.constant 0 : i32
    %c0_i32_1 = arith.constant 0 : i32
    return %c0_i32, %c0_i32_0 : i32, i32
  }
  func.func @transform_28(%arg0: i32) -> (i32, i32, i32) {
    %c0_i32 = arith.constant 0 : i32
    %c0_i32_0 = arith.constant 0 : i32
    %c0_i32_1 = arith.constant 0 : i32
    return %arg0, %c0_i32, %c0_i32_0 : i32, i32, i32
  }
}

module attributes {stable_mosaic.version = 11 : i64} {
  func.func @_head_kernel(%arg0: memref<52x32xf32, #tpu.memory_space<vmem>>, %arg1: memref<1x32xf32, #tpu.memory_space<vmem>>, %arg2: memref<1x32xf32, #tpu.memory_space<vmem>>, %arg3: memref<32x128xbf16, #tpu.memory_space<vmem>>, %arg4: memref<1x128xf32, #tpu.memory_space<vmem>>, %arg5: memref<52x128xf32, #tpu.memory_space<vmem>>) attributes {dimension_semantics = [], scalar_prefetch = 0 : i64, scratch_operands = 0 : i64, tpu.core_type = #tpu.core_type<tc>} {
    %c0 = arith.constant 0 : index
    %c0_0 = arith.constant 0 : index
    %0 = vector.load %arg0[%c0, %c0_0] : memref<52x32xf32, #tpu.memory_space<vmem>>, vector<52x32xf32>
    %c0_1 = arith.constant 0 : index
    %c0_2 = arith.constant 0 : index
    %1 = vector.load %arg1[%c0_1, %c0_2] : memref<1x32xf32, #tpu.memory_space<vmem>>, vector<1x32xf32>
    %c0_3 = arith.constant 0 : index
    %c0_4 = arith.constant 0 : index
    %2 = vector.load %arg2[%c0_3, %c0_4] : memref<1x32xf32, #tpu.memory_space<vmem>>, vector<1x32xf32>
    %cst = arith.constant dense<0.000000e+00> : vector<52xf32>
    %3 = vector.multi_reduction <add>, %0, %cst [1] : vector<52x32xf32> to vector<52xf32>
    %4 = vector.shape_cast %3 : vector<52xf32> to vector<52x1xf32>
    %cst_5 = arith.constant 3.200000e+01 : f32
    %5 = vector.broadcast %cst_5 : f32 to vector<52x1xf32>
    %6 = arith.divf %4, %5 : vector<52x1xf32>
    %7 = vector.broadcast %6 : vector<52x1xf32> to vector<52x32xf32>
    %8 = arith.subf %0, %7 : vector<52x32xf32>
    %9 = arith.mulf %8, %8 : vector<52x32xf32>
    %cst_6 = arith.constant dense<0.000000e+00> : vector<52xf32>
    %10 = vector.multi_reduction <add>, %9, %cst_6 [1] : vector<52x32xf32> to vector<52xf32>
    %11 = vector.shape_cast %10 : vector<52xf32> to vector<52x1xf32>
    %cst_7 = arith.constant 3.200000e+01 : f32
    %12 = vector.broadcast %cst_7 : f32 to vector<52x1xf32>
    %13 = arith.divf %11, %12 : vector<52x1xf32>
    %cst_8 = arith.constant 9.99999974E-6 : f32
    %14 = vector.broadcast %cst_8 : f32 to vector<52x1xf32>
    %15 = arith.addf %13, %14 : vector<52x1xf32>
    %16 = math.rsqrt %15 : vector<52x1xf32>
    %17 = vector.broadcast %16 : vector<52x1xf32> to vector<52x32xf32>
    %18 = arith.mulf %8, %17 : vector<52x32xf32>
    %19 = vector.broadcast %1 : vector<1x32xf32> to vector<52x32xf32>
    %20 = arith.mulf %18, %19 : vector<52x32xf32>
    %21 = vector.broadcast %2 : vector<1x32xf32> to vector<52x32xf32>
    %22 = arith.addf %20, %21 : vector<52x32xf32>
    %c0_9 = arith.constant 0 : index
    %c0_10 = arith.constant 0 : index
    %23 = vector.load %arg3[%c0_9, %c0_10] : memref<32x128xbf16, #tpu.memory_space<vmem>>, vector<32x128xbf16>
    %24 = arith.truncf %22 : vector<52x32xf32> to vector<52x32xbf16>
    %cst_11 = arith.constant dense<0.000000e+00> : vector<52x128xf32>
    %25 = tpu.matmul %24, %23, %cst_11 {dimension_numbers = #tpu.dot_dimension_numbers<[1], [0], [0], [1], [0, 0, 1, 1], [], []>} : vector<52x32xbf16>, vector<32x128xbf16>, vector<52x128xf32> -> vector<52x128xf32>
    %c0_12 = arith.constant 0 : index
    %c0_13 = arith.constant 0 : index
    %26 = vector.load %arg4[%c0_12, %c0_13] : memref<1x128xf32, #tpu.memory_space<vmem>>, vector<1x128xf32>
    %27 = vector.broadcast %26 : vector<1x128xf32> to vector<52x128xf32>
    %28 = arith.addf %25, %27 : vector<52x128xf32>
    %c0_14 = arith.constant 0 : index
    %c0_15 = arith.constant 0 : index
    %29 = vector.load %arg5[%c0_14, %c0_15] : memref<52x128xf32, #tpu.memory_space<vmem>>, vector<52x128xf32>
    tpu.vector_store %arg5[%c0_14, %c0_15], %28 {strides = array<i32>} : memref<52x128xf32, #tpu.memory_space<vmem>>, vector<52x128xf32>,
    return
  }
}

</mosaic_0001>

<bundles_post_ra>
// kernel: _lambda_.4
= control target key start
LH: loop header
LB: loop body
LE: loop exit
PB: predicated region body
PF: predicated region fallthrough
CT: control target
= control target key end

     0   :  { %v745_v2 = vmov 0   ;;  %vm96_vm0 = vcmask 392192   ;;  %s1041_s0 = inlined_call_operand.vmem [shape: f32[128,48], index: 0, kind: input, shape index: {}]   ;;  %s1042_s1 = inlined_call_operand.vmem [shape: bf16[48,256], index: 1, kind: input, shape index: {}]   ;;  %s1043_s2 = inlined_call_operand.vmem [shape: f32[1,256], index: 2, kind: input, shape index: {}]   ;;  %s1044_s3 = inlined_call_operand.vmem [shape: bf16[256,32], index: 3, kind: input, shape index: {}]   ;;  %s1045_s4 = inlined_call_operand.vmem [shape: f32[1,32], index: 4, kind: input, shape index: {}]   ;;  %s1046_s5 = inlined_call_operand.hbm [shape: f32[128,256], index: 5, kind: output, shape index: {0}]   ;;  %s1047_s6 = inlined_call_operand.vmem [shape: f32[128,32], index: 6, kind: output, shape index: {1}]  }
   0x1   :  { %v698_v0 = vld [vmem:[%s1042_s1 + $0x24] ss:$8 sps:$4 sm:$0xff]   ;;  %v700_v1 = vld [vmem:[%s1042_s1 + $0x20] ss:$8 sps:$4 sm:$0xff]   ;;  %153 = vmatprep.mubr.bf16.mxu0 %v745_v2  ;;  %v701_v3 = vld [vmem:[%s1042_s1 + $0x14] ss:$8 sps:$4 sm:$0xff]  }
   0x2   :  { %131 = vmatprep.subr.bf16.mxu0 %v698_v0  ;;  %v703_v4 = vld [vmem:[%s1042_s1 + $0x10] ss:$8 sps:$4 sm:$0xff]   ;;  %v704_v5 = vld [vmem:[%s1042_s1 + $0x4] ss:$8 sps:$4 sm:$0xff]   ;;  %v706_v6 = vld [vmem:[%s1042_s1] ss:$8 sps:$4 sm:$0xff]  }
   0x3   :  { %132 = vmatpush1.bf16.msra.mxu0 %v700_v1  ;;  %v24_v7 = vld [vmem:[%s1041_s0] sm:$0xff]  ;;  %v25_v8 = vld [vmem:[%s1041_s0 + $0x8] sm:$0xff]  ;;  %v707_v10 = vld [vmem:[%s1044_s3 + $0x78] sm:$0xff]  }
   0x4   :  { %133 = vmatprep.subr.bf16.mxu0 %v701_v3  ;;  %v46_v9 = vpack.c.bf16 %v25_v8, %v24_v7  ;;  %v708_v11 = vld [vmem:[%s1044_s3 + $0x38] sm:$0xff]   ;;  %v709_v12 = vld [vmem:[%s1044_s3 + $0x70] sm:$0xff]   ;;  %678 = vmatprep.subr.bf16.mxu1 %v707_v10  ;;  %v711_v16 = vld [vmem:[%s1044_s3 + $0x68] sm:$0xff]  }
   0x5   :  { %v26_v13 = vld [vmem:[%s1041_s0 + $0x10] sm:$0xff]  ;;  %686 = vmatpush3.bf16.msra.mxu1 %v708_v11  ;;  %v27_v14 = vld [vmem:[%s1041_s0 + $0x18] sm:$0xff]  ;;  %v712_v18 = vld [vmem:[%s1044_s3 + $0x28] sm:$0xff]  }
   0x6   :  { %679 = vmatprep.subr.bf16.mxu1 %v709_v12  ;;  %v710_v15 = vld [vmem:[%s1044_s3 + $0x30] sm:$0xff]   ;;  %v47_v17 = vpack.c.bf16 %v27_v14, %v26_v13  ;;  %v713_v19 = vld [vmem:[%s1044_s3 + $0x60] sm:$0xff]   ;;  %v29_v21 = vld [vmem:[%s1041_s0 + $0x28] sm:$0xff] }
   0x7   :  { %134 = vmatpush1.bf16.msra.mxu0 %v703_v4  ;;  %v28_v20 = vld [vmem:[%s1041_s0 + $0x20] sm:$0xff] }
   0x8   :  { %135 = vmatprep.subr.bf16.mxu0 %v704_v5  ;;  %v714_v22 = vld [vmem:[%s1044_s3 + $0x20] sm:$0xff]  }
   0x9   :  { %687 = vmatpush3.bf16.msra.mxu1 %v710_v15 }
   0xa   :  { %680 = vmatprep.subr.bf16.mxu1 %v711_v16 }
   0xb   :  { %136 = vmatpush1.bf16.msra.mxu0 %v706_v6 }
   0xc   :  { %614 = vmatprep.subr.bf16.mxu0 %v707_v10 }
   0xd   :  { %688 = vmatpush3.bf16.msra.mxu1 %v712_v18 }
   0xe   :  { %589 = vmatmul.mubr.msk.bf16.vlgmr.msra.gmra.mxu0 %vm96_vm0, %v46_v9  ;;  %681 = vmatprep.subr.bf16.mxu1 %v713_v19 }
   0xf   :  { %163 = vmatprep.mubr.bf16.mxu0 %v745_v2  ;;  %615 = vmatpush3.bf16.msra.mxu0 %v708_v11 }
  0x10   :  { %616 = vmatprep.subr.bf16.mxu0 %v709_v12 }
  0x13   :  { %617 = vmatpush3.bf16.msra.mxu0 %v710_v15 }
  0x14   :  { %618 = vmatprep.subr.bf16.mxu0 %v711_v16 }
  0x16   :  { %590 = vmatmul.mubr.msk.bf16.gmra.mxu0 %vm96_vm0, %v47_v17 }
  0x17   :  { %173 = vmatprep.mubr.bf16.mxu0 %v745_v2  ;;  %619 = vmatpush3.bf16.msra.mxu0 %v712_v18 }
  0x18   :  { %12 = vsyncpa [#allocation3], 0  ;;  %620 = vmatprep.subr.bf16.mxu0 %v713_v19  ;;  %v715_v23 = vld [vmem:[%s1044_s3 + $0x58] sm:$0xff]   ;;  %689 = vmatpush3.bf16.msra.mxu1 %v714_v22  ;;  %v48_v24 = vpack.c.bf16 %v29_v21, %v28_v20  ;;  %v30_v26 = vld [vmem:[%s1041_s0 + $0x30] sm:$0xff]  ;;  %v56_v47 = vlaneseq }
  0x19   :  { %682 = vmatprep.subr.bf16.mxu1 %v715_v23  ;;  %v716_v25 = vld [vmem:[%s1044_s3 + $0x18] sm:$0xff]   ;;  %v32_v29 = vld [vmem:[%s1041_s0 + $0x40] sm:$0xff]  ;;  %v33_v30 = vld [vmem:[%s1041_s0 + $0x48] sm:$0xff] }
  0x1a   :  { %v31_v27 = vld [vmem:[%s1041_s0 + $0x38] sm:$0xff]  ;;  %v50_v31 = vpack.c.bf16 %v33_v30, %v32_v29  ;;  %v34_v32 = vld [vmem:[%s1041_s0 + $0x50] sm:$0xff]  ;;  %v36_v35 = vld [vmem:[%s1041_s0 + $0x60] sm:$0xff]  ;;  %v57_v48 = vshrl.u32 %v56_v47, 7 }
  0x1b   :  { %621 = vmatpush3.bf16.msra.mxu0 %v714_v22  ;;  %v49_v28 = vpack.c.bf16 %v31_v27, %v30_v26  ;;  %v35_v33 = vld [vmem:[%s1041_s0 + $0x58] sm:$0xff]  ;;  %v37_v36 = vld [vmem:[%s1041_s0 + $0x68] sm:$0xff]  ;;  %v38_v38 = vld [vmem:[%s1041_s0 + $0x70] sm:$0xff] }
  0x1c   :  { %622 = vmatprep.subr.bf16.mxu0 %v715_v23  ;;  %690 = vmatpush3.bf16.msra.mxu1 %v716_v25  ;;  %v51_v34 = vpack.c.bf16 %v35_v33, %v34_v32  ;;  %v52_v37 = vpack.c.bf16 %v37_v36, %v36_v35  ;;  %v39_v39 = vld [vmem:[%s1041_s0 + $0x78] sm:$0xff]  ;;  %v717_v41 = vld [vmem:[%s1044_s3 + $0x50] sm:$0xff]   ;;  %v719_v43 = vld [vmem:[%s1044_s3 + $0x48] sm:$0xff]   ;;  %v58_v49 = vsub.s32 0, %v57_v48  ;;  %v62_v51 = vsub.s32 1, %v57_v48 }
  0x1d   :  { %v53_v40 = vpack.c.bf16 %v39_v39, %v38_v38  ;;  %v718_v42 = vld [vmem:[%s1044_s3 + $0x10] sm:$0xff]   ;;  %683 = vmatprep.subr.bf16.mxu1 %v717_v41  ;;  %v720_v44 = vld [vmem:[%s1044_s3 + $0x8] sm:$0xff]   ;;  %v721_v45 = vld [vmem:[%s1044_s3 + $0x40] sm:$0xff]  }
  0x1e   :  { %591 = vmatmul.mubr.msk.bf16.gmra.mxu0 %vm96_vm0, %v48_v24  ;;  %v722_v46 = vld [vmem:[%s1044_s3] sm:$0xff]  }
  0x1f   :  { %183 = vmatprep.mubr.bf16.mxu0 %v745_v2  ;;  %623 = vmatpush3.bf16.msra.mxu0 %v716_v25  ;;  %v54_v50 = vld [vmem:[%s1043_s2] sm:$0x3]  ;;  %s746_s2 = smov [#allocation2]  }
  0x20   :  { %624 = vmatprep.subr.bf16.mxu0 %v717_v41  ;;  %691 = vmatpush3.bf16.msra.mxu1 %v718_v42  ;;  %v917_v52 = vrot.slane %v54_v50, %v58_v49  ;;  %v919_v53 = vrot.slane %v54_v50, %v62_v51  ;;  %s568_s3 = sshll.u32 %s746_s2, 4  ;;  %s569_s3 = int_to_ptr.vmem [resolvable:$true] %s568_s3 }
  0x21   :  { %684 = vmatprep.subr.bf16.mxu1 %v719_v43  ;;  %s723_s23 = scalar_lea.vmem %s569_s3, 4096  ;;  %p728_p1 = scmp.lt.s32.totalorder %s569_s3, %s569_s3 }
  0x22   :  { %p724_p0 = scmp.ne.s32.totalorder %s569_s3, %s723_s23  ;;  %p729_p2 = scmp.lt.s32.totalorder %s723_s23, %s723_s23 }
  0x23   :  { %625 = vmatpush3.bf16.msra.mxu0 %v718_v42 }
  0x24   :  { %626 = vmatprep.subr.bf16.mxu0 %v719_v43  ;;  %692 = vmatpush3.bf16.msra.mxu1 %v720_v44  ;;  %p730_p3 = por %p729_p2, %p728_p1 }
  0x25   :  { %685 = vmatprep.subr.bf16.mxu1 %v721_v45 }
  0x26   :  { %592 = vmatmul.mubr.msk.bf16.gmra.mxu0 %vm96_vm0, %v49_v28  ;;  %p731_p4 = pnand %p730_p3, %p724_p0 }
  0x27   :  { %193 = vmatprep.mubr.bf16.mxu0 %v745_v2  ;;  %627 = vmatpush3.bf16.msra.mxu0 %v720_v44 }
  0x28   :  { %628 = vmatprep.subr.bf16.mxu0 %v721_v45  ;;  %693 = vmatpush3.bf16.msra.mxu1 %v722_v46 }
  0x2b   :  { %629 = vmatpush3.bf16.msra.mxu0 %v722_v46 }
  0x2e   :  { %593 = vmatmul.mubr.msk.bf16.gmra.mxu0 %vm96_vm0, %v50_v31 }
  0x2f   :  { %203 = vmatprep.mubr.bf16.mxu0 %v745_v2 }
  0x36   :  { %594 = vmatmul.mubr.msk.bf16.gmra.mxu0 %vm96_vm0, %v51_v34 }
  0x37   :  { %213 = vmatprep.mubr.bf16.mxu0 %v745_v2 }
  0x3e   :  { %595 = vmatmul.mubr.msk.bf16.gmra.mxu0 %vm96_vm0, %v52_v37 }
  0x3f   :  { %223 = vmatprep.mubr.bf16.mxu0 %v745_v2 }
  0x46   :  { %596 = vmatmul.mubr.msk.bf16.gmra.mxu0 %vm96_vm0, %v53_v40 }
  0xce   :  { %v155_v54 = vpop.f32.mrf.mxu0 }
  0xcf   :  { %v156_v55 = vadd.f32 %v155_v54, %v917_v52 }
  0xd0   :  { %v157_v56 = vpop.f32.mrf.mxu0 }
  0xd1   :  { %v234_v57 = vmax.f32 %v156_v55, 0.0  ;;  %v158_v58 = vadd.f32 %v157_v56, %v919_v53 }
  0xd2   :  { %v159_v59 = vpop.f32.mrf.mxu0 }
  0xd3   :  { %266 = vst [vmem:[#allocation2] sm:$0xff] %v234_v57  ;;  %v235_v60 = vmax.f32 %v158_v58, 0.0  ;;  %v160_v61 = vadd.f32 %v159_v59, %v917_v52 }
  0xd4   :  { %v161_v62 = vpop.f32.mrf.mxu0 }
  0xd5   :  { %267 = vst [vmem:[#allocation2 + $0x8] sm:$0xff] %v235_v60  ;;  %v236_v63 = vmax.f32 %v160_v61, 0.0  ;;  %v162_v0 = vadd.f32 %v161_v62, %v919_v53 }
  0xd6   :  { %v165_v1 = vpop.f32.mrf.mxu0 }
  0xd7   :  { %268 = vst [vmem:[#allocation2 + $0x10] sm:$0xff] %v236_v63  ;;  %v237_v2 = vmax.f32 %v162_v0, 0.0  ;;  %v166_v3 = vadd.f32 %v165_v1, %v917_v52  ;;  %v330_v8 = vpack.c.bf16 %v236_v63, %v234_v57 }
  0xd8   :  { %v167_v4 = vpop.f32.mrf.mxu0 }
  0xd9   :  { %269 = vst [vmem:[#allocation2 + $0x18] sm:$0xff] %v237_v2  ;;  %v331_v5 = vpack.c.bf16 %v237_v2, %v235_v60  ;;  %v238_v6 = vmax.f32 %v166_v3, 0.0  ;;  %v168_v7 = vadd.f32 %v167_v4, %v919_v53 }
  0xda   :  { %v169_v9 = vpop.f32.mrf.mxu0 }
  0xdb   :  { %270 = vst [vmem:[#allocation2 + $0x20] sm:$0xff] %v238_v6  ;;  %v239_v10 = vmax.f32 %v168_v7, 0.0  ;;  %v170_v11 = vadd.f32 %v169_v9, %v917_v52  ;;  %481 = vmatprep.mubr.bf16.mxu0 %v331_v5 }
  0xdc   :  { %v171_v12 = vpop.f32.mrf.mxu0  ;;  %482 = vmatmul.mubr.bf16.vlgmr.msra.gmra.mxu0 %v330_v8 }
  0xdd   :  { %271 = vst [vmem:[#allocation2 + $0x28] sm:$0xff] %v239_v10  ;;  %v240_v13 = vmax.f32 %v170_v11, 0.0  ;;  %v172_v14 = vadd.f32 %v171_v12, %v919_v53 }
  0xde   :  { %v175_v15 = vpop.f32.mrf.mxu0 }
  0xdf   :  { %272 = vst [vmem:[#allocation2 + $0x30] sm:$0xff] %v240_v13  ;;  %v241_v16 = vmax.f32 %v172_v14, 0.0  ;;  %v176_v17 = vadd.f32 %v175_v15, %v917_v52  ;;  %v332_v22 = vpack.c.bf16 %v240_v13, %v238_v6 }
  0xe0   :  { %v177_v18 = vpop.f32.mrf.mxu0 }
  0xe1   :  { %273 = vst [vmem:[#allocation2 + $0x38] sm:$0xff] %v241_v16  ;;  %v242_v19 = vmax.f32 %v176_v17, 0.0  ;;  %v178_v20 = vadd.f32 %v177_v18, %v919_v53  ;;  %v333_v21 = vpack.c.bf16 %v241_v16, %v239_v10 }
  0xe2   :  { %v179_v23 = vpop.f32.mrf.mxu0 }
  0xe3   :  { %274 = vst [vmem:[#allocation2 + $0x40] sm:$0xff] %v242_v19  ;;  %v243_v24 = vmax.f32 %v178_v20, 0.0  ;;  %v180_v25 = vadd.f32 %v179_v23, %v917_v52  ;;  %489 = vmatprep.mubr.bf16.mxu1 %v333_v21 }
  0xe4   :  { %v181_v26 = vpop.f32.mrf.mxu0  ;;  %490 = vmatmul.mubr.bf16.vlgmr.msra.gmra.mxu1 %v332_v22 }
  0xe5   :  { %275 = vst [vmem:[#allocation2 + $0x48] sm:$0xff] %v243_v24  ;;  %v244_v27 = vmax.f32 %v180_v25, 0.0  ;;  %v182_v28 = vadd.f32 %v181_v26, %v919_v53 }
  0xe6   :  { %v185_v29 = vpop.f32.mrf.mxu0 }
  0xe7   :  { %276 = vst [vmem:[#allocation2 + $0x50] sm:$0xff] %v244_v27  ;;  %v245_v30 = vmax.f32 %v182_v28, 0.0  ;;  %v186_v31 = vadd.f32 %v185_v29, %v917_v52  ;;  %v334_v36 = vpack.c.bf16 %v244_v27, %v242_v19 }
  0xe8   :  { %v187_v32 = vpop.f32.mrf.mxu0 }
  0xe9   :  { %277 = vst [vmem:[#allocation2 + $0x58] sm:$0xff] %v245_v30  ;;  %v335_v33 = vpack.c.bf16 %v245_v30, %v243_v24  ;;  %v246_v34 = vmax.f32 %v186_v31, 0.0  ;;  %v188_v35 = vadd.f32 %v187_v32, %v919_v53 }
  0xea   :  { %v189_v37 = vpop.f32.mrf.mxu0 }
  0xeb   :  { %278 = vst [vmem:[#allocation2 + $0x60] sm:$0xff] %v246_v34  ;;  %v247_v38 = vmax.f32 %v188_v35, 0.0  ;;  %v190_v39 = vadd.f32 %v189_v37, %v917_v52  ;;  %497 = vmatprep.mubr.bf16.mxu1 %v335_v33 }
  0xec   :  { %v191_v40 = vpop.f32.mrf.mxu0  ;;  %498 = vmatmul.mubr.bf16.gmra.mxu1 %v334_v36 }
  0xed   :  { %279 = vst [vmem:[#allocation2 + $0x68] sm:$0xff] %v247_v38  ;;  %v248_v41 = vmax.f32 %v190_v39, 0.0  ;;  %v192_v42 = vadd.f32 %v191_v40, %v919_v53 }
  0xee   :  { %v195_v43 = vpop.f32.mrf.mxu0 }
  0xef   :  { %280 = vst [vmem:[#allocation2 + $0x70] sm:$0xff] %v248_v41  ;;  %v249_v44 = vmax.f32 %v192_v42, 0.0  ;;  %v196_v45 = vadd.f32 %v195_v43, %v917_v52  ;;  %v336_v50 = vpack.c.bf16 %v248_v41, %v246_v34 }
  0xf0   :  { %v197_v46 = vpop.f32.mrf.mxu0 }
  0xf1   :  { %281 = vst [vmem:[#allocation2 + $0x78] sm:$0xff] %v249_v44  ;;  %v337_v47 = vpack.c.bf16 %v249_v44, %v247_v38  ;;  %v250_v48 = vmax.f32 %v196_v45, 0.0  ;;  %v198_v49 = vadd.f32 %v197_v46, %v919_v53 }
  0xf2   :  { %v199_v51 = vpop.f32.mrf.mxu0 }
  0xf3   :  { %282 = vst [vmem:[#allocation2 + $0x80] sm:$0xff] %v250_v48  ;;  %v251_v54 = vmax.f32 %v198_v49, 0.0  ;;  %v200_v55 = vadd.f32 %v199_v51, %v917_v52  ;;  %505 = vmatprep.mubr.bf16.mxu1 %v337_v47 }
  0xf4   :  { %v201_v56 = vpop.f32.mrf.mxu0  ;;  %506 = vmatmul.mubr.bf16.gmra.mxu1 %v336_v50 }
  0xf5   :  { %283 = vst [vmem:[#allocation2 + $0x88] sm:$0xff] %v251_v54  ;;  %v252_v57 = vmax.f32 %v200_v55, 0.0  ;;  %v202_v58 = vadd.f32 %v201_v56, %v919_v53 }
  0xf6   :  { %v205_v59 = vpop.f32.mrf.mxu0 }
  0xf7   :  { %284 = vst [vmem:[#allocation2 + $0x90] sm:$0xff] %v252_v57  ;;  %v253_v60 = vmax.f32 %v202_v58, 0.0  ;;  %v206_v61 = vadd.f32 %v205_v59, %v917_v52  ;;  %v338_v2 = vpack.c.bf16 %v252_v57, %v250_v48 }
  0xf8   :  { %v207_v62 = vpop.f32.mrf.mxu0 }
  0xf9   :  { %285 = vst [vmem:[#allocation2 + $0x98] sm:$0xff] %v253_v60  ;;  %v339_v63 = vpack.c.bf16 %v253_v60, %v251_v54  ;;  %v254_v0 = vmax.f32 %v206_v61, 0.0  ;;  %v208_v1 = vadd.f32 %v207_v62, %v919_v53 }
  0xfa   :  { %v209_v3 = vpop.f32.mrf.mxu0 }
  0xfb   :  { %286 = vst [vmem:[#allocation2 + $0xa0] sm:$0xff] %v254_v0  ;;  %v255_v4 = vmax.f32 %v208_v1, 0.0  ;;  %v210_v5 = vadd.f32 %v209_v3, %v917_v52  ;;  %513 = vmatprep.mubr.bf16.mxu1 %v339_v63 }
  0xfc   :  { %v211_v6 = vpop.f32.mrf.mxu0  ;;  %514 = vmatmul.mubr.bf16.gmra.mxu1 %v338_v2 }
  0xfd   :  { %287 = vst [vmem:[#allocation2 + $0xa8] sm:$0xff] %v255_v4  ;;  %v256_v7 = vmax.f32 %v210_v5, 0.0  ;;  %v212_v8 = vadd.f32 %v211_v6, %v919_v53 }
  0xfe   :  { %v215_v9 = vpop.f32.mrf.mxu0 }
  0xff   :  { %288 = vst [vmem:[#allocation2 + $0xb0] sm:$0xff] %v256_v7  ;;  %v257_v10 = vmax.f32 %v212_v8, 0.0  ;;  %v216_v11 = vadd.f32 %v215_v9, %v917_v52  ;;  %v340_v16 = vpack.c.bf16 %v256_v7, %v254_v0 }
 0x100   :  { %v217_v12 = vpop.f32.mrf.mxu0 }
 0x101   :  { %289 = vst [vmem:[#allocation2 + $0xb8] sm:$0xff] %v257_v10  ;;  %v341_v13 = vpack.c.bf16 %v257_v10, %v255_v4  ;;  %v258_v14 = vmax.f32 %v216_v11, 0.0  ;;  %v218_v15 = vadd.f32 %v217_v12, %v919_v53 }
 0x102   :  { %v219_v17 = vpop.f32.mrf.mxu0 }
 0x103   :  { %290 = vst [vmem:[#allocation2 + $0xc0] sm:$0xff] %v258_v14  ;;  %v259_v18 = vmax.f32 %v218_v15, 0.0  ;;  %v220_v19 = vadd.f32 %v219_v17, %v917_v52  ;;  %521 = vmatprep.mubr.bf16.mxu1 %v341_v13 }
 0x104   :  { %v221_v20 = vpop.f32.mrf.mxu0  ;;  %522 = vmatmul.mubr.bf16.gmra.mxu1 %v340_v16 }
 0x105   :  { %291 = vst [vmem:[#allocation2 + $0xc8] sm:$0xff] %v259_v18  ;;  %v260_v21 = vmax.f32 %v220_v19, 0.0  ;;  %v222_v22 = vadd.f32 %v221_v20, %v919_v53 }
 0x106   :  { %v225_v23 = vpop.f32.mrf.mxu0 }
 0x107   :  { %292 = vst [vmem:[#allocation2 + $0xd0] sm:$0xff] %v260_v21  ;;  %v261_v24 = vmax.f32 %v222_v22, 0.0  ;;  %v226_v25 = vadd.f32 %v225_v23, %v917_v52  ;;  %v342_v30 = vpack.c.bf16 %v260_v21, %v258_v14 }
 0x108   :  { %v227_v26 = vpop.f32.mrf.mxu0 }
 0x109   :  { %293 = vst [vmem:[#allocation2 + $0xd8] sm:$0xff] %v261_v24  ;;  %v343_v27 = vpack.c.bf16 %v261_v24, %v259_v18  ;;  %v262_v28 = vmax.f32 %v226_v25, 0.0  ;;  %v228_v29 = vadd.f32 %v227_v26, %v919_v53 }
 0x10a   :  { %v229_v31 = vpop.f32.mrf.mxu0 }
 0x10b   :  { %294 = vst [vmem:[#allocation2 + $0xe0] sm:$0xff] %v262_v28  ;;  %v263_v32 = vmax.f32 %v228_v29, 0.0  ;;  %v230_v33 = vadd.f32 %v229_v31, %v917_v52  ;;  %529 = vmatprep.mubr.bf16.mxu1 %v343_v27 }
 0x10c   :  { %v231_v34 = vpop.f32.mrf.mxu0  ;;  %530 = vmatmul.mubr.bf16.gmra.mxu1 %v342_v30 }
 0x10d   :  { %295 = vst [vmem:[#allocation2 + $0xe8] sm:$0xff] %v263_v32  ;;  %v264_v35 = vmax.f32 %v230_v33, 0.0  ;;  %v232_v36 = vadd.f32 %v231_v34, %v919_v53 }
 0x10f   :  { %296 = vst [vmem:[#allocation2 + $0xf0] sm:$0xff] %v264_v35  ;;  %v265_v37 = vmax.f32 %v232_v36, 0.0  ;;  %v344_v39 = vpack.c.bf16 %v264_v35, %v262_v28 }
 0x111   :  { %297 = vst [vmem:[#allocation2 + $0xf8] sm:$0xff] %v265_v37  ;;  %v345_v38 = vpack.c.bf16 %v265_v37, %v263_v32 }
 0x113   :  { %537 = vmatprep.mubr.bf16.mxu1 %v345_v38 }
 0x114   :  { %538 = vmatmul.mubr.bf16.gmra.mxu1 %v344_v39 }
 0x115   :  { %734 = shalt.err (!%p731_p4)
}
 0x116   :  { %s747_s24 = smov 256   ;;  %s748_s25 = smov 16   ;;  %v959_v53 = vld [vmem:[%s1045_s4] ss:$0 sm:$0xff]  ;;  %vm546_vm1 = vcmask 261120  }
 0x117   :  { %574 = dma.vmem_to_hbm [thread:$0]  %s569_s3, 4096, %s1046_s5, [#allocation3], %s747_s24, %s747_s24, %s748_s25  }
 0x19c   :  { %v630_v52 = vpop.f32.mrf.mxu0 }
 0x19e   :  { %v631_v40 = vpop.f32.mrf.mxu0 }
 0x19f   :  { %v632_v41 = vadd.f32 %v631_v40, %v630_v52 }
 0x1a0   :  { %v633_v42 = vpop.f32.mrf.mxu0 }
 0x1a1   :  { %v484_v43 = vadd.f32 %v632_v41, %v959_v53 }
 0x1a2   :  { %v634_v44 = vpop.f32.mrf.mxu0 }
 0x1a3   :  { %547 = vst.msk [vmem:[%s1047_s6] sm:$0xff] %vm546_vm1, %v484_v43  ;;  %v635_v45 = vadd.f32 %v634_v44, %v633_v42 }
 0x1a4   :  { %v636_v46 = vpop.f32.mrf.mxu1 }
 0x1a5   :  { %v487_v47 = vadd.f32 %v635_v45, %v959_v53 }
 0x1a6   :  { %v637_v48 = vpop.f32.mrf.mxu1 }
 0x1a7   :  { %548 = vst.msk [vmem:[%s1047_s6 + $0x8] sm:$0xff] %vm546_vm1, %v487_v47  ;;  %v638_v49 = vadd.f32 %v637_v48, %v636_v46 }
 0x1a8   :  { %v639_v50 = vpop.f32.mrf.mxu1 }
 0x1a9   :  { %v492_v51 = vadd.f32 %v638_v49, %v959_v53 }
 0x1aa   :  { %v640_v54 = vpop.f32.mrf.mxu1 }
 0x1ab   :  { %549 = vst.msk [vmem:[%s1047_s6 + $0x10] sm:$0xff] %vm546_vm1, %v492_v51  ;;  %v641_v55 = vadd.f32 %v640_v54, %v639_v50 }
 0x1ac   :  { %v642_v56 = vpop.f32.mrf.mxu1 }
 0x1ad   :  { %v495_v57 = vadd.f32 %v641_v55, %v959_v53 }
 0x1ae   :  { %v643_v58 = vpop.f32.mrf.mxu1 }
 0x1af   :  { %550 = vst.msk [vmem:[%s1047_s6 + $0x18] sm:$0xff] %vm546_vm1, %v495_v57  ;;  %v644_v59 = vadd.f32 %v643_v58, %v642_v56 }
 0x1b0   :  { %v645_v60 = vpop.f32.mrf.mxu1 }
 0x1b1   :  { %v500_v61 = vadd.f32 %v644_v59, %v959_v53 }
 0x1b2   :  { %v646_v62 = vpop.f32.mrf.mxu1 }
 0x1b3   :  { %551 = vst.msk [vmem:[%s1047_s6 + $0x20] sm:$0xff] %vm546_vm1, %v500_v61  ;;  %v647_v63 = vadd.f32 %v646_v62, %v645_v60 }
 0x1b4   :  { %v648_v0 = vpop.f32.mrf.mxu1 }
 0x1b5   :  { %v503_v1 = vadd.f32 %v647_v63, %v959_v53 }
 0x1b6   :  { %v649_v2 = vpop.f32.mrf.mxu1 }
 0x1b7   :  { %552 = vst.msk [vmem:[%s1047_s6 + $0x28] sm:$0xff] %vm546_vm1, %v503_v1  ;;  %v650_v3 = vadd.f32 %v649_v2, %v648_v0 }
 0x1b8   :  { %v651_v4 = vpop.f32.mrf.mxu1 }
 0x1b9   :  { %v508_v5 = vadd.f32 %v650_v3, %v959_v53 }
 0x1ba   :  { %v652_v6 = vpop.f32.mrf.mxu1 }
 0x1bb   :  { %553 = vst.msk [vmem:[%s1047_s6 + $0x30] sm:$0xff] %vm546_vm1, %v508_v5  ;;  %v653_v7 = vadd.f32 %v652_v6, %v651_v4 }
 0x1bc   :  { %v654_v8 = vpop.f32.mrf.mxu1 }
 0x1bd   :  { %v511_v9 = vadd.f32 %v653_v7, %v959_v53 }
 0x1be   :  { %v655_v10 = vpop.f32.mrf.mxu1 }
 0x1bf   :  { %554 = vst.msk [vmem:[%s1047_s6 + $0x38] sm:$0xff] %vm546_vm1, %v511_v9  ;;  %v656_v11 = vadd.f32 %v655_v10, %v654_v8 }
 0x1c0   :  { %v657_v12 = vpop.f32.mrf.mxu1 }
 0x1c1   :  { %v516_v13 = vadd.f32 %v656_v11, %v959_v53 }
 0x1c2   :  { %v658_v14 = vpop.f32.mrf.mxu1 }
 0x1c3   :  { %555 = vst.msk [vmem:[%s1047_s6 + $0x40] sm:$0xff] %vm546_vm1, %v516_v13  ;;  %v659_v15 = vadd.f32 %v658_v14, %v657_v12 }
 0x1c4   :  { %v660_v16 = vpop.f32.mrf.mxu1 }
 0x1c5   :  { %v519_v17 = vadd.f32 %v659_v15, %v959_v53 }
 0x1c6   :  { %v661_v18 = vpop.f32.mrf.mxu1 }
 0x1c7   :  { %556 = vst.msk [vmem:[%s1047_s6 + $0x48] sm:$0xff] %vm546_vm1, %v519_v17  ;;  %v662_v19 = vadd.f32 %v661_v18, %v660_v16 }
 0x1c8   :  { %v663_v20 = vpop.f32.mrf.mxu1 }
 0x1c9   :  { %v524_v21 = vadd.f32 %v662_v19, %v959_v53 }
 0x1ca   :  { %v664_v22 = vpop.f32.mrf.mxu1 }
 0x1cb   :  { %557 = vst.msk [vmem:[%s1047_s6 + $0x50] sm:$0xff] %vm546_vm1, %v524_v21  ;;  %v665_v23 = vadd.f32 %v664_v22, %v663_v20 }
 0x1cc   :  { %v666_v24 = vpop.f32.mrf.mxu1 }
 0x1cd   :  { %v527_v25 = vadd.f32 %v665_v23, %v959_v53 }
 0x1ce   :  { %v667_v26 = vpop.f32.mrf.mxu1 }
 0x1cf   :  { %558 = vst.msk [vmem:[%s1047_s6 + $0x58] sm:$0xff] %vm546_vm1, %v527_v25  ;;  %v668_v27 = vadd.f32 %v667_v26, %v666_v24 }
 0x1d0   :  { %v669_v28 = vpop.f32.mrf.mxu1 }
 0x1d1   :  { %v532_v29 = vadd.f32 %v668_v27, %v959_v53 }
 0x1d2   :  { %v670_v30 = vpop.f32.mrf.mxu1 }
 0x1d3   :  { %559 = vst.msk [vmem:[%s1047_s6 + $0x60] sm:$0xff] %vm546_vm1, %v532_v29  ;;  %v671_v31 = vadd.f32 %v670_v30, %v669_v28 }
 0x1d4   :  { %v672_v32 = vpop.f32.mrf.mxu1 }
 0x1d5   :  { %v535_v33 = vadd.f32 %v671_v31, %v959_v53 }
 0x1d6   :  { %v673_v34 = vpop.f32.mrf.mxu1 }
 0x1d7   :  { %560 = vst.msk [vmem:[%s1047_s6 + $0x68] sm:$0xff] %vm546_vm1, %v535_v33  ;;  %v674_v35 = vadd.f32 %v673_v34, %v672_v32 }
 0x1d8   :  { %v675_v36 = vpop.f32.mrf.mxu1 }
 0x1d9   :  { %v540_v37 = vadd.f32 %v674_v35, %v959_v53 }
 0x1da   :  { %v676_v38 = vpop.f32.mrf.mxu1 }
 0x1db   :  { %561 = vst.msk [vmem:[%s1047_s6 + $0x70] sm:$0xff] %vm546_vm1, %v540_v37  ;;  %v677_v39 = vadd.f32 %v676_v38, %v675_v36 }
 0x1dd   :  { %v543_v52 = vadd.f32 %v677_v39, %v959_v53 }
 0x1df   :  { %562 = vst.msk [vmem:[%s1047_s6 + $0x78] sm:$0xff] %vm546_vm1, %v543_v52 }
 0x1e0   :  { %743 = dma.done.wait [#allocation3], 4096  }
 0x1e1   :  { %744 = vsyncadd [#allocation3], 4294963200 }
 0x1e2   :  { %582 = vsyncpa [#allocation3], 1 }

// kernel: _lambda_.7
= control target key start
LH: loop header
LB: loop body
LE: loop exit
PB: predicated region body
PF: predicated region fallthrough
CT: control target
= control target key end

     0   :  { %vm30_vm0 = vcmask 261120   ;;  %vm49_vm1 = vcmask 257024   ;;  %s451_s0 = inlined_call_operand.vmem [shape: f32[52,32], index: 0, kind: input, shape index: {}]   ;;  %s452_s3 = inlined_call_operand.vmem [shape: bf16[32,128], index: 3, kind: input, shape index: {}]   ;;  %s453_s1 = inlined_call_operand.vmem [shape: f32[1,32], index: 1, kind: input, shape index: {}]   ;;  %s454_s2 = inlined_call_operand.vmem [shape: f32[1,32], index: 2, kind: input, shape index: {}]   ;;  %s455_s4 = inlined_call_operand.vmem [shape: f32[1,128], index: 4, kind: input, shape index: {}]   ;;  %s456_s5 = inlined_call_operand.vmem [shape: f32[52,128], index: 5, kind: output, shape index: {}]  }
   0x1   :  { %v21_v0 = vld [vmem:[%s451_s0] sm:$0xff]  ;;  %v22_v2 = vld [vmem:[%s451_s0 + $0x8] sm:$0xff]  ;;  %v23_v8 = vld [vmem:[%s451_s0 + $0x10] sm:$0xff] }
   0x2   :  { %v25_v1 = vld [vmem:[%s451_s0 + $0x20] sm:$0xff]  ;;  %v31_v3 = vsel %vm30_vm0, %v21_v0, 0.0  ;;  %v26_v5 = vld [vmem:[%s451_s0 + $0x28] sm:$0xff]  ;;  %v34_v6 = vsel %vm30_vm0, %v22_v2, 0.0  ;;  %v24_v9 = vld [vmem:[%s451_s0 + $0x18] sm:$0xff]  ;;  %v37_v10 = vsel %vm30_vm0, %v23_v8, 0.0 }
   0x3   :  { %v43_v4 = vsel %vm30_vm0, %v25_v1, 0.0  ;;  %32 = vadd.xlane.f32.xlu0 %v31_v3  ;;  %v46_v7 = vsel %vm30_vm0, %v26_v5, 0.0  ;;  %v40_v11 = vsel %vm30_vm0, %v24_v9, 0.0  ;;  %v27_v12 = vld [vmem:[%s451_s0 + $0x30] sm:$0xf]  ;;  %v295_v49 = vld [vmem:[%s452_s3 + $0x8] sm:$0xff]  }
   0x4   :  { %44 = vadd.xlane.f32.xlu1 %v43_v4  ;;  %v50_v13 = vsel %vm49_vm1, %v27_v12, 0.0  ;;  %279 = vmatprep.subr.bf16.mxu0 %v295_v49  ;;  %v296_v50 = vld [vmem:[%s452_s3] sm:$0xff]  }
   0x5   :  { %291 = vmatprep.subr.bf16.mxu1 %v295_v49  ;;  %280 = vmatpush3.bf16.msra.mxu0 %v295_v49 }
   0x6   :  { %293 = vmatpush3.bf16.msra.mxu1 %v295_v49  ;;  %281 = vmatprep.subr.bf16.mxu0 %v296_v50 }
   0x7   :  { %35 = vadd.xlane.f32.xlu0 %v34_v6  ;;  %292 = vmatprep.subr.bf16.mxu1 %v296_v50 }
   0x8   :  { %47 = vadd.xlane.f32.xlu1 %v46_v7 }
   0x9   :  { %282 = vmatpush3.bf16.msra.mxu0 %v296_v50 }
   0xa   :  { %294 = vmatpush3.bf16.msra.mxu1 %v296_v50 }
   0xb   :  { %38 = vadd.xlane.f32.xlu0 %v37_v10  ;;  %v264_v10 = vld [vmem:[%s453_s1] ss:$0 sm:$0xff] }
   0xc   :  { %41 = vadd.xlane.f32.xlu1 %v40_v11 }
   0xf   :  { %51 = vadd.xlane.f32.xlu0 %v50_v13 }
  0x8c   :  { %v33_v14 = vpop.xlane.xlu0 %32 }
  0x8d   :  { %v45_v15 = vpop.xlane.xlu1 %44  ;;  %v54_v16 = vmul.f32 0.03125, %v33_v14  ;;  %v265_v14 = vld [vmem:[%s454_s2] ss:$0 sm:$0xff] }
  0x8e   :  { %v58_v17 = vmul.f32 0.03125, %v45_v15 }
  0x8f   :  { %v369_v18 = vsub.f32 %v21_v0, %v54_v16 }
  0x90   :  { %v371_v19 = vsub.f32 %v25_v1, %v58_v17  ;;  %v36_v20 = vpop.xlane.xlu0 %35 }
  0x91   :  { %v48_v21 = vpop.xlane.xlu1 %47  ;;  %v55_v22 = vmul.f32 0.03125, %v36_v20  ;;  %v68_v24 = vmul.f32 %v369_v18, %v369_v18 }
  0x92   :  { %v59_v23 = vmul.f32 0.03125, %v48_v21  ;;  %v72_v25 = vmul.f32 %v371_v19, %v371_v19 }
  0x93   :  { %v377_v26 = vsub.f32 %v22_v2, %v55_v22  ;;  %v75_v28 = vsel %vm30_vm0, %v68_v24, 0.0 }
  0x94   :  { %v379_v27 = vsub.f32 %v26_v5, %v59_v23  ;;  %76 = vadd.xlane.f32.xlu1 %v75_v28  ;;  %v39_v29 = vpop.xlane.xlu0 %38  ;;  %v87_v31 = vsel %vm30_vm0, %v72_v25, 0.0 }
  0x95   :  { %v42_v30 = vpop.xlane.xlu1 %41  ;;  %v56_v32 = vmul.f32 0.03125, %v39_v29  ;;  %v69_v34 = vmul.f32 %v377_v26, %v377_v26 }
  0x96   :  { %v57_v33 = vmul.f32 0.03125, %v42_v30  ;;  %v73_v35 = vmul.f32 %v379_v27, %v379_v27 }
  0x97   :  { %v387_v36 = vsub.f32 %v23_v8, %v56_v32  ;;  %v78_v38 = vsel %vm30_vm0, %v69_v34, 0.0 }
  0x98   :  { %v389_v37 = vsub.f32 %v24_v9, %v57_v33  ;;  %88 = vadd.xlane.f32.xlu1 %v87_v31  ;;  %79 = vadd.xlane.f32.xlu0 %v78_v38  ;;  %v52_v39 = vpop.xlane.xlu0 %51  ;;  %v90_v41 = vsel %vm30_vm0, %v73_v35, 0.0 }
  0x99   :  { %v60_v40 = vmul.f32 0.03125, %v52_v39  ;;  %v70_v42 = vmul.f32 %v387_v36, %v387_v36 }
  0x9a   :  { %v71_v43 = vmul.f32 %v389_v37, %v389_v37 }
  0x9b   :  { %v397_v44 = vsub.f32 %v27_v12, %v60_v40  ;;  %v81_v45 = vsel %vm30_vm0, %v70_v42, 0.0 }
  0x9c   :  { %91 = vadd.xlane.f32.xlu0 %v90_v41  ;;  %82 = vadd.xlane.f32.xlu1 %v81_v45  ;;  %v84_v46 = vsel %vm30_vm0, %v71_v43, 0.0  ;;  %v266_v43 = vld [vmem:[%s455_s4] ss:$0 sm:$0xff] }
  0x9d   :  { %v74_v47 = vmul.f32 %v397_v44, %v397_v44 }
  0x9f   :  { %v93_v48 = vsel %vm49_vm1, %v74_v47, 0.0 }
  0xa0   :  { %85 = vadd.xlane.f32.xlu0 %v84_v46  ;;  %94 = vadd.xlane.f32.xlu1 %v93_v48 }
 0x11d   :  { %v77_v51 = vpop.xlane.xlu1 %76 }
 0x11e   :  { %v96_v52 = vmul.f32 0.03125, %v77_v51 }
 0x120   :  { %v103_v53 = vadd.f32 1e-05, %v96_v52 }
 0x121   :  { %v89_v54 = vpop.xlane.xlu1 %88  ;;  %v80_v55 = vpop.xlane.xlu0 %79 }
 0x122   :  { %297 = vrsqrt.f32 %v103_v53  ;;  %v100_v56 = vmul.f32 0.03125, %v89_v54  ;;  %v97_v57 = vmul.f32 0.03125, %v80_v55 }
 0x124   :  { %v107_v58 = vadd.f32 1e-05, %v100_v56  ;;  %v104_v59 = vadd.f32 1e-05, %v97_v57 }
 0x125   :  { %v83_v60 = vpop.xlane.xlu1 %82  ;;  %v92_v61 = vpop.xlane.xlu0 %91 }
 0x126   :  { %299 = vrsqrt.f32 %v107_v58  ;;  %v98_v62 = vmul.f32 0.03125, %v83_v60  ;;  %v101_v63 = vmul.f32 0.03125, %v92_v61 }
 0x127   :  { %301 = vrsqrt.f32 %v104_v59 }
 0x128   :  { %v105_v0 = vadd.f32 1e-05, %v98_v62  ;;  %v108_v1 = vadd.f32 1e-05, %v101_v63 }
 0x129   :  { %v95_v2 = vpop.xlane.xlu1 %94  ;;  %v86_v3 = vpop.xlane.xlu0 %85 }
 0x12a   :  { %303 = vrsqrt.f32 %v105_v0  ;;  %v102_v4 = vmul.f32 0.03125, %v95_v2  ;;  %v99_v5 = vmul.f32 0.03125, %v86_v3 }
 0x12b   :  { %305 = vrsqrt.f32 %v108_v1 }
 0x12c   :  { %v109_v6 = vadd.f32 1e-05, %v102_v4  ;;  %v106_v7 = vadd.f32 1e-05, %v99_v5 }
 0x12e   :  { %307 = vrsqrt.f32 %v109_v6 }
 0x12f   :  { %v298_v8 = vpop.eup %297  ;;  %309 = vrsqrt.f32 %v106_v7 }
 0x130   :  { %v117_v9 = vmul.f32 %v298_v8, %v369_v18 }
 0x132   :  { %v130_v13 = vmul.f32 %v264_v10, %v117_v9 }
 0x133   :  { %v300_v11 = vpop.eup %299 }
 0x134   :  { %v302_v12 = vpop.eup %301  ;;  %v121_v16 = vmul.f32 %v300_v11, %v371_v19  ;;  %v143_v22 = vadd.f32 %v265_v14, %v130_v13 }
 0x135   :  { %v118_v15 = vmul.f32 %v302_v12, %v377_v26 }
 0x136   :  { %v134_v24 = vmul.f32 %v264_v10, %v121_v16 }
 0x137   :  { %v304_v17 = vpop.eup %303  ;;  %v131_v20 = vmul.f32 %v264_v10, %v118_v15 }
 0x138   :  { %v306_v21 = vpop.eup %305  ;;  %v119_v25 = vmul.f32 %v304_v17, %v387_v36  ;;  %v147_v26 = vadd.f32 %v265_v14, %v134_v24 }
 0x139   :  { %v144_v18 = vadd.f32 %v265_v14, %v131_v20  ;;  %v122_v23 = vmul.f32 %v306_v21, %v379_v27 }
 0x13a   :  { %v132_v34 = vmul.f32 %v264_v10, %v119_v25 }
 0x13b   :  { %v308_v28 = vpop.eup %307  ;;  %v154_v29 = vpack.c.bf16 %v144_v18, %v143_v22  ;;  %v135_v30 = vmul.f32 %v264_v10, %v122_v23 }
 0x13c   :  { %v310_v31 = vpop.eup %309  ;;  %v123_v32 = vmul.f32 %v308_v28, %v397_v44  ;;  %v145_v36 = vadd.f32 %v265_v14, %v132_v34 }
 0x13d   :  { %283 = vmatprep.mubr.msk.bf16.mxu0 %vm30_vm0, %v154_v29  ;;  %v148_v19 = vadd.f32 %v265_v14, %v135_v30  ;;  %v120_v33 = vmul.f32 %v310_v31, %v389_v37 }
 0x13e   :  { %v136_v35 = vmul.f32 %v264_v10, %v123_v32 }
 0x13f   :  { %v156_v38 = vpack.c.bf16 %v148_v19, %v147_v26  ;;  %v133_v39 = vmul.f32 %v264_v10, %v120_v33 }
 0x140   :  { %v149_v27 = vadd.f32 %v265_v14, %v136_v35 }
 0x141   :  { %287 = vmatprep.mubr.msk.bf16.mxu1 %vm30_vm0, %v156_v38  ;;  %v146_v40 = vadd.f32 %v265_v14, %v133_v39 }
 0x142   :  { %v157_v41 = vpack.c.bf16 %v149_v27, %v149_v27 }
 0x143   :  { %v155_v42 = vpack.c.bf16 %v146_v40, %v145_v36 }
 0x144   :  { %288 = vmatmul.mubr.msk.bf16.vlgmr.msra.gmra.mxu1 %vm30_vm0, %v157_v41 }
 0x145   :  { %284 = vmatmul.mubr.msk.bf16.vlgmr.msra.gmra.mxu0 %vm30_vm0, %v155_v42 }
 0x204   :  { %v289_v37 = vpop.f32.mrf.mxu1 }
 0x205   :  { %v285_v44 = vpop.f32.mrf.mxu0  ;;  %v248_v45 = vadd.f32 %v289_v37, %v266_v43 }
 0x206   :  { %v232_v46 = vadd.f32 %v285_v44, %v266_v43  ;;  %v239_v47 = vpop.f32.mrf.mxu1 }
 0x207   :  { %259 = vst [vmem:[%s456_s5 + $0x30] sm:$0xf] %v248_v45  ;;  %v223_v48 = vpop.f32.mrf.mxu0  ;;  %v240_v49 = vadd.f32 %v266_v43, %v239_v47 }
 0x208   :  { %255 = vst [vmem:[%s456_s5 + $0x10] sm:$0xff] %v232_v46  ;;  %v224_v50 = vadd.f32 %v266_v43, %v223_v48  ;;  %v290_v51 = vpop.f32.mrf.mxu1 }
 0x209   :  { %257 = vst [vmem:[%s456_s5 + $0x20] sm:$0xff] %v240_v49  ;;  %v286_v52 = vpop.f32.mrf.mxu0 }
 0x20a   :  { %253 = vst [vmem:[%s456_s5] sm:$0xff] %v224_v50  ;;  %v235_v53 = vadd.f32 %v286_v52, %v266_v43  ;;  %v242_v54 = vpop.f32.mrf.mxu1 }
 0x20b   :  { %v226_v55 = vpop.f32.mrf.mxu0  ;;  %v243_v56 = vadd.f32 %v266_v43, %v242_v54 }
 0x20c   :  { %256 = vst [vmem:[%s456_s5 + $0x18] sm:$0xff] %v235_v53  ;;  %v227_v57 = vadd.f32 %v266_v43, %v226_v55 }
 0x20d   :  { %258 = vst [vmem:[%s456_s5 + $0x28] sm:$0xff] %v243_v56 }
 0x20e   :  { %254 = vst [vmem:[%s456_s5 + $0x8] sm:$0xff] %v227_v57 }

// kernel: _lambda_.5
= control target key start
LH: loop header
LB: loop body
LE: loop exit
PB: predicated region body
PF: predicated region fallthrough
CT: control target
= control target key end

     0   :  { %s3530_s21 = smov 0   ;;  %s4302_s0 = inlined_call_operand.vmem [shape: f32[2,64,32], index: 0, kind: input, shape index: {}]   ;;  %s4303_s1 = inlined_call_operand.vmem [shape: f32[2,64,32], index: 1, kind: input, shape index: {}]   ;;  %s4304_s2 = inlined_call_operand.vmem [shape: bf16[32,64], index: 2, kind: input, shape index: {}]   ;;  %s4305_s3 = inlined_call_operand.vmem [shape: f32[1,64], index: 3, kind: input, shape index: {}, may-alias: {3,11}]   ;;  %s4306_s4 = inlined_call_operand.vmem [shape: bf16[32,32], index: 4, kind: input, shape index: {}]   ;;  %s4307_s5 = inlined_call_operand.vmem [shape: f32[1,32], index: 5, kind: input, shape index: {}, may-alias: {5,7,9,13,15}]   ;;  %s4308_s6 = inlined_call_operand.vmem [shape: bf16[32,32], index: 6, kind: input, shape index: {}]   ;;  %s4309_s7 = inlined_call_operand.vmem [shape: f32[1,32], index: 7, kind: input, shape index: {}, may-alias: {5,7,9,13,15}]   ;;  %s4310_s8 = inlined_call_operand.vmem [shape: f32[1,32], index: 8, kind: input, shape index: {}, may-alias: {8,14}]   ;;  %s4311_s9 = inlined_call_operand.vmem [shape: f32[1,32], index: 9, kind: input, shape index: {}, may-alias: {5,7,9,13,15}]   ;;  %s4312_s10 = inlined_call_operand.vmem [shape: bf16[32,64], index: 10, kind: input, shape index: {}]   ;;  %s4313_s11 = inlined_call_operand.vmem [shape: f32[1,64], index: 11, kind: input, shape index: {}, may-alias: {3,11}]   ;;  %s4314_s12 = inlined_call_operand.vmem [shape: bf16[64,32], index: 12, kind: input, shape index: {}]   ;;  %s4315_s13 = inlined_call_operand.vmem [shape: f32[1,32], index: 13, kind: input, shape index: {}, may-alias: {5,7,9,13,15}]   ;;  %s4316_s14 = inlined_call_operand.vmem [shape: f32[1,32], index: 14, kind: input, shape index: {}, may-alias: {8,14}]   ;;  %s4317_s15 = inlined_call_operand.vmem [shape: f32[1,32], index: 15, kind: input, shape index: {}, may-alias: {5,7,9,13,15}]   ;;  %s4318_s16 = inlined_call_operand.vmem [shape: f32[2,64,32], index: 16, kind: output, shape index: {}]  }
   0x1   :  { %4319 = sst [smem:[#allocation2_spill]] %s4302_s0 }
   0x2 LB: > { %s2768_s22 = sadd.s32 4294967295, %s3433_s21   ;;  %p2772_p0 = scmp.ge.s32.totalorder %s3433_s21, 1  ;;  %s3433_s21 = sphi %s3530_s21, %s26_s21  }
   0x3   : > { %p472_p1 = scmp.lt.s32.totalorder %s3433_s21, 3 }
   0x5   : > { %p473_p2 = pnand %p2772_p0, %p472_p1 }
   0x6   : > { %p527_p3 = scmp.lt.s32.totalorder (!%p473_p2), %s2768_s22, 1  ;;  %s4320_s30 = sld [smem:[#allocation2_spill]] (!%p473_p2) }
   0x7   : > { %476 = sbr.rel (%p473_p2) target bundleno = 4236 (0x108c), region = 84  ;;  %s3435_s23 = smov (!%p473_p2), 96  }
   0x8   : > { %s3436_s17 = smov (!%p473_p2), 88   ;;  %s3437_s18 = smov (!%p473_p2), 120  }
   0x9   : > { %s3439_s20 = smov (!%p473_p2), 112   ;;  %s3442_s24 = smov (!%p473_p2), 8  }
   0xa   : > { %s3443_s25 = smov (!%p473_p2), 16  }
   0xc   : > { %v3247_v0 = vld [vmem:[%s4304_s2 + $0x8] sm:$0xff]   ;;  %v3248_v1 = vld [vmem:[%s4304_s2] sm:$0xff]   ;;  %s4322_s22 = smov (!%p527_p3, %s2768_s22), 1  ;;  %vm594_vm0 = vcmask 261120   ;;  %vm792_vm1 = vcmask 64512   ;;  %vm890_vm2 = vcmask 523264  }
   0xd   : > { %2953 = vmatprep.subr.bf16.mxu0 %v3247_v0  ;;  %s3544_s27 = sshll.u32 %s4322_s22, 6  ;;  %v2779_v31 = vld [vmem:[%s4305_s3] ss:$0 sm:$0xff]  ;;  %v3249_v59 = vld [vmem:[%s4306_s4 + $0x8] sm:$0xff]   ;;  %s3440_s22 = smov 72   ;;  %vm2054_vm3 = vcmask 130048  }
   0xe   : > { %2954 = vmatpush3.bf16.msra.mxu0 %v3247_v0  ;;  %s3550_s0 = scalar_lea.vmem %s4320_s30, %s3544_s27  ;;  %s536_s19 = scalar_lea.vmem %s4303_s1, %s3544_s27  ;;  %v3250_v60 = vld [vmem:[%s4306_s4] sm:$0xff]   ;;  %2965 = vmatprep.subr.bf16.mxu1 %v3249_v59  ;;  %vm2063_vm4 = vcmask 195584  }
   0xf   : > { %2955 = vmatprep.subr.bf16.mxu0 %v3248_v1  ;;  %v3557_v2 = vld [vmem:[%s3550_s0] sm:$0xff]  ;;  %v3560_v3 = vld [vmem:[%s3550_s0 + $0x8] sm:$0xff]  ;;  %v3564_v7 = vld [vmem:[%s3550_s0 + $0x10] sm:$0xff]  ;;  %2966 = vmatpush3.bf16.msra.mxu1 %v3249_v59 }
  0x10   : > { %v551_v4 = vld [vmem:[%s536_s19] sm:$0xff]  ;;  %v552_v5 = vld [vmem:[%s536_s19 + $0x8] sm:$0xff]  ;;  %v3567_v8 = vld [vmem:[%s3550_s0 + $0x18] sm:$0xff]  ;;  %v676_v61 = vpack.c.bf16 %v3560_v3, %v3557_v2  ;;  %2967 = vmatprep.subr.bf16.mxu1 %v3250_v60 }
  0x11   : > { %v559_v6 = vadd.f32 %v551_v4, %v3557_v2  ;;  %v560_v9 = vadd.f32 %v552_v5, %v3560_v3  ;;  %v553_v10 = vld [vmem:[%s536_s19 + $0x10] sm:$0xff]  ;;  %v554_v11 = vld [vmem:[%s536_s19 + $0x18] sm:$0xff]  ;;  %v3571_v12 = vld [vmem:[%s3550_s0 + $0x20] sm:$0xff]  ;;  %v677_v62 = vpack.c.bf16 %v3567_v8, %v3564_v7 }
  0x12   : > { %2956 = vmatpush3.bf16.msra.mxu0 %v3248_v1  ;;  %v561_v13 = vadd.f32 %v553_v10, %v3564_v7  ;;  %v562_v14 = vadd.f32 %v554_v11, %v3567_v8  ;;  %v3576_v15 = vld [vmem:[%s3550_s0 + $0x28] sm:$0xff]  ;;  %v555_v16 = vld [vmem:[%s536_s19 + $0x20] sm:$0xff]  ;;  %v3581_v21 = vld [vmem:[%s3550_s0 + $0x30] sm:$0xff]  ;;  %2969 = vmatprep.mubr.msk.bf16.mxu1 %vm594_vm0, %v676_v61 }
  0x13   : > { %v556_v17 = vld [vmem:[%s536_s19 + $0x28] sm:$0xff]  ;;  %v571_v18 = vpack.c.bf16 %v560_v9, %v559_v6  ;;  %v563_v19 = vadd.f32 %v555_v16, %v3571_v12  ;;  %v3584_v22 = vld [vmem:[%s3550_s0 + $0x38] sm:$0xff]  ;;  %v557_v23 = vld [vmem:[%s536_s19 + $0x30] sm:$0xff]  ;;  %2968 = vmatpush3.bf16.msra.mxu1 %v3250_v60  ;;  %v678_v63 = vpack.c.bf16 %v3576_v15, %v3571_v12 }
  0x14   : > { %v564_v20 = vadd.f32 %v556_v17, %v3576_v15  ;;  %v572_v24 = vpack.c.bf16 %v562_v14, %v561_v13  ;;  %v558_v25 = vld [vmem:[%s536_s19 + $0x38] sm:$0xff]  ;;  %v565_v27 = vadd.f32 %v557_v23, %v3581_v21  ;;  %v679_v0 = vpack.c.bf16 %v3584_v22, %v3581_v21  ;;  %s3438_s19 = smov 80  }
  0x15   : > { %2957 = vmatprep.mubr.msk.bf16.mxu0 %vm594_vm0, %v571_v18  ;;  %v566_v28 = vadd.f32 %v558_v25, %v3584_v22 }
  0x16   : > { %v573_v26 = vpack.c.bf16 %v564_v20, %v563_v19  ;;  %2958 = vmatmul.mubr.msk.bf16.vlgmr.msra.gmra.mxu0 %vm594_vm0, %v572_v24  ;;  %2970 = vmatmul.mubr.msk.bf16.vlgmr.msra.gmra.mxu1 %vm594_vm0, %v677_v62 }
  0x17   : > { %v574_v29 = vpack.c.bf16 %v566_v28, %v565_v27  ;;  %2973 = vmatprep.mubr.msk.bf16.mxu1 %vm594_vm0, %v678_v63 }
  0x18   : > { %2961 = vmatprep.mubr.msk.bf16.mxu0 %vm594_vm0, %v573_v26 }
  0x1e   : > { %2962 = vmatmul.mubr.msk.bf16.gmra.mxu0 %vm594_vm0, %v574_v29  ;;  %2974 = vmatmul.mubr.msk.bf16.gmra.mxu1 %vm594_vm0, %v679_v0  ;;  %v2786_v29 = vld [vmem:[%s4307_s5] ss:$0 sm:$0xff] }
  0xd6   : > { %v2959_v30 = vpop.f32.mrf.mxu0  ;;  %v2971_v25 = vpop.f32.mrf.mxu1 }
  0xd7   : > { %v650_v34 = vadd.f32 %v2959_v30, %v2779_v31 }
  0xd8   : > { %v641_v32 = vpop.f32.mrf.mxu0  ;;  %v745_v26 = vpop.f32.mrf.mxu1 }
  0xd9   : > { %v642_v37 = vadd.f32 %v2779_v31, %v641_v32 }
  0xda   : > { %v2960_v33 = vpop.f32.mrf.mxu0  ;;  %v2972_v27 = vpop.f32.mrf.mxu1 }
  0xdb   : > { %v653_v35 = vadd.f32 %v2960_v33, %v2779_v31 }
  0xdc   : > { %v644_v36 = vpop.f32.mrf.mxu0  ;;  %v748_v28 = vpop.f32.mrf.mxu1 }
  0xdd   : > { %v3595_v38 = vpack.c.bf16 %v653_v35, %v650_v34  ;;  %v645_v39 = vadd.f32 %v2779_v31, %v644_v36 }
  0xde   : > { %v2963_v40 = vpop.f32.mrf.mxu0  ;;  %v2975_v30 = vpop.f32.mrf.mxu1 }
  0xdf   : > { %v3597_v41 = vpack.c.bf16 %v645_v39, %v642_v37  ;;  %786 = vrot.lane.b32.xlu1 %v3595_v38, %s3435_s23  ;;  %v666_v44 = vadd.f32 %v2963_v40, %v2779_v31  ;;  %v770_v32 = vadd.f32 %v2975_v30, %v2786_v29  ;;  %v754_v39 = vadd.f32 %v2971_v25, %v2786_v29 }
  0xe0   : > { %v657_v42 = vpop.f32.mrf.mxu0  ;;  %v757_v40 = vadd.f32 %v2972_v27, %v2786_v29 }
  0xe1   : > { %2985 = vmatprep.mubr.msk.bf16.mxu0 %vm792_vm1, %v3597_v41  ;;  %v658_v49 = vadd.f32 %v2779_v31, %v657_v42 }
  0xe2   : > { %v2964_v43 = vpop.f32.mrf.mxu0 }
  0xe3   : > { %v669_v45 = vadd.f32 %v2964_v43, %v2779_v31  ;;  %784 = vrot.lane.b32.xlu1 %v3597_v41, %s3435_s23 }
  0xe4   : > { %v660_v46 = vpop.f32.mrf.mxu0 }
  0xe5   : > { %v3603_v47 = vpack.c.bf16 %v669_v45, %v666_v44  ;;  %v661_v48 = vadd.f32 %v2779_v31, %v660_v46  ;;  %v761_v31 = vpop.f32.mrf.mxu1 }
  0xe6   : > { %v762_v34 = vadd.f32 %v2786_v29, %v761_v31 }
  0xe7   : > { %790 = vrot.lane.b32.xlu0 %v3603_v47, %s3435_s23  ;;  %v3606_v50 = vpack.c.bf16 %v661_v48, %v658_v49  ;;  %v2976_v33 = vpop.f32.mrf.mxu1 }
  0xe8   : > { %v773_v35 = vadd.f32 %v2976_v33, %v2786_v29 }
  0xe9   : > { %v764_v37 = vpop.f32.mrf.mxu1 }
  0xea   : > { %v3658_v42 = vpack.c.bf16 %v773_v35, %v770_v32  ;;  %v765_v43 = vadd.f32 %v2786_v29, %v764_v37 }
  0xeb   : > { %788 = vrot.lane.b32.xlu0 %v3606_v50, %s3435_s23  ;;  %s3441_s23 = smov 104  }
  0xec   : > { %v3660_v45 = vpack.c.bf16 %v765_v43, %v762_v34  ;;  %2993 = vmatprep.subr.bf16.mxu1 %v3658_v42 }
  0xed   : > { %2994 = vmatpush3.bf16.msra.mxu1 %v3658_v42 }
  0xee   : > { %2995 = vmatprep.subr.bf16.mxu1 %v3660_v45 }
  0xf1   : > { %2996 = vmatpush3.bf16.msra.mxu1 %v3660_v45 }
 0x151   : > { %v787_v55 = vpop.permute.xlu1 %786 }
 0x152   : > { %v809_v56 = vsel %vm792_vm1, %v787_v55, 0 }
 0x155   : > { %v785_v57 = vpop.permute.xlu1 %784 }
 0x156   : > { %v806_v58 = vsel %vm792_vm1, %v785_v57, 0 }
 0x159   : > { %v791_v51 = vpop.permute.xlu0 %790 }
 0x15a   : > { %3153 = vmatprep.subr.msk.bf16.mxu0 %vm792_vm1, %v791_v51  ;;  %v815_v52 = vsel %vm792_vm1, %v791_v51, 0  ;;  %v746_v51 = vadd.f32 %v2786_v29, %v745_v26 }
 0x15b   : > { %2978 = vmatpush3.bf16.xpose.msra.mxu0 %v815_v52  ;;  %v3664_v52 = vpack.c.bf16 %v757_v40, %v754_v39 }
 0x15d   : > { %v789_v53 = vpop.permute.xlu0 %788  ;;  %2997 = vmatprep.subr.bf16.mxu1 %v3664_v52 }
 0x15e   : > { %3154 = vmatprep.subr.msk.bf16.mxu0 %vm792_vm1, %v789_v53  ;;  %v812_v54 = vsel %vm792_vm1, %v789_v53, 0  ;;  %v749_v53 = vadd.f32 %v2786_v29, %v748_v28  ;;  %2998 = vmatpush3.bf16.msra.mxu1 %v3664_v52 }
 0x160   : > { %v3668_v59 = vpack.c.bf16 %v749_v53, %v746_v51 }
 0x162   : > { %2999 = vmatprep.subr.bf16.mxu1 %v3668_v59 }
 0x163   : > { %2980 = vmatpush3.bf16.xpose.msra.mxu0 %v812_v54  ;;  %3000 = vmatpush3.bf16.msra.mxu1 %v3668_v59 }
 0x164   : > { %3155 = vmatprep.subr.msk.bf16.mxu0 %vm792_vm1, %v787_v55 }
 0x16b   : > { %2982 = vmatpush3.bf16.xpose.msra.mxu0 %v809_v56 }
 0x16c   : > { %3156 = vmatprep.subr.msk.bf16.mxu0 %vm792_vm1, %v785_v57 }
 0x173   : > { %2984 = vmatpush3.bf16.xpose.msra.mxu0 %v806_v58 }
 0x17a   : > { %2986 = vmatmul.mubr.msk.bf16.vlgmr.msra.gmra.mxu0 %vm792_vm1, %v3595_v38 }
 0x17b   : > { %2989 = vmatprep.mubr.msk.bf16.mxu0 %vm792_vm1, %v3606_v50 }
 0x182   : > { %2990 = vmatmul.mubr.msk.bf16.gmra.mxu0 %vm792_vm1, %v3603_v47 }
 0x23a   : > { %v2987_v1 = vpop.f32.mrf.mxu0 }
 0x23b   : > { %v884_v5 = vmul.f32 0.35355338, %v2987_v1 }
 0x23c   : > { %v851_v2 = vpop.f32.mrf.mxu0 }
 0x23d   : > { %v882_v3 = vmul.f32 0.35355338, %v851_v2  ;;  %v897_v11 = vsel %vm890_vm2, %v884_v5, -inf }
 0x23e   : > { %v2988_v4 = vpop.f32.mrf.mxu0 }
 0x23f   : > { %v891_v6 = vsel %vm890_vm2, %v882_v3, -inf  ;;  %v885_v10 = vmul.f32 0.35355338, %v2988_v4 }
 0x240   : > { %892 = vmax.xlane.f32.xlu0 %v891_v6  ;;  %v854_v7 = vpop.f32.mrf.mxu0 }
 0x241   : > { %v883_v8 = vmul.f32 0.35355338, %v854_v7  ;;  %v900_v17 = vsel %vm890_vm2, %v885_v10, -inf }
 0x242   : > { %v2991_v9 = vpop.f32.mrf.mxu0 }
 0x243   : > { %v894_v12 = vsel %vm890_vm2, %v883_v8, -inf  ;;  %v3646_v16 = vmul.f32 0.35355338, %v2991_v9 }
 0x244   : > { %898 = vmax.xlane.f32.xlu0 %v897_v11  ;;  %895 = vmax.xlane.f32.xlu1 %v894_v12  ;;  %v867_v13 = vpop.f32.mrf.mxu0 }
 0x245   : > { %v3644_v14 = vmul.f32 0.35355338, %v867_v13  ;;  %v909_v22 = vsel %vm890_vm2, %v3646_v16, -inf }
 0x246   : > { %v2992_v15 = vpop.f32.mrf.mxu0 }
 0x247   : > { %v903_v18 = vsel %vm890_vm2, %v3644_v14, -inf  ;;  %v889_v21 = vmul.f32 0.35355338, %v2992_v15 }
 0x248   : > { %901 = vmax.xlane.f32.xlu0 %v900_v17  ;;  %904 = vmax.xlane.f32.xlu1 %v903_v18  ;;  %v870_v19 = vpop.f32.mrf.mxu0 }
 0x249   : > { %v887_v20 = vmul.f32 0.35355338, %v870_v19  ;;  %v912_v24 = vsel %vm890_vm2, %v889_v21, -inf }
 0x24b   : > { %v906_v23 = vsel %vm890_vm2, %v887_v20, -inf }
 0x24c   : > { %910 = vmax.xlane.f32.xlu1 %v909_v22  ;;  %907 = vmax.xlane.f32.xlu0 %v906_v23 }
 0x250   : > { %913 = vmax.xlane.f32.xlu0 %v912_v24 }
 0x2c9   : > { %v893_v36 = vpop.xlane.xlu0 %892 }
 0x2ca   : > { %v915_v44 = vsub.f32 %v882_v3, %v893_v36 }
 0x2cc   : > { %v923_v54 = vmul.f32 1.442695, %v915_v44 }
 0x2cd   : > { %v899_v46 = vpop.xlane.xlu0 %898  ;;  %v896_v48 = vpop.xlane.xlu1 %895 }
 0x2ce   : > { %v917_v49 = vsub.f32 %v884_v5, %v899_v46  ;;  %v916_v56 = vsub.f32 %v883_v8, %v896_v48 }
 0x2d0   : > { %v927_v55 = vmul.f32 1.442695, %v917_v49  ;;  %v925_v60 = vmul.f32 1.442695, %v916_v56 }
 0x2d1   : > { %v902_v57 = vpop.xlane.xlu0 %901  ;;  %v905_v18 = vpop.xlane.xlu1 %904 }
 0x2d2   : > { %3259 = vpow2.f32 %v927_v55  ;;  %v918_v58 = vsub.f32 %v885_v10, %v902_v57 }
 0x2d3   : > { %3261 = vpow2.f32 %v923_v54 }
 0x2d4   : > { %v929_v61 = vmul.f32 1.442695, %v918_v58 }
 0x2d5   : > { %v908_v62 = vpop.xlane.xlu0 %907  ;;  %v911_v19 = vpop.xlane.xlu1 %910 }
 0x2d6   : > { %3263 = vpow2.f32 %v929_v61  ;;  %v920_v63 = vsub.f32 %v887_v20, %v908_v62  ;;  %v921_v20 = vsub.f32 %v3646_v16, %v911_v19 }
 0x2d7   : > { %3265 = vpow2.f32 %v925_v60 }
 0x2d8   : > { %v933_v2 = vmul.f32 1.442695, %v920_v63  ;;  %v935_v22 = vmul.f32 1.442695, %v921_v20 }
 0x2d9   : > { %v914_v0 = vpop.xlane.xlu0 %913 }
 0x2da   : > { %v922_v1 = vsub.f32 %v889_v21, %v914_v0  ;;  %v919_v21 = vsub.f32 %v3644_v14, %v905_v18 }
 0x2dc   : > { %v937_v3 = vmul.f32 1.442695, %v922_v1  ;;  %v931_v23 = vmul.f32 1.442695, %v919_v21 }
 0x2de   : > { %3267 = vpow2.f32 %v937_v3 }
 0x2df   : > { %v3674_v4 = vpop.eup %3259  ;;  %3269 = vpow2.f32 %v933_v2 }
 0x2e0   : > { %v945_v5 = vsel %vm890_vm2, %v3674_v4, 0.0  ;;  %v3262_v6 = vpop.eup %3261  ;;  %3271 = vpow2.f32 %v935_v22 }
 0x2e1   : > { %946 = vadd.xlane.f32.xlu1 %v945_v5  ;;  %v939_v8 = vsel %vm890_vm2, %v3262_v6, 0.0  ;;  %3273 = vpow2.f32 %v931_v23 }
 0x2e3   : > { %v3264_v7 = vpop.eup %3263 }
 0x2e4   : > { %v948_v9 = vsel %vm890_vm2, %v3264_v7, 0.0  ;;  %v3266_v10 = vpop.eup %3265 }
 0x2e5   : > { %940 = vadd.xlane.f32.xlu1 %v939_v8  ;;  %949 = vadd.xlane.f32.xlu0 %v948_v9  ;;  %v942_v11 = vsel %vm890_vm2, %v3266_v10, 0.0 }
 0x2e9   : > { %943 = vadd.xlane.f32.xlu0 %v942_v11 }
 0x2eb   : > { %v3681_v12 = vpop.eup %3267 }
 0x2ec   : > { %v960_v13 = vsel %vm890_vm2, %v3681_v12, 0.0  ;;  %v3685_v15 = vpop.eup %3269 }
 0x2ed   : > { %961 = vadd.xlane.f32.xlu0 %v960_v13  ;;  %v954_v17 = vsel %vm890_vm2, %v3685_v15, 0.0  ;;  %v3272_v24 = vpop.eup %3271 }
 0x2ee   : > { %v957_v25 = vsel %vm890_vm2, %v3272_v24, 0.0  ;;  %v3274_v26 = vpop.eup %3273 }
 0x2ef   : > { %v951_v14 = vsel %vm890_vm2, %v3274_v26, 0.0 }
 0x2f1   : > { %955 = vadd.xlane.f32.xlu0 %v954_v17 }
 0x2f6   : > { %1078 = vrot.lane.b32.xlu1 %v3603_v47, %s3436_s17 }
 0x307   : > { %1076 = vrot.lane.b32.xlu0 %v3606_v50, %s3436_s17 }
 0x30b   : > { %1064 = vrot.lane.b32.xlu0 %v3597_v41, %s3437_s18 }
 0x30f   : > { %1068 = vrot.lane.b32.xlu0 %v3606_v50, %s3437_s18 }
 0x31a   : > { %958 = vadd.xlane.f32.xlu1 %v957_v25 }
 0x31e   : > { %952 = vadd.xlane.f32.xlu1 %v951_v14 }
 0x32f   : > { %1074 = vrot.lane.b32.xlu1 %v3595_v38, %s3436_s17 }
 0x333   : > { %1072 = vrot.lane.b32.xlu1 %v3597_v41, %s3436_s17  ;;  %s3444_s17 = smov 24  }
 0x337   : > { %1066 = vrot.lane.b32.xlu1 %v3595_v38, %s3437_s18 }
 0x33b   : > { %1070 = vrot.lane.b32.xlu1 %v3603_v47, %s3437_s18 }
 0x33f   : > { %1279 = vrot.lane.b32.xlu1 %v3658_v42, %s3437_s18 }
 0x36a   : > { %v947_v16 = vpop.xlane.xlu1 %946 }
 0x36e   : > { %v941_v27 = vpop.xlane.xlu1 %940  ;;  %v950_v28 = vpop.xlane.xlu0 %949 }
 0x36f   : > { %3275 = vrcp.f32 %v950_v28 }
 0x370   : > { %3277 = vrcp.f32 %v941_v27 }
 0x371   : > { %3279 = vrcp.f32 %v947_v16 }
 0x372   : > { %v1079_v29 = vpop.permute.xlu1 %1078  ;;  %v944_v30 = vpop.xlane.xlu0 %943 }
 0x373   : > { %3281 = vrcp.f32 %v944_v30  ;;  %3157 = vmatprep.subr.msk.bf16.mxu1 %vm792_vm1, %v1079_v29  ;;  %v1102_v48 = vsel %vm792_vm1, %v1079_v29, 0 }
 0x376   : > { %v962_v31 = vpop.xlane.xlu0 %961 }
 0x37a   : > { %v956_v37 = vpop.xlane.xlu0 %955 }
 0x37c   : > { %v3276_v32 = vpop.eup %3275 }
 0x37d   : > { %v3278_v33 = vpop.eup %3277  ;;  %v974_v36 = vmul.f32 %v3276_v32, %v3264_v7 }
 0x37e   : > { %v3280_v34 = vpop.eup %3279  ;;  %v971_v39 = vmul.f32 %v3278_v33, %v3262_v6  ;;  %v1077_v49 = vpop.permute.xlu0 %1076 }
 0x37f   : > { %v973_v43 = vmul.f32 %v3280_v34, %v3674_v4  ;;  %v1099_v51 = vsel %vm792_vm1, %v1077_v49, 0 }
 0x380   : > { %v3282_v35 = vpop.eup %3281 }
 0x381   : > { %v972_v40 = vmul.f32 %v3282_v35, %v3266_v10  ;;  %v980_v46 = vpack.c.bf16 %v974_v36, %v973_v43 }
 0x382   : > { %v1065_v8 = vpop.permute.xlu0 %1064 }
 0x383   : > { %v979_v44 = vpack.c.bf16 %v972_v40, %v971_v39 }
 0x385   : > { %3001 = vmatprep.mubr.msk.bf16.mxu1 %vm890_vm2, %v979_v44 }
 0x386   : > { %3002 = vmatmul.mubr.msk.bf16.vlgmr.msra.gmra.mxu1 %vm890_vm2, %v980_v46  ;;  %v1069_v10 = vpop.permute.xlu0 %1068 }
 0x387   : > { %3010 = vmatpush3.bf16.xpose.msra.mxu1 %v1102_v48 }
 0x388   : > { %3158 = vmatprep.subr.msk.bf16.mxu1 %vm792_vm1, %v1077_v49 }
 0x38f   : > { %3012 = vmatpush3.bf16.xpose.msra.mxu1 %v1099_v51 }
 0x3a3   : > { %v959_v53 = vpop.xlane.xlu1 %958 }
 0x3a4   : > { %3283 = vrcp.f32 %v959_v53 }
 0x3a5   : > { %3285 = vrcp.f32 %v956_v37 }
 0x3a6   : > { %3287 = vrcp.f32 %v962_v31 }
 0x3a7   : > { %v953_v54 = vpop.xlane.xlu1 %952 }
 0x3a8   : > { %3289 = vrcp.f32 %v953_v54 }
 0x3ab   : > { %v1075_v55 = vpop.permute.xlu1 %1074 }
 0x3ac   : > { %3159 = vmatprep.subr.msk.bf16.mxu1 %vm792_vm1, %v1075_v55  ;;  %v1096_v56 = vsel %vm792_vm1, %v1075_v55, 0 }
 0x3ad   : > { %3014 = vmatpush3.bf16.xpose.msra.mxu1 %v1096_v56 }
 0x3af   : > { %v1073_v57 = vpop.permute.xlu1 %1072 }
 0x3b0   : > { %3160 = vmatprep.subr.msk.bf16.mxu1 %vm792_vm1, %v1073_v57  ;;  %v1093_v63 = vsel %vm792_vm1, %v1073_v57, 0 }
 0x3b1   : > { %v3284_v58 = vpop.eup %3283 }
 0x3b2   : > { %v3286_v60 = vpop.eup %3285  ;;  %v977_v1 = vmul.f32 %v3284_v58, %v3272_v24 }
 0x3b3   : > { %v1067_v61 = vpop.permute.xlu1 %1066  ;;  %v3288_v62 = vpop.eup %3287  ;;  %v976_v3 = vmul.f32 %v3286_v60, %v3685_v15 }
 0x3b4   : > { %v978_v5 = vmul.f32 %v3288_v62, %v3681_v12 }
 0x3b5   : > { %v3290_v0 = vpop.eup %3289  ;;  %3016 = vmatpush3.bf16.xpose.msra.mxu1 %v1093_v63 }
 0x3b6   : > { %v975_v2 = vmul.f32 %v3290_v0, %v3274_v26  ;;  %v982_v7 = vpack.c.bf16 %v978_v5, %v977_v1 }
 0x3b7   : > { %v1071_v4 = vpop.permute.xlu1 %1070 }
 0x3b8   : > { %v981_v6 = vpack.c.bf16 %v976_v3, %v975_v2 }
 0x3ba   : > { %3005 = vmatprep.mubr.msk.bf16.mxu1 %vm890_vm2, %v981_v6 }
 0x3bb   : > { %3006 = vmatmul.mubr.msk.bf16.gmra.mxu1 %vm890_vm2, %v982_v7  ;;  %v1280_v9 = vpop.permute.xlu1 %1279 }
 0x3bc   : > { %3017 = vmatprep.mubr.msk.bf16.mxu1 %vm792_vm1, %v1065_v8  ;;  %3025 = vmatprep.subr.bf16.mxu0 %v1280_v9 }
 0x3bd   : > { %3026 = vmatpush3.bf16.msra.mxu0 %v1280_v9 }
 0x3c3   : > { %3018 = vmatmul.mubr.msk.bf16.vlgmr.msra.gmra.mxu1 %vm792_vm1, %v1067_v61 }
 0x3c4   : > { %3021 = vmatprep.mubr.msk.bf16.mxu1 %vm792_vm1, %v1069_v10 }
 0x3cb   : > { %3022 = vmatmul.mubr.msk.bf16.gmra.mxu1 %vm792_vm1, %v1071_v4 }
 0x446   : > { %v3726_v11 = vpop.f32.mrf.mxu1 }
 0x448   : > { %v3728_v12 = vpop.f32.mrf.mxu1 }
 0x44a   : > { %v3730_v13 = vpop.f32.mrf.mxu1 }
 0x44c   : > { %v3732_v15 = vpop.f32.mrf.mxu1 }
 0x47b   : > { %v3734_v17 = vpop.f32.mrf.mxu1 }
 0x47d   : > { %v3736_v18 = vpop.f32.mrf.mxu1 }
 0x47f   : > { %v3738_v19 = vpop.f32.mrf.mxu1 }
 0x481   : > { %v3740_v20 = vpop.f32.mrf.mxu1 }
 0x483   : > { %v3019_v21 = vpop.f32.mrf.mxu1 }
 0x484   : > { %v1171_v22 = vmul.f32 0.35355338, %v3019_v21 }
 0x485   : > { %v1138_v23 = vpop.f32.mrf.mxu1 }
 0x486   : > { %v1169_v24 = vmul.f32 0.35355338, %v1138_v23  ;;  %v1183_v25 = vsel %vm890_vm2, %v1171_v22, -inf }
 0x487   : > { %1184 = vmax.xlane.f32.xlu0 %v1183_v25  ;;  %v3020_v26 = vpop.f32.mrf.mxu1 }
 0x488   : > { %v1172_v16 = vmul.f32 0.35355338, %v3020_v26  ;;  %v1177_v28 = vsel %vm890_vm2, %v1169_v24, -inf }
 0x489   : > { %v1141_v14 = vpop.f32.mrf.mxu1 }
 0x48a   : > { %v1170_v27 = vmul.f32 0.35355338, %v1141_v14  ;;  %v1186_v33 = vsel %vm890_vm2, %v1172_v16, -inf }
 0x48b   : > { %1178 = vmax.xlane.f32.xlu0 %v1177_v28  ;;  %v3023_v29 = vpop.f32.mrf.mxu1 }
 0x48c   : > { %v3744_v30 = vmul.f32 0.35355338, %v3023_v29  ;;  %v1180_v31 = vsel %vm890_vm2, %v1170_v27, -inf }
 0x48d   : > { %1181 = vmax.xlane.f32.xlu1 %v1180_v31  ;;  %v1154_v32 = vpop.f32.mrf.mxu1 }
 0x48e   : > { %v1173_v35 = vmul.f32 0.35355338, %v1154_v32  ;;  %v1195_v37 = vsel %vm890_vm2, %v3744_v30, -inf }
 0x48f   : > { %1187 = vmax.xlane.f32.xlu0 %v1186_v33  ;;  %v3024_v34 = vpop.f32.mrf.mxu1 }
 0x490   : > { %v1176_v36 = vmul.f32 0.35355338, %v3024_v34  ;;  %v1189_v44 = vsel %vm890_vm2, %v1173_v35, -inf }
 0x491   : > { %1196 = vmax.xlane.f32.xlu1 %v1195_v37  ;;  %v1157_v39 = vpop.f32.mrf.mxu1 }
 0x492   : > { %v1174_v40 = vmul.f32 0.35355338, %v1157_v39  ;;  %v1198_v43 = vsel %vm890_vm2, %v1176_v36, -inf }
 0x493   : > { %1199 = vmax.xlane.f32.xlu0 %v1198_v43 }
 0x494   : > { %v1192_v46 = vsel %vm890_vm2, %v1174_v40, -inf }
 0x495   : > { %1190 = vmax.xlane.f32.xlu1 %v1189_v44 }
 0x497   : > { %1193 = vmax.xlane.f32.xlu0 %v1192_v46 }
 0x4a6   : > { %1275 = vrot.lane.b32.xlu1 %v3664_v52, %s3437_s18 }
 0x4ad   : > { %1277 = vrot.lane.b32.xlu0 %v3660_v45, %s3437_s18 }
 0x510   : > { %v1185_v48 = vpop.xlane.xlu0 %1184 }
 0x511   : > { %v1203_v49 = vsub.f32 %v1171_v22, %v1185_v48 }
 0x513   : > { %v1213_v51 = vmul.f32 1.442695, %v1203_v49 }
 0x514   : > { %v1179_v53 = vpop.xlane.xlu0 %1178 }
 0x515   : > { %3291 = vpow2.f32 %v1213_v51  ;;  %v1201_v54 = vsub.f32 %v1169_v24, %v1179_v53 }
 0x516   : > { %v1182_v55 = vpop.xlane.xlu1 %1181 }
 0x517   : > { %v1209_v56 = vmul.f32 1.442695, %v1201_v54  ;;  %v1202_v57 = vsub.f32 %v1170_v27, %v1182_v55 }
 0x518   : > { %v1188_v58 = vpop.xlane.xlu0 %1187 }
 0x519   : > { %3293 = vpow2.f32 %v1209_v56  ;;  %v1204_v60 = vsub.f32 %v1172_v16, %v1188_v58  ;;  %v1211_v62 = vmul.f32 1.442695, %v1202_v57 }
 0x51a   : > { %v1197_v61 = vpop.xlane.xlu1 %1196 }
 0x51b   : > { %v1215_v63 = vmul.f32 1.442695, %v1204_v60  ;;  %v1207_v24 = vsub.f32 %v3744_v30, %v1197_v61 }
 0x51c   : > { %v1200_v0 = vpop.xlane.xlu0 %1199 }
 0x51d   : > { %3295 = vpow2.f32 %v1215_v63  ;;  %v1208_v25 = vsub.f32 %v1176_v36, %v1200_v0  ;;  %v1221_v14 = vmul.f32 1.442695, %v1207_v24 }
 0x51e   : > { %3297 = vpow2.f32 %v1211_v62  ;;  %v1191_v1 = vpop.xlane.xlu1 %1190 }
 0x51f   : > { %v1205_v23 = vsub.f32 %v1173_v35, %v1191_v1  ;;  %v1223_v16 = vmul.f32 1.442695, %v1208_v25 }
 0x520   : > { %v1194_v2 = vpop.xlane.xlu0 %1193 }
 0x521   : > { %v1217_v26 = vmul.f32 1.442695, %v1205_v23  ;;  %v1206_v27 = vsub.f32 %v1174_v40, %v1194_v2 }
 0x522   : > { %v3757_v3 = vpop.eup %3291  ;;  %v1276_v7 = vpop.permute.xlu1 %1275 }
 0x523   : > { %v1231_v4 = vsel %vm890_vm2, %v3757_v3, 0.0  ;;  %3299 = vpow2.f32 %v1217_v26  ;;  %v1219_v28 = vmul.f32 1.442695, %v1206_v27 }
 0x524   : > { %1232 = vadd.xlane.f32.xlu1 %v1231_v4  ;;  %v1278_v5 = vpop.permute.xlu0 %1277  ;;  %3301 = vpow2.f32 %v1221_v14 }
 0x525   : > { %3027 = vmatprep.subr.bf16.mxu0 %v1278_v5  ;;  %3303 = vpow2.f32 %v1223_v16 }
 0x526   : > { %v3761_v6 = vpop.eup %3293  ;;  %3028 = vmatpush3.bf16.msra.mxu0 %v1278_v5  ;;  %3305 = vpow2.f32 %v1219_v28 }
 0x527   : > { %3029 = vmatprep.subr.bf16.mxu0 %v1276_v7  ;;  %v1225_v8 = vsel %vm890_vm2, %v3761_v6, 0.0 }
 0x528   : > { %1226 = vadd.xlane.f32.xlu1 %v1225_v8 }
 0x52a   : > { %v3296_v9 = vpop.eup %3295  ;;  %3030 = vmatpush3.bf16.msra.mxu0 %v1276_v7 }
 0x52b   : > { %v1234_v10 = vsel %vm890_vm2, %v3296_v9, 0.0  ;;  %v3298_v21 = vpop.eup %3297 }
 0x52c   : > { %1235 = vadd.xlane.f32.xlu0 %v1234_v10  ;;  %v1228_v22 = vsel %vm890_vm2, %v3298_v21, 0.0 }
 0x530   : > { %1229 = vadd.xlane.f32.xlu0 %v1228_v22  ;;  %v3774_v29 = vpop.eup %3299 }
 0x531   : > { %v3776_v31 = vpop.eup %3301  ;;  %v1237_v32 = vsel %vm890_vm2, %v3774_v29, 0.0 }
 0x532   : > { %v3780_v33 = vpop.eup %3303  ;;  %v1243_v30 = vsel %vm890_vm2, %v3776_v31, 0.0 }
 0x533   : > { %v1246_v34 = vsel %vm890_vm2, %v3780_v33, 0.0  ;;  %v3786_v35 = vpop.eup %3305 }
 0x534   : > { %v1240_v36 = vsel %vm890_vm2, %v3786_v35, 0.0 }
 0x539   : > { %1376 = vrot.lane.b32.xlu1 %v3603_v47, %s3438_s19 }
 0x53d   : > { %1374 = vrot.lane.b32.xlu1 %v3606_v50, %s3438_s19 }
 0x546   : > { %1273 = vrot.lane.b32.xlu0 %v3668_v59, %s3437_s18 }
 0x561   : > { %1238 = vadd.xlane.f32.xlu1 %v1237_v32 }
 0x565   : > { %1244 = vadd.xlane.f32.xlu0 %v1243_v30  ;;  %1247 = vadd.xlane.f32.xlu1 %v1246_v34 }
 0x569   : > { %1241 = vadd.xlane.f32.xlu0 %v1240_v36 }
 0x576   : > { %1370 = vrot.lane.b32.xlu1 %v3597_v41, %s3438_s19 }
 0x57a   : > { %1364 = vrot.lane.b32.xlu1 %v3595_v38, %s3439_s20 }
 0x57e   : > { %1368 = vrot.lane.b32.xlu1 %v3603_v47, %s3439_s20 }
 0x57f   : > { %1372 = vrot.lane.b32.xlu0 %v3595_v38, %s3438_s19 }
 0x582   : > { %1573 = vrot.lane.b32.xlu1 %v3658_v42, %s3439_s20 }
 0x583   : > { %1362 = vrot.lane.b32.xlu0 %v3597_v41, %s3439_s20 }
 0x587   : > { %1366 = vrot.lane.b32.xlu0 %v3606_v50, %s3439_s20 }
 0x5ad   : > { %v1233_v37 = vpop.xlane.xlu1 %1232 }
 0x5b1   : > { %v1227_v39 = vpop.xlane.xlu1 %1226 }
 0x5b5   : > { %v1236_v40 = vpop.xlane.xlu0 %1235  ;;  %v1377_v46 = vpop.permute.xlu1 %1376 }
 0x5b6   : > { %3307 = vrcp.f32 %v1236_v40  ;;  %v1400_v61 = vsel %vm792_vm1, %v1377_v46, 0 }
 0x5b7   : > { %3309 = vrcp.f32 %v1227_v39 }
 0x5b8   : > { %3311 = vrcp.f32 %v1233_v37 }
 0x5b9   : > { %v1230_v43 = vpop.xlane.xlu0 %1229  ;;  %v1375_v62 = vpop.permute.xlu1 %1374 }
 0x5ba   : > { %3313 = vrcp.f32 %v1230_v43  ;;  %v1397_v63 = vsel %vm792_vm1, %v1375_v62, 0 }
 0x5bd   : > { %v1274_v44 = vpop.permute.xlu0 %1273 }
 0x5be   : > { %3031 = vmatprep.subr.bf16.mxu0 %v1274_v44 }
 0x5bf   : > { %3032 = vmatpush3.bf16.msra.mxu0 %v1274_v44 }
 0x5c0   : > { %3161 = vmatprep.subr.msk.bf16.mxu0 %vm792_vm1, %v1377_v46 }
 0x5c3   : > { %v3308_v48 = vpop.eup %3307 }
 0x5c4   : > { %v3310_v49 = vpop.eup %3309  ;;  %v1260_v54 = vmul.f32 %v3308_v48, %v3296_v9 }
 0x5c5   : > { %v3312_v51 = vpop.eup %3311  ;;  %v1257_v55 = vmul.f32 %v3310_v49, %v3761_v6 }
 0x5c6   : > { %v1259_v57 = vmul.f32 %v3312_v51, %v3757_v3 }
 0x5c7   : > { %v3314_v53 = vpop.eup %3313 }
 0x5c8   : > { %v1258_v56 = vmul.f32 %v3314_v53, %v3298_v21  ;;  %v1266_v60 = vpack.c.bf16 %v1260_v54, %v1259_v57 }
 0x5ca   : > { %v1265_v58 = vpack.c.bf16 %v1258_v56, %v1257_v55 }
 0x5cc   : > { %3033 = vmatprep.mubr.msk.bf16.mxu0 %vm890_vm2, %v1265_v58 }
 0x5cd   : > { %3034 = vmatmul.mubr.msk.bf16.vlgmr.msra.gmra.mxu0 %vm890_vm2, %v1266_v60 }
 0x5ce   : > { %3042 = vmatpush3.bf16.xpose.msra.mxu0 %v1400_v61 }
 0x5cf   : > { %3162 = vmatprep.subr.msk.bf16.mxu0 %vm792_vm1, %v1375_v62 }
 0x5d6   : > { %3044 = vmatpush3.bf16.xpose.msra.mxu0 %v1397_v63 }
 0x5ea   : > { %v1239_v0 = vpop.xlane.xlu1 %1238 }
 0x5ee   : > { %v1248_v1 = vpop.xlane.xlu1 %1247  ;;  %v1245_v2 = vpop.xlane.xlu0 %1244 }
 0x5ef   : > { %3315 = vrcp.f32 %v1248_v1 }
 0x5f0   : > { %3317 = vrcp.f32 %v1245_v2 }
 0x5f1   : > { %3319 = vrcp.f32 %v1239_v0 }
 0x5f2   : > { %v1371_v3 = vpop.permute.xlu1 %1370  ;;  %v1242_v4 = vpop.xlane.xlu0 %1241 }
 0x5f3   : > { %3321 = vrcp.f32 %v1242_v4  ;;  %v1391_v23 = vsel %vm792_vm1, %v1371_v3, 0 }
 0x5f6   : > { %v1365_v5 = vpop.permute.xlu1 %1364  ;;  %v1373_v6 = vpop.permute.xlu0 %1372 }
 0x5f7   : > { %3163 = vmatprep.subr.msk.bf16.mxu0 %vm792_vm1, %v1373_v6  ;;  %v1394_v7 = vsel %vm792_vm1, %v1373_v6, 0 }
 0x5f8   : > { %3046 = vmatpush3.bf16.xpose.msra.mxu0 %v1394_v7 }
 0x5f9   : > { %3164 = vmatprep.subr.msk.bf16.mxu0 %vm792_vm1, %v1371_v3 }
 0x5fa   : > { %v1369_v8 = vpop.permute.xlu1 %1368  ;;  %v1363_v32 = vpop.permute.xlu0 %1362 }
 0x5fc   : > { %v3316_v9 = vpop.eup %3315 }
 0x5fd   : > { %v3318_v10 = vpop.eup %3317  ;;  %v1264_v26 = vmul.f32 %v3316_v9, %v3780_v33 }
 0x5fe   : > { %v3320_v21 = vpop.eup %3319  ;;  %v1574_v22 = vpop.permute.xlu1 %1573  ;;  %v1263_v25 = vmul.f32 %v3318_v10, %v3776_v31 }
 0x5ff   : > { %3057 = vmatprep.subr.bf16.mxu1 %v1574_v22  ;;  %v1261_v14 = vmul.f32 %v3320_v21, %v3774_v29  ;;  %v1367_v30 = vpop.permute.xlu0 %1366 }
 0x600   : > { %v3322_v24 = vpop.eup %3321  ;;  %3048 = vmatpush3.bf16.xpose.msra.mxu0 %v1391_v23  ;;  %3058 = vmatpush3.bf16.msra.mxu1 %v1574_v22  ;;  %v1268_v28 = vpack.c.bf16 %v1264_v26, %v1263_v25 }
 0x601   : > { %v1262_v16 = vmul.f32 %v3322_v24, %v3786_v35 }
 0x603   : > { %v1267_v27 = vpack.c.bf16 %v1262_v16, %v1261_v14 }
 0x605   : > { %3037 = vmatprep.mubr.msk.bf16.mxu0 %vm890_vm2, %v1267_v27 }
 0x606   : > { %3038 = vmatmul.mubr.msk.bf16.gmra.mxu0 %vm890_vm2, %v1268_v28 }
 0x607   : > { %3049 = vmatprep.mubr.msk.bf16.mxu0 %vm792_vm1, %v1363_v32 }
 0x60e   : > { %3050 = vmatmul.mubr.msk.bf16.vlgmr.msra.gmra.mxu0 %vm792_vm1, %v1365_v5 }
 0x60f   : > { %3053 = vmatprep.mubr.msk.bf16.mxu0 %vm792_vm1, %v1367_v30 }
 0x616   : > { %3054 = vmatmul.mubr.msk.bf16.gmra.mxu0 %vm792_vm1, %v1369_v8 }
 0x68d   : > { %v3826_v31 = vpop.f32.mrf.mxu0 }
 0x68f   : > { %v3828_v29 = vpop.f32.mrf.mxu0 }
 0x691   : > { %v3830_v33 = vpop.f32.mrf.mxu0 }
 0x692   : > { %v3192_v34 = vpack.i.bf16 %v3830_v33, %v3826_v31 }
 0x693   : > { %v3834_v35 = vpop.f32.mrf.mxu0 }
 0x694   : > { %v3187_v36 = vpack.i.bf16 %v3834_v35, %v3828_v29 }
 0x6c6   : > { %v3838_v37 = vpop.f32.mrf.mxu0 }
 0x6c8   : > { %v3840_v39 = vpop.f32.mrf.mxu0 }
 0x6ca   : > { %v3842_v40 = vpop.f32.mrf.mxu0 }
 0x6cb   : > { %v3212_v43 = vpack.i.bf16 %v3842_v40, %v3838_v37 }
 0x6cc   : > { %v3846_v44 = vpop.f32.mrf.mxu0 }
 0x6cd   : > { %v3207_v46 = vpack.i.bf16 %v3846_v44, %v3840_v39 }
 0x6ce   : > { %v3051_v48 = vpop.f32.mrf.mxu0 }
 0x6cf   : > { %v1469_v49 = vmul.f32 0.35355338, %v3051_v48 }
 0x6d0   : > { %v1436_v51 = vpop.f32.mrf.mxu0 }
 0x6d1   : > { %v1467_v53 = vmul.f32 0.35355338, %v1436_v51  ;;  %v1481_v54 = vsel %vm890_vm2, %v1469_v49, -inf }
 0x6d2   : > { %1482 = vmax.xlane.f32.xlu0 %v1481_v54  ;;  %v3052_v55 = vpop.f32.mrf.mxu0 }
 0x6d3   : > { %v1470_v57 = vmul.f32 0.35355338, %v3052_v55  ;;  %v1475_v60 = vsel %vm890_vm2, %v1467_v53, -inf }
 0x6d4   : > { %v1439_v56 = vpop.f32.mrf.mxu0 }
 0x6d5   : > { %v1468_v58 = vmul.f32 0.35355338, %v1439_v56  ;;  %v1484_v1 = vsel %vm890_vm2, %v1470_v57, -inf }
 0x6d6   : > { %1476 = vmax.xlane.f32.xlu0 %v1475_v60  ;;  %v3055_v61 = vpop.f32.mrf.mxu0 }
 0x6d7   : > { %v3852_v62 = vmul.f32 0.35355338, %v3055_v61  ;;  %v1478_v63 = vsel %vm890_vm2, %v1468_v58, -inf }
 0x6d8   : > { %1479 = vmax.xlane.f32.xlu1 %v1478_v63  ;;  %v1452_v0 = vpop.f32.mrf.mxu0 }
 0x6d9   : > { %v1471_v3 = vmul.f32 0.35355338, %v1452_v0  ;;  %v1493_v5 = vsel %vm890_vm2, %v3852_v62, -inf }
 0x6da   : > { %1485 = vmax.xlane.f32.xlu0 %v1484_v1  ;;  %v3056_v2 = vpop.f32.mrf.mxu0 }
 0x6db   : > { %v1474_v4 = vmul.f32 0.35355338, %v3056_v2  ;;  %v1487_v9 = vsel %vm890_vm2, %v1471_v3, -inf }
 0x6dc   : > { %1494 = vmax.xlane.f32.xlu1 %v1493_v5  ;;  %v1455_v6 = vpop.f32.mrf.mxu0 }
 0x6dd   : > { %v1472_v7 = vmul.f32 0.35355338, %v1455_v6  ;;  %v1496_v8 = vsel %vm890_vm2, %v1474_v4, -inf }
 0x6de   : > { %1497 = vmax.xlane.f32.xlu0 %v1496_v8 }
 0x6df   : > { %v1490_v10 = vsel %vm890_vm2, %v1472_v7, -inf }
 0x6e0   : > { %1488 = vmax.xlane.f32.xlu1 %v1487_v9 }
 0x6e2   : > { %1491 = vmax.xlane.f32.xlu0 %v1490_v10 }
 0x6f1   : > { %1569 = vrot.lane.b32.xlu1 %v3664_v52, %s3439_s20 }
 0x6f8   : > { %1571 = vrot.lane.b32.xlu0 %v3660_v45, %s3439_s20 }
 0x75b   : > { %v1483_v21 = vpop.xlane.xlu0 %1482 }
 0x75c   : > { %v1501_v22 = vsub.f32 %v1469_v49, %v1483_v21 }
 0x75e   : > { %v1511_v23 = vmul.f32 1.442695, %v1501_v22 }
 0x75f   : > { %v1477_v24 = vpop.xlane.xlu0 %1476 }
 0x760   : > { %3323 = vpow2.f32 %v1511_v23  ;;  %v1499_v25 = vsub.f32 %v1467_v53, %v1477_v24 }
 0x761   : > { %v1480_v26 = vpop.xlane.xlu1 %1479 }
 0x762   : > { %v1507_v14 = vmul.f32 1.442695, %v1499_v25  ;;  %v1500_v16 = vsub.f32 %v1468_v58, %v1480_v26 }
 0x763   : > { %v1486_v27 = vpop.xlane.xlu0 %1485 }
 0x764   : > { %3325 = vpow2.f32 %v1507_v14  ;;  %v1502_v28 = vsub.f32 %v1470_v57, %v1486_v27  ;;  %v1509_v30 = vmul.f32 1.442695, %v1500_v16 }
 0x765   : > { %v1495_v32 = vpop.xlane.xlu1 %1494 }
 0x766   : > { %v1513_v48 = vmul.f32 1.442695, %v1502_v28  ;;  %v1505_v5 = vsub.f32 %v3852_v62, %v1495_v32 }
 0x767   : > { %v1498_v51 = vpop.xlane.xlu0 %1497 }
 0x768   : > { %3327 = vpow2.f32 %v1513_v48  ;;  %v1506_v6 = vsub.f32 %v1474_v4, %v1498_v51  ;;  %v1519_v9 = vmul.f32 1.442695, %v1505_v5 }
 0x769   : > { %3329 = vpow2.f32 %v1509_v30  ;;  %v1489_v54 = vpop.xlane.xlu1 %1488 }
 0x76a   : > { %v1503_v2 = vsub.f32 %v1471_v3, %v1489_v54  ;;  %v1521_v10 = vmul.f32 1.442695, %v1506_v6 }
 0x76b   : > { %v1492_v55 = vpop.xlane.xlu0 %1491 }
 0x76c   : > { %v1515_v8 = vmul.f32 1.442695, %v1503_v2  ;;  %v1504_v21 = vsub.f32 %v1472_v7, %v1492_v55 }
 0x76d   : > { %v3865_v56 = vpop.eup %3323  ;;  %v1570_v60 = vpop.permute.xlu1 %1569 }
 0x76e   : > { %v1529_v49 = vsel %vm890_vm2, %v3865_v56, 0.0  ;;  %3331 = vpow2.f32 %v1515_v8  ;;  %v1517_v22 = vmul.f32 1.442695, %v1504_v21 }
 0x76f   : > { %1530 = vadd.xlane.f32.xlu1 %v1529_v49  ;;  %v1572_v53 = vpop.permute.xlu0 %1571  ;;  %3333 = vpow2.f32 %v1519_v9 }
 0x770   : > { %3059 = vmatprep.subr.bf16.mxu1 %v1572_v53  ;;  %3335 = vpow2.f32 %v1521_v10 }
 0x771   : > { %v3869_v58 = vpop.eup %3325  ;;  %3060 = vmatpush3.bf16.msra.mxu1 %v1572_v53  ;;  %3337 = vpow2.f32 %v1517_v22 }
 0x772   : > { %3061 = vmatprep.subr.bf16.mxu1 %v1570_v60  ;;  %v1523_v57 = vsel %vm890_vm2, %v3869_v58, 0.0 }
 0x773   : > { %1524 = vadd.xlane.f32.xlu1 %v1523_v57 }
 0x775   : > { %v3328_v61 = vpop.eup %3327  ;;  %3062 = vmatpush3.bf16.msra.mxu1 %v1570_v60 }
 0x776   : > { %v1532_v63 = vsel %vm890_vm2, %v3328_v61, 0.0  ;;  %v3330_v0 = vpop.eup %3329 }
 0x777   : > { %1533 = vadd.xlane.f32.xlu0 %v1532_v63  ;;  %v1526_v1 = vsel %vm890_vm2, %v3330_v0, 0.0 }
 0x77b   : > { %1527 = vadd.xlane.f32.xlu0 %v1526_v1  ;;  %v3882_v23 = vpop.eup %3331 }
 0x77c   : > { %v3884_v24 = vpop.eup %3333  ;;  %v1535_v25 = vsel %vm890_vm2, %v3882_v23, 0.0 }
 0x77d   : > { %v3888_v3 = vpop.eup %3335  ;;  %v1541_v62 = vsel %vm890_vm2, %v3884_v24, 0.0 }
 0x77e   : > { %v1544_v4 = vsel %vm890_vm2, %v3888_v3, 0.0  ;;  %v3894_v7 = vpop.eup %3337 }
 0x77f   : > { %v1538_v26 = vsel %vm890_vm2, %v3894_v7, 0.0 }
 0x784   : > { %1670 = vrot.lane.b32.xlu1 %v3603_v47, %s3440_s22 }
 0x788   : > { %1668 = vrot.lane.b32.xlu1 %v3606_v50, %s3440_s22 }
 0x791   : > { %1567 = vrot.lane.b32.xlu0 %v3668_v59, %s3439_s20 }
 0x7ac   : > { %1536 = vadd.xlane.f32.xlu1 %v1535_v25 }
 0x7b0   : > { %1542 = vadd.xlane.f32.xlu0 %v1541_v62  ;;  %1545 = vadd.xlane.f32.xlu1 %v1544_v4 }
 0x7b4   : > { %1539 = vadd.xlane.f32.xlu0 %v1538_v26 }
 0x7c1   : > { %1664 = vrot.lane.b32.xlu1 %v3597_v41, %s3440_s22 }
 0x7c5   : > { %1658 = vrot.lane.b32.xlu1 %v3595_v38, %s3441_s23 }
 0x7c9   : > { %1662 = vrot.lane.b32.xlu1 %v3603_v47, %s3441_s23 }
 0x7ca   : > { %1666 = vrot.lane.b32.xlu0 %v3595_v38, %s3440_s22 }
 0x7ce   : > { %1656 = vrot.lane.b32.xlu0 %v3597_v41, %s3441_s23 }
 0x7d2   : > { %1660 = vrot.lane.b32.xlu0 %v3606_v50, %s3441_s23 }
 0x7f8   : > { %v1531_v14 = vpop.xlane.xlu1 %1530 }
 0x7fc   : > { %v1525_v16 = vpop.xlane.xlu1 %1524 }
 0x800   : > { %v1534_v27 = vpop.xlane.xlu0 %1533  ;;  %v1671_v47 = vpop.permute.xlu1 %1670 }
 0x801   : > { %3339 = vrcp.f32 %v1534_v27  ;;  %v1694_v60 = vsel %vm792_vm1, %v1671_v47, 0 }
 0x802   : > { %3341 = vrcp.f32 %v1525_v16 }
 0x803   : > { %3343 = vrcp.f32 %v1531_v14 }
 0x804   : > { %v1528_v28 = vpop.xlane.xlu0 %1527  ;;  %v1669_v57 = vpop.permute.xlu1 %1668 }
 0x805   : > { %3345 = vrcp.f32 %v1528_v28  ;;  %v1691_v63 = vsel %vm792_vm1, %v1669_v57, 0 }
 0x808   : > { %v1568_v32 = vpop.permute.xlu0 %1567 }
 0x809   : > { %3063 = vmatprep.subr.bf16.mxu1 %v1568_v32 }
 0x80a   : > { %3064 = vmatpush3.bf16.msra.mxu1 %v1568_v32 }
 0x80b   : > { %3165 = vmatprep.subr.msk.bf16.mxu1 %vm792_vm1, %v1671_v47 }
 0x80e   : > { %v3340_v38 = vpop.eup %3339 }
 0x80f   : > { %v3342_v30 = vpop.eup %3341  ;;  %v1558_v51 = vmul.f32 %v3340_v38, %v3328_v61 }
 0x810   : > { %v3344_v41 = vpop.eup %3343  ;;  %v1555_v50 = vmul.f32 %v3342_v30, %v3869_v58 }
 0x811   : > { %v1557_v55 = vmul.f32 %v3344_v41, %v3865_v56 }
 0x812   : > { %v3346_v48 = vpop.eup %3345 }
 0x813   : > { %v1556_v54 = vmul.f32 %v3346_v48, %v3330_v0  ;;  %v1564_v53 = vpack.c.bf16 %v1558_v51, %v1557_v55 }
 0x815   : > { %v1563_v49 = vpack.c.bf16 %v1556_v54, %v1555_v50 }
 0x817   : > { %3065 = vmatprep.mubr.msk.bf16.mxu1 %vm890_vm2, %v1563_v49 }
 0x818   : > { %3066 = vmatmul.mubr.msk.bf16.vlgmr.msra.gmra.mxu1 %vm890_vm2, %v1564_v53 }
 0x819   : > { %3074 = vmatpush3.bf16.xpose.msra.mxu1 %v1694_v60 }
 0x81a   : > { %3166 = vmatprep.subr.msk.bf16.mxu1 %vm792_vm1, %v1669_v57 }
 0x821   : > { %3076 = vmatpush3.bf16.xpose.msra.mxu1 %v1691_v63 }
 0x835   : > { %v1537_v61 = vpop.xlane.xlu1 %1536 }
 0x839   : > { %v1546_v58 = vpop.xlane.xlu1 %1545  ;;  %v1543_v0 = vpop.xlane.xlu0 %1542 }
 0x83a   : > { %3347 = vrcp.f32 %v1546_v58 }
 0x83b   : > { %3349 = vrcp.f32 %v1543_v0 }
 0x83c   : > { %3351 = vrcp.f32 %v1537_v61 }
 0x83d   : > { %v1540_v56 = vpop.xlane.xlu0 %1539  ;;  %v1665_v5 = vpop.permute.xlu1 %1664 }
 0x83e   : > { %3353 = vrcp.f32 %v1540_v56  ;;  %v1685_v10 = vsel %vm792_vm1, %v1665_v5, 0 }
 0x841   : > { %v1667_v1 = vpop.permute.xlu0 %1666  ;;  %v1659_v27 = vpop.permute.xlu1 %1658 }
 0x842   : > { %v1688_v2 = vsel %vm792_vm1, %v1667_v1, 0  ;;  %3167 = vmatprep.subr.msk.bf16.mxu1 %vm792_vm1, %v1667_v1 }
 0x843   : > { %3078 = vmatpush3.bf16.xpose.msra.mxu1 %v1688_v2 }
 0x844   : > { %3168 = vmatprep.subr.msk.bf16.mxu1 %vm792_vm1, %v1665_v5 }
 0x845   : > { %v1657_v16 = vpop.permute.xlu0 %1656 }
 0x847   : > { %v3348_v6 = vpop.eup %3347 }
 0x848   : > { %v3350_v8 = vpop.eup %3349  ;;  %v1562_v25 = vmul.f32 %v3348_v6, %v3888_v3 }
 0x849   : > { %v3352_v9 = vpop.eup %3351  ;;  %v1561_v22 = vmul.f32 %v3350_v8, %v3884_v24  ;;  %v1661_v28 = vpop.permute.xlu0 %1660 }
 0x84a   : > { %v1559_v62 = vmul.f32 %v3352_v9, %v3882_v23  ;;  %v1663_v24 = vpop.permute.xlu1 %1662 }
 0x84b   : > { %v3354_v21 = vpop.eup %3353  ;;  %3080 = vmatpush3.bf16.xpose.msra.mxu1 %v1685_v10  ;;  %v1566_v14 = vpack.c.bf16 %v1562_v25, %v1561_v22 }
 0x84c   : > { %v1560_v4 = vmul.f32 %v3354_v21, %v3894_v7 }
 0x84e   : > { %v1565_v26 = vpack.c.bf16 %v1560_v4, %v1559_v62 }
 0x850   : > { %3069 = vmatprep.mubr.msk.bf16.mxu1 %vm890_vm2, %v1565_v26 }
 0x851   : > { %3070 = vmatmul.mubr.msk.bf16.gmra.mxu1 %vm890_vm2, %v1566_v14 }
 0x852   : > { %3081 = vmatprep.mubr.msk.bf16.mxu1 %vm792_vm1, %v1657_v16 }
 0x859   : > { %3082 = vmatmul.mubr.msk.bf16.vlgmr.msra.gmra.mxu1 %vm792_vm1, %v1659_v27 }
 0x85a   : > { %3085 = vmatprep.mubr.msk.bf16.mxu1 %vm792_vm1, %v1661_v28 }
 0x861   : > { %3086 = vmatmul.mubr.msk.bf16.gmra.mxu1 %vm792_vm1, %v1663_v24 }
 0x8d8   : > { %v3932_v23 = vpop.f32.mrf.mxu1 }
 0x8da   : > { %v3934_v3 = vpop.f32.mrf.mxu1 }
 0x8dc   : > { %v3936_v7 = vpop.f32.mrf.mxu1 }
 0x8dd   : > { %v3202_v32 = vpack.i.bf16 %v3936_v7, %v3932_v23 }
 0x8de   : > { %v3940_v47 = vpop.f32.mrf.mxu1 }
 0x8df   : > { %v3197_v38 = vpack.i.bf16 %v3940_v47, %v3934_v3 }
 0x911   : > { %v3944_v30 = vpop.f32.mrf.mxu1 }
 0x913   : > { %v3946_v41 = vpop.f32.mrf.mxu1 }
 0x915   : > { %v3948_v48 = vpop.f32.mrf.mxu1 }
 0x916   : > { %v3232_v51 = vpack.i.bf16 %v3948_v48, %v3944_v30 }
 0x917   : > { %v3952_v50 = vpop.f32.mrf.mxu1 }
 0x918   : > { %v3227_v54 = vpack.i.bf16 %v3952_v50, %v3946_v41 }
 0x919   : > { %v3083_v55 = vpop.f32.mrf.mxu1 }
 0x91a   : > { %v1763_v57 = vmul.f32 0.35355338, %v3083_v55 }
 0x91b   : > { %v1730_v49 = vpop.f32.mrf.mxu1 }
 0x91c   : > { %v1761_v53 = vmul.f32 0.35355338, %v1730_v49  ;;  %v1775_v1 = vsel %vm890_vm2, %v1763_v57, -inf }
 0x91d   : > { %v3084_v60 = vpop.f32.mrf.mxu1 }
 0x91e   : > { %v1769_v63 = vsel %vm890_vm2, %v1761_v53, -inf  ;;  %v1764_v56 = vmul.f32 0.35355338, %v3084_v60 }
 0x91f   : > { %1770 = vmax.xlane.f32.xlu0 %v1769_v63  ;;  %v1733_v61 = vpop.f32.mrf.mxu1 }
 0x920   : > { %v1762_v58 = vmul.f32 0.35355338, %v1733_v61  ;;  %v1778_v10 = vsel %vm890_vm2, %v1764_v56, -inf }
 0x921   : > { %v3087_v0 = vpop.f32.mrf.mxu1 }
 0x922   : > { %v1772_v2 = vsel %vm890_vm2, %v1762_v58, -inf  ;;  %v1767_v9 = vmul.f32 0.35355338, %v3087_v0 }
 0x923   : > { %1776 = vmax.xlane.f32.xlu0 %v1775_v1  ;;  %1773 = vmax.xlane.f32.xlu1 %v1772_v2  ;;  %v1746_v5 = vpop.f32.mrf.mxu1 }
 0x924   : > { %v1765_v6 = vmul.f32 0.35355338, %v1746_v5  ;;  %v1787_v4 = vsel %vm890_vm2, %v1767_v9, -inf }
 0x925   : > { %v3088_v8 = vpop.f32.mrf.mxu1 }
 0x926   : > { %v1781_v21 = vsel %vm890_vm2, %v1765_v6, -inf  ;;  %v1768_v62 = vmul.f32 0.35355338, %v3088_v8 }
 0x927   : > { %1779 = vmax.xlane.f32.xlu0 %v1778_v10  ;;  %1782 = vmax.xlane.f32.xlu1 %v1781_v21  ;;  %v1749_v22 = vpop.f32.mrf.mxu1 }
 0x928   : > { %v1766_v25 = vmul.f32 0.35355338, %v1749_v22  ;;  %v1790_v14 = vsel %vm890_vm2, %v1768_v62, -inf }
 0x92a   : > { %v1784_v26 = vsel %vm890_vm2, %v1766_v25, -inf }
 0x92b   : > { %1788 = vmax.xlane.f32.xlu1 %v1787_v4  ;;  %1785 = vmax.xlane.f32.xlu0 %v1784_v26 }
 0x92f   : > { %1791 = vmax.xlane.f32.xlu0 %v1790_v14 }
 0x93c   : > { %1867 = vrot.lane.b32.xlu1 %v3658_v42, %s3441_s23 }
 0x9a8   : > { %v1771_v16 = vpop.xlane.xlu0 %1770 }
 0x9a9   : > { %v1793_v27 = vsub.f32 %v1761_v53, %v1771_v16 }
 0x9ab   : > { %v1801_v60 = vmul.f32 1.442695, %v1793_v27 }
 0x9ac   : > { %v1774_v28 = vpop.xlane.xlu1 %1773  ;;  %v1777_v24 = vpop.xlane.xlu0 %1776 }
 0x9ad   : > { %v1795_v55 = vsub.f32 %v1763_v57, %v1777_v24  ;;  %v1794_v63 = vsub.f32 %v1762_v58, %v1774_v28 }
 0x9af   : > { %v1805_v49 = vmul.f32 1.442695, %v1795_v55  ;;  %v1803_v5 = vmul.f32 1.442695, %v1794_v63 }
 0x9b0   : > { %v1783_v61 = vpop.xlane.xlu1 %1782  ;;  %v1780_v0 = vpop.xlane.xlu0 %1779 }
 0x9b1   : > { %v1796_v1 = vsub.f32 %v1764_v56, %v1780_v0  ;;  %3355 = vpow2.f32 %v1805_v49  ;;  %v1797_v8 = vsub.f32 %v1765_v6, %v1783_v61 }
 0x9b2   : > { %3357 = vpow2.f32 %v1801_v60 }
 0x9b3   : > { %v1807_v2 = vmul.f32 1.442695, %v1796_v1  ;;  %v1809_v53 = vmul.f32 1.442695, %v1797_v8 }
 0x9b4   : > { %v1789_v10 = vpop.xlane.xlu1 %1788  ;;  %v1786_v21 = vpop.xlane.xlu0 %1785 }
 0x9b5   : > { %v1799_v22 = vsub.f32 %v1767_v9, %v1789_v10  ;;  %3359 = vpow2.f32 %v1807_v2  ;;  %v1798_v4 = vsub.f32 %v1766_v25, %v1786_v21 }
 0x9b6   : > { %3361 = vpow2.f32 %v1803_v5 }
 0x9b7   : > { %v1813_v42 = vmul.f32 1.442695, %v1799_v22  ;;  %v1811_v14 = vmul.f32 1.442695, %v1798_v4 }
 0x9b8   : > { %v1868_v57 = vpop.permute.xlu1 %1867  ;;  %v1792_v26 = vpop.xlane.xlu0 %1791 }
 0x9b9   : > { %3363 = vpow2.f32 %v1813_v42  ;;  %v1800_v58 = vsub.f32 %v1768_v62, %v1792_v26  ;;  %3089 = vmatprep.subr.bf16.mxu0 %v1868_v57  ;;  %3145 = vmatprep.subr.bf16.mxu1 %v1868_v57 }
 0x9ba   : > { %3090 = vmatpush3.bf16.msra.mxu0 %v1868_v57  ;;  %3149 = vmatpush3.bf16.msra.mxu1 %v1868_v57  ;;  %3365 = vpow2.f32 %v1809_v53 }
 0x9bb   : > { %v1815_v56 = vmul.f32 1.442695, %v1800_v58  ;;  %v3251_v58 = vld [vmem:[%s4308_s6 + $0x8] sm:$0xff]  }
 0x9bd   : > { %3367 = vpow2.f32 %v1815_v56  ;;  %v3252_v56 = vld [vmem:[%s4308_s6] sm:$0xff]  }
 0x9be   : > { %v3966_v6 = vpop.eup %3355  ;;  %3369 = vpow2.f32 %v1811_v14 }
 0x9bf   : > { %v1823_v9 = vsel %vm890_vm2, %v3966_v6, 0.0  ;;  %v3358_v16 = vpop.eup %3357 }
 0x9c0   : > { %1824 = vadd.xlane.f32.xlu1 %v1823_v9  ;;  %v1817_v62 = vsel %vm890_vm2, %v3358_v16, 0.0 }
 0x9c2   : > { %v3970_v25 = vpop.eup %3359 }
 0x9c3   : > { %v1826_v27 = vsel %vm890_vm2, %v3970_v25, 0.0  ;;  %v3362_v28 = vpop.eup %3361 }
 0x9c4   : > { %1818 = vadd.xlane.f32.xlu1 %v1817_v62  ;;  %1827 = vadd.xlane.f32.xlu0 %v1826_v27  ;;  %v1820_v49 = vsel %vm890_vm2, %v3362_v28, 0.0 }
 0x9c6   : > { %v3975_v24 = vpop.eup %3363 }
 0x9c7   : > { %v1835_v55 = vsel %vm890_vm2, %v3975_v24, 0.0  ;;  %v3980_v60 = vpop.eup %3365 }
 0x9c8   : > { %1836 = vadd.xlane.f32.xlu1 %v1835_v55  ;;  %1821 = vadd.xlane.f32.xlu0 %v1820_v49  ;;  %v1829_v0 = vsel %vm890_vm2, %v3980_v60, 0.0 }
 0x9ca   : > { %v3982_v63 = vpop.eup %3367 }
 0x9cb   : > { %v1838_v61 = vsel %vm890_vm2, %v3982_v63, 0.0  ;;  %v3988_v1 = vpop.eup %3369 }
 0x9cc   : > { %1830 = vadd.xlane.f32.xlu1 %v1829_v0  ;;  %1839 = vadd.xlane.f32.xlu0 %v1838_v61  ;;  %v1832_v2 = vsel %vm890_vm2, %v3988_v1, 0.0 }
 0x9d0   : > { %1833 = vadd.xlane.f32.xlu0 %v1832_v2 }
 0x9dd   : > { %1863 = vrot.lane.b32.xlu1 %v3664_v52, %s3441_s23 }
 0x9e1   : > { %1861 = vrot.lane.b32.xlu1 %v3668_v59, %s3441_s23 }
 0x9e5   : > { %3193 = vrot.lane.b32.xlu1 %v3192_v34, %s3442_s24 }
 0x9e6   : > { %1865 = vrot.lane.b32.xlu0 %v3660_v45, %s3441_s23 }
 0x9e9   : > { %3203 = vrot.lane.b32.xlu1 %v3202_v32, %s3443_s25 }
 0x9ea   : > { %3188 = vrot.lane.b32.xlu0 %v3187_v36, %s3442_s24 }
 0x9ed   : > { %3213 = vrot.lane.b32.xlu1 %v3212_v43, %s3442_s24 }
 0x9ee   : > { %3198 = vrot.lane.b32.xlu0 %v3197_v38, %s3443_s25 }
 0x9f2   : > { %3208 = vrot.lane.b32.xlu0 %v3207_v46, %s3442_s24 }
 0xa49   : > { %v1825_v45 = vpop.xlane.xlu1 %1824 }
 0xa4d   : > { %v1819_v52 = vpop.xlane.xlu1 %1818  ;;  %v1828_v59 = vpop.xlane.xlu0 %1827 }
 0xa4e   : > { %3371 = vrcp.f32 %v1819_v52 }
 0xa51   : > { %v1837_v31 = vpop.xlane.xlu1 %1836  ;;  %v1822_v29 = vpop.xlane.xlu0 %1821 }
 0xa52   : > { %3373 = vrcp.f32 %v1822_v29 }
 0xa53   : > { %3375 = vrcp.f32 %v1828_v59 }
 0xa54   : > { %3377 = vrcp.f32 %v1825_v45 }
 0xa55   : > { %v1840_v33 = vpop.xlane.xlu0 %1839  ;;  %v1831_v34 = vpop.xlane.xlu1 %1830  ;;  %3379 = vrcp.f32 %v1837_v31 }
 0xa56   : > { %3381 = vrcp.f32 %v1840_v33 }
 0xa57   : > { %3383 = vrcp.f32 %v1831_v34 }
 0xa59   : > { %v1834_v35 = vpop.xlane.xlu0 %1833  ;;  %v1864_v36 = vpop.permute.xlu1 %1863 }
 0xa5a   : > { %3385 = vrcp.f32 %v1834_v35 }
 0xa5b   : > { %v3372_v39 = vpop.eup %3371 }
 0xa5c   : > { %v1849_v44 = vmul.f32 %v3372_v39, %v3358_v16 }
 0xa5d   : > { %v1866_v37 = vpop.permute.xlu0 %1865  ;;  %v1862_v3 = vpop.permute.xlu1 %1861 }
 0xa5e   : > { %3091 = vmatprep.subr.bf16.mxu0 %v1866_v37  ;;  %3146 = vmatprep.subr.bf16.mxu1 %v1866_v37 }
 0xa5f   : > { %3092 = vmatpush3.bf16.msra.mxu0 %v1866_v37  ;;  %3150 = vmatpush3.bf16.msra.mxu1 %v1866_v37  ;;  %v3374_v40 = vpop.eup %3373 }
 0xa60   : > { %3093 = vmatprep.subr.bf16.mxu0 %v1864_v36  ;;  %3147 = vmatprep.subr.bf16.mxu1 %v1864_v36  ;;  %v3376_v43 = vpop.eup %3375  ;;  %v1850_v46 = vmul.f32 %v3374_v40, %v3362_v28 }
 0xa61   : > { %v3378_v23 = vpop.eup %3377  ;;  %v1852_v47 = vmul.f32 %v3376_v43, %v3970_v25  ;;  %v3189_v61 = vpop.permute.xlu0 %3188 }
 0xa62   : > { %v1857_v7 = vpack.c.bf16 %v1850_v46, %v1849_v44  ;;  %v3380_v32 = vpop.eup %3379  ;;  %v1851_v8 = vmul.f32 %v3378_v23, %v3966_v6  ;;  %v3191_v59 = vunpack.i.h.bf16 %v3189_v61  ;;  %v3190_v30 = vunpack.i.l.bf16 %v3189_v61  ;;  %v2825_v61 = vld [vmem:[%s4309_s7] ss:$0 sm:$0xff] }
 0xa63   : > { %3094 = vmatpush3.bf16.msra.mxu0 %v1864_v36  ;;  %3151 = vmatpush3.bf16.msra.mxu1 %v1864_v36  ;;  %v3382_v38 = vpop.eup %3381  ;;  %v1855_v4 = vmul.f32 %v3380_v32, %v3975_v24 }
 0xa64   : > { %3095 = vmatprep.subr.bf16.mxu0 %v1862_v3  ;;  %3148 = vmatprep.subr.bf16.mxu1 %v1862_v3  ;;  %v3384_v5 = vpop.eup %3383  ;;  %v1858_v21 = vpack.c.bf16 %v1852_v47, %v1851_v8  ;;  %v1856_v22 = vmul.f32 %v3382_v38, %v3982_v63  ;;  %v3194_v63 = vpop.permute.xlu1 %3193  ;;  %v2047_v36 = vsel %vm792_vm1, %v3732_v15, %v3191_v59 }
 0xa65   : > { %3097 = vmatprep.mubr.msk.bf16.mxu0 %vm890_vm2, %v1857_v7  ;;  %v1853_v42 = vmul.f32 %v3384_v5, %v3980_v60  ;;  %v3196_v45 = vunpack.i.h.bf16 %v3194_v63  ;;  %v3195_v52 = vunpack.i.l.bf16 %v3194_v63  ;;  %v2046_v37 = vsel %vm792_vm1, %v3728_v12, %v3190_v30 }
 0xa66   : > { %v1860_v26 = vpack.c.bf16 %v1856_v22, %v1855_v4 }
 0xa67   : > { %v3386_v10 = vpop.eup %3385  ;;  %3096 = vmatpush3.bf16.msra.mxu0 %v1862_v3  ;;  %3152 = vmatpush3.bf16.msra.mxu1 %v1862_v3  ;;  %v2049_v34 = vsel %vm792_vm1, %v3730_v13, %v3196_v45  ;;  %v2048_v35 = vsel %vm792_vm1, %v3726_v11, %v3195_v52  ;;  %v3419_v52 = vld [vmem:[%s3550_s0] sm:$0xff] }
 0xa68   : > { %v1854_v53 = vmul.f32 %v3386_v10, %v3988_v1  ;;  %3105 = vmatprep.subr.bf16.mxu0 %v3251_v58  ;;  %v3204_v0 = vpop.permute.xlu1 %3203  ;;  %v3199_v1 = vpop.permute.xlu0 %3198 }
 0xa69   : > { %v3205_v31 = vunpack.i.l.bf16 %v3204_v0  ;;  %v3201_v29 = vunpack.i.h.bf16 %v3199_v1  ;;  %v3200_v33 = vunpack.i.l.bf16 %v3199_v1 }
 0xa6a   : > { %3098 = vmatmul.mubr.msk.bf16.vlgmr.msra.gmra.mxu0 %vm890_vm2, %v1858_v21  ;;  %v1859_v57 = vpack.c.bf16 %v1854_v53, %v1853_v42 }
 0xa6b   : > { %3106 = vmatpush3.bf16.msra.mxu0 %v3251_v58  ;;  %v2057_v40 = vsel %vm2054_vm3, %v2048_v35, %v3205_v31  ;;  %v2055_v23 = vsel %vm2054_vm3, %v2046_v37, %v3200_v33  ;;  %v2056_v13 = vsel %vm2054_vm3, %v2047_v36, %v3201_v29 }
 0xa6c   : > { %3101 = vmatprep.mubr.msk.bf16.mxu1 %vm890_vm2, %v1859_v57  ;;  %3107 = vmatprep.subr.bf16.mxu0 %v3252_v56  ;;  %v3214_v2 = vpop.permute.xlu1 %3213  ;;  %v3209_v48 = vpop.permute.xlu0 %3208 }
 0xa6d   : > { %3102 = vmatmul.mubr.msk.bf16.vlgmr.msra.gmra.mxu1 %vm890_vm2, %v1860_v26  ;;  %v3216_v15 = vunpack.i.h.bf16 %v3214_v2  ;;  %v3215_v47 = vunpack.i.l.bf16 %v3214_v2  ;;  %v3211_v38 = vunpack.i.h.bf16 %v3209_v48  ;;  %v3210_v5 = vunpack.i.l.bf16 %v3209_v48 }
 0xa6f   : > { %3108 = vmatpush3.bf16.msra.mxu0 %v3252_v56  ;;  %v2053_v56 = vsel %vm792_vm1, %v3738_v19, %v3216_v15 }
 0xb2a   : > { %v3099_v14 = vpop.f32.mrf.mxu0 }
 0xb2c   : > { %v1919_v6 = vpop.f32.mrf.mxu0 }
 0xb2d   : > { %v3103_v9 = vpop.f32.mrf.mxu1 }
 0xb2e   : > { %v3100_v16 = vpop.f32.mrf.mxu0 }
 0xb2f   : > { %v3217_v25 = vpack.i.bf16 %v3100_v16, %v3099_v14  ;;  %v1935_v62 = vpop.f32.mrf.mxu1  ;;  %v2052_v14 = vsel %vm792_vm1, %v3734_v17, %v3215_v47  ;;  %v3425_v47 = vld [vmem:[%s3550_s0 + $0x28] sm:$0xff] }
 0xb30   : > { %v1922_v27 = vpop.f32.mrf.mxu0 }
 0xb31   : > { %v3222_v28 = vpack.i.bf16 %v1922_v27, %v1919_v6  ;;  %3218 = vrot.lane.b32.xlu1 %v3217_v25, %s3444_s17  ;;  %v3104_v24 = vpop.f32.mrf.mxu1  ;;  %v2051_v6 = vsel %vm792_vm1, %v3740_v20, %v3211_v38 }
 0xb32   : > { %v3242_v49 = vpack.i.bf16 %v3104_v24, %v3103_v9  ;;  %v2050_v9 = vsel %vm792_vm1, %v3736_v18, %v3210_v5  ;;  %v3426_v5 = vld [vmem:[%s3550_s0 + $0x38] sm:$0xff] }
 0xb33   : > { %3223 = vrot.lane.b32.xlu0 %v3222_v28, %s3444_s17  ;;  %v1938_v55 = vpop.f32.mrf.mxu1 }
 0xb34   : > { %v3237_v60 = vpack.i.bf16 %v1938_v55, %v1935_v62 }
 0xb35   : > { %3233 = vrot.lane.b32.xlu1 %v3232_v51, %s3443_s25  ;;  %v3206_v51 = vunpack.i.h.bf16 %v3204_v0 }
 0xb37   : > { %3228 = vrot.lane.b32.xlu0 %v3227_v54, %s3443_s25  ;;  %v2058_v43 = vsel %vm2054_vm3, %v2049_v34, %v3206_v51  ;;  %v3420_v51 = vld [vmem:[%s3550_s0 + $0x10] sm:$0xff]  ;;  %v3422_v34 = vld [vmem:[%s3550_s0 + $0x18] sm:$0xff] }
 0xb39   : > { %3243 = vrot.lane.b32.xlu1 %v3242_v49, %s3444_s17 }
 0xb3b   : > { %3238 = vrot.lane.b32.xlu0 %v3237_v60, %s3444_s17 }
 0xba3   : > { %v3219_v41 = vpop.permute.xlu1 %3218 }
 0xba4   : > { %v3221_v50 = vunpack.i.h.bf16 %v3219_v41  ;;  %v3220_v54 = vunpack.i.l.bf16 %v3219_v41 }
 0xba5   : > { %v3224_v39 = vpop.permute.xlu0 %3223 }
 0xba6   : > { %v3226_v44 = vunpack.i.h.bf16 %v3224_v39  ;;  %v3225_v46 = vunpack.i.l.bf16 %v3224_v39  ;;  %v2067_v3 = vsel %vm2063_vm4, %v2058_v43, %v3221_v50  ;;  %v2066_v11 = vsel %vm2063_vm4, %v2057_v40, %v3220_v54  ;;  %v3421_v50 = vld [vmem:[%s3550_s0 + $0x8] sm:$0xff] }
 0xba7   : > { %v3234_v7 = vpop.permute.xlu1 %3233  ;;  %v2077_v21 = vpack.c.bf16 %v2067_v3, %v2066_v11  ;;  %v3424_v11 = vld [vmem:[%s3550_s0 + $0x30] sm:$0xff] }
 0xba8   : > { %v2064_v32 = vsel %vm2063_vm4, %v2055_v23, %v3225_v46  ;;  %v2065_v12 = vsel %vm2063_vm4, %v2056_v13, %v3226_v44  ;;  %v3236_v22 = vunpack.i.h.bf16 %v3234_v7  ;;  %v3235_v42 = vunpack.i.l.bf16 %v3234_v7  ;;  %v3423_v46 = vld [vmem:[%s3550_s0 + $0x20] sm:$0xff]  ;;  %s4274_s0 = scalar_lea.vmem %s4318_s16, %s3544_s27 }
 0xba9   : > { %v2076_v8 = vpack.c.bf16 %v2065_v12, %v2064_v32  ;;  %v3229_v10 = vpop.permute.xlu0 %3228 }
 0xbaa   : > { %v3231_v53 = vunpack.i.h.bf16 %v3229_v10  ;;  %v3230_v4 = vunpack.i.l.bf16 %v3229_v10  ;;  %v2062_v25 = vsel %vm2054_vm3, %v2053_v56, %v3236_v22  ;;  %v2061_v62 = vsel %vm2054_vm3, %v2052_v14, %v3235_v42 }
 0xbab   : > { %v3244_v57 = vpop.permute.xlu1 %3243  ;;  %3109 = vmatprep.mubr.msk.bf16.mxu0 %vm594_vm0, %v2076_v8 }
 0xbac   : > { %v3246_v26 = vunpack.i.h.bf16 %v3244_v57  ;;  %v3245_v58 = vunpack.i.l.bf16 %v3244_v57  ;;  %3110 = vmatmul.mubr.msk.bf16.vlgmr.msra.gmra.mxu0 %vm594_vm0, %v2077_v21  ;;  %v2059_v24 = vsel %vm2054_vm3, %v2050_v9, %v3230_v4  ;;  %v2060_v19 = vsel %vm2054_vm3, %v2051_v6, %v3231_v53 }
 0xbad   : > { %v3239_v16 = vpop.permute.xlu0 %3238 }
 0xbae   : > { %v3241_v27 = vunpack.i.h.bf16 %v3239_v16  ;;  %v3240_v28 = vunpack.i.l.bf16 %v3239_v16  ;;  %v2070_v17 = vsel %vm2063_vm4, %v2061_v62, %v3245_v58  ;;  %v2071_v55 = vsel %vm2063_vm4, %v2062_v25, %v3246_v26 }
 0xbaf   : > { %v2079_v60 = vpack.c.bf16 %v2071_v55, %v2070_v17 }
 0xbb0   : > { %v2068_v20 = vsel %vm2063_vm4, %v2059_v24, %v3240_v28  ;;  %v2069_v18 = vsel %vm2063_vm4, %v2060_v19, %v3241_v27 }
 0xbb1   : > { %v2078_v49 = vpack.c.bf16 %v2069_v18, %v2068_v20 }
 0xbb3   : > { %3113 = vmatprep.mubr.msk.bf16.mxu0 %vm594_vm0, %v2078_v49 }
 0xbb4   : > { %3114 = vmatmul.mubr.msk.bf16.gmra.mxu0 %vm594_vm0, %v2079_v60 }
 0xc6c   : > { %v3111_v63 = vpop.f32.mrf.mxu0 }
 0xc6d   : > { %v2154_v1 = vadd.f32 %v3111_v63, %v2825_v61 }
 0xc6e   : > { %v2145_v0 = vpop.f32.mrf.mxu0 }
 0xc6f   : > { %v2146_v2 = vadd.f32 %v2825_v61, %v2145_v0  ;;  %v2178_v31 = vadd.f32 %v3420_v51, %v2154_v1 }
 0xc70   : > { %v3112_v45 = vpop.f32.mrf.mxu0 }
 0xc71   : > { %v2176_v59 = vadd.f32 %v3419_v52, %v2146_v2  ;;  %v2157_v30 = vadd.f32 %v3112_v45, %v2825_v61  ;;  %v2192_v43 = vsel %vm594_vm0, %v2178_v31, 0.0 }
 0xc72   : > { %v2148_v48 = vpop.f32.mrf.mxu0 }
 0xc73   : > { %v2149_v29 = vadd.f32 %v2825_v61, %v2148_v48  ;;  %v2186_v33 = vsel %vm594_vm0, %v2176_v59, 0.0  ;;  %v2179_v35 = vadd.f32 %v3422_v34, %v2157_v30  ;;  %v3253_v34 = vld [vmem:[%s4312_s10 + $0x8] sm:$0xff]  }
 0xc74   : > { %v3115_v41 = vpop.f32.mrf.mxu0  ;;  %2187 = vadd.xlane.f32.xlu0 %v2186_v33  ;;  %3117 = vmatprep.subr.bf16.mxu1 %v3253_v34 }
 0xc75   : > { %v2177_v54 = vadd.f32 %v3421_v50, %v2149_v29  ;;  %v2170_v37 = vadd.f32 %v3115_v41, %v2825_v61  ;;  %v2195_v3 = vsel %vm594_vm0, %v2179_v35, 0.0  ;;  %3118 = vmatpush3.bf16.msra.mxu1 %v3253_v34 }
 0xc76   : > { %v2161_v36 = vpop.f32.mrf.mxu0 }
 0xc77   : > { %v2162_v39 = vadd.f32 %v2825_v61, %v2161_v36  ;;  %v2189_v40 = vsel %vm594_vm0, %v2177_v54, 0.0  ;;  %v2182_v7 = vadd.f32 %v3424_v11, %v2170_v37  ;;  %v3255_v36 = vld [vmem:[%s4314_s12 + $0x18] sm:$0xff]  }
 0xc78   : > { %v3116_v44 = vpop.f32.mrf.mxu0  ;;  %2190 = vadd.xlane.f32.xlu1 %v2189_v40  ;;  %2193 = vadd.xlane.f32.xlu0 %v2192_v43 }
 0xc79   : > { %v2180_v23 = vadd.f32 %v3423_v46, %v2162_v39  ;;  %v2173_v15 = vadd.f32 %v3116_v44, %v2825_v61  ;;  %v2204_v10 = vsel %vm594_vm0, %v2182_v7, 0.0  ;;  %3129 = vmatprep.subr.bf16.mxu0 %v3255_v36 }
 0xc7a   : > { %v2164_v13 = vpop.f32.mrf.mxu0  ;;  %3130 = vmatpush3.bf16.msra.mxu0 %v3255_v36  ;;  %v3257_v36 = vld [vmem:[%s4314_s12 + $0x8] sm:$0xff]  }
 0xc7b   : > { %v2165_v32 = vadd.f32 %v2825_v61, %v2164_v13  ;;  %v2198_v12 = vsel %vm594_vm0, %v2180_v23, 0.0  ;;  %v2183_v8 = vadd.f32 %v3426_v5, %v2173_v15 }
 0xc7c   : > { %2199 = vadd.xlane.f32.xlu1 %v2198_v12  ;;  %2196 = vadd.xlane.f32.xlu0 %v2195_v3 }
 0xc7d   : > { %v2181_v38 = vadd.f32 %v3425_v47, %v2165_v32  ;;  %v2207_v22 = vsel %vm594_vm0, %v2183_v8, 0.0 }
 0xc7f   : > { %v2201_v21 = vsel %vm594_vm0, %v2181_v38, 0.0 }
 0xc80   : > { %2205 = vadd.xlane.f32.xlu1 %v2204_v10  ;;  %2202 = vadd.xlane.f32.xlu0 %v2201_v21 }
 0xc84   : > { %2208 = vadd.xlane.f32.xlu0 %v2207_v22 }
 0xcfd   : > { %v2188_v42 = vpop.xlane.xlu0 %2187 }
 0xcfe   : > { %v2211_v53 = vmul.f32 0.03125, %v2188_v42 }
 0xd00   : > { %v4097_v4 = vsub.f32 %v2176_v59, %v2211_v53 }
 0xd01   : > { %v2191_v57 = vpop.xlane.xlu1 %2190  ;;  %v2194_v26 = vpop.xlane.xlu0 %2193 }
 0xd02   : > { %v2212_v58 = vmul.f32 0.03125, %v2191_v57  ;;  %v2213_v56 = vmul.f32 0.03125, %v2194_v26  ;;  %v2227_v14 = vmul.f32 %v4097_v4, %v4097_v4 }
 0xd04   : > { %v4101_v6 = vsub.f32 %v2177_v54, %v2212_v58  ;;  %v4103_v9 = vsub.f32 %v2178_v31, %v2213_v56  ;;  %v2235_v16 = vsel %vm594_vm0, %v2227_v14, 0.0  ;;  %v2832_v56 = vld [vmem:[%s4310_s8] ss:$0 sm:$0xff] }
 0xd05   : > { %v2200_v25 = vpop.xlane.xlu1 %2199  ;;  %2236 = vadd.xlane.f32.xlu1 %v2235_v16  ;;  %v2197_v62 = vpop.xlane.xlu0 %2196 }
 0xd06   : > { %v2215_v27 = vmul.f32 0.03125, %v2200_v25  ;;  %v2214_v28 = vmul.f32 0.03125, %v2197_v62  ;;  %v2228_v24 = vmul.f32 %v4101_v6, %v4101_v6  ;;  %v2229_v19 = vmul.f32 %v4103_v9, %v4103_v9 }
 0xd08   : > { %v4110_v17 = vsub.f32 %v2180_v23, %v2215_v27  ;;  %v4112_v55 = vsub.f32 %v2179_v35, %v2214_v28  ;;  %v2238_v20 = vsel %vm594_vm0, %v2228_v24, 0.0  ;;  %v2241_v18 = vsel %vm594_vm0, %v2229_v19, 0.0  ;;  %v3254_v35 = vld [vmem:[%s4312_s10] sm:$0xff]  }
 0xd09   : > { %v2206_v49 = vpop.xlane.xlu1 %2205  ;;  %2239 = vadd.xlane.f32.xlu0 %v2238_v20  ;;  %2242 = vadd.xlane.f32.xlu1 %v2241_v18  ;;  %v2203_v60 = vpop.xlane.xlu0 %2202  ;;  %v2833_v27 = vld [vmem:[%s4311_s9] ss:$0 sm:$0xff] }
 0xd0a   : > { %v2217_v63 = vmul.f32 0.03125, %v2206_v49  ;;  %v2216_v61 = vmul.f32 0.03125, %v2203_v60  ;;  %v2231_v0 = vmul.f32 %v4110_v17, %v4110_v17  ;;  %v2230_v1 = vmul.f32 %v4112_v55, %v4112_v55  ;;  %3119 = vmatprep.subr.bf16.mxu1 %v3254_v35 }
 0xd0b   : > { %3120 = vmatpush3.bf16.msra.mxu1 %v3254_v35  ;;  %v3256_v35 = vld [vmem:[%s4314_s12 + $0x10] sm:$0xff]  }
 0xd0c   : > { %v4120_v2 = vsub.f32 %v2182_v7, %v2217_v63  ;;  %v4122_v45 = vsub.f32 %v2181_v38, %v2216_v61  ;;  %v2247_v52 = vsel %vm594_vm0, %v2231_v0, 0.0  ;;  %v2244_v59 = vsel %vm594_vm0, %v2230_v1, 0.0  ;;  %3131 = vmatprep.subr.bf16.mxu0 %v3256_v35 }
 0xd0d   : > { %2248 = vadd.xlane.f32.xlu1 %v2247_v52  ;;  %2245 = vadd.xlane.f32.xlu0 %v2244_v59  ;;  %v2209_v30 = vpop.xlane.xlu0 %2208 }
 0xd0e   : > { %v2218_v48 = vmul.f32 0.03125, %v2209_v30  ;;  %v2233_v51 = vmul.f32 %v4120_v2, %v4120_v2  ;;  %v2232_v31 = vmul.f32 %v4122_v45, %v4122_v45  ;;  %3132 = vmatpush3.bf16.msra.mxu0 %v3256_v35 }
 0xd0f   : > { %3133 = vmatprep.subr.bf16.mxu0 %v3257_v36 }
 0xd10   : > { %v4130_v29 = vsub.f32 %v2183_v8, %v2218_v48  ;;  %v2253_v33 = vsel %vm594_vm0, %v2233_v51, 0.0  ;;  %v2250_v41 = vsel %vm594_vm0, %v2232_v31, 0.0 }
 0xd11   : > { %2254 = vadd.xlane.f32.xlu1 %v2253_v33  ;;  %2251 = vadd.xlane.f32.xlu0 %v2250_v41 }
 0xd12   : > { %v2234_v50 = vmul.f32 %v4130_v29, %v4130_v29  ;;  %3134 = vmatpush3.bf16.msra.mxu0 %v3257_v36 }
 0xd14   : > { %v2256_v54 = vsel %vm594_vm0, %v2234_v50, 0.0 }
 0xd15   : > { %2257 = vadd.xlane.f32.xlu0 %v2256_v54 }
 0xd8e   : > { %v2237_v37 = vpop.xlane.xlu1 %2236 }
 0xd8f   : > { %v2259_v39 = vmul.f32 0.03125, %v2237_v37  ;;  %v3258_v37 = vld [vmem:[%s4314_s12] sm:$0xff]  }
 0xd90   : > { %3135 = vmatprep.subr.bf16.mxu0 %v3258_v37 }
 0xd91   : > { %v2267_v40 = vadd.f32 1e-05, %v2259_v39  ;;  %3136 = vmatpush3.bf16.msra.mxu0 %v3258_v37 }
 0xd92   : > { %v2243_v43 = vpop.xlane.xlu1 %2242  ;;  %v2240_v44 = vpop.xlane.xlu0 %2239 }
 0xd93   : > { %3387 = vrsqrt.f32 %v2267_v40  ;;  %v2261_v46 = vmul.f32 0.03125, %v2243_v43  ;;  %v2260_v23 = vmul.f32 0.03125, %v2240_v44  ;;  %v2834_v43 = vld [vmem:[%s4313_s11] ss:$0 sm:$0xff] }
 0xd95   : > { %v2269_v13 = vadd.f32 1e-05, %v2261_v46  ;;  %v2268_v3 = vadd.f32 1e-05, %v2260_v23 }
 0xd96   : > { %v2249_v11 = vpop.xlane.xlu1 %2248  ;;  %v2246_v7 = vpop.xlane.xlu0 %2245 }
 0xd97   : > { %3389 = vrsqrt.f32 %v2269_v13  ;;  %v2263_v15 = vmul.f32 0.03125, %v2249_v11  ;;  %v2262_v32 = vmul.f32 0.03125, %v2246_v7 }
 0xd98   : > { %3391 = vrsqrt.f32 %v2268_v3 }
 0xd99   : > { %v2271_v12 = vadd.f32 1e-05, %v2263_v15  ;;  %v2270_v47 = vadd.f32 1e-05, %v2262_v32 }
 0xd9a   : > { %v2255_v38 = vpop.xlane.xlu1 %2254  ;;  %v2252_v5 = vpop.xlane.xlu0 %2251 }
 0xd9b   : > { %3393 = vrsqrt.f32 %v2271_v12  ;;  %v2265_v8 = vmul.f32 0.03125, %v2255_v38  ;;  %v2264_v10 = vmul.f32 0.03125, %v2252_v5 }
 0xd9c   : > { %3395 = vrsqrt.f32 %v2270_v47 }
 0xd9d   : > { %v2273_v21 = vadd.f32 1e-05, %v2265_v8  ;;  %v2272_v22 = vadd.f32 1e-05, %v2264_v10 }
 0xd9e   : > { %v2258_v42 = vpop.xlane.xlu0 %2257 }
 0xd9f   : > { %3397 = vrsqrt.f32 %v2273_v21  ;;  %v2266_v53 = vmul.f32 0.03125, %v2258_v42 }
 0xda0   : > { %v3388_v57 = vpop.eup %3387  ;;  %3399 = vrsqrt.f32 %v2272_v22 }
 0xda1   : > { %v2274_v26 = vadd.f32 1e-05, %v2266_v53  ;;  %v2283_v58 = vmul.f32 %v3388_v57, %v4097_v4 }
 0xda3   : > { %3401 = vrsqrt.f32 %v2274_v26  ;;  %v2297_v25 = vmul.f32 %v2832_v56, %v2283_v58 }
 0xda4   : > { %v3390_v14 = vpop.eup %3389 }
 0xda5   : > { %v3392_v16 = vpop.eup %3391  ;;  %v2285_v62 = vmul.f32 %v3390_v14, %v4103_v9  ;;  %v4155_v4 = vadd.f32 %v2833_v27, %v2297_v25 }
 0xda6   : > { %v2284_v28 = vmul.f32 %v3392_v16, %v4101_v6 }
 0xda7   : > { %v2299_v60 = vmul.f32 %v2832_v56, %v2285_v62  ;;  %v2841_v62 = vld [vmem:[%s4315_s13] ss:$0 sm:$0xff] }
 0xda8   : > { %v3394_v24 = vpop.eup %3393  ;;  %v2298_v19 = vmul.f32 %v2832_v56, %v2284_v28 }
 0xda9   : > { %v3396_v20 = vpop.eup %3395  ;;  %v2287_v63 = vmul.f32 %v3394_v24, %v4110_v17  ;;  %v4165_v52 = vadd.f32 %v2833_v27, %v2299_v60 }
 0xdaa   : > { %v2286_v18 = vmul.f32 %v3396_v20, %v4112_v55  ;;  %v4158_v49 = vadd.f32 %v2833_v27, %v2298_v19 }
 0xdab   : > { %v2301_v30 = vmul.f32 %v2832_v56, %v2287_v63 }
 0xdac   : > { %v3398_v61 = vpop.eup %3397  ;;  %v2323_v9 = vpack.c.bf16 %v4158_v49, %v4155_v4  ;;  %v2300_v0 = vmul.f32 %v2832_v56, %v2286_v18 }
 0xdad   : > { %v3400_v1 = vpop.eup %3399  ;;  %v2289_v6 = vmul.f32 %v3398_v61, %v4120_v2  ;;  %v4174_v2 = vadd.f32 %v2833_v27, %v2301_v30 }
 0xdae   : > { %3121 = vmatprep.mubr.msk.bf16.mxu1 %vm594_vm0, %v2323_v9  ;;  %v4167_v59 = vadd.f32 %v2833_v27, %v2300_v0  ;;  %v2288_v55 = vmul.f32 %v3400_v1, %v4122_v45 }
 0xdaf   : > { %v2303_v33 = vmul.f32 %v2832_v56, %v2289_v6 }
 0xdb0   : > { %v3402_v48 = vpop.eup %3401  ;;  %v2324_v17 = vpack.c.bf16 %v4167_v59, %v4165_v52  ;;  %v2302_v51 = vmul.f32 %v2832_v56, %v2288_v55 }
 0xdb1   : > { %v2290_v31 = vmul.f32 %v3402_v48, %v4130_v29  ;;  %v4180_v45 = vadd.f32 %v2833_v27, %v2303_v33 }
 0xdb2   : > { %3122 = vmatmul.mubr.msk.bf16.vlgmr.msra.gmra.mxu1 %vm594_vm0, %v2324_v17  ;;  %v4176_v41 = vadd.f32 %v2833_v27, %v2302_v51 }
 0xdb3   : > { %v2304_v50 = vmul.f32 %v2832_v56, %v2290_v31 }
 0xdb4   : > { %v2325_v54 = vpack.c.bf16 %v4176_v41, %v4174_v2 }
 0xdb5   : > { %v4182_v34 = vadd.f32 %v2833_v27, %v2304_v50 }
 0xdb6   : > { %3125 = vmatprep.mubr.msk.bf16.mxu1 %vm594_vm0, %v2325_v54 }
 0xdb7   : > { %v2326_v29 = vpack.c.bf16 %v4182_v34, %v4180_v45 }
 0xdba   : > { %3126 = vmatmul.mubr.msk.bf16.gmra.mxu1 %vm594_vm0, %v2326_v29 }
 0xe72   : > { %v3123_v39 = vpop.f32.mrf.mxu1 }
 0xe73   : > { %v2401_v13 = vadd.f32 %v3123_v39, %v2834_v43 }
 0xe74   : > { %v2392_v40 = vpop.f32.mrf.mxu1 }
 0xe75   : > { %v2393_v46 = vadd.f32 %v2834_v43, %v2392_v40  ;;  %v2425_v47 = vmax.f32 %v2401_v13, 0.0 }
 0xe76   : > { %v3124_v44 = vpop.f32.mrf.mxu1 }
 0xe77   : > { %v2404_v23 = vadd.f32 %v3124_v44, %v2834_v43  ;;  %v2423_v32 = vmax.f32 %v2393_v46, 0.0 }
 0xe78   : > { %v2395_v3 = vpop.f32.mrf.mxu1 }
 0xe79   : > { %v2396_v11 = vadd.f32 %v2834_v43, %v2395_v3  ;;  %v2426_v7 = vmax.f32 %v2404_v23, 0.0 }
 0xe7a   : > { %v3127_v15 = vpop.f32.mrf.mxu1 }
 0xe7b   : > { %v2424_v12 = vmax.f32 %v2396_v11, 0.0  ;;  %v2440_v8 = vpack.c.bf16 %v2426_v7, %v2425_v47  ;;  %v2417_v42 = vadd.f32 %v3127_v15, %v2834_v43 }
 0xe7c   : > { %v2408_v38 = vpop.f32.mrf.mxu1 }
 0xe7d   : > { %v2439_v5 = vpack.c.bf16 %v2424_v12, %v2423_v32  ;;  %v2409_v21 = vadd.f32 %v2834_v43, %v2408_v38  ;;  %v2429_v14 = vmax.f32 %v2417_v42, 0.0 }
 0xe7e   : > { %v3128_v10 = vpop.f32.mrf.mxu1 }
 0xe7f   : > { %v2420_v22 = vadd.f32 %v3128_v10, %v2834_v43  ;;  %3137 = vmatprep.mubr.msk.bf16.mxu0 %vm890_vm2, %v2439_v5  ;;  %v2427_v58 = vmax.f32 %v2409_v21, 0.0 }
 0xe80   : > { %v2411_v53 = vpop.f32.mrf.mxu1  ;;  %3138 = vmatmul.mubr.msk.bf16.vlgmr.msra.gmra.mxu0 %vm890_vm2, %v2440_v8 }
 0xe81   : > { %v2412_v57 = vadd.f32 %v2834_v43, %v2411_v53  ;;  %v2430_v26 = vmax.f32 %v2420_v22, 0.0 }
 0xe83   : > { %v2428_v56 = vmax.f32 %v2412_v57, 0.0  ;;  %v2442_v25 = vpack.c.bf16 %v2430_v26, %v2429_v14 }
 0xe85   : > { %v2441_v16 = vpack.c.bf16 %v2428_v56, %v2427_v58 }
 0xe87   : > { %3141 = vmatprep.mubr.msk.bf16.mxu0 %vm890_vm2, %v2441_v16 }
 0xe88   : > { %3142 = vmatmul.mubr.msk.bf16.gmra.mxu0 %vm890_vm2, %v2442_v25 }
 0xf40   : > { %v3139_v27 = vpop.f32.mrf.mxu0 }
 0xf41   : > { %v2529_v28 = vadd.f32 %v3139_v27, %v2841_v62 }
 0xf42   : > { %v2520_v24 = vpop.f32.mrf.mxu0 }
 0xf43   : > { %v2553_v19 = vadd.f32 %v2529_v28, %v4165_v52  ;;  %v2521_v20 = vadd.f32 %v2841_v62, %v2520_v24 }
 0xf44   : > { %v3140_v18 = vpop.f32.mrf.mxu0 }
 0xf45   : > { %v2551_v60 = vadd.f32 %v2521_v20, %v4155_v4  ;;  %v2532_v63 = vadd.f32 %v3140_v18, %v2841_v62  ;;  %v2567_v61 = vsel %vm594_vm0, %v2553_v19, 0.0 }
 0xf46   : > { %2568 = vadd.xlane.f32.xlu1 %v2567_v61  ;;  %v2523_v9 = vpop.f32.mrf.mxu0 }
 0xf47   : > { %v2554_v0 = vadd.f32 %v2532_v63, %v4167_v59  ;;  %v2524_v1 = vadd.f32 %v2841_v62, %v2523_v9  ;;  %v2561_v48 = vsel %vm594_vm0, %v2551_v60, 0.0 }
 0xf48   : > { %v3143_v6 = vpop.f32.mrf.mxu0 }
 0xf49   : > { %v2552_v55 = vadd.f32 %v2524_v1, %v4158_v49  ;;  %v2570_v30 = vsel %vm594_vm0, %v2554_v0, 0.0  ;;  %v2545_v17 = vadd.f32 %v3143_v6, %v2841_v62 }
 0xf4a   : > { %2571 = vadd.xlane.f32.xlu0 %v2570_v30  ;;  %2562 = vadd.xlane.f32.xlu1 %v2561_v48  ;;  %v2536_v52 = vpop.f32.mrf.mxu0 }
 0xf4b   : > { %v2537_v4 = vadd.f32 %v2841_v62, %v2536_v52  ;;  %v2564_v33 = vsel %vm594_vm0, %v2552_v55, 0.0  ;;  %v2557_v50 = vadd.f32 %v2545_v17, %v4180_v45 }
 0xf4c   : > { %v3144_v51 = vpop.f32.mrf.mxu0 }
 0xf4d   : > { %v2555_v31 = vadd.f32 %v2537_v4, %v4174_v2  ;;  %v2548_v54 = vadd.f32 %v3144_v51, %v2841_v62  ;;  %v2579_v39 = vsel %vm594_vm0, %v2557_v50, 0.0 }
 0xf4e   : > { %2565 = vadd.xlane.f32.xlu0 %v2564_v33  ;;  %v2539_v59 = vpop.f32.mrf.mxu0 }
 0xf4f   : > { %v2540_v49 = vadd.f32 %v2841_v62, %v2539_v59  ;;  %v2573_v29 = vsel %vm594_vm0, %v2555_v31, 0.0  ;;  %v2558_v36 = vadd.f32 %v2548_v54, %v4182_v34 }
 0xf50   : > { %2574 = vadd.xlane.f32.xlu1 %v2573_v29 }
 0xf51   : > { %v2556_v35 = vadd.f32 %v2540_v49, %v4176_v41  ;;  %v2582_v2 = vsel %vm594_vm0, %v2558_v36, 0.0 }
 0xf53   : > { %v2576_v37 = vsel %vm594_vm0, %v2556_v35, 0.0 }
 0xf54   : > { %2577 = vadd.xlane.f32.xlu0 %v2576_v37  ;;  %2580 = vadd.xlane.f32.xlu1 %v2579_v39  ;;  %v2850_v39 = vld [vmem:[%s4316_s14] ss:$0 sm:$0xff] }
 0xf58   : > { %2583 = vadd.xlane.f32.xlu0 %v2582_v2 }
 0xfcf   : > { %v2569_v40 = vpop.xlane.xlu1 %2568 }
 0xfd0   : > { %v2587_v45 = vmul.f32 0.03125, %v2569_v40 }
 0xfd2   : > { %v4223_v43 = vsub.f32 %v2553_v19, %v2587_v45 }
 0xfd3   : > { %v2563_v44 = vpop.xlane.xlu1 %2562  ;;  %v2572_v46 = vpop.xlane.xlu0 %2571 }
 0xfd4   : > { %v2585_v23 = vmul.f32 0.03125, %v2563_v44  ;;  %v2588_v13 = vmul.f32 0.03125, %v2572_v46  ;;  %v2603_v41 = vmul.f32 %v4223_v43, %v4223_v43  ;;  %v2851_v44 = vld [vmem:[%s4317_s15] ss:$0 sm:$0xff] }
 0xfd6   : > { %v4227_v34 = vsub.f32 %v2551_v60, %v2585_v23  ;;  %v4229_v3 = vsub.f32 %v2554_v0, %v2588_v13  ;;  %v2615_v11 = vsel %vm594_vm0, %v2603_v41, 0.0 }
 0xfd7   : > { %2616 = vadd.xlane.f32.xlu1 %v2615_v11  ;;  %v2566_v7 = vpop.xlane.xlu0 %2565 }
 0xfd8   : > { %v2586_v15 = vmul.f32 0.03125, %v2566_v7  ;;  %v2601_v32 = vmul.f32 %v4227_v34, %v4227_v34  ;;  %v2604_v12 = vmul.f32 %v4229_v3, %v4229_v3 }
 0xfd9   : > { %v2575_v47 = vpop.xlane.xlu1 %2574 }
 0xfda   : > { %v4236_v38 = vsub.f32 %v2552_v55, %v2586_v15  ;;  %v2589_v5 = vmul.f32 0.03125, %v2575_v47  ;;  %v2609_v8 = vsel %vm594_vm0, %v2601_v32, 0.0  ;;  %v2618_v10 = vsel %vm594_vm0, %v2604_v12, 0.0 }
 0xfdb   : > { %2610 = vadd.xlane.f32.xlu1 %v2609_v8  ;;  %2619 = vadd.xlane.f32.xlu0 %v2618_v10 }
 0xfdc   : > { %v4240_v21 = vsub.f32 %v2555_v31, %v2589_v5  ;;  %v2602_v22 = vmul.f32 %v4236_v38, %v4236_v38 }
 0xfdd   : > { %v2581_v42 = vpop.xlane.xlu1 %2580  ;;  %v2578_v53 = vpop.xlane.xlu0 %2577 }
 0xfde   : > { %v2591_v57 = vmul.f32 0.03125, %v2581_v42  ;;  %v2590_v26 = vmul.f32 0.03125, %v2578_v53  ;;  %v2612_v58 = vsel %vm594_vm0, %v2602_v22, 0.0  ;;  %v2605_v56 = vmul.f32 %v4240_v21, %v4240_v21 }
 0xfdf   : > { %2613 = vadd.xlane.f32.xlu0 %v2612_v58 }
 0xfe0   : > { %v4247_v14 = vsub.f32 %v2557_v50, %v2591_v57  ;;  %v4249_v16 = vsub.f32 %v2556_v35, %v2590_v26  ;;  %v2621_v25 = vsel %vm594_vm0, %v2605_v56, 0.0 }
 0xfe1   : > { %2622 = vadd.xlane.f32.xlu1 %v2621_v25  ;;  %v2584_v62 = vpop.xlane.xlu0 %2583 }
 0xfe2   : > { %v2592_v27 = vmul.f32 0.03125, %v2584_v62  ;;  %v2607_v28 = vmul.f32 %v4247_v14, %v4247_v14  ;;  %v2606_v24 = vmul.f32 %v4249_v16, %v4249_v16 }
 0xfe4   : > { %v4256_v19 = vsub.f32 %v2558_v36, %v2592_v27  ;;  %v2627_v20 = vsel %vm594_vm0, %v2607_v28, 0.0  ;;  %v2624_v18 = vsel %vm594_vm0, %v2606_v24, 0.0 }
 0xfe5   : > { %2628 = vadd.xlane.f32.xlu1 %v2627_v20  ;;  %2625 = vadd.xlane.f32.xlu0 %v2624_v18 }
 0xfe6   : > { %v2608_v60 = vmul.f32 %v4256_v19, %v4256_v19 }
 0xfe8   : > { %v2630_v63 = vsel %vm594_vm0, %v2608_v60, 0.0 }
 0xfe9   : > { %2631 = vadd.xlane.f32.xlu0 %v2630_v63 }
0x1060   : > { %v2617_v61 = vpop.xlane.xlu1 %2616 }
0x1061   : > { %v2635_v9 = vmul.f32 0.03125, %v2617_v61 }
0x1063   : > { %v2643_v0 = vadd.f32 1e-05, %v2635_v9 }
0x1064   : > { %v2611_v1 = vpop.xlane.xlu1 %2610  ;;  %v2620_v6 = vpop.xlane.xlu0 %2619 }
0x1065   : > { %3403 = vrsqrt.f32 %v2643_v0  ;;  %v2633_v55 = vmul.f32 0.03125, %v2611_v1  ;;  %v2636_v30 = vmul.f32 0.03125, %v2620_v6 }
0x1067   : > { %v2641_v48 = vadd.f32 1e-05, %v2633_v55  ;;  %v2644_v52 = vadd.f32 1e-05, %v2636_v30 }
0x1068   : > { %v2614_v17 = vpop.xlane.xlu0 %2613 }
0x1069   : > { %3405 = vrsqrt.f32 %v2641_v48  ;;  %v2634_v4 = vmul.f32 0.03125, %v2614_v17 }
0x106a   : > { %3407 = vrsqrt.f32 %v2644_v52  ;;  %v2623_v51 = vpop.xlane.xlu1 %2622 }
0x106b   : > { %v2642_v31 = vadd.f32 1e-05, %v2634_v4  ;;  %v2637_v33 = vmul.f32 0.03125, %v2623_v51 }
0x106d   : > { %3409 = vrsqrt.f32 %v2642_v31  ;;  %v2645_v59 = vadd.f32 1e-05, %v2637_v33 }
0x106e   : > { %v2629_v50 = vpop.xlane.xlu1 %2628  ;;  %v2626_v54 = vpop.xlane.xlu0 %2625 }
0x106f   : > { %3411 = vrsqrt.f32 %v2645_v59  ;;  %v2639_v49 = vmul.f32 0.03125, %v2629_v50  ;;  %v2638_v29 = vmul.f32 0.03125, %v2626_v54 }
0x1071   : > { %v2647_v35 = vadd.f32 1e-05, %v2639_v49  ;;  %v2646_v36 = vadd.f32 1e-05, %v2638_v29 }
0x1072   : > { %v3404_v37 = vpop.eup %3403  ;;  %v2632_v2 = vpop.xlane.xlu0 %2631 }
0x1073   : > { %v2659_v40 = vmul.f32 %v3404_v37, %v4223_v43  ;;  %3413 = vrsqrt.f32 %v2647_v35  ;;  %v2640_v45 = vmul.f32 0.03125, %v2632_v2 }
0x1074   : > { %3415 = vrsqrt.f32 %v2646_v36 }
0x1075   : > { %v2673_v46 = vmul.f32 %v2850_v39, %v2659_v40  ;;  %v2648_v23 = vadd.f32 1e-05, %v2640_v45 }
0x1076   : > { %v3406_v13 = vpop.eup %3405 }
0x1077   : > { %v3408_v41 = vpop.eup %3407  ;;  %v2687_v43 = vadd.f32 %v2851_v44, %v2673_v46  ;;  %v2657_v11 = vmul.f32 %v3406_v13, %v4227_v34  ;;  %3417 = vrsqrt.f32 %v2648_v23 }
0x1078   : > { %v2660_v7 = vmul.f32 %v3408_v41, %v4229_v3 }
0x1079   : > { %2695 = vst.msk [vmem:[%s4274_s0 + $0x10] sm:$0xff] %vm594_vm0, %v2687_v43  ;;  %v2671_v15 = vmul.f32 %v2850_v39, %v2657_v11 }
0x107a   : > { %v3410_v32 = vpop.eup %3409  ;;  %v2674_v12 = vmul.f32 %v2850_v39, %v2660_v7 }
0x107b   : > { %v2685_v47 = vadd.f32 %v2851_v44, %v2671_v15  ;;  %v2658_v5 = vmul.f32 %v3410_v32, %v4236_v38 }
0x107c   : > { %v3412_v8 = vpop.eup %3411  ;;  %v2688_v10 = vadd.f32 %v2851_v44, %v2674_v12 }
0x107d   : > { %2693 = vst.msk [vmem:[%s4274_s0] sm:$0xff] %vm594_vm0, %v2685_v47  ;;  %v2672_v22 = vmul.f32 %v2850_v39, %v2658_v5  ;;  %v2661_v34 = vmul.f32 %v3412_v8, %v4240_v21 }
0x107e   : > { %2696 = vst.msk [vmem:[%s4274_s0 + $0x18] sm:$0xff] %vm594_vm0, %v2688_v10 }
0x107f   : > { %v2686_v3 = vadd.f32 %v2851_v44, %v2672_v22  ;;  %v2675_v42 = vmul.f32 %v2850_v39, %v2661_v34 }
0x1080   : > { %v3414_v53 = vpop.eup %3413 }
0x1081   : > { %v3416_v57 = vpop.eup %3415  ;;  %2694 = vst.msk [vmem:[%s4274_s0 + $0x8] sm:$0xff] %vm594_vm0, %v2686_v3  ;;  %v2689_v26 = vadd.f32 %v2851_v44, %v2675_v42  ;;  %v2663_v38 = vmul.f32 %v3414_v53, %v4247_v14 }
0x1082   : > { %v2662_v58 = vmul.f32 %v3416_v57, %v4249_v16 }
0x1083   : > { %2697 = vst.msk [vmem:[%s4274_s0 + $0x20] sm:$0xff] %vm594_vm0, %v2689_v26  ;;  %v2677_v56 = vmul.f32 %v2850_v39, %v2663_v38 }
0x1084   : > { %v3418_v21 = vpop.eup %3417  ;;  %v2676_v25 = vmul.f32 %v2850_v39, %v2662_v58 }
0x1085   : > { %v2691_v62 = vadd.f32 %v2851_v44, %v2677_v56  ;;  %v2664_v27 = vmul.f32 %v3418_v21, %v4256_v19 }
0x1086   : > { %v2690_v28 = vadd.f32 %v2851_v44, %v2676_v25 }
0x1087   : > { %2699 = vst.msk [vmem:[%s4274_s0 + $0x30] sm:$0xff] %vm594_vm0, %v2691_v62  ;;  %v2678_v24 = vmul.f32 %v2850_v39, %v2664_v27 }
0x1088   : > { %2698 = vst.msk [vmem:[%s4274_s0 + $0x28] sm:$0xff] %vm594_vm0, %v2690_v28 }
0x1089   : > { %v2692_v20 = vadd.f32 %v2851_v44, %v2678_v24 }
0x108b   : > { %2700 = vst.msk [vmem:[%s4274_s0 + $0x38] sm:$0xff] %vm594_vm0, %v2692_v20 }
0x108c PF: > { %s26_s21 = sadd.s32 1, %s3433_s21  }
0x108d   : > { %p23_p4 = scmp.ge.s32.totalorder %s26_s21, 4  }
0x108f   :  { %25 = sbr.rel (!%p23_p4) target bundleno = 2 (0x2), region = 117 }

// kernel: _lambda_.6
= control target key start
LH: loop header
LB: loop body
LE: loop exit
PB: predicated region body
PF: predicated region fallthrough
CT: control target
= control target key end

     0   :  { %s5303_s0 = inlined_call_operand.vmem [shape: f32[2,26,32], index: 0, kind: input, shape index: {}]   ;;  %s5304_s1 = inlined_call_operand.vmem [shape: f32[2,64,32], index: 1, kind: input, shape index: {}]   ;;  %s5305_s2 = inlined_call_operand.vmem [shape: f32[2,64,32], index: 2, kind: input, shape index: {}]   ;;  %s5306_s3 = inlined_call_operand.vmem [shape: f32[26,32], index: 3, kind: input, shape index: {}]   ;;  %s5307_s4 = inlined_call_operand.vmem [shape: bf16[32,64], index: 4, kind: input, shape index: {}]   ;;  %s5308_s5 = inlined_call_operand.vmem [shape: f32[1,64], index: 5, kind: input, shape index: {}, may-alias: {5,23}]   ;;  %s5309_s6 = inlined_call_operand.vmem [shape: bf16[32,32], index: 6, kind: input, shape index: {}]   ;;  %s5310_s7 = inlined_call_operand.vmem [shape: f32[1,32], index: 7, kind: input, shape index: {}, may-alias: {7,9,11,13,15,17,19,21,25,27}]   ;;  %s5311_s8 = inlined_call_operand.vmem [shape: bf16[32,32], index: 8, kind: input, shape index: {}]   ;;  %s5312_s9 = inlined_call_operand.vmem [shape: f32[1,32], index: 9, kind: input, shape index: {}, may-alias: {7,9,11,13,15,17,19,21,25,27}]   ;;  %s5313_s10 = inlined_call_operand.vmem [shape: f32[1,32], index: 10, kind: input, shape index: {}, may-alias: {10,20,26}]   ;;  %s5314_s11 = inlined_call_operand.vmem [shape: f32[1,32], index: 11, kind: input, shape index: {}, may-alias: {7,9,11,13,15,17,19,21,25,27}]   ;;  %s5315_s12 = inlined_call_operand.vmem [shape: bf16[32,32], index: 12, kind: input, shape index: {}]   ;;  %s5316_s13 = inlined_call_operand.vmem [shape: f32[1,32], index: 13, kind: input, shape index: {}, may-alias: {7,9,11,13,15,17,19,21,25,27}]   ;;  %s5317_s14 = inlined_call_operand.vmem [shape: bf16[32,32], index: 14, kind: input, shape index: {}]   ;;  %s5318_s15 = inlined_call_operand.vmem [shape: f32[1,32], index: 15, kind: input, shape index: {}, may-alias: {7,9,11,13,15,17,19,21,25,27}]   ;;  %s5319_s16 = inlined_call_operand.vmem [shape: bf16[32,32], index: 16, kind: input, shape index: {}]   ;;  %s5320_s17 = inlined_call_operand.vmem [shape: f32[1,32], index: 17, kind: input, shape index: {}, may-alias: {7,9,11,13,15,17,19,21,25,27}]   ;;  %s5321_s18 = inlined_call_operand.vmem [shape: bf16[32,32], index: 18, kind: input, shape index: {}]   ;;  %s5322_s19 = inlined_call_operand.vmem [shape: f32[1,32], index: 19, kind: input, shape index: {}, may-alias: {7,9,11,13,15,17,19,21,25,27}]   ;;  %s5323_s20 = inlined_call_operand.vmem [shape: f32[1,32], index: 20, kind: input, shape index: {}, may-alias: {10,20,26}]   ;;  %s5324_s21 = inlined_call_operand.vmem [shape: f32[1,32], index: 21, kind: input, shape index: {}, may-alias: {7,9,11,13,15,17,19,21,25,27}]   ;;  %s5325_s22 = inlined_call_operand.vmem [shape: bf16[32,64], index: 22, kind: input, shape index: {}]   ;;  %s5326_s23 = inlined_call_operand.vmem [shape: f32[1,64], index: 23, kind: input, shape index: {}, may-alias: {5,23}]   ;;  %s5327_s24 = inlined_call_operand.vmem [shape: bf16[64,32], index: 24, kind: input, shape index: {}]   ;;  %s5328_s25 = inlined_call_operand.vmem [shape: f32[1,32], index: 25, kind: input, shape index: {}, may-alias: {7,9,11,13,15,17,19,21,25,27}]   ;;  %s5329_s26 = inlined_call_operand.vmem [shape: f32[1,32], index: 26, kind: input, shape index: {}, may-alias: {10,20,26}]   ;;  %s5330_s27 = inlined_call_operand.vmem [shape: f32[1,32], index: 27, kind: input, shape index: {}, may-alias: {7,9,11,13,15,17,19,21,25,27}]   ;;  %s5331_s28 = inlined_call_operand.vmem [shape: f32[2,26,32], index: 28, kind: output, shape index: {}]  }
   0x1   :  { %5352 = sst [smem:[#allocation2_spill]] %s5303_s0 }
   0x2   :  { %5353 = sst [smem:[#allocation3_spill]] %s5304_s1 }
   0x3   :  { %5354 = sst [smem:[#allocation4_spill]] %s5305_s2 }
   0x4   :  { %5355 = sst [smem:[#allocation5_spill]] %s5306_s3 }
   0x5   :  { %5356 = sst [smem:[#allocation6_spill]] %s5307_s4 }
   0x6   :  { %5357 = sst [smem:[#allocation7_spill]] %s5308_s5 }
   0x7   :  { %5358 = sst [smem:[#allocation8_spill]] %s5309_s6 }
   0x8   :  { %5359 = sst [smem:[#allocation9_spill]] %s5310_s7 }
   0x9   :  { %5360 = sst [smem:[#allocation10_spill]] %s5311_s8  ;;  %s4593_s8 = smov 0  }
   0xa   :  { %5361 = sst [smem:[#allocation11_spill]] %s5312_s9 }
   0xb   :  { %5362 = sst [smem:[#allocation12_spill]] %s5313_s10 }
   0xc   :  { %5363 = sst [smem:[#allocation13_spill]] %s5314_s11 }
   0xd   :  { %5364 = sst [smem:[#allocation14_spill]] %s5315_s12 }
   0xe LB: > { %s3670_s5 = sadd.s32 4294967295, %s4436_s8   ;;  %p3674_p0 = scmp.ge.s32.totalorder %s4436_s8, 1  ;;  %s4436_s8 = sphi %s4593_s8, %s38_s8  }
   0xf   : > { %p782_p1 = scmp.lt.s32.totalorder %s4436_s8, 3 }
  0x11   : > { %p783_p2 = pnand %p3674_p0, %p782_p1 }
  0x12   : > { %s5365_s3 = sld [smem:[#allocation6_spill]] (!%p783_p2)  ;;  %p866_p3 = scmp.lt.s32.totalorder (!%p783_p2), %s3670_s5, 1 }
  0x13   : > { %786 = sbr.rel (%p783_p2) target bundleno = 7303 (0x1c87), region = 132  ;;  %s5366_s29 = sld [smem:[#allocation5_spill]] (!%p783_p2) }
  0x14   : > { %s5367_s0 = sld [smem:[#allocation2_spill]] (!%p783_p2)  ;;  %s4438_s1 = smov (!%p783_p2), 96  }
  0x15   : > { %s5368_s12 = sld [smem:[#allocation7_spill]] (!%p783_p2)  ;;  %s4439_s2 = smov (!%p783_p2), 88  }
  0x16   : > { %s5369_s6 = sld [smem:[#allocation8_spill]] (!%p783_p2)  ;;  %s5348_s9 = smov (!%p783_p2), 120  }
  0x17   : > { %s4441_s30 = smov (!%p783_p2), 80   ;;  %s5346_s10 = smov (!%p783_p2), 112  }
  0x18   : > { %v4250_v0 = vld [vmem:[%s5365_s3 + $0x8] sm:$0xff]   ;;  %v4251_v1 = vld [vmem:[%s5365_s3] sm:$0xff]   ;;  %s5386_s5 = smov (!%p866_p3, %s3670_s5), 1  ;;  %vm940_vm0 = vcmask 261120   ;;  %vm1084_vm1 = vcmask 64512   ;;  %vm1150_vm2 = vcmask 211968  }
  0x19   : > { %3900 = vmatprep.subr.bf16.mxu1 %v4250_v0  ;;  %v907_v2 = vld [vmem:[%s5366_s29] sm:$0xff]  ;;  %v908_v3 = vld [vmem:[%s5366_s29 + $0x8] sm:$0xff]  ;;  %v910_v4 = vld [vmem:[%s5366_s29 + $0x18] sm:$0x3]  ;;  %s5337_s4 = sshll.u32 %s5386_s5, 5  ;;  %vm1160_vm3 = vcmask 205824  }
  0x1a   : > { %3901 = vmatpush3.bf16.msra.mxu1 %v4250_v0  ;;  %v909_v5 = vld [vmem:[%s5366_s29 + $0x10] sm:$0xff]  ;;  %s4627_s11 = scalar_lea.vmem %s5367_s0, %s5337_s4  ;;  %vm1206_vm4 = vcmask 1044480   ;;  %s4443_s0 = smov 72   ;;  %vm1859_vm5 = vcmask 130048   ;;  %vm1864_vm6 = vcmask 195584   ;;  %vm1964_vm7 = vcmask 254976  }
  0x1b   : > { %3902 = vmatprep.subr.bf16.mxu1 %v4251_v1  ;;  %v887_v6 = vld [vmem:[%s4627_s11] sm:$0xff]  ;;  %v888_v7 = vld [vmem:[%s4627_s11 + $0x8] sm:$0xff]  ;;  %v889_v8 = vld [vmem:[%s4627_s11 + $0x10] sm:$0xff]  ;;  %s5340_s7 = smov 8   ;;  %s5376_s4 = sld [smem:[#allocation12_spill]]  ;;  %vm2406_vm8 = vcmask 523264  }
  0x1c   : > { %v911_v9 = vadd.f32 %v907_v2, %v887_v6  ;;  %v912_v10 = vadd.f32 %v908_v3, %v888_v7  ;;  %v890_v11 = vld [vmem:[%s4627_s11 + $0x18] sm:$0x3]  ;;  %v913_v12 = vadd.f32 %v909_v5, %v889_v8  ;;  %v3683_v17 = vld [vmem:[%s5368_s12] ss:$0 sm:$0xff]  ;;  %v4252_v31 = vld [vmem:[%s5369_s6 + $0x8] sm:$0xff]   ;;  %v1000_v33 = vpack.c.bf16 %v888_v7, %v887_v6  ;;  %s5338_s12 = smov 16  }
  0x1d   : > { %v914_v13 = vadd.f32 %v910_v4, %v890_v11  ;;  %v4253_v32 = vld [vmem:[%s5369_s6] sm:$0xff]   ;;  %v1001_v34 = vpack.c.bf16 %v890_v11, %v889_v8  ;;  %vm2416_vm9 = vcmask 517120   ;;  %s5380_s3 = smov 104  }
  0x1e   : > { %3903 = vmatpush3.bf16.msra.mxu1 %v4251_v1  ;;  %v919_v14 = vpack.c.bf16 %v912_v10, %v911_v9 }
  0x1f   : > { %v920_v15 = vpack.c.bf16 %v914_v13, %v913_v12  ;;  %3908 = vmatprep.subr.bf16.mxu1 %v4252_v31 }
  0x20   : > { %3904 = vmatprep.mubr.msk.bf16.mxu1 %vm940_vm0, %v919_v14 }
  0x21   : > { %3905 = vmatmul.mubr.msk.bf16.vlgmr.msra.gmra.mxu1 %vm940_vm0, %v920_v15 }
  0x22   : > { %3912 = vmatprep.mubr.msk.bf16.mxu1 %vm940_vm0, %v1000_v33  ;;  %3909 = vmatpush3.bf16.msra.mxu1 %v4252_v31 }
  0x23   : > { %3910 = vmatprep.subr.bf16.mxu1 %v4253_v32 }
  0x26   : > { %3911 = vmatpush3.bf16.msra.mxu1 %v4253_v32 }
  0x29   : > { %3913 = vmatmul.mubr.msk.bf16.vlgmr.msra.gmra.mxu1 %vm940_vm0, %v1001_v34 }
  0xe1   : > { %v3906_v16 = vpop.f32.mrf.mxu1 }
  0xe2   : > { %v990_v20 = vadd.f32 %v3906_v16, %v3683_v17 }
  0xe3   : > { %v981_v18 = vpop.f32.mrf.mxu1 }
  0xe4   : > { %v982_v23 = vadd.f32 %v3683_v17, %v981_v18 }
  0xe5   : > { %v3907_v19 = vpop.f32.mrf.mxu1 }
  0xe6   : > { %v993_v21 = vadd.f32 %v3907_v19, %v3683_v17 }
  0xe7   : > { %v984_v22 = vpop.f32.mrf.mxu1 }
  0xe8   : > { %v4638_v24 = vpack.c.bf16 %v993_v21, %v990_v20  ;;  %v985_v25 = vadd.f32 %v3683_v17, %v984_v22 }
  0xe9   : > { %v3914_v2 = vpop.f32.mrf.mxu1 }
  0xea   : > { %v4640_v26 = vpack.c.bf16 %v985_v25, %v982_v23  ;;  %1082 = vrot.lane.b32.xlu0 %v4638_v24, %s4438_s1 }
  0xeb   : > { %v1061_v5 = vpop.f32.mrf.mxu1 }
  0xec   : > { %3920 = vmatprep.mubr.msk.bf16.mxu0 %vm1084_vm1, %v4640_v26 }
  0xed   : > { %v3915_v7 = vpop.f32.mrf.mxu1 }
  0xee   : > { %1080 = vrot.lane.b32.xlu0 %v4640_v26, %s4438_s1  ;;  %s5370_s1 = sld [smem:[#allocation9_spill]] }
  0xef   : > { %v1064_v11 = vpop.f32.mrf.mxu1 }
  0xf4   : > { %v3688_v3 = vld [vmem:[%s5370_s1] ss:$0 sm:$0xff]  ;;  %s5372_s1 = sld [smem:[#allocation11_spill]] }
  0xf5   : > { %v1070_v6 = vadd.f32 %v3914_v2, %v3688_v3  ;;  %v1073_v8 = vadd.f32 %v3915_v7, %v3688_v3  ;;  %v1062_v9 = vadd.f32 %v3688_v3, %v1061_v5  ;;  %v1065_v12 = vadd.f32 %v3688_v3, %v1064_v11 }
  0xf7   : > { %v4673_v10 = vpack.c.bf16 %v1073_v8, %v1070_v6  ;;  %v4679_v14 = vpack.c.bf16 %v1065_v12, %v1062_v9 }
  0xf9   : > { %4146 = vmatprep.subr.msk.bf16.mxu1 %vm1206_vm4, %v4673_v10  ;;  %v1208_v13 = vsel %vm1206_vm4, %v4673_v10, 0 }
  0xfa   : > { %3925 = vmatpush3.bf16.msra.mxu1 %v1208_v13 }
  0xfb   : > { %3926 = vmatprep.subr.bf16.mxu1 %v4679_v14 }
  0xfe   : > { %3927 = vmatpush3.bf16.msra.mxu1 %v4679_v14 }
 0x15c   : > { %v1083_v27 = vpop.permute.xlu0 %1082 }
 0x15d   : > { %4144 = vmatprep.subr.msk.bf16.mxu0 %vm1084_vm1, %v1083_v27  ;;  %v1095_v28 = vsel %vm1084_vm1, %v1083_v27, 0 }
 0x15e   : > { %3917 = vmatpush3.bf16.xpose.msra.mxu0 %v1095_v28 }
 0x160   : > { %v1081_v29 = vpop.permute.xlu0 %1080 }
 0x161   : > { %4145 = vmatprep.subr.msk.bf16.mxu0 %vm1084_vm1, %v1081_v29  ;;  %v1092_v30 = vsel %vm1084_vm1, %v1081_v29, 0 }
 0x166   : > { %3919 = vmatpush3.bf16.xpose.msra.mxu0 %v1092_v30 }
 0x16d   : > { %3921 = vmatmul.mubr.msk.bf16.vlgmr.msra.gmra.mxu0 %vm1084_vm1, %v4638_v24 }
 0x22d   : > { %v3922_v35 = vpop.f32.mrf.mxu0 }
 0x22e   : > { %v1148_v36 = vmul.f32 0.35355338, %v3922_v35 }
 0x22f   : > { %v1131_v37 = vpop.f32.mrf.mxu0 }
 0x230   : > { %v1146_v38 = vmul.f32 0.35355338, %v1131_v37  ;;  %v1157_v39 = vsel %vm1150_vm2, %v1148_v36, -inf }
 0x231   : > { %1158 = vmax.xlane.f32.xlu0 %v1157_v39  ;;  %v3923_v40 = vpop.f32.mrf.mxu0 }
 0x232   : > { %v1151_v41 = vsel %vm1150_vm2, %v1146_v38, -inf  ;;  %v1149_v44 = vmul.f32 0.35355338, %v3923_v40 }
 0x233   : > { %1152 = vmax.xlane.f32.xlu1 %v1151_v41  ;;  %v1134_v42 = vpop.f32.mrf.mxu0 }
 0x234   : > { %v1147_v43 = vmul.f32 0.35355338, %v1134_v42  ;;  %v1161_v46 = vsel %vm1160_vm3, %v1149_v44, -inf }
 0x236   : > { %v1154_v45 = vsel %vm1150_vm2, %v1147_v43, -inf }
 0x237   : > { %1155 = vmax.xlane.f32.xlu1 %v1154_v45 }
 0x23b   : > { %1162 = vmax.xlane.f32.xlu1 %v1161_v46 }
 0x247   : > { %1263 = vrot.lane.b32.xlu0 %v4640_v26, %s4439_s2 }
 0x2ba   : > { %v1159_v47 = vpop.xlane.xlu0 %1158 }
 0x2bb   : > { %v1166_v48 = vsub.f32 %v1148_v36, %v1159_v47 }
 0x2bc   : > { %v1153_v49 = vpop.xlane.xlu1 %1152 }
 0x2bd   : > { %v1172_v50 = vmul.f32 1.442695, %v1166_v48  ;;  %v1164_v51 = vsub.f32 %v1146_v38, %v1153_v49 }
 0x2be   : > { %v1264_v34 = vpop.permute.xlu0 %1263 }
 0x2bf   : > { %4270 = vpow2.f32 %v1172_v50  ;;  %v1168_v52 = vmul.f32 1.442695, %v1164_v51  ;;  %v1274_v35 = vsel %vm1084_vm1, %v1264_v34, 0 }
 0x2c0   : > { %v1156_v53 = vpop.xlane.xlu1 %1155 }
 0x2c1   : > { %4272 = vpow2.f32 %v1168_v52  ;;  %v1165_v54 = vsub.f32 %v1147_v43, %v1156_v53 }
 0x2c3   : > { %v1170_v57 = vmul.f32 1.442695, %v1165_v54 }
 0x2c4   : > { %v1163_v55 = vpop.xlane.xlu1 %1162 }
 0x2c5   : > { %v1167_v56 = vsub.f32 %v1149_v44, %v1163_v55 }
 0x2c7   : > { %v1174_v58 = vmul.f32 1.442695, %v1167_v56 }
 0x2c9   : > { %4274 = vpow2.f32 %v1174_v58 }
 0x2ca   : > { %4276 = vpow2.f32 %v1170_v57 }
 0x2cc   : > { %v4271_v59 = vpop.eup %4270 }
 0x2cd   : > { %v1182_v60 = vsel %vm1150_vm2, %v4271_v59, 0.0 }
 0x2ce   : > { %v4273_v61 = vpop.eup %4272  ;;  %1183 = vadd.xlane.f32.xlu1 %v1182_v60 }
 0x2cf   : > { %v1176_v62 = vsel %vm1150_vm2, %v4273_v61, 0.0 }
 0x2d2   : > { %1177 = vadd.xlane.f32.xlu1 %v1176_v62 }
 0x2d6   : > { %v4275_v63 = vpop.eup %4274 }
 0x2d7   : > { %v1185_v0 = vsel %vm1160_vm3, %v4275_v63, 0.0  ;;  %v4277_v1 = vpop.eup %4276 }
 0x2d8   : > { %1186 = vadd.xlane.f32.xlu1 %v1185_v0  ;;  %v1179_v4 = vsel %vm1150_vm2, %v4277_v1, 0.0 }
 0x2dc   : > { %1180 = vadd.xlane.f32.xlu1 %v1179_v4 }
 0x2ed   : > { %1265 = vrot.lane.b32.xlu1 %v4638_v24, %s4439_s2  ;;  %s5344_s2 = smov 104  }
 0x2f1   : > { %1259 = vrot.lane.b32.xlu1 %v4640_v26, %s5348_s9 }
 0x2f5   : > { %1261 = vrot.lane.b32.xlu1 %v4638_v24, %s5348_s9 }
 0x357   : > { %v1184_v15 = vpop.xlane.xlu1 %1183 }
 0x35b   : > { %v1178_v16 = vpop.xlane.xlu1 %1177 }
 0x361   : > { %v1187_v17 = vpop.xlane.xlu1 %1186 }
 0x362   : > { %4278 = vrcp.f32 %v1187_v17 }
 0x363   : > { %4280 = vrcp.f32 %v1178_v16 }
 0x364   : > { %4282 = vrcp.f32 %v1184_v15 }
 0x365   : > { %v1181_v18 = vpop.xlane.xlu1 %1180 }
 0x366   : > { %4284 = vrcp.f32 %v1181_v18 }
 0x369   : > { %v1266_v19 = vpop.permute.xlu1 %1265 }
 0x36a   : > { %4147 = vmatprep.subr.msk.bf16.mxu1 %vm1084_vm1, %v1266_v19  ;;  %v1277_v33 = vsel %vm1084_vm1, %v1266_v19, 0 }
 0x36d   : > { %v1260_v32 = vpop.permute.xlu1 %1259 }
 0x36f   : > { %v4279_v20 = vpop.eup %4278 }
 0x370   : > { %v4281_v21 = vpop.eup %4280  ;;  %v1195_v25 = vmul.f32 %v4279_v20, %v4275_v63 }
 0x371   : > { %v4283_v22 = vpop.eup %4282  ;;  %v1192_v27 = vmul.f32 %v4281_v21, %v4273_v61  ;;  %v1262_v36 = vpop.permute.xlu1 %1261 }
 0x372   : > { %v1194_v29 = vmul.f32 %v4283_v22, %v4271_v59 }
 0x373   : > { %v4285_v23 = vpop.eup %4284 }
 0x374   : > { %v1193_v28 = vmul.f32 %v4285_v23, %v4277_v1  ;;  %v1197_v31 = vpack.c.bf16 %v1195_v25, %v1194_v29 }
 0x376   : > { %v1196_v30 = vpack.c.bf16 %v1193_v28, %v1192_v27 }
 0x378   : > { %3928 = vmatprep.mubr.msk.bf16.mxu1 %vm1150_vm2, %v1196_v30 }
 0x379   : > { %3929 = vmatmul.mubr.msk.bf16.vlgmr.msra.gmra.mxu1 %vm1150_vm2, %v1197_v31 }
 0x37a   : > { %3933 = vmatpush3.bf16.xpose.msra.mxu1 %v1277_v33  ;;  %3936 = vmatprep.mubr.msk.bf16.mxu1 %vm1084_vm1, %v1260_v32 }
 0x37b   : > { %4148 = vmatprep.subr.msk.bf16.mxu1 %vm1084_vm1, %v1264_v34 }
 0x382   : > { %3935 = vmatpush3.bf16.xpose.msra.mxu1 %v1274_v35 }
 0x389   : > { %3937 = vmatmul.mubr.msk.bf16.vlgmr.msra.gmra.mxu1 %vm1084_vm1, %v1262_v36 }
 0x439   : > { %v4697_v37 = vpop.f32.mrf.mxu1 }
 0x43b   : > { %v4699_v38 = vpop.f32.mrf.mxu1 }
 0x43d   : > { %v4701_v39 = vpop.f32.mrf.mxu1 }
 0x43f   : > { %v4703_v40 = vpop.f32.mrf.mxu1 }
 0x449   : > { %v3938_v41 = vpop.f32.mrf.mxu1 }
 0x44a   : > { %v1330_v45 = vmul.f32 0.35355338, %v3938_v41 }
 0x44b   : > { %v1313_v42 = vpop.f32.mrf.mxu1 }
 0x44c   : > { %v1328_v43 = vmul.f32 0.35355338, %v1313_v42  ;;  %v1338_v50 = vsel %vm1150_vm2, %v1330_v45, -inf }
 0x44d   : > { %v3939_v44 = vpop.f32.mrf.mxu1 }
 0x44e   : > { %v1332_v46 = vsel %vm1150_vm2, %v1328_v43, -inf  ;;  %v1331_v49 = vmul.f32 0.35355338, %v3939_v44 }
 0x44f   : > { %1333 = vmax.xlane.f32.xlu1 %v1332_v46  ;;  %v1316_v47 = vpop.f32.mrf.mxu1 }
 0x450   : > { %v1329_v48 = vmul.f32 0.35355338, %v1316_v47  ;;  %v1341_v52 = vsel %vm1160_vm3, %v1331_v49, -inf }
 0x452   : > { %v1335_v51 = vsel %vm1150_vm2, %v1329_v48, -inf }
 0x453   : > { %1339 = vmax.xlane.f32.xlu1 %v1338_v50  ;;  %1336 = vmax.xlane.f32.xlu0 %v1335_v51 }
 0x457   : > { %1342 = vmax.xlane.f32.xlu0 %v1341_v52 }
 0x464   : > { %1382 = vrot.lane.b32.xlu1 %v4673_v10, %s5348_s9 }
 0x4d8   : > { %v1334_v53 = vpop.xlane.xlu1 %1333 }
 0x4d9   : > { %v1344_v54 = vsub.f32 %v1328_v43, %v1334_v53 }
 0x4db   : > { %v1348_v58 = vmul.f32 1.442695, %v1344_v54 }
 0x4dc   : > { %v1340_v55 = vpop.xlane.xlu1 %1339  ;;  %v1337_v56 = vpop.xlane.xlu0 %1336 }
 0x4dd   : > { %v1346_v57 = vsub.f32 %v1330_v45, %v1340_v55  ;;  %v1345_v60 = vsub.f32 %v1329_v48, %v1337_v56 }
 0x4df   : > { %v1352_v59 = vmul.f32 1.442695, %v1346_v57  ;;  %v1350_v1 = vmul.f32 1.442695, %v1345_v60 }
 0x4e0   : > { %v1383_v61 = vpop.permute.xlu1 %1382  ;;  %v1343_v62 = vpop.xlane.xlu0 %1342 }
 0x4e1   : > { %4286 = vpow2.f32 %v1352_v59  ;;  %v1347_v63 = vsub.f32 %v1331_v49, %v1343_v62  ;;  %4149 = vmatprep.subr.msk.bf16.mxu0 %vm1206_vm4, %v1383_v61  ;;  %v1392_v0 = vsel %vm1206_vm4, %v1383_v61, 0 }
 0x4e2   : > { %3941 = vmatpush3.bf16.msra.mxu0 %v1392_v0  ;;  %4288 = vpow2.f32 %v1348_v58 }
 0x4e3   : > { %v1354_v2 = vmul.f32 1.442695, %v1347_v63 }
 0x4e5   : > { %4290 = vpow2.f32 %v1354_v2 }
 0x4e6   : > { %4292 = vpow2.f32 %v1350_v1 }
 0x4ee   : > { %v4287_v3 = vpop.eup %4286 }
 0x4ef   : > { %v1362_v4 = vsel %vm1150_vm2, %v4287_v3, 0.0  ;;  %v4289_v5 = vpop.eup %4288 }
 0x4f0   : > { %1363 = vadd.xlane.f32.xlu1 %v1362_v4  ;;  %v1356_v7 = vsel %vm1150_vm2, %v4289_v5, 0.0 }
 0x4f2   : > { %v4291_v6 = vpop.eup %4290 }
 0x4f3   : > { %v1365_v8 = vsel %vm1160_vm3, %v4291_v6, 0.0  ;;  %v4293_v9 = vpop.eup %4292 }
 0x4f4   : > { %1357 = vadd.xlane.f32.xlu1 %v1356_v7  ;;  %1366 = vadd.xlane.f32.xlu0 %v1365_v8  ;;  %v1359_v11 = vsel %vm1150_vm2, %v4293_v9, 0.0 }
 0x4f8   : > { %1360 = vadd.xlane.f32.xlu0 %v1359_v11 }
 0x505   : > { %1449 = vrot.lane.b32.xlu1 %v4638_v24, %s4441_s30 }
 0x509   : > { %1447 = vrot.lane.b32.xlu1 %v4640_v26, %s4441_s30  ;;  %s3775_s30 = sshll.u32 %s5386_s5, 6 }
 0x50d   : > { %1445 = vrot.lane.b32.xlu1 %v4638_v24, %s5346_s10 }
 0x50e   : > { %1380 = vrot.lane.b32.xlu0 %v4679_v14, %s5348_s9  ;;  %s5374_s9 = sld [smem:[#allocation4_spill]] }
 0x512   : > { %1443 = vrot.lane.b32.xlu0 %v4640_v26, %s5346_s10 }
 0x579   : > { %v1364_v12 = vpop.xlane.xlu1 %1363 }
 0x57d   : > { %v1358_v13 = vpop.xlane.xlu1 %1357  ;;  %v1367_v15 = vpop.xlane.xlu0 %1366 }
 0x57e   : > { %4294 = vrcp.f32 %v1367_v15 }
 0x57f   : > { %4296 = vrcp.f32 %v1358_v13 }
 0x580   : > { %4298 = vrcp.f32 %v1364_v12 }
 0x581   : > { %v1361_v16 = vpop.xlane.xlu0 %1360  ;;  %v1450_v18 = vpop.permute.xlu1 %1449 }
 0x582   : > { %4300 = vrcp.f32 %v1361_v16  ;;  %v1461_v32 = vsel %vm1084_vm1, %v1450_v18, 0 }
 0x585   : > { %v1381_v17 = vpop.permute.xlu0 %1380  ;;  %v1448_v33 = vpop.permute.xlu1 %1447 }
 0x586   : > { %3942 = vmatprep.subr.bf16.mxu0 %v1381_v17  ;;  %v1458_v34 = vsel %vm1084_vm1, %v1448_v33, 0 }
 0x587   : > { %3943 = vmatpush3.bf16.msra.mxu0 %v1381_v17 }
 0x588   : > { %4150 = vmatprep.subr.msk.bf16.mxu0 %vm1084_vm1, %v1450_v18 }
 0x589   : > { %v1444_v31 = vpop.permute.xlu0 %1443  ;;  %v1446_v35 = vpop.permute.xlu1 %1445 }
 0x58b   : > { %v4295_v19 = vpop.eup %4294 }
 0x58c   : > { %v4297_v20 = vpop.eup %4296  ;;  %v1375_v23 = vmul.f32 %v4295_v19, %v4291_v6 }
 0x58d   : > { %v4299_v21 = vpop.eup %4298  ;;  %v1372_v25 = vmul.f32 %v4297_v20, %v4289_v5 }
 0x58e   : > { %v1374_v28 = vmul.f32 %v4299_v21, %v4287_v3 }
 0x58f   : > { %v4301_v22 = vpop.eup %4300 }
 0x590   : > { %v1373_v27 = vmul.f32 %v4301_v22, %v4293_v9  ;;  %v1377_v30 = vpack.c.bf16 %v1375_v23, %v1374_v28 }
 0x592   : > { %v1376_v29 = vpack.c.bf16 %v1373_v27, %v1372_v25 }
 0x594   : > { %3944 = vmatprep.mubr.msk.bf16.mxu0 %vm1150_vm2, %v1376_v29 }
 0x595   : > { %3945 = vmatmul.mubr.msk.bf16.vlgmr.msra.gmra.mxu0 %vm1150_vm2, %v1377_v30 }
 0x596   : > { %3949 = vmatpush3.bf16.xpose.msra.mxu0 %v1461_v32  ;;  %3952 = vmatprep.mubr.msk.bf16.mxu0 %vm1084_vm1, %v1444_v31 }
 0x597   : > { %4151 = vmatprep.subr.msk.bf16.mxu0 %vm1084_vm1, %v1448_v33 }
 0x59e   : > { %3951 = vmatpush3.bf16.xpose.msra.mxu0 %v1458_v34 }
 0x5a5   : > { %3953 = vmatmul.mubr.msk.bf16.vlgmr.msra.gmra.mxu0 %vm1084_vm1, %v1446_v35 }
 0x655   : > { %v4733_v36 = vpop.f32.mrf.mxu0 }
 0x657   : > { %v4735_v41 = vpop.f32.mrf.mxu0 }
 0x659   : > { %v4737_v42 = vpop.f32.mrf.mxu0 }
 0x65a   : > { %v4195_v43 = vpack.i.bf16 %v4737_v42, %v4733_v36 }
 0x65b   : > { %v4741_v44 = vpop.f32.mrf.mxu0 }
 0x65c   : > { %v4190_v45 = vpack.i.bf16 %v4741_v44, %v4735_v41 }
 0x665   : > { %v3954_v46 = vpop.f32.mrf.mxu0 }
 0x666   : > { %v1514_v50 = vmul.f32 0.35355338, %v3954_v46 }
 0x667   : > { %v1497_v47 = vpop.f32.mrf.mxu0 }
 0x668   : > { %v1512_v48 = vmul.f32 0.35355338, %v1497_v47  ;;  %v1522_v55 = vsel %vm1150_vm2, %v1514_v50, -inf }
 0x669   : > { %v3955_v49 = vpop.f32.mrf.mxu0 }
 0x66a   : > { %v1516_v51 = vsel %vm1150_vm2, %v1512_v48, -inf  ;;  %v1515_v54 = vmul.f32 0.35355338, %v3955_v49 }
 0x66b   : > { %1517 = vmax.xlane.f32.xlu0 %v1516_v51  ;;  %v1500_v52 = vpop.f32.mrf.mxu0 }
 0x66c   : > { %v1513_v53 = vmul.f32 0.35355338, %v1500_v52  ;;  %v1525_v57 = vsel %vm1160_vm3, %v1515_v54, -inf }
 0x66e   : > { %v1519_v56 = vsel %vm1150_vm2, %v1513_v53, -inf }
 0x66f   : > { %1523 = vmax.xlane.f32.xlu0 %v1522_v55  ;;  %1520 = vmax.xlane.f32.xlu1 %v1519_v56 }
 0x673   : > { %1526 = vmax.xlane.f32.xlu0 %v1525_v57 }
 0x680   : > { %1564 = vrot.lane.b32.xlu1 %v4673_v10, %s5346_s10 }
 0x6f4   : > { %v1518_v58 = vpop.xlane.xlu0 %1517 }
 0x6f5   : > { %v1528_v59 = vsub.f32 %v1512_v48, %v1518_v58 }
 0x6f7   : > { %v1532_v63 = vmul.f32 1.442695, %v1528_v59 }
 0x6f8   : > { %v1524_v60 = vpop.xlane.xlu0 %1523  ;;  %v1521_v61 = vpop.xlane.xlu1 %1520 }
 0x6f9   : > { %v1530_v62 = vsub.f32 %v1514_v50, %v1524_v60  ;;  %v1529_v1 = vsub.f32 %v1513_v53, %v1521_v61 }
 0x6fb   : > { %v1536_v0 = vmul.f32 1.442695, %v1530_v62  ;;  %v1534_v6 = vmul.f32 1.442695, %v1529_v1 }
 0x6fc   : > { %v1527_v2 = vpop.xlane.xlu0 %1526  ;;  %v1565_v3 = vpop.permute.xlu1 %1564 }
 0x6fd   : > { %4302 = vpow2.f32 %v1536_v0  ;;  %v1531_v4 = vsub.f32 %v1515_v54, %v1527_v2  ;;  %4152 = vmatprep.subr.msk.bf16.mxu1 %vm1206_vm4, %v1565_v3  ;;  %v1574_v5 = vsel %vm1206_vm4, %v1565_v3, 0 }
 0x6fe   : > { %3957 = vmatpush3.bf16.msra.mxu1 %v1574_v5  ;;  %4304 = vpow2.f32 %v1532_v63 }
 0x6ff   : > { %v1538_v7 = vmul.f32 1.442695, %v1531_v4 }
 0x701   : > { %4306 = vpow2.f32 %v1538_v7 }
 0x702   : > { %4308 = vpow2.f32 %v1534_v6 }
 0x70a   : > { %v4303_v8 = vpop.eup %4302 }
 0x70b   : > { %v1546_v9 = vsel %vm1150_vm2, %v4303_v8, 0.0  ;;  %v4305_v11 = vpop.eup %4304 }
 0x70c   : > { %1547 = vadd.xlane.f32.xlu1 %v1546_v9  ;;  %v1540_v15 = vsel %vm1150_vm2, %v4305_v11, 0.0 }
 0x70e   : > { %v4307_v12 = vpop.eup %4306 }
 0x70f   : > { %v1549_v13 = vsel %vm1160_vm3, %v4307_v12, 0.0  ;;  %v4309_v16 = vpop.eup %4308 }
 0x710   : > { %1550 = vadd.xlane.f32.xlu0 %v1549_v13  ;;  %1541 = vadd.xlane.f32.xlu1 %v1540_v15  ;;  %v1543_v17 = vsel %vm1150_vm2, %v4309_v16, 0.0 }
 0x714   : > { %1544 = vadd.xlane.f32.xlu0 %v1543_v17 }
 0x721   : > { %1631 = vrot.lane.b32.xlu1 %v4638_v24, %s4443_s0 }
 0x725   : > { %1629 = vrot.lane.b32.xlu1 %v4640_v26, %s4443_s0  ;;  %s5371_s0 = sld [smem:[#allocation10_spill]] }
 0x729   : > { %1627 = vrot.lane.b32.xlu1 %v4638_v24, %s5344_s2 }
 0x72a   : > { %1562 = vrot.lane.b32.xlu0 %v4679_v14, %s5346_s10  ;;  %s5375_s10 = sld [smem:[#allocation14_spill]] }
 0x72e   : > { %1625 = vrot.lane.b32.xlu0 %v4640_v26, %s5344_s2 }
 0x795   : > { %v1548_v18 = vpop.xlane.xlu1 %1547 }
 0x799   : > { %v1551_v19 = vpop.xlane.xlu0 %1550  ;;  %v1542_v20 = vpop.xlane.xlu1 %1541 }
 0x79a   : > { %4310 = vrcp.f32 %v1551_v19 }
 0x79b   : > { %4312 = vrcp.f32 %v1542_v20 }
 0x79c   : > { %4314 = vrcp.f32 %v1548_v18 }
 0x79d   : > { %v1545_v21 = vpop.xlane.xlu0 %1544  ;;  %v1632_v23 = vpop.permute.xlu1 %1631 }
 0x79e   : > { %4316 = vrcp.f32 %v1545_v21  ;;  %v1643_v35 = vsel %vm1084_vm1, %v1632_v23, 0 }
 0x7a1   : > { %v1563_v22 = vpop.permute.xlu0 %1562  ;;  %v1630_v46 = vpop.permute.xlu1 %1629 }
 0x7a2   : > { %3958 = vmatprep.subr.bf16.mxu1 %v1563_v22  ;;  %v1640_v47 = vsel %vm1084_vm1, %v1630_v46, 0 }
 0x7a3   : > { %3959 = vmatpush3.bf16.msra.mxu1 %v1563_v22 }
 0x7a4   : > { %4153 = vmatprep.subr.msk.bf16.mxu1 %vm1084_vm1, %v1632_v23 }
 0x7a5   : > { %v1626_v34 = vpop.permute.xlu0 %1625  ;;  %v1628_v48 = vpop.permute.xlu1 %1627 }
 0x7a7   : > { %v4311_v24 = vpop.eup %4310 }
 0x7a8   : > { %v4313_v25 = vpop.eup %4312  ;;  %v1559_v29 = vmul.f32 %v4311_v24, %v4307_v12 }
 0x7a9   : > { %v4315_v27 = vpop.eup %4314  ;;  %v1556_v26 = vmul.f32 %v4313_v25, %v4305_v11 }
 0x7aa   : > { %v1558_v31 = vmul.f32 %v4315_v27, %v4303_v8 }
 0x7ab   : > { %v4317_v28 = vpop.eup %4316 }
 0x7ac   : > { %v1557_v30 = vmul.f32 %v4317_v28, %v4309_v16  ;;  %v1561_v33 = vpack.c.bf16 %v1559_v29, %v1558_v31 }
 0x7ae   : > { %v1560_v32 = vpack.c.bf16 %v1557_v30, %v1556_v26 }
 0x7b0   : > { %3960 = vmatprep.mubr.msk.bf16.mxu1 %vm1150_vm2, %v1560_v32 }
 0x7b1   : > { %3961 = vmatmul.mubr.msk.bf16.vlgmr.msra.gmra.mxu1 %vm1150_vm2, %v1561_v33 }
 0x7b2   : > { %3965 = vmatpush3.bf16.xpose.msra.mxu1 %v1643_v35  ;;  %3968 = vmatprep.mubr.msk.bf16.mxu1 %vm1084_vm1, %v1626_v34  ;;  %v4254_v34 = vld [vmem:[%s5371_s0 + $0x8] sm:$0xff]   ;;  %v4255_v35 = vld [vmem:[%s5371_s0] sm:$0xff]   ;;  %s5384_s0 = sshll.u32 %s5386_s5, 5 }
 0x7b3   : > { %4154 = vmatprep.subr.msk.bf16.mxu1 %vm1084_vm1, %v1630_v46 }
 0x7ba   : > { %3967 = vmatpush3.bf16.xpose.msra.mxu1 %v1640_v47 }
 0x7c1   : > { %3969 = vmatmul.mubr.msk.bf16.vlgmr.msra.gmra.mxu1 %vm1084_vm1, %v1628_v48 }
 0x871   : > { %v3962_v49 = vpop.f32.mrf.mxu1 }
 0x873   : > { %v1610_v50 = vpop.f32.mrf.mxu1 }
 0x875   : > { %v3963_v51 = vpop.f32.mrf.mxu1 }
 0x876   : > { %v4205_v52 = vpack.i.bf16 %v3963_v51, %v3962_v49 }
 0x877   : > { %v1613_v53 = vpop.f32.mrf.mxu1 }
 0x878   : > { %v4200_v54 = vpack.i.bf16 %v1613_v53, %v1610_v50 }
 0x881   : > { %v3970_v55 = vpop.f32.mrf.mxu1 }
 0x882   : > { %v1696_v59 = vmul.f32 0.35355338, %v3970_v55 }
 0x883   : > { %v1679_v56 = vpop.f32.mrf.mxu1 }
 0x884   : > { %v1694_v57 = vmul.f32 0.35355338, %v1679_v56  ;;  %v1704_v0 = vsel %vm1150_vm2, %v1696_v59, -inf }
 0x885   : > { %v3971_v58 = vpop.f32.mrf.mxu1 }
 0x886   : > { %v1698_v60 = vsel %vm1150_vm2, %v1694_v57, -inf  ;;  %v1697_v63 = vmul.f32 0.35355338, %v3971_v58 }
 0x887   : > { %1699 = vmax.xlane.f32.xlu0 %v1698_v60  ;;  %v1682_v61 = vpop.f32.mrf.mxu1 }
 0x888   : > { %v1695_v62 = vmul.f32 0.35355338, %v1682_v61  ;;  %v1707_v2 = vsel %vm1160_vm3, %v1697_v63, -inf }
 0x88a   : > { %v1701_v1 = vsel %vm1150_vm2, %v1695_v62, -inf }
 0x88b   : > { %1705 = vmax.xlane.f32.xlu0 %v1704_v0  ;;  %1702 = vmax.xlane.f32.xlu1 %v1701_v1 }
 0x88f   : > { %1708 = vmax.xlane.f32.xlu0 %v1707_v2 }
 0x910   : > { %v1700_v3 = vpop.xlane.xlu0 %1699 }
 0x911   : > { %v1710_v4 = vsub.f32 %v1694_v57, %v1700_v3 }
 0x913   : > { %v1714_v8 = vmul.f32 1.442695, %v1710_v4 }
 0x914   : > { %v1706_v5 = vpop.xlane.xlu0 %1705  ;;  %v1703_v6 = vpop.xlane.xlu1 %1702 }
 0x915   : > { %v1712_v7 = vsub.f32 %v1696_v59, %v1706_v5  ;;  %v1711_v11 = vsub.f32 %v1695_v62, %v1703_v6 }
 0x917   : > { %v1718_v9 = vmul.f32 1.442695, %v1712_v7  ;;  %v1716_v15 = vmul.f32 1.442695, %v1711_v11 }
 0x918   : > { %v1709_v12 = vpop.xlane.xlu0 %1708 }
 0x919   : > { %4318 = vpow2.f32 %v1718_v9  ;;  %v1713_v13 = vsub.f32 %v1697_v63, %v1709_v12 }
 0x91a   : > { %4320 = vpow2.f32 %v1714_v8 }
 0x91b   : > { %v1720_v16 = vmul.f32 1.442695, %v1713_v13 }
 0x91d   : > { %4322 = vpow2.f32 %v1720_v16 }
 0x91e   : > { %4324 = vpow2.f32 %v1716_v15 }
 0x926   : > { %v4319_v17 = vpop.eup %4318 }
 0x927   : > { %v1728_v18 = vsel %vm1150_vm2, %v4319_v17, 0.0  ;;  %v4321_v19 = vpop.eup %4320 }
 0x928   : > { %1729 = vadd.xlane.f32.xlu1 %v1728_v18  ;;  %v1722_v22 = vsel %vm1150_vm2, %v4321_v19, 0.0 }
 0x92a   : > { %v4323_v20 = vpop.eup %4322 }
 0x92b   : > { %v1731_v21 = vsel %vm1160_vm3, %v4323_v20, 0.0  ;;  %v4325_v23 = vpop.eup %4324 }
 0x92c   : > { %1732 = vadd.xlane.f32.xlu0 %v1731_v21  ;;  %1723 = vadd.xlane.f32.xlu1 %v1722_v22  ;;  %v1725_v24 = vsel %vm1150_vm2, %v4325_v23, 0.0 }
 0x930   : > { %1726 = vadd.xlane.f32.xlu0 %v1725_v24  ;;  %v4422_v24 = vld [vmem:[%s4627_s11] sm:$0xff] }
 0x93d   : > { %1746 = vrot.lane.b32.xlu1 %v4673_v10, %s5344_s2 }
 0x941   : > { %4191 = vrot.lane.b32.xlu1 %v4190_v45, %s5340_s7 }
 0x945   : > { %4196 = vrot.lane.b32.xlu1 %v4195_v43, %s5340_s7  ;;  %s5342_s7 = smov 24  }
 0x946   : > { %1744 = vrot.lane.b32.xlu0 %v4679_v14, %s5344_s2  ;;  %s5382_s2 = smov 16  }
 0x949   : > { %4206 = vrot.lane.b32.xlu1 %v4205_v52, %s5338_s12 }
 0x94a   : > { %4201 = vrot.lane.b32.xlu0 %v4200_v54, %s5338_s12  ;;  %s5379_s12 = smov 112  }
 0x9b1   : > { %v1730_v10 = vpop.xlane.xlu1 %1729 }
 0x9b5   : > { %v1733_v25 = vpop.xlane.xlu0 %1732  ;;  %v1724_v27 = vpop.xlane.xlu1 %1723 }
 0x9b6   : > { %4326 = vrcp.f32 %v1733_v25 }
 0x9b7   : > { %4328 = vrcp.f32 %v1724_v27 }
 0x9b8   : > { %4330 = vrcp.f32 %v1730_v10 }
 0x9b9   : > { %v1727_v41 = vpop.xlane.xlu0 %1726  ;;  %v1747_v44 = vpop.permute.xlu1 %1746 }
 0x9ba   : > { %4332 = vrcp.f32 %v1727_v41  ;;  %4155 = vmatprep.subr.msk.bf16.mxu0 %vm1206_vm4, %v1747_v44  ;;  %v1756_v36 = vsel %vm1206_vm4, %v1747_v44, 0 }
 0x9bb   : > { %3973 = vmatpush3.bf16.msra.mxu0 %v1756_v36  ;;  %v4423_v36 = vld [vmem:[%s4627_s11 + $0x10] sm:$0xff] }
 0x9bd   : > { %v1745_v14 = vpop.permute.xlu0 %1744  ;;  %v4192_v52 = vpop.permute.xlu1 %4191 }
 0x9be   : > { %3974 = vmatprep.subr.bf16.mxu0 %v1745_v14  ;;  %v4194_v56 = vunpack.i.h.bf16 %v4192_v52  ;;  %v4193_v57 = vunpack.i.l.bf16 %v4192_v52 }
 0x9bf   : > { %3975 = vmatpush3.bf16.msra.mxu0 %v1745_v14 }
 0x9c0   : > { %3980 = vmatprep.subr.bf16.mxu0 %v4254_v34  ;;  %v1856_v3 = vsel %vm1084_vm1, %v4703_v40, %v4194_v56  ;;  %v1855_v4 = vsel %vm1084_vm1, %v4699_v38, %v4193_v57 }
 0x9c1   : > { %v4197_v53 = vpop.permute.xlu1 %4196  ;;  %v4202_v55 = vpop.permute.xlu0 %4201 }
 0x9c2   : > { %v4199_v58 = vunpack.i.h.bf16 %v4197_v53  ;;  %v4198_v59 = vunpack.i.l.bf16 %v4197_v53  ;;  %v4204_v62 = vunpack.i.h.bf16 %v4202_v55  ;;  %v4203_v63 = vunpack.i.l.bf16 %v4202_v55 }
 0x9c3   : > { %v4327_v42 = vpop.eup %4326 }
 0x9c4   : > { %v4329_v43 = vpop.eup %4328  ;;  %v1741_v29 = vmul.f32 %v4327_v42, %v4323_v20  ;;  %v1858_v5 = vsel %vm1084_vm1, %v4701_v39, %v4199_v58  ;;  %v1857_v6 = vsel %vm1084_vm1, %v4697_v37, %v4198_v59  ;;  %v1860_v13 = vsel %vm1859_vm5, %v1855_v4, %v4203_v63  ;;  %v4424_v42 = vld [vmem:[%s4627_s11 + $0x8] sm:$0xff] }
 0x9c5   : > { %v4331_v45 = vpop.eup %4330  ;;  %v1738_v26 = vmul.f32 %v4329_v43, %v4321_v19  ;;  %v4207_v54 = vpop.permute.xlu1 %4206  ;;  %v1861_v40 = vsel %vm1859_vm5, %v1856_v3, %v4204_v62  ;;  %v3709_v19 = vld [vmem:[%s5372_s1] ss:$0 sm:$0xff]  ;;  %s5373_s1 = sld [smem:[#allocation3_spill]] }
 0x9c6   : > { %v1740_v31 = vmul.f32 %v4331_v45, %v4319_v17  ;;  %v4209_v60 = vunpack.i.h.bf16 %v4207_v54  ;;  %v4208_v61 = vunpack.i.l.bf16 %v4207_v54 }
 0x9c7   : > { %v4333_v28 = vpop.eup %4332 }
 0x9c8   : > { %v1739_v30 = vmul.f32 %v4333_v28, %v4325_v23  ;;  %v1743_v33 = vpack.c.bf16 %v1741_v29, %v1740_v31  ;;  %v1862_v8 = vsel %vm1859_vm5, %v1857_v6, %v4208_v61  ;;  %v1863_v9 = vsel %vm1859_vm5, %v1858_v5, %v4209_v60  ;;  %v4425_v29 = vld [vmem:[%s4627_s11 + $0x18] sm:$0x3]  ;;  %s4851_s11 = scalar_lea.vmem %s5374_s9, %s3775_s30  ;;  %v4256_v31 = vld [vmem:[%s5317_s14 + $0x8] sm:$0xff]   ;;  %s5377_s9 = sld [smem:[#allocation13_spill]] }
 0x9c9   : > { %v902_v52 = vld [vmem:[%s4851_s11 + $0x18] sm:$0xff]  ;;  %v903_v58 = vld [vmem:[%s4851_s11 + $0x20] sm:$0xff]  ;;  %v904_v59 = vld [vmem:[%s4851_s11 + $0x28] sm:$0xff] }
 0x9ca   : > { %v1742_v32 = vpack.c.bf16 %v1739_v30, %v1738_v26  ;;  %v906_v3 = vld [vmem:[%s4851_s11 + $0x38] sm:$0xff] }
 0x9cc   : > { %3976 = vmatprep.mubr.msk.bf16.mxu0 %vm1150_vm2, %v1742_v32  ;;  %v4257_v32 = vld [vmem:[%s5317_s14] sm:$0xff]  }
 0x9cd   : > { %3977 = vmatmul.mubr.msk.bf16.vlgmr.msra.gmra.mxu0 %vm1150_vm2, %v1743_v33 }
 0x9ce   : > { %3981 = vmatpush3.bf16.msra.mxu0 %v4254_v34 }
 0x9cf   : > { %3982 = vmatprep.subr.bf16.mxu0 %v4255_v35 }
 0x9d2   : > { %3983 = vmatpush3.bf16.msra.mxu0 %v4255_v35  ;;  %v899_v35 = vld [vmem:[%s4851_s11] sm:$0xff] }
 0x9d3   : > { %3996 = vmatprep.subr.bf16.mxu0 %v4256_v31 }
 0xa8d   : > { %v3978_v46 = vpop.f32.mrf.mxu0 }
 0xa8f   : > { %v1792_v47 = vpop.f32.mrf.mxu0 }
 0xa91   : > { %v3979_v48 = vpop.f32.mrf.mxu0 }
 0xa92   : > { %v4215_v49 = vpack.i.bf16 %v3979_v48, %v3978_v46  ;;  %v900_v46 = vld [vmem:[%s4851_s11 + $0x8] sm:$0xff] }
 0xa93   : > { %v1795_v50 = vpop.f32.mrf.mxu0 }
 0xa94   : > { %v4210_v51 = vpack.i.bf16 %v1795_v50, %v1792_v47  ;;  %4216 = vrot.lane.b32.xlu1 %v4215_v49, %s5342_s7 }
 0xa96   : > { %4211 = vrot.lane.b32.xlu0 %v4210_v51, %s5342_s7  ;;  %s4846_s7 = scalar_lea.vmem %s5373_s1, %s3775_s30  ;;  %v901_v51 = vld [vmem:[%s4851_s11 + $0x10] sm:$0xff] }
 0xa97   : > { %v4860_v33 = vld [vmem:[%s4846_s7] sm:$0xff]  ;;  %v4863_v34 = vld [vmem:[%s4846_s7 + $0x8] sm:$0xff]  ;;  %v4870_v49 = vld [vmem:[%s4846_s7 + $0x10] sm:$0xff] }
 0xa98   : > { %v2113_v47 = vadd.f32 %v899_v35, %v4860_v33  ;;  %v2114_v48 = vadd.f32 %v900_v46, %v4863_v34  ;;  %v4873_v50 = vld [vmem:[%s4846_s7 + $0x18] sm:$0xff]  ;;  %v2115_v53 = vadd.f32 %v901_v51, %v4870_v49  ;;  %v4879_v54 = vld [vmem:[%s4846_s7 + $0x20] sm:$0xff]  ;;  %v4882_v55 = vld [vmem:[%s4846_s7 + $0x28] sm:$0xff] }
 0xa99   : > { %v2116_v57 = vadd.f32 %v902_v52, %v4873_v50  ;;  %v2117_v60 = vadd.f32 %v903_v58, %v4879_v54  ;;  %v2118_v61 = vadd.f32 %v904_v59, %v4882_v55  ;;  %v4891_v63 = vld [vmem:[%s4846_s7 + $0x30] sm:$0xff] }
 0xa9a   : > { %v2125_v56 = vpack.c.bf16 %v2114_v48, %v2113_v47 }
 0xa9b   : > { %v2126_v62 = vpack.c.bf16 %v2116_v57, %v2115_v53 }
 0xb06   : > { %v4217_v0 = vpop.permute.xlu1 %4216 }
 0xb07   : > { %v4219_v1 = vunpack.i.h.bf16 %v4217_v0  ;;  %v4218_v2 = vunpack.i.l.bf16 %v4217_v0  ;;  %v2127_v0 = vpack.c.bf16 %v2118_v61, %v2117_v60 }
 0xb08   : > { %v4212_v7 = vpop.permute.xlu0 %4211 }
 0xb09   : > { %v4214_v11 = vunpack.i.h.bf16 %v4212_v7  ;;  %v4213_v12 = vunpack.i.l.bf16 %v4212_v7  ;;  %v1867_v38 = vsel %vm1864_vm6, %v1862_v8, %v4218_v2  ;;  %v1868_v15 = vsel %vm1864_vm6, %v1863_v9, %v4219_v1  ;;  %v4894_v1 = vld [vmem:[%s4846_s7 + $0x38] sm:$0xff]  ;;  %v905_v2 = vld [vmem:[%s4851_s11 + $0x30] sm:$0xff]  ;;  %s5383_s11 = smov 24  }
 0xb0a   : > { %v1874_v17 = vpack.c.bf16 %v1868_v15, %v1867_v38  ;;  %v2119_v4 = vadd.f32 %v905_v2, %v4891_v63  ;;  %v2120_v5 = vadd.f32 %v906_v3, %v4894_v1 }
 0xb0b   : > { %v1865_v39 = vsel %vm1864_vm6, %v1860_v13, %v4213_v12  ;;  %v1866_v37 = vsel %vm1864_vm6, %v1861_v40, %v4214_v11 }
 0xb0c   : > { %v1873_v16 = vpack.c.bf16 %v1866_v37, %v1865_v39  ;;  %v2128_v6 = vpack.c.bf16 %v2120_v5, %v2119_v4 }
 0xb0e   : > { %3984 = vmatprep.mubr.msk.bf16.mxu0 %vm940_vm0, %v1873_v16 }
 0xb0f   : > { %3985 = vmatmul.mubr.msk.bf16.vlgmr.msra.gmra.mxu0 %vm940_vm0, %v1874_v17 }
 0xb10   : > { %3997 = vmatpush3.bf16.msra.mxu0 %v4256_v31  ;;  %4000 = vmatprep.mubr.msk.bf16.mxu0 %vm940_vm0, %v2125_v56 }
 0xb11   : > { %3998 = vmatprep.subr.bf16.mxu0 %v4257_v32 }
 0xb14   : > { %3999 = vmatpush3.bf16.msra.mxu0 %v4257_v32 }
 0xb17   : > { %4001 = vmatmul.mubr.msk.bf16.vlgmr.msra.gmra.mxu0 %vm940_vm0, %v2126_v62 }
 0xb18   : > { %4004 = vmatprep.mubr.msk.bf16.mxu0 %vm940_vm0, %v2127_v0 }
 0xb1f   : > { %4005 = vmatmul.mubr.msk.bf16.gmra.mxu0 %vm940_vm0, %v2128_v6 }
 0xbcf   : > { %v3986_v18 = vpop.f32.mrf.mxu0 }
 0xbd0   : > { %v1943_v21 = vadd.f32 %v3986_v18, %v3709_v19 }
 0xbd1   : > { %v1934_v20 = vpop.f32.mrf.mxu0 }
 0xbd2   : > { %v1935_v22 = vadd.f32 %v3709_v19, %v1934_v20  ;;  %v4831_v14 = vadd.f32 %v4423_v36, %v1943_v21 }
 0xbd3   : > { %v3987_v23 = vpop.f32.mrf.mxu0 }
 0xbd4   : > { %v1949_v10 = vadd.f32 %v4422_v24, %v1935_v22  ;;  %v1946_v27 = vadd.f32 %v3987_v23, %v3709_v19  ;;  %v1961_v28 = vsel %vm940_vm0, %v4831_v14, 0.0 }
 0xbd5   : > { %v1937_v25 = vpop.f32.mrf.mxu0 }
 0xbd6   : > { %v1938_v41 = vadd.f32 %v3709_v19, %v1937_v25  ;;  %v1955_v44 = vsel %vm940_vm0, %v1949_v10, 0.0  ;;  %v4838_v26 = vadd.f32 %v4425_v29, %v1946_v27  ;;  %v4259_v25 = vld [vmem:[%s5375_s10] sm:$0xff]  }
 0xbd7   : > { %1956 = vadd.xlane.f32.xlu0 %v1955_v44  ;;  %v4002_v27 = vpop.f32.mrf.mxu0 }
 0xbd8   : > { %v1950_v43 = vadd.f32 %v4424_v42, %v1938_v41  ;;  %v1965_v30 = vsel %vm1964_vm7, %v4838_v26, 0.0 }
 0xbd9   : > { %v2194_v41 = vpop.f32.mrf.mxu0 }
 0xbda   : > { %v1958_v45 = vsel %vm940_vm0, %v1950_v43, 0.0 }
 0xbdb   : > { %1959 = vadd.xlane.f32.xlu1 %v1958_v45  ;;  %1962 = vadd.xlane.f32.xlu0 %v1961_v28  ;;  %v4003_v44 = vpop.f32.mrf.mxu0 }
 0xbdd   : > { %v2197_v36 = vpop.f32.mrf.mxu0 }
 0xbdf   : > { %1966 = vadd.xlane.f32.xlu0 %v1965_v30  ;;  %v4006_v42 = vpop.f32.mrf.mxu0 }
 0xc60   : > { %v1957_v7 = vpop.xlane.xlu0 %1956 }
 0xc61   : > { %v1969_v8 = vmul.f32 0.03125, %v1957_v7 }
 0xc63   : > { %v4903_v9 = vsub.f32 %v1949_v10, %v1969_v8  ;;  %v4258_v10 = vld [vmem:[%s5375_s10 + $0x8] sm:$0xff]  }
 0xc64   : > { %v1960_v11 = vpop.xlane.xlu1 %1959  ;;  %v1963_v12 = vpop.xlane.xlu0 %1962  ;;  %3988 = vmatprep.subr.bf16.mxu1 %v4258_v10 }
 0xc65   : > { %v1970_v13 = vmul.f32 0.03125, %v1960_v11  ;;  %v1971_v40 = vmul.f32 0.03125, %v1963_v12  ;;  %v1977_v38 = vmul.f32 %v4903_v9, %v4903_v9  ;;  %3989 = vmatpush3.bf16.msra.mxu1 %v4258_v10 }
 0xc66   : > { %3990 = vmatprep.subr.bf16.mxu1 %v4259_v25 }
 0xc67   : > { %v4907_v15 = vsub.f32 %v1950_v43, %v1970_v13  ;;  %v4910_v39 = vsub.f32 %v4831_v14, %v1971_v40  ;;  %v1981_v37 = vsel %vm940_vm0, %v1977_v38, 0.0  ;;  %v3721_v14 = vld [vmem:[%s5318_s15] ss:$0 sm:$0xff]  ;;  %v2210_v43 = vpop.f32.mrf.mxu0 }
 0xc68   : > { %1982 = vadd.xlane.f32.xlu1 %v1981_v37  ;;  %v1967_v16 = vpop.xlane.xlu0 %1966  ;;  %v2219_v45 = vadd.f32 %v4006_v42, %v3721_v14  ;;  %v2211_v29 = vadd.f32 %v3721_v14, %v2210_v43  ;;  %v2203_v47 = vadd.f32 %v4002_v27, %v3721_v14  ;;  %v2206_v48 = vadd.f32 %v4003_v44, %v3721_v14  ;;  %v3714_v13 = vld [vmem:[%s5376_s4] ss:$0 sm:$0xff]  ;;  %v4429_v43 = vld [vmem:[%s5366_s29 + $0x18] sm:$0x3]  ;;  %s5378_s4 = smov 120  }
 0xc69   : > { %v1972_v17 = vmul.f32 0.03125, %v1967_v16  ;;  %v1978_v18 = vmul.f32 %v4907_v15, %v4907_v15  ;;  %v1979_v19 = vmul.f32 %v4910_v39, %v4910_v39  ;;  %3991 = vmatpush3.bf16.msra.mxu1 %v4259_v25  ;;  %v4007_v28 = vpop.f32.mrf.mxu0  ;;  %v2195_v53 = vadd.f32 %v3721_v14, %v2194_v41 }
 0xc6a   : > { %v4944_v51 = vpack.c.bf16 %v2206_v48, %v2203_v47  ;;  %v2198_v56 = vadd.f32 %v3721_v14, %v2197_v36 }
 0xc6b   : > { %v4918_v20 = vsub.f32 %v4838_v26, %v1972_v17  ;;  %v1984_v21 = vsel %vm940_vm0, %v1978_v18, 0.0  ;;  %v1987_v22 = vsel %vm940_vm0, %v1979_v19, 0.0  ;;  %v2222_v26 = vadd.f32 %v4007_v28, %v3721_v14  ;;  %v2213_v30 = vpop.f32.mrf.mxu0  ;;  %v3715_v18 = vld [vmem:[%s5377_s9] ss:$0 sm:$0xff]  ;;  %s5381_s9 = smov 8  }
 0xc6c   : > { %1985 = vadd.xlane.f32.xlu0 %v1984_v21  ;;  %1988 = vadd.xlane.f32.xlu1 %v1987_v22  ;;  %v2214_v32 = vadd.f32 %v3721_v14, %v2213_v30  ;;  %v4950_v57 = vpack.c.bf16 %v2198_v56, %v2195_v53  ;;  %v2345_v58 = vsel %vm1084_vm1, %v4944_v51, 0  ;;  %v4428_v14 = vld [vmem:[%s5366_s29 + $0x10] sm:$0xff] }
 0xc6d   : > { %v1980_v23 = vmul.f32 %v4918_v20, %v4918_v20  ;;  %v4934_v31 = vpack.c.bf16 %v2222_v26, %v2219_v45 }
 0xc6e   : > { %v4940_v46 = vpack.c.bf16 %v2214_v32, %v2211_v29  ;;  %v2342_v59 = vsel %vm1084_vm1, %v4950_v57, 0  ;;  %v3716_v32 = vld [vmem:[%s5316_s13] ss:$0 sm:$0xff] }
 0xc6f   : > { %v1990_v24 = vsel %vm1964_vm7, %v1980_v23, 0.0  ;;  %4156 = vmatprep.subr.msk.bf16.mxu0 %vm1084_vm1, %v4934_v31  ;;  %v2351_v35 = vsel %vm1084_vm1, %v4934_v31, 0 }
 0xc70   : > { %1991 = vadd.xlane.f32.xlu0 %v1990_v24  ;;  %4021 = vmatpush3.bf16.xpose.msra.mxu0 %v2351_v35  ;;  %v2348_v52 = vsel %vm1084_vm1, %v4940_v46, 0 }
 0xc71   : > { %4157 = vmatprep.subr.msk.bf16.mxu0 %vm1084_vm1, %v4940_v46 }
 0xc78   : > { %4023 = vmatpush3.bf16.xpose.msra.mxu0 %v2348_v52 }
 0xc79   : > { %4158 = vmatprep.subr.msk.bf16.mxu0 %vm1084_vm1, %v4944_v51 }
 0xc80   : > { %4025 = vmatpush3.bf16.xpose.msra.mxu0 %v2345_v58 }
 0xc81   : > { %4159 = vmatprep.subr.msk.bf16.mxu0 %vm1084_vm1, %v4950_v57 }
 0xc88   : > { %4027 = vmatpush3.bf16.xpose.msra.mxu0 %v2342_v59  ;;  %v4260_v59 = vld [vmem:[%s5319_s16 + $0x8] sm:$0xff]  }
 0xc89   : > { %4008 = vmatprep.subr.bf16.mxu1 %v4260_v59 }
 0xcf1   : > { %v1983_v60 = vpop.xlane.xlu1 %1982 }
 0xcf2   : > { %v1993_v61 = vmul.f32 0.03125, %v1983_v60  ;;  %v4261_v60 = vld [vmem:[%s5319_s16] sm:$0xff]  }
 0xcf4   : > { %v1997_v62 = vadd.f32 1e-05, %v1993_v61  ;;  %v2229_v61 = vpack.c.bf16 %v4863_v34, %v4860_v33 }
 0xcf5   : > { %v1989_v0 = vpop.xlane.xlu1 %1988  ;;  %v1986_v2 = vpop.xlane.xlu0 %1985 }
 0xcf6   : > { %4334 = vrsqrt.f32 %v1997_v62  ;;  %v1995_v3 = vmul.f32 0.03125, %v1989_v0  ;;  %v1994_v4 = vmul.f32 0.03125, %v1986_v2  ;;  %v2230_v62 = vpack.c.bf16 %v4873_v50, %v4870_v49 }
 0xcf7   : > { %v2231_v0 = vpack.c.bf16 %v4882_v55, %v4879_v54  ;;  %v2232_v2 = vpack.c.bf16 %v4894_v1, %v4891_v63 }
 0xcf8   : > { %v1999_v5 = vadd.f32 1e-05, %v1995_v3  ;;  %v1998_v6 = vadd.f32 1e-05, %v1994_v4 }
 0xcf9   : > { %v1992_v7 = vpop.xlane.xlu0 %1991 }
 0xcfa   : > { %4336 = vrsqrt.f32 %v1999_v5  ;;  %v1996_v8 = vmul.f32 0.03125, %v1992_v7 }
 0xcfb   : > { %4338 = vrsqrt.f32 %v1998_v6 }
 0xcfc   : > { %v2000_v11 = vadd.f32 1e-05, %v1996_v8 }
 0xcfe   : > { %4340 = vrsqrt.f32 %v2000_v11 }
 0xd03   : > { %v4335_v12 = vpop.eup %4334 }
 0xd04   : > { %v2005_v40 = vmul.f32 %v4335_v12, %v4903_v9 }
 0xd06   : > { %v2015_v37 = vmul.f32 %v3714_v13, %v2005_v40 }
 0xd07   : > { %v4337_v38 = vpop.eup %4336 }
 0xd08   : > { %v4339_v16 = vpop.eup %4338  ;;  %v2007_v17 = vmul.f32 %v4337_v38, %v4910_v39  ;;  %v4967_v24 = vadd.f32 %v3715_v18, %v2015_v37  ;;  %v4426_v39 = vld [vmem:[%s5366_s29] sm:$0xff] }
 0xd09   : > { %v2006_v19 = vmul.f32 %v4339_v16, %v4907_v15  ;;  %v4427_v15 = vld [vmem:[%s5366_s29 + $0x8] sm:$0xff] }
 0xd0a   : > { %v2017_v21 = vmul.f32 %v3714_v13, %v2007_v17  ;;  %v2029_v41 = vadd.f32 %v4426_v39, %v4967_v24 }
 0xd0b   : > { %v4341_v22 = vpop.eup %4340  ;;  %v2016_v23 = vmul.f32 %v3714_v13, %v2006_v19 }
 0xd0c   : > { %v2008_v10 = vmul.f32 %v4341_v22, %v4918_v20  ;;  %v4972_v27 = vadd.f32 %v3715_v18, %v2017_v21 }
 0xd0d   : > { %v4970_v25 = vadd.f32 %v3715_v18, %v2016_v23 }
 0xd0e   : > { %v2018_v9 = vmul.f32 %v3714_v13, %v2008_v10  ;;  %v2031_v42 = vadd.f32 %v4428_v14, %v4972_v27  ;;  %v3728_v13 = vld [vmem:[%s5320_s17] ss:$0 sm:$0xff] }
 0xd0f   : > { %v2030_v44 = vadd.f32 %v4427_v15, %v4970_v25 }
 0xd10   : > { %v4982_v36 = vadd.f32 %v3715_v18, %v2018_v9 }
 0xd11   : > { %v2037_v20 = vpack.c.bf16 %v2030_v44, %v2029_v41 }
 0xd12   : > { %v2032_v45 = vadd.f32 %v4429_v43, %v4982_v36 }
 0xd13   : > { %3992 = vmatprep.mubr.msk.bf16.mxu1 %vm940_vm0, %v2037_v20 }
 0xd14   : > { %v2038_v28 = vpack.c.bf16 %v2032_v45, %v2031_v42 }
 0xd16   : > { %3993 = vmatmul.mubr.msk.bf16.vlgmr.msra.gmra.mxu1 %vm940_vm0, %v2038_v28 }
 0xd17   : > { %4012 = vmatprep.mubr.msk.bf16.mxu1 %vm940_vm0, %v2229_v61  ;;  %4009 = vmatpush3.bf16.msra.mxu1 %v4260_v59 }
 0xd18   : > { %4010 = vmatprep.subr.bf16.mxu1 %v4261_v60 }
 0xd1b   : > { %4011 = vmatpush3.bf16.msra.mxu1 %v4261_v60 }
 0xd1e   : > { %4013 = vmatmul.mubr.msk.bf16.vlgmr.msra.gmra.mxu1 %vm940_vm0, %v2230_v62 }
 0xd1f   : > { %4016 = vmatprep.mubr.msk.bf16.mxu1 %vm940_vm0, %v2231_v0 }
 0xd26   : > { %4017 = vmatmul.mubr.msk.bf16.gmra.mxu1 %vm940_vm0, %v2232_v2 }
 0xdd6   : > { %v3994_v29 = vpop.f32.mrf.mxu1 }
 0xdd7   : > { %v2107_v53 = vadd.f32 %v3994_v29, %v3716_v32 }
 0xdd8   : > { %v2098_v26 = vpop.f32.mrf.mxu1 }
 0xdd9   : > { %v2099_v48 = vadd.f32 %v3716_v32, %v2098_v26 }
 0xdda   : > { %v3995_v30 = vpop.f32.mrf.mxu1 }
 0xddb   : > { %v2110_v35 = vadd.f32 %v3995_v30, %v3716_v32 }
 0xddc   : > { %v2101_v47 = vpop.f32.mrf.mxu1 }
 0xddd   : > { %v2102_v52 = vadd.f32 %v3716_v32, %v2101_v47  ;;  %v4999_v58 = vpack.c.bf16 %v2110_v35, %v2107_v53 }
 0xdde   : > { %v4014_v1 = vpop.f32.mrf.mxu1 }
 0xddf   : > { %v4997_v56 = vpack.c.bf16 %v2102_v52, %v2099_v48  ;;  %v2307_v21 = vadd.f32 %v4014_v1, %v3728_v13 }
 0xde0   : > { %v2298_v8 = vpop.f32.mrf.mxu1 }
 0xde1   : > { %4028 = vmatprep.mubr.msk.bf16.mxu0 %vm1084_vm1, %v4997_v56  ;;  %v2299_v39 = vadd.f32 %v3728_v13, %v2298_v8 }
 0xde2   : > { %4029 = vmatmul.mubr.msk.bf16.vlgmr.msra.gmra.mxu0 %vm1084_vm1, %v4999_v58  ;;  %v4015_v11 = vpop.f32.mrf.mxu1 }
 0xde3   : > { %v2310_v22 = vadd.f32 %v4015_v11, %v3728_v13 }
 0xde4   : > { %v2301_v12 = vpop.f32.mrf.mxu1 }
 0xde5   : > { %v5036_v41 = vpack.c.bf16 %v2310_v22, %v2307_v21  ;;  %v2302_v15 = vadd.f32 %v3728_v13, %v2301_v12 }
 0xde6   : > { %v4018_v40 = vpop.f32.mrf.mxu1 }
 0xde7   : > { %v2323_v37 = vadd.f32 %v4018_v40, %v3728_v13  ;;  %v5040_v44 = vpack.c.bf16 %v2302_v15, %v2299_v39 }
 0xde8   : > { %v2314_v38 = vpop.f32.mrf.mxu1 }
 0xde9   : > { %v2315_v17 = vadd.f32 %v3728_v13, %v2314_v38 }
 0xdea   : > { %v4019_v16 = vpop.f32.mrf.mxu1 }
 0xdeb   : > { %v2326_v18 = vadd.f32 %v4019_v16, %v3728_v13 }
 0xdec   : > { %v2317_v19 = vpop.f32.mrf.mxu1 }
 0xded   : > { %v5030_v23 = vpack.c.bf16 %v2326_v18, %v2323_v37  ;;  %v2318_v10 = vadd.f32 %v3728_v13, %v2317_v19 }
 0xdef   : > { %v5032_v9 = vpack.c.bf16 %v2318_v10, %v2315_v17  ;;  %4032 = vmatprep.subr.bf16.mxu1 %v5030_v23 }
 0xdf0   : > { %4033 = vmatpush3.bf16.msra.mxu1 %v5030_v23 }
 0xdf1   : > { %4034 = vmatprep.subr.bf16.mxu1 %v5032_v9 }
 0xdf4   : > { %4035 = vmatpush3.bf16.msra.mxu1 %v5032_v9 }
 0xdf5   : > { %4036 = vmatprep.subr.bf16.mxu1 %v5036_v41 }
 0xdf8   : > { %4037 = vmatpush3.bf16.msra.mxu1 %v5036_v41 }
 0xdf9   : > { %4038 = vmatprep.subr.bf16.mxu1 %v5040_v44 }
 0xdfc   : > { %4039 = vmatpush3.bf16.msra.mxu1 %v5040_v44 }
 0xea2   : > { %v4030_v33 = vpop.f32.mrf.mxu0 }
 0xea3   : > { %v2404_v5 = vmul.f32 0.35355338, %v4030_v33 }
 0xea4   : > { %v2387_v34 = vpop.f32.mrf.mxu0 }
 0xea5   : > { %v2402_v3 = vmul.f32 0.35355338, %v2387_v34  ;;  %v2413_v6 = vsel %vm2406_vm8, %v2404_v5, -inf }
 0xea6   : > { %v4031_v4 = vpop.f32.mrf.mxu0 }
 0xea7   : > { %v2407_v49 = vsel %vm2406_vm8, %v2402_v3, -inf  ;;  %v2405_v55 = vmul.f32 0.35355338, %v4031_v4 }
 0xea8   : > { %2408 = vmax.xlane.f32.xlu1 %v2407_v49  ;;  %v2390_v50 = vpop.f32.mrf.mxu0 }
 0xea9   : > { %v2403_v54 = vmul.f32 0.35355338, %v2390_v50  ;;  %v2417_v63 = vsel %vm2416_vm9, %v2405_v55, -inf }
 0xeab   : > { %v2410_v7 = vsel %vm2406_vm8, %v2403_v54, -inf }
 0xeac   : > { %2414 = vmax.xlane.f32.xlu1 %v2413_v6  ;;  %2411 = vmax.xlane.f32.xlu0 %v2410_v7 }
 0xeb0   : > { %2418 = vmax.xlane.f32.xlu0 %v2417_v63 }
 0xf31   : > { %v2409_v20 = vpop.xlane.xlu1 %2408 }
 0xf32   : > { %v2420_v14 = vsub.f32 %v2402_v3, %v2409_v20 }
 0xf34   : > { %v2424_v29 = vmul.f32 1.442695, %v2420_v14 }
 0xf35   : > { %v2415_v42 = vpop.xlane.xlu1 %2414  ;;  %v2412_v43 = vpop.xlane.xlu0 %2411 }
 0xf36   : > { %v2422_v45 = vsub.f32 %v2404_v5, %v2415_v42  ;;  %v2421_v28 = vsub.f32 %v2403_v54, %v2412_v43 }
 0xf38   : > { %v2428_v26 = vmul.f32 1.442695, %v2422_v45  ;;  %v2426_v30 = vmul.f32 1.442695, %v2421_v28 }
 0xf39   : > { %v2419_v32 = vpop.xlane.xlu0 %2418 }
 0xf3a   : > { %4342 = vpow2.f32 %v2428_v26  ;;  %v2423_v35 = vsub.f32 %v2405_v55, %v2419_v32 }
 0xf3b   : > { %4344 = vpow2.f32 %v2426_v30 }
 0xf3c   : > { %4346 = vpow2.f32 %v2424_v29  ;;  %v2430_v47 = vmul.f32 1.442695, %v2423_v35 }
 0xf3e   : > { %4348 = vpow2.f32 %v2430_v47 }
 0xf47   : > { %v4343_v48 = vpop.eup %4342 }
 0xf48   : > { %v4345_v52 = vpop.eup %4344  ;;  %v2438_v53 = vsel %vm2406_vm8, %v4343_v48, 0.0 }
 0xf49   : > { %v4347_v59 = vpop.eup %4346  ;;  %2439 = vadd.xlane.f32.xlu1 %v2438_v53  ;;  %v2435_v60 = vsel %vm2406_vm8, %v4345_v52, 0.0 }
 0xf4a   : > { %2436 = vadd.xlane.f32.xlu0 %v2435_v60  ;;  %v2432_v62 = vsel %vm2406_vm8, %v4347_v59, 0.0 }
 0xf4b   : > { %v4349_v61 = vpop.eup %4348 }
 0xf4c   : > { %v2441_v0 = vsel %vm2416_vm9, %v4349_v61, 0.0 }
 0xf4d   : > { %2433 = vadd.xlane.f32.xlu1 %v2432_v62 }
 0xf4e   : > { %2442 = vadd.xlane.f32.xlu0 %v2441_v0 }
 0xf5e   : > { %2529 = vrot.lane.b32.xlu1 %v4934_v31, %s5378_s4 }
 0xf62   : > { %2525 = vrot.lane.b32.xlu1 %v4944_v51, %s5378_s4 }
 0xf64   : > { %2527 = vrot.lane.b32.xlu0 %v4940_v46, %s5378_s4 }
 0xf66   : > { %2523 = vrot.lane.b32.xlu1 %v4950_v57, %s5378_s4 }
 0xf68   : > { %2515 = vrot.lane.b32.xlu0 %v4997_v56, %s5378_s4 }
 0xf6a   : > { %2517 = vrot.lane.b32.xlu1 %v4999_v58, %s5378_s4 }
 0xfd2   : > { %v2440_v2 = vpop.xlane.xlu1 %2439 }
 0xfd3   : > { %v2437_v33 = vpop.xlane.xlu0 %2436 }
 0xfd4   : > { %4350 = vrcp.f32 %v2437_v33 }
 0xfd5   : > { %4352 = vrcp.f32 %v2440_v2 }
 0xfd6   : > { %v2434_v34 = vpop.xlane.xlu1 %2433 }
 0xfd7   : > { %4354 = vrcp.f32 %v2434_v34  ;;  %v2443_v3 = vpop.xlane.xlu0 %2442 }
 0xfd8   : > { %4356 = vrcp.f32 %v2443_v3 }
 0xfda   : > { %v2530_v4 = vpop.permute.xlu1 %2529 }
 0xfdb   : > { %4160 = vmatprep.subr.msk.bf16.mxu1 %vm1084_vm1, %v2530_v4  ;;  %v2528_v54 = vpop.permute.xlu0 %2527  ;;  %v2547_v12 = vsel %vm1084_vm1, %v2530_v4, 0 }
 0xfdc   : > { %v2544_v40 = vsel %vm1084_vm1, %v2528_v54, 0 }
 0xfde   : > { %v2526_v38 = vpop.permute.xlu1 %2525 }
 0xfdf   : > { %v2516_v13 = vpop.permute.xlu0 %2515  ;;  %v2541_v37 = vsel %vm1084_vm1, %v2526_v38, 0 }
 0xfe1   : > { %v4351_v5 = vpop.eup %4350 }
 0xfe2   : > { %v4353_v49 = vpop.eup %4352  ;;  %v2449_v7 = vmul.f32 %v4351_v5, %v4345_v52  ;;  %v2524_v16 = vpop.permute.xlu1 %2523 }
 0xfe3   : > { %v2450_v63 = vmul.f32 %v4353_v49, %v4343_v48  ;;  %v2538_v17 = vsel %vm1084_vm1, %v2524_v16, 0 }
 0xfe4   : > { %v4355_v50 = vpop.eup %4354 }
 0xfe5   : > { %v4357_v55 = vpop.eup %4356  ;;  %v2448_v6 = vmul.f32 %v4355_v50, %v4347_v59 }
 0xfe6   : > { %v2451_v1 = vmul.f32 %v4357_v55, %v4349_v61  ;;  %v2518_v18 = vpop.permute.xlu1 %2517 }
 0xfe7   : > { %v2452_v8 = vpack.c.bf16 %v2449_v7, %v2448_v6 }
 0xfe8   : > { %v2453_v11 = vpack.c.bf16 %v2451_v1, %v2450_v63 }
 0xfe9   : > { %4040 = vmatprep.mubr.msk.bf16.mxu1 %vm2406_vm8, %v2452_v8 }
 0xfea   : > { %4041 = vmatmul.mubr.msk.bf16.vlgmr.msra.gmra.mxu1 %vm2406_vm8, %v2453_v11 }
 0xfeb   : > { %4045 = vmatpush3.bf16.xpose.msra.mxu1 %v2547_v12  ;;  %4052 = vmatprep.mubr.msk.bf16.mxu1 %vm1084_vm1, %v2516_v13 }
 0xfec   : > { %4161 = vmatprep.subr.msk.bf16.mxu1 %vm1084_vm1, %v2528_v54 }
 0xff3   : > { %4047 = vmatpush3.bf16.xpose.msra.mxu1 %v2544_v40 }
 0xff4   : > { %4162 = vmatprep.subr.msk.bf16.mxu1 %vm1084_vm1, %v2526_v38 }
 0xffb   : > { %4049 = vmatpush3.bf16.xpose.msra.mxu1 %v2541_v37 }
 0xffc   : > { %4163 = vmatprep.subr.msk.bf16.mxu1 %vm1084_vm1, %v2524_v16 }
0x1003   : > { %4051 = vmatpush3.bf16.xpose.msra.mxu1 %v2538_v17 }
0x100a   : > { %4053 = vmatmul.mubr.msk.bf16.vlgmr.msra.gmra.mxu1 %vm1084_vm1, %v2518_v18 }
0x10aa   : > { %v5074_v19 = vpop.f32.mrf.mxu1 }
0x10ac   : > { %v5076_v21 = vpop.f32.mrf.mxu1 }
0x10ae   : > { %v5078_v22 = vpop.f32.mrf.mxu1 }
0x10b0   : > { %v5080_v10 = vpop.f32.mrf.mxu1 }
0x10ca   : > { %v4054_v39 = vpop.f32.mrf.mxu1 }
0x10cb   : > { %v2600_v42 = vmul.f32 0.35355338, %v4054_v39 }
0x10cc   : > { %v2583_v15 = vpop.f32.mrf.mxu1 }
0x10cd   : > { %v2598_v20 = vmul.f32 0.35355338, %v2583_v15  ;;  %v2608_v26 = vsel %vm2406_vm8, %v2600_v42, -inf }
0x10ce   : > { %v4055_v14 = vpop.f32.mrf.mxu1 }
0x10cf   : > { %v2602_v43 = vsel %vm2406_vm8, %v2598_v20, -inf  ;;  %v2601_v29 = vmul.f32 0.35355338, %v4055_v14 }
0x10d0   : > { %2603 = vmax.xlane.f32.xlu0 %v2602_v43  ;;  %v2586_v45 = vpop.f32.mrf.mxu1 }
0x10d1   : > { %v2599_v28 = vmul.f32 0.35355338, %v2586_v45  ;;  %v2611_v32 = vsel %vm2416_vm9, %v2601_v29, -inf }
0x10d3   : > { %v2605_v30 = vsel %vm2406_vm8, %v2599_v28, -inf }
0x10d4   : > { %2609 = vmax.xlane.f32.xlu0 %v2608_v26  ;;  %2606 = vmax.xlane.f32.xlu1 %v2605_v30 }
0x10d8   : > { %2612 = vmax.xlane.f32.xlu0 %v2611_v32 }
0x10e5   : > { %2658 = vrot.lane.b32.xlu1 %v5030_v23, %s5378_s4 }
0x10e9   : > { %2654 = vrot.lane.b32.xlu1 %v5036_v41, %s5378_s4 }
0x10ee   : > { %2656 = vrot.lane.b32.xlu0 %v5032_v9, %s5378_s4 }
0x1159   : > { %v2604_v35 = vpop.xlane.xlu0 %2603 }
0x115a   : > { %v2614_v47 = vsub.f32 %v2598_v20, %v2604_v35 }
0x115c   : > { %v2618_v59 = vmul.f32 1.442695, %v2614_v47 }
0x115d   : > { %v2610_v48 = vpop.xlane.xlu0 %2609  ;;  %v2607_v52 = vpop.xlane.xlu1 %2606 }
0x115e   : > { %v2616_v53 = vsub.f32 %v2600_v42, %v2610_v48  ;;  %v2615_v61 = vsub.f32 %v2599_v28, %v2607_v52 }
0x1160   : > { %v2622_v60 = vmul.f32 1.442695, %v2616_v53  ;;  %v2620_v33 = vmul.f32 1.442695, %v2615_v61 }
0x1161   : > { %v2613_v62 = vpop.xlane.xlu0 %2612  ;;  %v2659_v0 = vpop.permute.xlu1 %2658 }
0x1162   : > { %4358 = vpow2.f32 %v2622_v60  ;;  %v2617_v2 = vsub.f32 %v2601_v29, %v2613_v62  ;;  %4056 = vmatprep.subr.bf16.mxu0 %v2659_v0 }
0x1163   : > { %4057 = vmatpush3.bf16.msra.mxu0 %v2659_v0  ;;  %4360 = vpow2.f32 %v2618_v59 }
0x1164   : > { %v2624_v34 = vmul.f32 1.442695, %v2617_v2 }
0x1165   : > { %v2657_v3 = vpop.permute.xlu0 %2656  ;;  %v2655_v4 = vpop.permute.xlu1 %2654 }
0x1166   : > { %4362 = vpow2.f32 %v2624_v34  ;;  %4058 = vmatprep.subr.bf16.mxu0 %v2657_v3 }
0x1167   : > { %4059 = vmatpush3.bf16.msra.mxu0 %v2657_v3  ;;  %4364 = vpow2.f32 %v2620_v33 }
0x1168   : > { %4060 = vmatprep.subr.bf16.mxu0 %v2655_v4 }
0x116b   : > { %4061 = vmatpush3.bf16.msra.mxu0 %v2655_v4 }
0x116f   : > { %v4359_v5 = vpop.eup %4358 }
0x1170   : > { %v2632_v49 = vsel %vm2406_vm8, %v4359_v5, 0.0  ;;  %v4361_v50 = vpop.eup %4360 }
0x1171   : > { %2633 = vadd.xlane.f32.xlu1 %v2632_v49  ;;  %v2626_v6 = vsel %vm2406_vm8, %v4361_v50, 0.0 }
0x1173   : > { %v4363_v54 = vpop.eup %4362 }
0x1174   : > { %v2635_v55 = vsel %vm2416_vm9, %v4363_v54, 0.0  ;;  %v4365_v7 = vpop.eup %4364 }
0x1175   : > { %2636 = vadd.xlane.f32.xlu0 %v2635_v55  ;;  %2627 = vadd.xlane.f32.xlu1 %v2626_v6  ;;  %v2629_v63 = vsel %vm2406_vm8, %v4365_v7, 0.0 }
0x1179   : > { %2630 = vadd.xlane.f32.xlu0 %v2629_v63 }
0x1186   : > { %2652 = vrot.lane.b32.xlu1 %v5040_v44, %s5378_s4 }
0x118a   : > { %2727 = vrot.lane.b32.xlu1 %v4940_v46, %s5379_s12 }
0x118e   : > { %2723 = vrot.lane.b32.xlu1 %v4950_v57, %s5379_s12 }
0x118f   : > { %2729 = vrot.lane.b32.xlu0 %v4934_v31, %s5379_s12 }
0x1192   : > { %2721 = vrot.lane.b32.xlu1 %v4999_v58, %s5379_s12 }
0x1193   : > { %2725 = vrot.lane.b32.xlu0 %v4944_v51, %s5379_s12 }
0x1197   : > { %2719 = vrot.lane.b32.xlu0 %v4997_v56, %s5379_s12 }
0x11fa   : > { %v2634_v1 = vpop.xlane.xlu1 %2633 }
0x11fe   : > { %v2637_v8 = vpop.xlane.xlu0 %2636  ;;  %v2628_v11 = vpop.xlane.xlu1 %2627 }
0x11ff   : > { %4366 = vrcp.f32 %v2637_v8 }
0x1200   : > { %4368 = vrcp.f32 %v2628_v11 }
0x1201   : > { %4370 = vrcp.f32 %v2634_v1 }
0x1202   : > { %v2631_v12 = vpop.xlane.xlu0 %2630  ;;  %v2653_v13 = vpop.permute.xlu1 %2652 }
0x1203   : > { %4372 = vrcp.f32 %v2631_v12  ;;  %4062 = vmatprep.subr.bf16.mxu0 %v2653_v13 }
0x1204   : > { %4063 = vmatpush3.bf16.msra.mxu0 %v2653_v13 }
0x1206   : > { %v2730_v40 = vpop.permute.xlu0 %2729  ;;  %v2728_v29 = vpop.permute.xlu1 %2727 }
0x1207   : > { %4164 = vmatprep.subr.msk.bf16.mxu0 %vm1084_vm1, %v2730_v40  ;;  %v2747_v45 = vsel %vm1084_vm1, %v2730_v40, 0  ;;  %v2744_v26 = vsel %vm1084_vm1, %v2728_v29, 0 }
0x120a   : > { %v2726_v18 = vpop.permute.xlu0 %2725  ;;  %v2724_v32 = vpop.permute.xlu1 %2723 }
0x120b   : > { %v2741_v30 = vsel %vm1084_vm1, %v2726_v18, 0  ;;  %v2738_v35 = vsel %vm1084_vm1, %v2724_v32, 0 }
0x120c   : > { %v4367_v38 = vpop.eup %4366 }
0x120d   : > { %v4369_v37 = vpop.eup %4368  ;;  %v2645_v39 = vmul.f32 %v4367_v38, %v4363_v54 }
0x120e   : > { %v4371_v16 = vpop.eup %4370  ;;  %v2642_v15 = vmul.f32 %v4369_v37, %v4361_v50  ;;  %v2720_v28 = vpop.permute.xlu0 %2719 }
0x120f   : > { %v2644_v14 = vmul.f32 %v4371_v16, %v4359_v5  ;;  %v2722_v47 = vpop.permute.xlu1 %2721 }
0x1210   : > { %v4373_v17 = vpop.eup %4372 }
0x1211   : > { %v2643_v20 = vmul.f32 %v4373_v17, %v4365_v7  ;;  %v2647_v43 = vpack.c.bf16 %v2645_v39, %v2644_v14 }
0x1213   : > { %v2646_v42 = vpack.c.bf16 %v2643_v20, %v2642_v15 }
0x1215   : > { %4064 = vmatprep.mubr.msk.bf16.mxu0 %vm2406_vm8, %v2646_v42 }
0x1216   : > { %4065 = vmatmul.mubr.msk.bf16.vlgmr.msra.gmra.mxu0 %vm2406_vm8, %v2647_v43 }
0x1217   : > { %4069 = vmatpush3.bf16.xpose.msra.mxu0 %v2747_v45  ;;  %4076 = vmatprep.mubr.msk.bf16.mxu0 %vm1084_vm1, %v2720_v28 }
0x1218   : > { %4165 = vmatprep.subr.msk.bf16.mxu0 %vm1084_vm1, %v2728_v29 }
0x121f   : > { %4071 = vmatpush3.bf16.xpose.msra.mxu0 %v2744_v26 }
0x1220   : > { %4166 = vmatprep.subr.msk.bf16.mxu0 %vm1084_vm1, %v2726_v18 }
0x1227   : > { %4073 = vmatpush3.bf16.xpose.msra.mxu0 %v2741_v30 }
0x1228   : > { %4167 = vmatprep.subr.msk.bf16.mxu0 %vm1084_vm1, %v2724_v32 }
0x122f   : > { %4075 = vmatpush3.bf16.xpose.msra.mxu0 %v2738_v35 }
0x1236   : > { %4077 = vmatmul.mubr.msk.bf16.vlgmr.msra.gmra.mxu0 %vm1084_vm1, %v2722_v47 }
0x12d6   : > { %v5122_v48 = vpop.f32.mrf.mxu0 }
0x12d8   : > { %v5124_v52 = vpop.f32.mrf.mxu0 }
0x12da   : > { %v5126_v53 = vpop.f32.mrf.mxu0 }
0x12db   : > { %v4225_v59 = vpack.i.bf16 %v5126_v53, %v5122_v48 }
0x12dc   : > { %v5130_v60 = vpop.f32.mrf.mxu0 }
0x12dd   : > { %v4220_v61 = vpack.i.bf16 %v5130_v60, %v5124_v52 }
0x12f6   : > { %v4078_v62 = vpop.f32.mrf.mxu0 }
0x12f7   : > { %v2800_v34 = vmul.f32 0.35355338, %v4078_v62 }
0x12f8   : > { %v2783_v0 = vpop.f32.mrf.mxu0 }
0x12f9   : > { %v2798_v2 = vmul.f32 0.35355338, %v2783_v0  ;;  %v2808_v50 = vsel %vm2406_vm8, %v2800_v34, -inf }
0x12fa   : > { %v4079_v33 = vpop.f32.mrf.mxu0 }
0x12fb   : > { %v2802_v3 = vsel %vm2406_vm8, %v2798_v2, -inf  ;;  %v2801_v49 = vmul.f32 0.35355338, %v4079_v33 }
0x12fc   : > { %2803 = vmax.xlane.f32.xlu0 %v2802_v3  ;;  %v2786_v4 = vpop.f32.mrf.mxu0 }
0x12fd   : > { %v2799_v5 = vmul.f32 0.35355338, %v2786_v4  ;;  %v2811_v55 = vsel %vm2416_vm9, %v2801_v49, -inf }
0x12ff   : > { %v2805_v54 = vsel %vm2406_vm8, %v2799_v5, -inf }
0x1300   : > { %2809 = vmax.xlane.f32.xlu0 %v2808_v50  ;;  %2806 = vmax.xlane.f32.xlu1 %v2805_v54 }
0x1304   : > { %2812 = vmax.xlane.f32.xlu0 %v2811_v55 }
0x1311   : > { %2854 = vrot.lane.b32.xlu1 %v5030_v23, %s5379_s12 }
0x1315   : > { %2850 = vrot.lane.b32.xlu1 %v5036_v41, %s5379_s12 }
0x131a   : > { %2852 = vrot.lane.b32.xlu0 %v5032_v9, %s5379_s12 }
0x1385   : > { %v2804_v6 = vpop.xlane.xlu0 %2803 }
0x1386   : > { %v2814_v7 = vsub.f32 %v2798_v2, %v2804_v6 }
0x1388   : > { %v2818_v11 = vmul.f32 1.442695, %v2814_v7 }
0x1389   : > { %v2810_v63 = vpop.xlane.xlu0 %2809  ;;  %v2807_v1 = vpop.xlane.xlu1 %2806 }
0x138a   : > { %v2816_v8 = vsub.f32 %v2800_v34, %v2810_v63  ;;  %v2815_v13 = vsub.f32 %v2799_v5, %v2807_v1 }
0x138c   : > { %v2822_v12 = vmul.f32 1.442695, %v2816_v8  ;;  %v2820_v16 = vmul.f32 1.442695, %v2815_v13 }
0x138d   : > { %v2813_v40 = vpop.xlane.xlu0 %2812  ;;  %v2855_v38 = vpop.permute.xlu1 %2854 }
0x138e   : > { %4374 = vpow2.f32 %v2822_v12  ;;  %v2817_v37 = vsub.f32 %v2801_v49, %v2813_v40  ;;  %4080 = vmatprep.subr.bf16.mxu1 %v2855_v38 }
0x138f   : > { %4081 = vmatpush3.bf16.msra.mxu1 %v2855_v38  ;;  %4376 = vpow2.f32 %v2818_v11 }
0x1390   : > { %v2824_v17 = vmul.f32 1.442695, %v2817_v37 }
0x1391   : > { %v2853_v18 = vpop.permute.xlu0 %2852  ;;  %v2851_v39 = vpop.permute.xlu1 %2850 }
0x1392   : > { %4378 = vpow2.f32 %v2824_v17  ;;  %4082 = vmatprep.subr.bf16.mxu1 %v2853_v18 }
0x1393   : > { %4083 = vmatpush3.bf16.msra.mxu1 %v2853_v18  ;;  %4380 = vpow2.f32 %v2820_v16 }
0x1394   : > { %4084 = vmatprep.subr.bf16.mxu1 %v2851_v39 }
0x1397   : > { %4085 = vmatpush3.bf16.msra.mxu1 %v2851_v39 }
0x139b   : > { %v4375_v15 = vpop.eup %4374 }
0x139c   : > { %v2832_v20 = vsel %vm2406_vm8, %v4375_v15, 0.0  ;;  %v4377_v14 = vpop.eup %4376 }
0x139d   : > { %2833 = vadd.xlane.f32.xlu1 %v2832_v20  ;;  %v2826_v45 = vsel %vm2406_vm8, %v4377_v14, 0.0 }
0x139f   : > { %v4379_v42 = vpop.eup %4378 }
0x13a0   : > { %v2835_v43 = vsel %vm2416_vm9, %v4379_v42, 0.0  ;;  %v4381_v28 = vpop.eup %4380 }
0x13a1   : > { %2836 = vadd.xlane.f32.xlu0 %v2835_v43  ;;  %2827 = vadd.xlane.f32.xlu1 %v2826_v45  ;;  %v2829_v29 = vsel %vm2406_vm8, %v4381_v28, 0.0 }
0x13a5   : > { %2830 = vadd.xlane.f32.xlu0 %v2829_v29 }
0x13b2   : > { %2848 = vrot.lane.b32.xlu1 %v5040_v44, %s5379_s12 }
0x13b6   : > { %2923 = vrot.lane.b32.xlu1 %v4940_v46, %s5380_s3 }
0x13ba   : > { %2919 = vrot.lane.b32.xlu1 %v4950_v57, %s5380_s3 }
0x13bb   : > { %2925 = vrot.lane.b32.xlu0 %v4934_v31, %s5380_s3 }
0x13be   : > { %2917 = vrot.lane.b32.xlu1 %v4999_v58, %s5380_s3 }
0x13bf   : > { %2921 = vrot.lane.b32.xlu0 %v4944_v51, %s5380_s3 }
0x13c3   : > { %2915 = vrot.lane.b32.xlu0 %v4997_v56, %s5380_s3 }
0x1426   : > { %v2834_v26 = vpop.xlane.xlu1 %2833 }
0x142a   : > { %v2837_v30 = vpop.xlane.xlu0 %2836  ;;  %v2828_v32 = vpop.xlane.xlu1 %2827 }
0x142b   : > { %4382 = vrcp.f32 %v2837_v30 }
0x142c   : > { %4384 = vrcp.f32 %v2828_v32 }
0x142d   : > { %4386 = vrcp.f32 %v2834_v26 }
0x142e   : > { %v2831_v46 = vpop.xlane.xlu0 %2830  ;;  %v2849_v57 = vpop.permute.xlu1 %2848 }
0x142f   : > { %4388 = vrcp.f32 %v2831_v46  ;;  %4086 = vmatprep.subr.bf16.mxu1 %v2849_v57 }
0x1430   : > { %4087 = vmatpush3.bf16.msra.mxu1 %v2849_v57 }
0x1432   : > { %v2926_v31 = vpop.permute.xlu0 %2925  ;;  %v2924_v49 = vpop.permute.xlu1 %2923 }
0x1433   : > { %4168 = vmatprep.subr.msk.bf16.mxu1 %vm1084_vm1, %v2926_v31  ;;  %v2943_v4 = vsel %vm1084_vm1, %v2926_v31, 0  ;;  %v2940_v50 = vsel %vm1084_vm1, %v2924_v49, 0 }
0x1436   : > { %v2922_v62 = vpop.permute.xlu0 %2921  ;;  %v2920_v55 = vpop.permute.xlu1 %2919 }
0x1437   : > { %v2937_v54 = vsel %vm1084_vm1, %v2922_v62, 0  ;;  %v2934_v6 = vsel %vm1084_vm1, %v2920_v55, 0 }
0x1438   : > { %v4383_v58 = vpop.eup %4382 }
0x1439   : > { %v4385_v35 = vpop.eup %4384  ;;  %v2845_v56 = vmul.f32 %v4383_v58, %v4379_v42 }
0x143a   : > { %v4387_v51 = vpop.eup %4386  ;;  %v2842_v0 = vmul.f32 %v4385_v35, %v4377_v14  ;;  %v2916_v5 = vpop.permute.xlu0 %2915 }
0x143b   : > { %v2844_v33 = vmul.f32 %v4387_v51, %v4375_v15  ;;  %v2918_v7 = vpop.permute.xlu1 %2917 }
0x143c   : > { %v4389_v47 = vpop.eup %4388 }
0x143d   : > { %v2843_v2 = vmul.f32 %v4389_v47, %v4381_v28  ;;  %v2847_v3 = vpack.c.bf16 %v2845_v56, %v2844_v33 }
0x143f   : > { %v2846_v34 = vpack.c.bf16 %v2843_v2, %v2842_v0 }
0x1441   : > { %4088 = vmatprep.mubr.msk.bf16.mxu1 %vm2406_vm8, %v2846_v34 }
0x1442   : > { %4089 = vmatmul.mubr.msk.bf16.vlgmr.msra.gmra.mxu1 %vm2406_vm8, %v2847_v3 }
0x1443   : > { %4093 = vmatpush3.bf16.xpose.msra.mxu1 %v2943_v4  ;;  %4100 = vmatprep.mubr.msk.bf16.mxu1 %vm1084_vm1, %v2916_v5 }
0x1444   : > { %4169 = vmatprep.subr.msk.bf16.mxu1 %vm1084_vm1, %v2924_v49 }
0x144b   : > { %4095 = vmatpush3.bf16.xpose.msra.mxu1 %v2940_v50 }
0x144c   : > { %4170 = vmatprep.subr.msk.bf16.mxu1 %vm1084_vm1, %v2922_v62 }
0x1453   : > { %4097 = vmatpush3.bf16.xpose.msra.mxu1 %v2937_v54 }
0x1454   : > { %4171 = vmatprep.subr.msk.bf16.mxu1 %vm1084_vm1, %v2920_v55 }
0x145b   : > { %4099 = vmatpush3.bf16.xpose.msra.mxu1 %v2934_v6 }
0x1462   : > { %4101 = vmatmul.mubr.msk.bf16.vlgmr.msra.gmra.mxu1 %vm1084_vm1, %v2918_v7 }
0x1502   : > { %v4090_v63 = vpop.f32.mrf.mxu1 }
0x1504   : > { %v2900_v1 = vpop.f32.mrf.mxu1 }
0x1506   : > { %v4091_v8 = vpop.f32.mrf.mxu1 }
0x1507   : > { %v4235_v11 = vpack.i.bf16 %v4091_v8, %v4090_v63  ;;  %v4262_v63 = vld [vmem:[%s5321_s18 + $0x8] sm:$0xff]  }
0x1508   : > { %v2903_v12 = vpop.f32.mrf.mxu1 }
0x1509   : > { %v4230_v13 = vpack.i.bf16 %v2903_v12, %v2900_v1  ;;  %v4263_v1 = vld [vmem:[%s5321_s18] sm:$0xff]  }
0x1522   : > { %v4102_v40 = vpop.f32.mrf.mxu1 }
0x1523   : > { %v2996_v17 = vmul.f32 0.35355338, %v4102_v40 }
0x1524   : > { %v2979_v38 = vpop.f32.mrf.mxu1 }
0x1525   : > { %v2994_v37 = vmul.f32 0.35355338, %v2979_v38  ;;  %v3004_v14 = vsel %vm2406_vm8, %v2996_v17, -inf }
0x1526   : > { %v4103_v16 = vpop.f32.mrf.mxu1 }
0x1527   : > { %v2998_v18 = vsel %vm2406_vm8, %v2994_v37, -inf  ;;  %v2997_v20 = vmul.f32 0.35355338, %v4103_v16 }
0x1528   : > { %2999 = vmax.xlane.f32.xlu0 %v2998_v18  ;;  %v2982_v39 = vpop.f32.mrf.mxu1 }
0x1529   : > { %v2995_v15 = vmul.f32 0.35355338, %v2982_v39  ;;  %v3007_v43 = vsel %vm2416_vm9, %v2997_v20, -inf }
0x152b   : > { %v3001_v42 = vsel %vm2406_vm8, %v2995_v15, -inf }
0x152c   : > { %3005 = vmax.xlane.f32.xlu0 %v3004_v14  ;;  %3002 = vmax.xlane.f32.xlu1 %v3001_v42 }
0x1530   : > { %3008 = vmax.xlane.f32.xlu0 %v3007_v43 }
0x153d   : > { %3050 = vrot.lane.b32.xlu1 %v5030_v23, %s5380_s3 }
0x15b1   : > { %v3000_v45 = vpop.xlane.xlu0 %2999 }
0x15b2   : > { %v3010_v28 = vsub.f32 %v2994_v37, %v3000_v45 }
0x15b4   : > { %v3014_v32 = vmul.f32 1.442695, %v3010_v28 }
0x15b5   : > { %v3006_v29 = vpop.xlane.xlu0 %3005  ;;  %v3003_v26 = vpop.xlane.xlu1 %3002 }
0x15b6   : > { %v3012_v30 = vsub.f32 %v2996_v17, %v3006_v29  ;;  %v3011_v57 = vsub.f32 %v2995_v15, %v3003_v26 }
0x15b8   : > { %v3018_v46 = vmul.f32 1.442695, %v3012_v30  ;;  %v3016_v51 = vmul.f32 1.442695, %v3011_v57 }
0x15b9   : > { %v3009_v31 = vpop.xlane.xlu0 %3008  ;;  %v3051_v58 = vpop.permute.xlu1 %3050 }
0x15ba   : > { %4390 = vpow2.f32 %v3018_v46  ;;  %v3013_v35 = vsub.f32 %v2997_v20, %v3009_v31  ;;  %4104 = vmatprep.subr.bf16.mxu0 %v3051_v58 }
0x15bb   : > { %4105 = vmatpush3.bf16.msra.mxu0 %v3051_v58  ;;  %4392 = vpow2.f32 %v3014_v32 }
0x15bc   : > { %v3020_v47 = vmul.f32 1.442695, %v3013_v35 }
0x15be   : > { %4394 = vpow2.f32 %v3020_v47 }
0x15bf   : > { %4396 = vpow2.f32 %v3016_v51 }
0x15c7   : > { %v4391_v23 = vpop.eup %4390 }
0x15c8   : > { %v3028_v62 = vsel %vm2406_vm8, %v4391_v23, 0.0  ;;  %v4393_v56 = vpop.eup %4392 }
0x15c9   : > { %3029 = vadd.xlane.f32.xlu1 %v3028_v62  ;;  %v3022_v33 = vsel %vm2406_vm8, %v4393_v56, 0.0 }
0x15cb   : > { %v4395_v0 = vpop.eup %4394 }
0x15cc   : > { %v3031_v2 = vsel %vm2416_vm9, %v4395_v0, 0.0  ;;  %v4397_v34 = vpop.eup %4396 }
0x15cd   : > { %3032 = vadd.xlane.f32.xlu0 %v3031_v2  ;;  %3023 = vadd.xlane.f32.xlu1 %v3022_v33  ;;  %v3025_v3 = vsel %vm2406_vm8, %v4397_v34, 0.0 }
0x15d1   : > { %3026 = vadd.xlane.f32.xlu0 %v3025_v3 }
0x15de   : > { %3046 = vrot.lane.b32.xlu1 %v5036_v41, %s5380_s3 }
0x15e2   : > { %3044 = vrot.lane.b32.xlu1 %v5040_v44, %s5380_s3 }
0x15e6   : > { %4226 = vrot.lane.b32.xlu1 %v4225_v59, %s5381_s9 }
0x15e7   : > { %3048 = vrot.lane.b32.xlu0 %v5032_v9, %s5380_s3 }
0x15ea   : > { %4236 = vrot.lane.b32.xlu1 %v4235_v11, %s5382_s2 }
0x15eb   : > { %4221 = vrot.lane.b32.xlu0 %v4220_v61, %s5381_s9 }
0x15ef   : > { %4231 = vrot.lane.b32.xlu0 %v4230_v13, %s5382_s2 }
0x1652   : > { %v3030_v41 = vpop.xlane.xlu1 %3029 }
0x1653   : > { %4398 = vrcp.f32 %v3030_v41 }
0x1656   : > { %v3033_v4 = vpop.xlane.xlu0 %3032  ;;  %v3024_v44 = vpop.xlane.xlu1 %3023 }
0x1657   : > { %4400 = vrcp.f32 %v3033_v4 }
0x1658   : > { %4402 = vrcp.f32 %v3024_v44 }
0x165a   : > { %v3027_v48 = vpop.xlane.xlu0 %3026  ;;  %v3047_v53 = vpop.permute.xlu1 %3046 }
0x165b   : > { %4404 = vrcp.f32 %v3027_v48 }
0x165e   : > { %v3049_v59 = vpop.permute.xlu0 %3048  ;;  %v3045_v9 = vpop.permute.xlu1 %3044 }
0x165f   : > { %4106 = vmatprep.subr.bf16.mxu0 %v3049_v59 }
0x1660   : > { %4107 = vmatpush3.bf16.msra.mxu0 %v3049_v59  ;;  %v4399_v5 = vpop.eup %4398 }
0x1661   : > { %4108 = vmatprep.subr.bf16.mxu0 %v3047_v53  ;;  %v3040_v55 = vmul.f32 %v4399_v5, %v4391_v23 }
0x1662   : > { %v4227_v37 = vpop.permute.xlu1 %4226  ;;  %v4222_v16 = vpop.permute.xlu0 %4221 }
0x1663   : > { %v4224_v39 = vunpack.i.h.bf16 %v4222_v16  ;;  %v4223_v15 = vunpack.i.l.bf16 %v4222_v16  ;;  %v4229_v20 = vunpack.i.h.bf16 %v4227_v37  ;;  %v4228_v14 = vunpack.i.l.bf16 %v4227_v37 }
0x1664   : > { %4109 = vmatpush3.bf16.msra.mxu0 %v3047_v53  ;;  %v4401_v52 = vpop.eup %4400 }
0x1665   : > { %4110 = vmatprep.subr.bf16.mxu0 %v3045_v9  ;;  %v4403_v60 = vpop.eup %4402  ;;  %v3041_v49 = vmul.f32 %v4401_v52, %v4395_v0  ;;  %v3160_v32 = vsel %vm1084_vm1, %v5080_v10, %v4224_v39  ;;  %v3159_v46 = vsel %vm1084_vm1, %v5076_v21, %v4223_v15  ;;  %v3162_v57 = vsel %vm1084_vm1, %v5078_v22, %v4229_v20  ;;  %v4264_v15 = vld [vmem:[%s5325_s22 + $0x8] sm:$0xff]   ;;  %v4265_v20 = vld [vmem:[%s5325_s22] sm:$0xff]  }
0x1666   : > { %v3038_v50 = vmul.f32 %v4403_v60, %v4393_v56  ;;  %v4237_v17 = vpop.permute.xlu1 %4236  ;;  %v4232_v18 = vpop.permute.xlu0 %4231  ;;  %v3161_v31 = vsel %vm1084_vm1, %v5074_v19, %v4228_v14  ;;  %4124 = vmatprep.subr.bf16.mxu1 %v4264_v15  ;;  %v4266_v14 = vld [vmem:[%s5327_s24 + $0x18] sm:$0xff]  }
0x1667   : > { %v3043_v7 = vpack.c.bf16 %v3041_v49, %v3040_v55  ;;  %v4239_v42 = vunpack.i.h.bf16 %v4237_v17  ;;  %v4238_v43 = vunpack.i.l.bf16 %v4237_v17  ;;  %v4234_v45 = vunpack.i.h.bf16 %v4232_v18  ;;  %4125 = vmatpush3.bf16.msra.mxu1 %v4264_v15 }
0x1668   : > { %v4405_v61 = vpop.eup %4404  ;;  %4111 = vmatpush3.bf16.msra.mxu0 %v3045_v9  ;;  %v4233_v28 = vunpack.i.l.bf16 %v4232_v18  ;;  %4126 = vmatprep.subr.bf16.mxu1 %v4265_v20 }
0x1669   : > { %v3039_v54 = vmul.f32 %v4405_v61, %v4397_v34  ;;  %4116 = vmatprep.subr.bf16.mxu0 %v4262_v63  ;;  %v3165_v35 = vsel %vm1859_vm5, %v3161_v31, %v4238_v43  ;;  %v3166_v51 = vsel %vm1859_vm5, %v3162_v57, %v4239_v42  ;;  %v3164_v10 = vsel %vm1859_vm5, %v3160_v32, %v4234_v45  ;;  %v3751_v34 = vld [vmem:[%s5322_s19] ss:$0 sm:$0xff] }
0x166a   : > { %v3163_v62 = vsel %vm1859_vm5, %v3159_v46, %v4233_v28 }
0x166b   : > { %v3042_v6 = vpack.c.bf16 %v3039_v54, %v3038_v50  ;;  %4127 = vmatpush3.bf16.msra.mxu1 %v4265_v20 }
0x166d   : > { %4112 = vmatprep.mubr.msk.bf16.mxu0 %vm2406_vm8, %v3042_v6 }
0x166e   : > { %4113 = vmatmul.mubr.msk.bf16.vlgmr.msra.gmra.mxu0 %vm2406_vm8, %v3043_v7 }
0x166f   : > { %4117 = vmatpush3.bf16.msra.mxu0 %v4262_v63 }
0x1670   : > { %4118 = vmatprep.subr.bf16.mxu0 %v4263_v1 }
0x1673   : > { %4119 = vmatpush3.bf16.msra.mxu0 %v4263_v1 }
0x1674   : > { %4132 = vmatprep.subr.bf16.mxu0 %v4266_v14 }
0x172e   : > { %v4114_v8 = vpop.f32.mrf.mxu0 }
0x1730   : > { %v3096_v11 = vpop.f32.mrf.mxu0 }
0x1732   : > { %v4115_v12 = vpop.f32.mrf.mxu0 }
0x1733   : > { %v4245_v13 = vpack.i.bf16 %v4115_v12, %v4114_v8 }
0x1734   : > { %v3099_v40 = vpop.f32.mrf.mxu0 }
0x1735   : > { %v4240_v38 = vpack.i.bf16 %v3099_v40, %v3096_v11  ;;  %4246 = vrot.lane.b32.xlu1 %v4245_v13, %s5383_s11 }
0x1737   : > { %4241 = vrot.lane.b32.xlu0 %v4240_v38, %s5383_s11  ;;  %s885_s11 = scalar_lea.vmem %s5331_s28, %s5384_s0 }
0x17a7   : > { %v4247_v29 = vpop.permute.xlu1 %4246 }
0x17a8   : > { %v4249_v26 = vunpack.i.h.bf16 %v4247_v29  ;;  %v4248_v30 = vunpack.i.l.bf16 %v4247_v29 }
0x17a9   : > { %v4242_v58 = vpop.permute.xlu0 %4241 }
0x17aa   : > { %v4244_v47 = vunpack.i.h.bf16 %v4242_v58  ;;  %v4243_v23 = vunpack.i.l.bf16 %v4242_v58  ;;  %v3169_v56 = vsel %vm1864_vm6, %v3165_v35, %v4248_v30  ;;  %v3170_v21 = vsel %vm1864_vm6, %v3166_v51, %v4249_v26 }
0x17ab   : > { %v3176_v2 = vpack.c.bf16 %v3170_v21, %v3169_v56 }
0x17ac   : > { %v3168_v22 = vsel %vm1864_vm6, %v3164_v10, %v4244_v47  ;;  %v3167_v0 = vsel %vm1864_vm6, %v3163_v62, %v4243_v23  ;;  %v3756_v47 = vld [vmem:[%s5323_s20] ss:$0 sm:$0xff] }
0x17ad   : > { %v3175_v19 = vpack.c.bf16 %v3168_v22, %v3167_v0  ;;  %v3757_v22 = vld [vmem:[%s5324_s21] ss:$0 sm:$0xff] }
0x17af   : > { %4120 = vmatprep.mubr.msk.bf16.mxu0 %vm940_vm0, %v3175_v19 }
0x17b0   : > { %4121 = vmatmul.mubr.msk.bf16.vlgmr.msra.gmra.mxu0 %vm940_vm0, %v3176_v2 }
0x17b1   : > { %4133 = vmatpush3.bf16.msra.mxu0 %v4266_v14 }
0x1870   : > { %v4122_v33 = vpop.f32.mrf.mxu0 }
0x1871   : > { %v3245_v41 = vadd.f32 %v4122_v33, %v3751_v34 }
0x1872   : > { %v3236_v3 = vpop.f32.mrf.mxu0 }
0x1873   : > { %v3237_v4 = vadd.f32 %v3751_v34, %v3236_v3  ;;  %v3253_v59 = vadd.f32 %v3245_v41, %v4972_v27 }
0x1874   : > { %v4123_v44 = vpop.f32.mrf.mxu0 }
0x1875   : > { %v3251_v48 = vadd.f32 %v3237_v4, %v4967_v24  ;;  %v3248_v9 = vadd.f32 %v4123_v44, %v3751_v34  ;;  %v3263_v50 = vsel %vm940_vm0, %v3253_v59, 0.0 }
0x1876   : > { %v3239_v53 = vpop.f32.mrf.mxu0 }
0x1877   : > { %v3240_v5 = vadd.f32 %v3751_v34, %v3239_v53  ;;  %v3257_v52 = vsel %vm940_vm0, %v3251_v48, 0.0  ;;  %v3254_v61 = vadd.f32 %v3248_v9, %v4982_v36  ;;  %v4268_v9 = vld [vmem:[%s5327_s24 + $0x8] sm:$0xff]  }
0x1878   : > { %3258 = vadd.xlane.f32.xlu0 %v3257_v52 }
0x1879   : > { %v3252_v60 = vadd.f32 %v3240_v5, %v4970_v25  ;;  %v3266_v24 = vsel %vm1964_vm7, %v3254_v61, 0.0  ;;  %v4269_v5 = vld [vmem:[%s5327_s24] sm:$0xff]  }
0x187b   : > { %v3260_v49 = vsel %vm940_vm0, %v3252_v60, 0.0 }
0x187c   : > { %3261 = vadd.xlane.f32.xlu1 %v3260_v49  ;;  %3264 = vadd.xlane.f32.xlu0 %v3263_v50 }
0x1880   : > { %3267 = vadd.xlane.f32.xlu0 %v3266_v24 }
0x1901   : > { %v3259_v54 = vpop.xlane.xlu0 %3258 }
0x1902   : > { %v3269_v27 = vmul.f32 0.03125, %v3259_v54 }
0x1904   : > { %v3273_v55 = vsub.f32 %v3251_v48, %v3269_v27 }
0x1905   : > { %v3262_v6 = vpop.xlane.xlu1 %3261  ;;  %v3265_v7 = vpop.xlane.xlu0 %3264 }
0x1906   : > { %v3270_v63 = vmul.f32 0.03125, %v3262_v6  ;;  %v3271_v1 = vmul.f32 0.03125, %v3265_v7  ;;  %v3277_v8 = vmul.f32 %v3273_v55, %v3273_v55 }
0x1908   : > { %v3274_v25 = vsub.f32 %v3252_v60, %v3270_v63  ;;  %v3275_v11 = vsub.f32 %v3253_v59, %v3271_v1  ;;  %v3281_v36 = vsel %vm940_vm0, %v3277_v8, 0.0  ;;  %v4267_v59 = vld [vmem:[%s5327_s24 + $0x10] sm:$0xff]  }
0x1909   : > { %3282 = vadd.xlane.f32.xlu1 %v3281_v36  ;;  %v3268_v12 = vpop.xlane.xlu0 %3267  ;;  %4134 = vmatprep.subr.bf16.mxu0 %v4267_v59  ;;  %v3763_v36 = vld [vmem:[%s5328_s25] ss:$0 sm:$0xff] }
0x190a   : > { %v3272_v13 = vmul.f32 0.03125, %v3268_v12  ;;  %v3278_v40 = vmul.f32 %v3274_v25, %v3274_v25  ;;  %v3279_v38 = vmul.f32 %v3275_v11, %v3275_v11  ;;  %4135 = vmatpush3.bf16.msra.mxu0 %v4267_v59 }
0x190b   : > { %4136 = vmatprep.subr.bf16.mxu0 %v4268_v9 }
0x190c   : > { %v3276_v37 = vsub.f32 %v3254_v61, %v3272_v13  ;;  %v3284_v16 = vsel %vm940_vm0, %v3278_v40, 0.0  ;;  %v3287_v17 = vsel %vm940_vm0, %v3279_v38, 0.0  ;;  %v3758_v61 = vld [vmem:[%s5326_s23] ss:$0 sm:$0xff] }
0x190d   : > { %3285 = vadd.xlane.f32.xlu0 %v3284_v16  ;;  %3288 = vadd.xlane.f32.xlu1 %v3287_v17 }
0x190e   : > { %v3280_v18 = vmul.f32 %v3276_v37, %v3276_v37  ;;  %4137 = vmatpush3.bf16.msra.mxu0 %v4268_v9 }
0x190f   : > { %4138 = vmatprep.subr.bf16.mxu0 %v4269_v5 }
0x1910   : > { %v3290_v39 = vsel %vm1964_vm7, %v3280_v18, 0.0 }
0x1911   : > { %3291 = vadd.xlane.f32.xlu0 %v3290_v39 }
0x1912   : > { %4139 = vmatpush3.bf16.msra.mxu0 %v4269_v5 }
0x1992   : > { %v3283_v42 = vpop.xlane.xlu1 %3282 }
0x1993   : > { %v3293_v43 = vmul.f32 0.03125, %v3283_v42 }
0x1995   : > { %v3297_v45 = vadd.f32 1e-05, %v3293_v43 }
0x1996   : > { %v3289_v28 = vpop.xlane.xlu1 %3288  ;;  %v3286_v29 = vpop.xlane.xlu0 %3285 }
0x1997   : > { %4406 = vrsqrt.f32 %v3297_v45  ;;  %v3295_v26 = vmul.f32 0.03125, %v3289_v28  ;;  %v3294_v30 = vmul.f32 0.03125, %v3286_v29 }
0x1999   : > { %v3299_v32 = vadd.f32 1e-05, %v3295_v26  ;;  %v3298_v46 = vadd.f32 1e-05, %v3294_v30 }
0x199a   : > { %v3292_v57 = vpop.xlane.xlu0 %3291 }
0x199b   : > { %4408 = vrsqrt.f32 %v3299_v32  ;;  %v3296_v31 = vmul.f32 0.03125, %v3292_v57 }
0x199c   : > { %4410 = vrsqrt.f32 %v3298_v46 }
0x199d   : > { %v3300_v58 = vadd.f32 1e-05, %v3296_v31 }
0x199f   : > { %4412 = vrsqrt.f32 %v3300_v58 }
0x19a4   : > { %v4407_v35 = vpop.eup %4406 }
0x19a5   : > { %v3305_v51 = vmul.f32 %v4407_v35, %v3273_v55 }
0x19a7   : > { %v3315_v21 = vmul.f32 %v3756_v47, %v3305_v51 }
0x19a8   : > { %v4409_v23 = vpop.eup %4408 }
0x19a9   : > { %v4411_v62 = vpop.eup %4410  ;;  %v3307_v10 = vmul.f32 %v4409_v23, %v3275_v11  ;;  %v3325_v34 = vadd.f32 %v3757_v22, %v3315_v21 }
0x19aa   : > { %v3306_v56 = vmul.f32 %v4411_v62, %v3274_v25 }
0x19ab   : > { %v3317_v33 = vmul.f32 %v3756_v47, %v3307_v10 }
0x19ac   : > { %v4413_v0 = vpop.eup %4412  ;;  %v3316_v19 = vmul.f32 %v3756_v47, %v3306_v56 }
0x19ad   : > { %v3308_v2 = vmul.f32 %v4413_v0, %v3276_v37  ;;  %v3327_v44 = vadd.f32 %v3757_v22, %v3317_v33 }
0x19ae   : > { %v3326_v3 = vadd.f32 %v3757_v22, %v3316_v19 }
0x19af   : > { %v3318_v41 = vmul.f32 %v3756_v47, %v3308_v2 }
0x19b0   : > { %v3333_v4 = vpack.c.bf16 %v3326_v3, %v3325_v34 }
0x19b1   : > { %v3328_v48 = vadd.f32 %v3757_v22, %v3318_v41 }
0x19b2   : > { %4128 = vmatprep.mubr.msk.bf16.mxu1 %vm940_vm0, %v3333_v4 }
0x19b3   : > { %v3334_v53 = vpack.c.bf16 %v3328_v48, %v3327_v44 }
0x19b5   : > { %4129 = vmatmul.mubr.msk.bf16.vlgmr.msra.gmra.mxu1 %vm940_vm0, %v3334_v53 }
0x1a75   : > { %v4130_v52 = vpop.f32.mrf.mxu1 }
0x1a76   : > { %v3403_v54 = vadd.f32 %v4130_v52, %v3758_v61 }
0x1a77   : > { %v3394_v60 = vpop.f32.mrf.mxu1 }
0x1a78   : > { %v3395_v50 = vadd.f32 %v3758_v61, %v3394_v60  ;;  %v3411_v1 = vmax.f32 %v3403_v54, 0.0  ;;  %v3770_v60 = vld [vmem:[%s5329_s26] ss:$0 sm:$0xff] }
0x1a79   : > { %v4131_v49 = vpop.f32.mrf.mxu1 }
0x1a7a   : > { %v3406_v24 = vadd.f32 %v4131_v49, %v3758_v61  ;;  %v3409_v7 = vmax.f32 %v3395_v50, 0.0  ;;  %v3771_v49 = vld [vmem:[%s5330_s27] ss:$0 sm:$0xff] }
0x1a7b   : > { %v3397_v27 = vpop.f32.mrf.mxu1 }
0x1a7c   : > { %v3398_v55 = vadd.f32 %v3758_v61, %v3397_v27  ;;  %v3412_v6 = vmax.f32 %v3406_v24, 0.0 }
0x1a7e   : > { %v3410_v63 = vmax.f32 %v3398_v55, 0.0  ;;  %v3422_v25 = vpack.c.bf16 %v3412_v6, %v3411_v1 }
0x1a80   : > { %v3421_v8 = vpack.c.bf16 %v3410_v63, %v3409_v7 }
0x1a82   : > { %4140 = vmatprep.mubr.msk.bf16.mxu0 %vm2406_vm8, %v3421_v8 }
0x1a83   : > { %4141 = vmatmul.mubr.msk.bf16.vlgmr.msra.gmra.mxu0 %vm2406_vm8, %v3422_v25 }
0x1b43   : > { %v4142_v11 = vpop.f32.mrf.mxu0 }
0x1b44   : > { %v3503_v13 = vadd.f32 %v4142_v11, %v3763_v36 }
0x1b45   : > { %v3494_v12 = vpop.f32.mrf.mxu0 }
0x1b46   : > { %v3495_v40 = vadd.f32 %v3763_v36, %v3494_v12  ;;  %v3511_v17 = vadd.f32 %v3503_v13, %v3327_v44 }
0x1b47   : > { %v4143_v38 = vpop.f32.mrf.mxu0 }
0x1b48   : > { %v3509_v37 = vadd.f32 %v3495_v40, %v3325_v34  ;;  %v3506_v18 = vadd.f32 %v4143_v38, %v3763_v36  ;;  %v3521_v43 = vsel %vm940_vm0, %v3511_v17, 0.0 }
0x1b49   : > { %v3497_v16 = vpop.f32.mrf.mxu0 }
0x1b4a   : > { %v3498_v39 = vadd.f32 %v3763_v36, %v3497_v16  ;;  %v3515_v15 = vsel %vm940_vm0, %v3509_v37, 0.0  ;;  %v3512_v14 = vadd.f32 %v3506_v18, %v3328_v48 }
0x1b4b   : > { %3516 = vadd.xlane.f32.xlu1 %v3515_v15 }
0x1b4c   : > { %v3510_v20 = vadd.f32 %v3498_v39, %v3326_v3  ;;  %v3524_v45 = vsel %vm1964_vm7, %v3512_v14, 0.0 }
0x1b4e   : > { %v3518_v42 = vsel %vm940_vm0, %v3510_v20, 0.0 }
0x1b4f   : > { %3519 = vadd.xlane.f32.xlu0 %v3518_v42  ;;  %3522 = vadd.xlane.f32.xlu1 %v3521_v43 }
0x1b53   : > { %3525 = vadd.xlane.f32.xlu0 %v3524_v45 }
0x1bd4   : > { %v3517_v28 = vpop.xlane.xlu1 %3516 }
0x1bd5   : > { %v3527_v29 = vmul.f32 0.03125, %v3517_v28 }
0x1bd7   : > { %v3531_v26 = vsub.f32 %v3509_v37, %v3527_v29 }
0x1bd8   : > { %v3520_v30 = vpop.xlane.xlu0 %3519  ;;  %v3523_v32 = vpop.xlane.xlu1 %3522 }
0x1bd9   : > { %v3528_v46 = vmul.f32 0.03125, %v3520_v30  ;;  %v3529_v57 = vmul.f32 0.03125, %v3523_v32  ;;  %v3535_v31 = vmul.f32 %v3531_v26, %v3531_v26 }
0x1bdb   : > { %v3532_v58 = vsub.f32 %v3510_v20, %v3528_v46  ;;  %v3533_v35 = vsub.f32 %v3511_v17, %v3529_v57  ;;  %v3539_v51 = vsel %vm940_vm0, %v3535_v31, 0.0 }
0x1bdc   : > { %v3526_v47 = vpop.xlane.xlu0 %3525  ;;  %3540 = vadd.xlane.f32.xlu1 %v3539_v51 }
0x1bdd   : > { %v3530_v23 = vmul.f32 0.03125, %v3526_v47  ;;  %v3536_v62 = vmul.f32 %v3532_v58, %v3532_v58  ;;  %v3537_v10 = vmul.f32 %v3533_v35, %v3533_v35 }
0x1bdf   : > { %v3534_v56 = vsub.f32 %v3512_v14, %v3530_v23  ;;  %v3542_v21 = vsel %vm940_vm0, %v3536_v62, 0.0  ;;  %v3545_v22 = vsel %vm940_vm0, %v3537_v10, 0.0 }
0x1be0   : > { %3543 = vadd.xlane.f32.xlu0 %v3542_v21  ;;  %3546 = vadd.xlane.f32.xlu1 %v3545_v22 }
0x1be1   : > { %v3538_v0 = vmul.f32 %v3534_v56, %v3534_v56 }
0x1be3   : > { %v3548_v19 = vsel %vm1964_vm7, %v3538_v0, 0.0 }
0x1be4   : > { %3549 = vadd.xlane.f32.xlu0 %v3548_v19 }
0x1c65   : > { %v3541_v2 = vpop.xlane.xlu1 %3540 }
0x1c66   : > { %v3551_v33 = vmul.f32 0.03125, %v3541_v2 }
0x1c68   : > { %v3555_v34 = vadd.f32 1e-05, %v3551_v33 }
0x1c69   : > { %v3544_v3 = vpop.xlane.xlu0 %3543  ;;  %v3547_v41 = vpop.xlane.xlu1 %3546 }
0x1c6a   : > { %4414 = vrsqrt.f32 %v3555_v34  ;;  %v3552_v4 = vmul.f32 0.03125, %v3544_v3  ;;  %v3553_v44 = vmul.f32 0.03125, %v3547_v41 }
0x1c6c   : > { %v3556_v48 = vadd.f32 1e-05, %v3552_v4  ;;  %v3557_v53 = vadd.f32 1e-05, %v3553_v44 }
0x1c6d   : > { %v3550_v59 = vpop.xlane.xlu0 %3549 }
0x1c6e   : > { %4416 = vrsqrt.f32 %v3556_v48  ;;  %v3554_v9 = vmul.f32 0.03125, %v3550_v59 }
0x1c6f   : > { %4418 = vrsqrt.f32 %v3557_v53 }
0x1c70   : > { %v3558_v5 = vadd.f32 1e-05, %v3554_v9 }
0x1c72   : > { %4420 = vrsqrt.f32 %v3558_v5 }
0x1c77   : > { %v4415_v52 = vpop.eup %4414 }
0x1c78   : > { %v3563_v61 = vmul.f32 %v4415_v52, %v3531_v26 }
0x1c7a   : > { %v3573_v50 = vmul.f32 %v3770_v60, %v3563_v61 }
0x1c7b   : > { %v4417_v24 = vpop.eup %4416 }
0x1c7c   : > { %v4419_v54 = vpop.eup %4418  ;;  %v3583_v27 = vadd.f32 %v3771_v49, %v3573_v50  ;;  %v3564_v55 = vmul.f32 %v4417_v24, %v3532_v58 }
0x1c7d   : > { %v3565_v6 = vmul.f32 %v4419_v54, %v3533_v35 }
0x1c7e   : > { %3587 = vst.msk [vmem:[%s885_s11] sm:$0xff] %vm940_vm0, %v3583_v27  ;;  %v3574_v7 = vmul.f32 %v3770_v60, %v3564_v55 }
0x1c7f   : > { %v4421_v63 = vpop.eup %4420  ;;  %v3575_v1 = vmul.f32 %v3770_v60, %v3565_v6 }
0x1c80   : > { %v3584_v8 = vadd.f32 %v3771_v49, %v3574_v7  ;;  %v3566_v25 = vmul.f32 %v4421_v63, %v3534_v56 }
0x1c81   : > { %v3585_v11 = vadd.f32 %v3771_v49, %v3575_v1 }
0x1c82   : > { %3588 = vst.msk [vmem:[%s885_s11 + $0x8] sm:$0xff] %vm940_vm0, %v3584_v8  ;;  %v3576_v36 = vmul.f32 %v3770_v60, %v3566_v25 }
0x1c83   : > { %3589 = vst.msk [vmem:[%s885_s11 + $0x10] sm:$0xff] %vm940_vm0, %v3585_v11 }
0x1c84   : > { %v3586_v12 = vadd.f32 %v3771_v49, %v3576_v36 }
0x1c86   : > { %3590 = vst.msk [vmem:[%s885_s11 + $0x18] sm:$0x3] %vm1964_vm7, %v3586_v12 }
0x1c87 PF: > { %s38_s8 = sadd.s32 1, %s4436_s8  }
0x1c88   : > { %p35_p4 = scmp.ge.s32.totalorder %s38_s8, 4  }
0x1c8a   :  { %37 = sbr.rel (!%p35_p4) target bundleno = 14 (0xe), region = 168 }

</bundles_post_ra>
